<compile_context>
chip_gen: v7x
topology: tpu7x:2x2x1
jax: 0.10.0
libtpu: 0.0.40
codegen_flags: <defaults>
</compile_context>

<pallas_src>
import functools

import jax
import jax.numpy as jnp
from jax.experimental import pallas as pl
from jax.experimental.pallas import tpu as pltpu

LANE = 128  # TPU lane width; channel dims are padded to a multiple of this.


def _round_up(v, m):
    return ((v + m - 1) // m) * m


def _tpu_config():
    """Per-generation knobs: preferred Cout (MXU N) tile and scoped-VMEM limit."""
    kind = ""
    try:
        kind = jax.devices()[0].device_kind.lower()
    except Exception:
        pass
    # v6e / v7x MXU is 256-wide; earlier generations are 128-wide.
    mxu_n = 256 if ("v6" in kind or "v7" in kind) else 128
    if "v7" in kind:
        vmem = 48 * 1024 * 1024          # 64 MiB physical on v7x -> stay under
    elif any(g in kind for g in ("v4", "v5", "v6")):
        vmem = 96 * 1024 * 1024          # 128 MiB physical
    else:
        vmem = 32 * 1024 * 1024          # unknown generation: conservative
    return mxu_n, vmem


_MXU_N, _VMEM_LIMIT = _tpu_config()


# ---------------------------------------------------------------------------
# Pallas kernel: direct convolution with the kw column taps packed into the
# contraction (K) dim -> kh matmuls per Cout tile.  Fused bias + optional
# residual-add + optional ReLU.  Inputs/outputs bf16, accumulation f32.
#   x_ref : (Nt, n_phase*Hs, Ws, Cin_p)   phase-split padded images (VMEM)
#   w_ref : (kh, kw*Cin_p, Cout_tile)     kw-packed weights for this Cout tile
#   b_ref : (1, Cout_tile)                bias (f32)
#   r_ref : (Nt, Ho, Wo, Cout_tile)       optional residual
#   o_ref : (Nt, Ho, Wo, Cout_tile)       output
# ---------------------------------------------------------------------------
def _conv_kernel(*refs, kh, kw, stride, hs, ho, wo, apply_relu, has_residual):
    if has_residual:
        x_ref, w_ref, b_ref, r_ref, o_ref = refs
    else:
        x_ref, w_ref, b_ref, o_ref = refs
        r_ref = None
    nt = o_ref.shape[0]
    cout_t = o_ref.shape[-1]
    cin_p = x_ref.shape[-1]
    m = nt * ho * wo

    # Bias folded into the accumulator init (f32 accumulation on the MXU path).
    acc = jnp.broadcast_to(b_ref[...], (m, cout_t)).astype(jnp.float32)

    # kh matmuls; each one contracts over kw*Cin_p (kw taps packed into K).
    for di in range(kh):
        if kw == 1:
            phase = (di % stride) * stride
            row0 = phase * hs + di // stride                 # static offsets
            win = x_ref[:, row0:row0 + ho, 0:wo, :]          # (nt, ho, wo, Cin_p)
            patch = win.reshape(m, cin_p)
        else:
            cols = []
            for dj in range(kw):
                phase = (di % stride) * stride + (dj % stride)
                row0 = phase * hs + di // stride
                col0 = dj // stride
                cols.append(x_ref[:, row0:row0 + ho, col0:col0 + wo, :])
            patch = jnp.concatenate(cols, axis=-1).reshape(m, kw * cin_p)
        acc = acc + jnp.dot(patch, w_ref[di],
                            preferred_element_type=jnp.float32)

    if r_ref is not None:
        acc = acc + r_ref[...].reshape(m, cout_t).astype(jnp.float32)
    if apply_relu:
        acc = jnp.maximum(acc, 0.0)
    o_ref[...] = acc.reshape(nt, ho, wo, cout_t).astype(o_ref.dtype)


# ---------------------------------------------------------------------------
# Parameter packing (done ONCE at model init; no per-forward pad/convert).
# ---------------------------------------------------------------------------
def pack_conv(w, b, *, im2col=False):
    """w:(KH,KW,Cin,Cout) f32, b:(Cout,) f32 -> padded, kw-packed bf16 weights."""
    kh, kw, cin, cout = w.shape
    cout_p = _round_up(cout, LANE)
    b_p = jnp.zeros((1, cout_p), jnp.float32).at[:, :cout].set(b)
    if im2col:
        # Stem-style: all kh*kw*cin taps merged into a single K (<=128 useful).
        k = kh * kw * cin
        k_p = _round_up(k, LANE)
        w_p = jnp.zeros((k_p, cout_p), jnp.float32)
        w_p = w_p.at[:k, :cout].set(w.reshape(k, cout))
        w_p = w_p.reshape(1, k_p, cout_p).astype(jnp.bfloat16)
        return {"w": w_p, "b": b_p, "kh": 1, "kw": 1, "cout": cout,
                "im2col": True, "orig": (kh, kw, cin)}
    cin_p = _round_up(cin, LANE)
    w_p = jnp.zeros((kh, kw, cin_p, cout_p), jnp.float32)
    w_p = w_p.at[:, :, :cin, :cout].set(w)
    w_p = w_p.reshape(kh, kw * cin_p, cout_p).astype(jnp.bfloat16)
    return {"w": w_p, "b": b_p, "kh": kh, "kw": kw, "cout": cout,
            "im2col": False, "orig": (kh, kw, cin)}


# ---------------------------------------------------------------------------
# conv2d wrapper: spatial pad + (for strided 3x3) phase split are cheap
# one-pass XLA glue, then a single pallas_call does the whole conv.
# ---------------------------------------------------------------------------
def conv2d(x, p, *, stride=1, padding=1, relu=False, residual=None):
    """x:(N,H,W,Cin_p) bf16, channel-padded (or im2col patch for the stem).
    p: packed params from pack_conv.  residual:(N,Ho,Wo,Cout_p) bf16 or None.
    Returns (N,Ho,Wo,Cout_p) bf16 with Cout_p = round_up(Cout, 128)."""
    kh, kw = p["kh"], p["kw"]
    w_p, b_p = p["w"], p["b"]
    cout_p = w_p.shape[-1]

    # 1x1 strided conv (downsample shortcut): decimate host-side instead of
    # phase-splitting, so we never DMA the 3 unused phases.
    if kh == 1 and kw == 1 and stride > 1:
        assert padding == 0
        x = x[:, ::stride, ::stride, :]
        stride = 1

    N, H, W, cin_p = x.shape
    assert w_p.shape[1] == kw * cin_p, "weight K does not match input channels"
    ho = (H + 2 * padding - kh) // stride + 1
    wo = (W + 2 * padding - kw) // stride + 1

    # Spatial pad.
    xp = x if padding == 0 else jnp.pad(
        x, ((0, 0), (padding, padding), (padding, padding), (0, 0)))
    hp, wp_ = xp.shape[1], xp.shape[2]

    # Phase split for strided convs so every tap is a contiguous window.
    if stride == 1:
        hs, ws, n_phase, xs = hp, wp_, 1, xp
    else:
        hs = _round_up(hp, stride) // stride
        ws = _round_up(wp_, stride) // stride
        xp = jnp.pad(xp, ((0, 0), (0, hs * stride - hp),
                          (0, ws * stride - wp_), (0, 0)))
        xs = xp.reshape(N, hs, stride, ws, stride, cin_p)
        xs = xs.transpose(0, 2, 4, 1, 3, 5)
        n_phase = stride * stride
        xs = xs.reshape(N, n_phase * hs, ws, cin_p)

    # Tap windows must stay inside the phase sub-image (correctness guard).
    assert (kh - 1) // stride + ho <= hs, "row tap window exceeds phase image"
    assert (kw - 1) // stride + wo <= ws, "col tap window exceeds phase image"

    # Cout tile: fill the MXU N dimension on this generation.
    tco = _MXU_N if (cout_p % _MXU_N == 0) else LANE
    tco = min(tco, cout_p)

    # Fold batch into the matmul M for small feature maps (late stages).
    target = max(1, -(-256 // (ho * wo)))
    nt = 1
    for d in range(1, N + 1):
        if N % d == 0 and d <= target:
            nt = d

    def _block_bytes(nt_):
        x_b = nt_ * n_phase * hs * ws * cin_p * 2
        o_b = nt_ * ho * wo * tco * 2
        r_b = o_b if residual is not None else 0
        w_b = kh * kw * cin_p * tco * 2
        acc_b = nt_ * ho * wo * tco * 4
        return 2 * (x_b + o_b + r_b + w_b) + acc_b    # BlockSpec double-buffers

    while nt > 1 and _block_bytes(nt) > int(0.7 * _VMEM_LIMIT):
        nt -= 1
        while nt > 1 and N % nt != 0:
            nt -= 1

    grid = (N // nt, cout_p // tco)   # batch blocks outermost, cout innermost
    in_specs = [
        # Whole (phase-split) padded image block resident in VMEM this step.
        pl.BlockSpec((nt, n_phase * hs, ws, cin_p), lambda n, c: (n, 0, 0, 0)),
        # kw-packed weight slab for this Cout tile.
        pl.BlockSpec((kh, kw * cin_p, tco), lambda n, c: (0, 0, c)),
        pl.BlockSpec((1, tco), lambda n, c: (0, c)),
    ]
    args = [xs, w_p, b_p]
    if residual is not None:                           # no fake zeros stream
        in_specs.append(pl.BlockSpec((nt, ho, wo, tco),
                                     lambda n, c: (n, 0, 0, c)))
        args.append(residual)

    kernel = functools.partial(
        _conv_kernel, kh=kh, kw=kw, stride=stride, hs=hs, ho=ho, wo=wo,
        apply_relu=relu, has_residual=residual is not None)

    out = pl.pallas_call(
        kernel,
        out_shape=jax.ShapeDtypeStruct((N, ho, wo, cout_p), jnp.bfloat16),
        grid=grid,
        in_specs=in_specs,
        out_specs=pl.BlockSpec((nt, ho, wo, tco), lambda n, c: (n, 0, 0, c)),
        compiler_params=pltpu.CompilerParams(
            dimension_semantics=("parallel", "parallel"),
            vmem_limit_bytes=_VMEM_LIMIT),
    )(*args)
    return out


# ---------------------------------------------------------------------------
# Parameter construction (deterministic, in-script)
# ---------------------------------------------------------------------------
def _init_conv(key, kh, kw, cin, cout):
    wkey, bkey = jax.random.split(key)
    fan_in = float(kh * kw * cin)
    w = jax.random.normal(wkey, (kh, kw, cin, cout), jnp.float32) / jnp.sqrt(fan_in)
    b = 0.01 * jax.random.normal(bkey, (cout,), jnp.float32)
    return w, b


def make_basic_block(key, in_channels, out_channels, stride):
    """BasicBlock (a ResNetBlockBase): conv3x3(s)+ReLU, conv3x3 +shortcut, ReLU."""
    k1, k2, k3 = jax.random.split(key, 3)
    params = {
        "conv1": pack_conv(*_init_conv(k1, 3, 3, in_channels, out_channels)),
        "conv2": pack_conv(*_init_conv(k2, 3, 3, out_channels, out_channels)),
    }
    if stride != 1 or in_channels != out_channels:
        params["shortcut"] = pack_conv(*_init_conv(k3, 1, 1, in_channels,
                                                   out_channels))
    return {"params": params, "in_channels": in_channels,
            "out_channels": out_channels, "stride": stride}


def basic_block_forward(block, x):
    # TODO(synk): fuse the whole block (shortcut + conv1 + conv2) into a single
    # pallas_call so the conv1 output tile never round-trips HBM (biggest win
    # on v5e where HBM BW is lowest).
    p, s = block["params"], block["stride"]
    if "shortcut" in p:
        shortcut = conv2d(x, p["shortcut"], stride=s, padding=0, relu=False)
    else:
        shortcut = x
    out = conv2d(x, p["conv1"], stride=s, padding=1, relu=True)
    out = conv2d(out, p["conv2"], stride=1, padding=1, relu=True,
                 residual=shortcut)
    return out


def make_stem(key, in_channels, out_channels, stride=1):
    """Simple stem: conv3x3(stride) + ReLU.  Small-cin stems use a single
    im2col matmul (K = kh*kw*cin padded to 128) instead of per-tap matmuls."""
    use_im2col = 3 * 3 * in_channels <= LANE
    return {"params": {"conv": pack_conv(*_init_conv(key, 3, 3, in_channels,
                                                     out_channels),
                                         im2col=use_im2col)},
            "in_channels": in_channels, "out_channels": out_channels,
            "stride": stride, "padding": 1}


def stem_forward(stem, x_raw):
    """x_raw: (N,H,W,Cin) bf16 with RAW (un-padded) channel count."""
    p = stem["params"]["conv"]
    s, pad = stem["stride"], stem["padding"]
    if p["im2col"]:
        kh, kw, cin = p["orig"]
        N, H, W, _ = x_raw.shape
        ho = (H + 2 * pad - kh) // s + 1
        wo = (W + 2 * pad - kw) // s + 1
        xp = x_raw if pad == 0 else jnp.pad(
            x_raw, ((0, 0), (pad, pad), (pad, pad), (0, 0)))
        cols = []
        for di in range(kh):
            for dj in range(kw):
                cols.append(xp[:, di:di + (ho - 1) * s + 1:s,
                                dj:dj + (wo - 1) * s + 1:s, :])
        patch = jnp.concatenate(cols, axis=-1)          # (N, ho, wo, kh*kw*cin)
        k = kh * kw * cin
        k_p = p["w"].shape[1]
        patch = jnp.pad(patch, ((0, 0), (0, 0), (0, 0), (0, k_p - k)))
        return conv2d(patch, p, stride=1, padding=0, relu=True)
    # Generic path: pad channels to a lane-dense width and run the conv.
    cin = p["orig"][2]
    cin_p = _round_up(cin, LANE)
    x = x_raw if cin_p == cin else jnp.pad(
        x_raw, ((0, 0), (0, 0), (0, 0), (0, cin_p - cin)))
    return conv2d(x, p, stride=s, padding=pad, relu=True)


# ---------------------------------------------------------------------------
# ResNet (mirrors the PyTorch ResNet.forward: stem -> stages, collect outputs)
# ---------------------------------------------------------------------------
class ResNetPallas:
    def __init__(self, stem, stages, num_classes=None, out_features=None):
        self.stem = stem
        self.num_classes = num_classes
        current_stride = stem["stride"]
        self._out_feature_strides = {"stem": current_stride}
        self._out_feature_channels = {"stem": stem["out_channels"]}
        self.stages_and_names = []
        for i, blocks in enumerate(stages):
            name = "res" + str(i + 2)
            self.stages_and_names.append((blocks, name))
            prod = 1
            for blk in blocks:
                prod *= blk["stride"]
            current_stride = int(current_stride * prod)
            self._out_feature_strides[name] = current_stride
            self._out_feature_channels[name] = blocks[-1]["out_channels"]
        assert out_features is not None and len(out_features)
        children = ["stem"] + [n for _, n in self.stages_and_names]
        for f in out_features:
            assert f in children, f"Available children: {', '.join(children)}"
        self._out_features = out_features

    def __call__(self, x_nchw):
        # host layout NCHW f32 -> internal NHWC bf16 (stem handles channel pad)
        x = jnp.transpose(x_nchw, (0, 2, 3, 1)).astype(jnp.bfloat16)

        outputs = {}
        x = stem_forward(self.stem, x)
        if "stem" in self._out_features:
            outputs["stem"] = x
        for blocks, name in self.stages_and_names:
            for blk in blocks:
                x = basic_block_forward(blk, x)
            if name in self._out_features:
                outputs[name] = x

        # drop channel padding, back to NCHW f32 to match PyTorch convention
        return {
            k: jnp.transpose(
                v[..., :self._out_feature_channels[k]].astype(jnp.float32),
                (0, 3, 1, 2))
            for k, v in outputs.items()
        }


# ---------------------------------------------------------------------------
if __name__ == "__main__":
    key = jax.random.PRNGKey(0)
    kx, ks, kb1, kb2 = jax.random.split(key, 4)

    # Small deterministic config: N=2, Cin=4, H=W=16
    x = jax.random.normal(kx, (2, 4, 16, 16), jnp.float32)

    stem = make_stem(ks, in_channels=4, out_channels=8, stride=1)
    stages = [
        [make_basic_block(kb1, 8, 8, stride=1)],    # res2
        [make_basic_block(kb2, 8, 16, stride=2)],   # res3
    ]
    model = ResNetPallas(stem, stages, num_classes=None,
                         out_features=("stem", "res2", "res3"))

    outs = jax.jit(model.__call__)(x)
    outs = jax.block_until_ready(outs)

    assert outs["stem"].shape == (2, 8, 16, 16)
    assert outs["res2"].shape == (2, 8, 16, 16)
    assert outs["res3"].shape == (2, 16, 8, 8)
    print("KERNEL_OK")
</pallas_src>

<mosaic_0001>
module attributes {stable_mosaic.version = 11 : i64} {
  func.func @_conv_kernel(%arg0: i32, %arg1: i32, %arg2: memref<1x16x16x128xbf16, #tpu.memory_space<vmem>>, %arg3: memref<1x128x128xbf16, #tpu.memory_space<vmem>>, %arg4: memref<1x128xf32, #tpu.memory_space<vmem>>, %arg5: memref<1x16x16x128xbf16, #tpu.memory_space<vmem>>) attributes {dimension_semantics = [#tpu.dimension_semantics<parallel>, #tpu.dimension_semantics<parallel>], iteration_bounds = array<i64: 2, 1>, scalar_prefetch = 0 : i64, scratch_operands = 0 : i64, tpu.core_type = #tpu.core_type<tc>, window_params = [{transform_indices = @transform_0, window_bounds = array<i64: 1, 16, 16, 128>}, {transform_indices = @transform_1, window_bounds = array<i64: 1, 128, 128>}, {transform_indices = @transform_2, window_bounds = array<i64: 1, 128>}, {transform_indices = @transform_3, window_bounds = array<i64: 1, 16, 16, 128>}]} {
    %c0 = arith.constant 0 : index
    %c0_0 = arith.constant 0 : index
    %0 = vector.load %arg4[%c0, %c0_0] : memref<1x128xf32, #tpu.memory_space<vmem>>, vector<1x128xf32>
    %1 = vector.shape_cast %0 : vector<1x128xf32> to vector<1x128xf32>
    %2 = vector.broadcast %1 : vector<1x128xf32> to vector<256x128xf32>
    %c0_1 = arith.constant 0 : index
    %c0_2 = arith.constant 0 : index
    %c0_3 = arith.constant 0 : index
    %c0_4 = arith.constant 0 : index
    %3 = vector.load %arg2[%c0_1, %c0_2, %c0_3, %c0_4] : memref<1x16x16x128xbf16, #tpu.memory_space<vmem>>, vector<1x16x16x128xbf16>
    %4 = vector.shape_cast %3 : vector<1x16x16x128xbf16> to vector<256x128xbf16>
    %c0_5 = arith.constant 0 : index
    %c0_6 = arith.constant 0 : index
    %c0_7 = arith.constant 0 : index
    %5 = vector.load %arg3[%c0_5, %c0_6, %c0_7] : memref<1x128x128xbf16, #tpu.memory_space<vmem>>, vector<1x128x128xbf16>
    %6 = vector.shape_cast %5 : vector<1x128x128xbf16> to vector<128x128xbf16>
    %cst = arith.constant dense<0.000000e+00> : vector<256x128xf32>
    %7 = tpu.matmul %4, %6, %cst {dimension_numbers = #tpu.dot_dimension_numbers<[1], [0], [0], [1], [0, 0, 1, 1], [], []>} : vector<256x128xbf16>, vector<128x128xbf16>, vector<256x128xf32> -> vector<256x128xf32>
    %8 = arith.addf %2, %7 : vector<256x128xf32>
    %cst_8 = arith.constant 0.000000e+00 : f32
    %9 = vector.broadcast %cst_8 : f32 to vector<256x128xf32>
    %10 = arith.maximumf %8, %9 : vector<256x128xf32>
    %11 = vector.shape_cast %10 : vector<256x128xf32> to vector<1x16x16x128xf32>
    %12 = arith.truncf %11 : vector<1x16x16x128xf32> to vector<1x16x16x128xbf16>
    %c0_9 = arith.constant 0 : index
    %c0_10 = arith.constant 0 : index
    %c0_11 = arith.constant 0 : index
    %c0_12 = arith.constant 0 : index
    %13 = vector.load %arg5[%c0_9, %c0_10, %c0_11, %c0_12] : memref<1x16x16x128xbf16, #tpu.memory_space<vmem>>, vector<1x16x16x128xbf16>
    tpu.vector_store %arg5[%c0_9, %c0_10, %c0_11, %c0_12], %12 {strides = array<i32>} : memref<1x16x16x128xbf16, #tpu.memory_space<vmem>>, vector<1x16x16x128xbf16>,
    return
  }
  func.func @transform_0(%arg0: i32, %arg1: i32) -> (i32, i32, i32, i32) {
    %c0_i32 = arith.constant 0 : i32
    %c0_i32_0 = arith.constant 0 : i32
    %c0_i32_1 = arith.constant 0 : i32
    %c0_i32_2 = arith.constant 0 : i32
    return %arg0, %c0_i32, %c0_i32_0, %c0_i32_1 : i32, i32, i32, i32
  }
  func.func @transform_1(%arg0: i32, %arg1: i32) -> (i32, i32, i32) {
    %c0_i32 = arith.constant 0 : i32
    %c0_i32_0 = arith.constant 0 : i32
    %c0_i32_1 = arith.constant 0 : i32
    return %c0_i32, %c0_i32_0, %arg1 : i32, i32, i32
  }
  func.func @transform_2(%arg0: i32, %arg1: i32) -> (i32, i32) {
    %c0_i32 = arith.constant 0 : i32
    %c0_i32_0 = arith.constant 0 : i32
    return %c0_i32, %arg1 : i32, i32
  }
  func.func @transform_3(%arg0: i32, %arg1: i32) -> (i32, i32, i32, i32) {
    %c0_i32 = arith.constant 0 : i32
    %c0_i32_0 = arith.constant 0 : i32
    %c0_i32_1 = arith.constant 0 : i32
    return %arg0, %c0_i32, %c0_i32_0, %arg1 : i32, i32, i32, i32
  }
}

module attributes {stable_mosaic.version = 11 : i64} {
  func.func @_conv_kernel(%arg0: i32, %arg1: i32, %arg2: memref<1x18x18x128xbf16, #tpu.memory_space<vmem>>, %arg3: memref<3x384x128xbf16, #tpu.memory_space<vmem>>, %arg4: memref<1x128xf32, #tpu.memory_space<vmem>>, %arg5: memref<1x16x16x128xbf16, #tpu.memory_space<vmem>>, %arg6: memref<1x16x16x128xbf16, #tpu.memory_space<vmem>>) attributes {dimension_semantics = [#tpu.dimension_semantics<parallel>, #tpu.dimension_semantics<parallel>], iteration_bounds = array<i64: 2, 1>, scalar_prefetch = 0 : i64, scratch_operands = 0 : i64, tpu.core_type = #tpu.core_type<tc>, window_params = [{transform_indices = @transform_0, window_bounds = array<i64: 1, 18, 18, 128>}, {transform_indices = @transform_1, window_bounds = array<i64: 3, 384, 128>}, {transform_indices = @transform_2, window_bounds = array<i64: 1, 128>}, {transform_indices = @transform_3, window_bounds = array<i64: 1, 16, 16, 128>}, {transform_indices = @transform_4, window_bounds = array<i64: 1, 16, 16, 128>}]} {
    %c0 = arith.constant 0 : index
    %c0_0 = arith.constant 0 : index
    %0 = vector.load %arg4[%c0, %c0_0] : memref<1x128xf32, #tpu.memory_space<vmem>>, vector<1x128xf32>
    %1 = vector.shape_cast %0 : vector<1x128xf32> to vector<1x128xf32>
    %2 = vector.broadcast %1 : vector<1x128xf32> to vector<256x128xf32>
    %c0_1 = arith.constant 0 : index
    %c0_2 = arith.constant 0 : index
    %c0_3 = arith.constant 0 : index
    %c0_4 = arith.constant 0 : index
    %3 = vector.load %arg2[%c0_1, %c0_2, %c0_3, %c0_4] : memref<1x18x18x128xbf16, #tpu.memory_space<vmem>>, vector<1x16x16x128xbf16>
    %c0_5 = arith.constant 0 : index
    %c0_6 = arith.constant 0 : index
    %c1 = arith.constant 1 : index
    %c0_7 = arith.constant 0 : index
    %4 = vector.load %arg2[%c0_5, %c0_6, %c1, %c0_7] : memref<1x18x18x128xbf16, #tpu.memory_space<vmem>>, vector<1x16x16x128xbf16>
    %c0_8 = arith.constant 0 : index
    %c0_9 = arith.constant 0 : index
    %c2 = arith.constant 2 : index
    %c0_10 = arith.constant 0 : index
    %5 = vector.load %arg2[%c0_8, %c0_9, %c2, %c0_10] : memref<1x18x18x128xbf16, #tpu.memory_space<vmem>>, vector<1x16x16x128xbf16>
    %6 = tpu.concatenate %3, %4, %5 in 3 : vector<1x16x16x128xbf16>, vector<1x16x16x128xbf16>, vector<1x16x16x128xbf16> -> vector<1x16x16x384xbf16>
    %7 = vector.shape_cast %6 : vector<1x16x16x384xbf16> to vector<256x384xbf16>
    %c0_11 = arith.constant 0 : index
    %c0_12 = arith.constant 0 : index
    %c0_13 = arith.constant 0 : index
    %8 = vector.load %arg3[%c0_11, %c0_12, %c0_13] : memref<3x384x128xbf16, #tpu.memory_space<vmem>>, vector<1x384x128xbf16>
    %9 = vector.shape_cast %8 : vector<1x384x128xbf16> to vector<384x128xbf16>
    %cst = arith.constant dense<0.000000e+00> : vector<256x128xf32>
    %10 = tpu.matmul %7, %9, %cst {dimension_numbers = #tpu.dot_dimension_numbers<[1], [0], [0], [1], [0, 0, 1, 1], [], []>} : vector<256x384xbf16>, vector<384x128xbf16>, vector<256x128xf32> -> vector<256x128xf32>
    %11 = arith.addf %2, %10 : vector<256x128xf32>
    %c0_14 = arith.constant 0 : index
    %c1_15 = arith.constant 1 : index
    %c0_16 = arith.constant 0 : index
    %c0_17 = arith.constant 0 : index
    %12 = vector.load %arg2[%c0_14, %c1_15, %c0_16, %c0_17] : memref<1x18x18x128xbf16, #tpu.memory_space<vmem>>, vector<1x16x16x128xbf16>
    %c0_18 = arith.constant 0 : index
    %c1_19 = arith.constant 1 : index
    %c1_20 = arith.constant 1 : index
    %c0_21 = arith.constant 0 : index
    %13 = vector.load %arg2[%c0_18, %c1_19, %c1_20, %c0_21] : memref<1x18x18x128xbf16, #tpu.memory_space<vmem>>, vector<1x16x16x128xbf16>
    %c0_22 = arith.constant 0 : index
    %c1_23 = arith.constant 1 : index
    %c2_24 = arith.constant 2 : index
    %c0_25 = arith.constant 0 : index
    %14 = vector.load %arg2[%c0_22, %c1_23, %c2_24, %c0_25] : memref<1x18x18x128xbf16, #tpu.memory_space<vmem>>, vector<1x16x16x128xbf16>
    %15 = tpu.concatenate %12, %13, %14 in 3 : vector<1x16x16x128xbf16>, vector<1x16x16x128xbf16>, vector<1x16x16x128xbf16> -> vector<1x16x16x384xbf16>
    %16 = vector.shape_cast %15 : vector<1x16x16x384xbf16> to vector<256x384xbf16>
    %c1_26 = arith.constant 1 : index
    %c0_27 = arith.constant 0 : index
    %c0_28 = arith.constant 0 : index
    %17 = vector.load %arg3[%c1_26, %c0_27, %c0_28] : memref<3x384x128xbf16, #tpu.memory_space<vmem>>, vector<1x384x128xbf16>
    %18 = vector.shape_cast %17 : vector<1x384x128xbf16> to vector<384x128xbf16>
    %cst_29 = arith.constant dense<0.000000e+00> : vector<256x128xf32>
    %19 = tpu.matmul %16, %18, %cst_29 {dimension_numbers = #tpu.dot_dimension_numbers<[1], [0], [0], [1], [0, 0, 1, 1], [], []>} : vector<256x384xbf16>, vector<384x128xbf16>, vector<256x128xf32> -> vector<256x128xf32>
    %20 = arith.addf %11, %19 : vector<256x128xf32>
    %c0_30 = arith.constant 0 : index
    %c2_31 = arith.constant 2 : index
    %c0_32 = arith.constant 0 : index
    %c0_33 = arith.constant 0 : index
    %21 = vector.load %arg2[%c0_30, %c2_31, %c0_32, %c0_33] : memref<1x18x18x128xbf16, #tpu.memory_space<vmem>>, vector<1x16x16x128xbf16>
    %c0_34 = arith.constant 0 : index
    %c2_35 = arith.constant 2 : index
    %c1_36 = arith.constant 1 : index
    %c0_37 = arith.constant 0 : index
    %22 = vector.load %arg2[%c0_34, %c2_35, %c1_36, %c0_37] : memref<1x18x18x128xbf16, #tpu.memory_space<vmem>>, vector<1x16x16x128xbf16>
    %c0_38 = arith.constant 0 : index
    %c2_39 = arith.constant 2 : index
    %c2_40 = arith.constant 2 : index
    %c0_41 = arith.constant 0 : index
    %23 = vector.load %arg2[%c0_38, %c2_39, %c2_40, %c0_41] : memref<1x18x18x128xbf16, #tpu.memory_space<vmem>>, vector<1x16x16x128xbf16>
    %24 = tpu.concatenate %21, %22, %23 in 3 : vector<1x16x16x128xbf16>, vector<1x16x16x128xbf16>, vector<1x16x16x128xbf16> -> vector<1x16x16x384xbf16>
    %25 = vector.shape_cast %24 : vector<1x16x16x384xbf16> to vector<256x384xbf16>
    %c2_42 = arith.constant 2 : index
    %c0_43 = arith.constant 0 : index
    %c0_44 = arith.constant 0 : index
    %26 = vector.load %arg3[%c2_42, %c0_43, %c0_44] : memref<3x384x128xbf16, #tpu.memory_space<vmem>>, vector<1x384x128xbf16>
    %27 = vector.shape_cast %26 : vector<1x384x128xbf16> to vector<384x128xbf16>
    %cst_45 = arith.constant dense<0.000000e+00> : vector<256x128xf32>
    %28 = tpu.matmul %25, %27, %cst_45 {dimension_numbers = #tpu.dot_dimension_numbers<[1], [0], [0], [1], [0, 0, 1, 1], [], []>} : vector<256x384xbf16>, vector<384x128xbf16>, vector<256x128xf32> -> vector<256x128xf32>
    %29 = arith.addf %20, %28 : vector<256x128xf32>
    %c0_46 = arith.constant 0 : index
    %c0_47 = arith.constant 0 : index
    %c0_48 = arith.constant 0 : index
    %c0_49 = arith.constant 0 : index
    %30 = vector.load %arg5[%c0_46, %c0_47, %c0_48, %c0_49] : memref<1x16x16x128xbf16, #tpu.memory_space<vmem>>, vector<1x16x16x128xbf16>
    %31 = vector.shape_cast %30 : vector<1x16x16x128xbf16> to vector<256x128xbf16>
    %32 = arith.extf %31 : vector<256x128xbf16> to vector<256x128xf32>
    %33 = arith.addf %29, %32 : vector<256x128xf32>
    %cst_50 = arith.constant 0.000000e+00 : f32
    %34 = vector.broadcast %cst_50 : f32 to vector<256x128xf32>
    %35 = arith.maximumf %33, %34 : vector<256x128xf32>
    %36 = vector.shape_cast %35 : vector<256x128xf32> to vector<1x16x16x128xf32>
    %37 = arith.truncf %36 : vector<1x16x16x128xf32> to vector<1x16x16x128xbf16>
    %c0_51 = arith.constant 0 : index
    %c0_52 = arith.constant 0 : index
    %c0_53 = arith.constant 0 : index
    %c0_54 = arith.constant 0 : index
    %38 = vector.load %arg6[%c0_51, %c0_52, %c0_53, %c0_54] : memref<1x16x16x128xbf16, #tpu.memory_space<vmem>>, vector<1x16x16x128xbf16>
    tpu.vector_store %arg6[%c0_51, %c0_52, %c0_53, %c0_54], %37 {strides = array<i32>} : memref<1x16x16x128xbf16, #tpu.memory_space<vmem>>, vector<1x16x16x128xbf16>,
    return
  }
  func.func @transform_0(%arg0: i32, %arg1: i32) -> (i32, i32, i32, i32) {
    %c0_i32 = arith.constant 0 : i32
    %c0_i32_0 = arith.constant 0 : i32
    %c0_i32_1 = arith.constant 0 : i32
    %c0_i32_2 = arith.constant 0 : i32
    return %arg0, %c0_i32, %c0_i32_0, %c0_i32_1 : i32, i32, i32, i32
  }
  func.func @transform_1(%arg0: i32, %arg1: i32) -> (i32, i32, i32) {
    %c0_i32 = arith.constant 0 : i32
    %c0_i32_0 = arith.constant 0 : i32
    %c0_i32_1 = arith.constant 0 : i32
    return %c0_i32, %c0_i32_0, %arg1 : i32, i32, i32
  }
  func.func @transform_2(%arg0: i32, %arg1: i32) -> (i32, i32) {
    %c0_i32 = arith.constant 0 : i32
    %c0_i32_0 = arith.constant 0 : i32
    return %c0_i32, %arg1 : i32, i32
  }
  func.func @transform_3(%arg0: i32, %arg1: i32) -> (i32, i32, i32, i32) {
    %c0_i32 = arith.constant 0 : i32
    %c0_i32_0 = arith.constant 0 : i32
    %c0_i32_1 = arith.constant 0 : i32
    return %arg0, %c0_i32, %c0_i32_0, %arg1 : i32, i32, i32, i32
  }
  func.func @transform_4(%arg0: i32, %arg1: i32) -> (i32, i32, i32, i32) {
    %c0_i32 = arith.constant 0 : i32
    %c0_i32_0 = arith.constant 0 : i32
    %c0_i32_1 = arith.constant 0 : i32
    return %arg0, %c0_i32, %c0_i32_0, %arg1 : i32, i32, i32, i32
  }
}

module attributes {stable_mosaic.version = 11 : i64} {
  func.func @_conv_kernel(%arg0: i32, %arg1: i32, %arg2: memref<1x18x18x128xbf16, #tpu.memory_space<vmem>>, %arg3: memref<3x384x128xbf16, #tpu.memory_space<vmem>>, %arg4: memref<1x128xf32, #tpu.memory_space<vmem>>, %arg5: memref<1x16x16x128xbf16, #tpu.memory_space<vmem>>) attributes {dimension_semantics = [#tpu.dimension_semantics<parallel>, #tpu.dimension_semantics<parallel>], iteration_bounds = array<i64: 2, 1>, scalar_prefetch = 0 : i64, scratch_operands = 0 : i64, tpu.core_type = #tpu.core_type<tc>, window_params = [{transform_indices = @transform_0, window_bounds = array<i64: 1, 18, 18, 128>}, {transform_indices = @transform_1, window_bounds = array<i64: 3, 384, 128>}, {transform_indices = @transform_2, window_bounds = array<i64: 1, 128>}, {transform_indices = @transform_3, window_bounds = array<i64: 1, 16, 16, 128>}]} {
    %c0 = arith.constant 0 : index
    %c0_0 = arith.constant 0 : index
    %0 = vector.load %arg4[%c0, %c0_0] : memref<1x128xf32, #tpu.memory_space<vmem>>, vector<1x128xf32>
    %1 = vector.shape_cast %0 : vector<1x128xf32> to vector<1x128xf32>
    %2 = vector.broadcast %1 : vector<1x128xf32> to vector<256x128xf32>
    %c0_1 = arith.constant 0 : index
    %c0_2 = arith.constant 0 : index
    %c0_3 = arith.constant 0 : index
    %c0_4 = arith.constant 0 : index
    %3 = vector.load %arg2[%c0_1, %c0_2, %c0_3, %c0_4] : memref<1x18x18x128xbf16, #tpu.memory_space<vmem>>, vector<1x16x16x128xbf16>
    %c0_5 = arith.constant 0 : index
    %c0_6 = arith.constant 0 : index
    %c1 = arith.constant 1 : index
    %c0_7 = arith.constant 0 : index
    %4 = vector.load %arg2[%c0_5, %c0_6, %c1, %c0_7] : memref<1x18x18x128xbf16, #tpu.memory_space<vmem>>, vector<1x16x16x128xbf16>
    %c0_8 = arith.constant 0 : index
    %c0_9 = arith.constant 0 : index
    %c2 = arith.constant 2 : index
    %c0_10 = arith.constant 0 : index
    %5 = vector.load %arg2[%c0_8, %c0_9, %c2, %c0_10] : memref<1x18x18x128xbf16, #tpu.memory_space<vmem>>, vector<1x16x16x128xbf16>
    %6 = tpu.concatenate %3, %4, %5 in 3 : vector<1x16x16x128xbf16>, vector<1x16x16x128xbf16>, vector<1x16x16x128xbf16> -> vector<1x16x16x384xbf16>
    %7 = vector.shape_cast %6 : vector<1x16x16x384xbf16> to vector<256x384xbf16>
    %c0_11 = arith.constant 0 : index
    %c0_12 = arith.constant 0 : index
    %c0_13 = arith.constant 0 : index
    %8 = vector.load %arg3[%c0_11, %c0_12, %c0_13] : memref<3x384x128xbf16, #tpu.memory_space<vmem>>, vector<1x384x128xbf16>
    %9 = vector.shape_cast %8 : vector<1x384x128xbf16> to vector<384x128xbf16>
    %cst = arith.constant dense<0.000000e+00> : vector<256x128xf32>
    %10 = tpu.matmul %7, %9, %cst {dimension_numbers = #tpu.dot_dimension_numbers<[1], [0], [0], [1], [0, 0, 1, 1], [], []>} : vector<256x384xbf16>, vector<384x128xbf16>, vector<256x128xf32> -> vector<256x128xf32>
    %11 = arith.addf %2, %10 : vector<256x128xf32>
    %c0_14 = arith.constant 0 : index
    %c1_15 = arith.constant 1 : index
    %c0_16 = arith.constant 0 : index
    %c0_17 = arith.constant 0 : index
    %12 = vector.load %arg2[%c0_14, %c1_15, %c0_16, %c0_17] : memref<1x18x18x128xbf16, #tpu.memory_space<vmem>>, vector<1x16x16x128xbf16>
    %c0_18 = arith.constant 0 : index
    %c1_19 = arith.constant 1 : index
    %c1_20 = arith.constant 1 : index
    %c0_21 = arith.constant 0 : index
    %13 = vector.load %arg2[%c0_18, %c1_19, %c1_20, %c0_21] : memref<1x18x18x128xbf16, #tpu.memory_space<vmem>>, vector<1x16x16x128xbf16>
    %c0_22 = arith.constant 0 : index
    %c1_23 = arith.constant 1 : index
    %c2_24 = arith.constant 2 : index
    %c0_25 = arith.constant 0 : index
    %14 = vector.load %arg2[%c0_22, %c1_23, %c2_24, %c0_25] : memref<1x18x18x128xbf16, #tpu.memory_space<vmem>>, vector<1x16x16x128xbf16>
    %15 = tpu.concatenate %12, %13, %14 in 3 : vector<1x16x16x128xbf16>, vector<1x16x16x128xbf16>, vector<1x16x16x128xbf16> -> vector<1x16x16x384xbf16>
    %16 = vector.shape_cast %15 : vector<1x16x16x384xbf16> to vector<256x384xbf16>
    %c1_26 = arith.constant 1 : index
    %c0_27 = arith.constant 0 : index
    %c0_28 = arith.constant 0 : index
    %17 = vector.load %arg3[%c1_26, %c0_27, %c0_28] : memref<3x384x128xbf16, #tpu.memory_space<vmem>>, vector<1x384x128xbf16>
    %18 = vector.shape_cast %17 : vector<1x384x128xbf16> to vector<384x128xbf16>
    %cst_29 = arith.constant dense<0.000000e+00> : vector<256x128xf32>
    %19 = tpu.matmul %16, %18, %cst_29 {dimension_numbers = #tpu.dot_dimension_numbers<[1], [0], [0], [1], [0, 0, 1, 1], [], []>} : vector<256x384xbf16>, vector<384x128xbf16>, vector<256x128xf32> -> vector<256x128xf32>
    %20 = arith.addf %11, %19 : vector<256x128xf32>
    %c0_30 = arith.constant 0 : index
    %c2_31 = arith.constant 2 : index
    %c0_32 = arith.constant 0 : index
    %c0_33 = arith.constant 0 : index
    %21 = vector.load %arg2[%c0_30, %c2_31, %c0_32, %c0_33] : memref<1x18x18x128xbf16, #tpu.memory_space<vmem>>, vector<1x16x16x128xbf16>
    %c0_34 = arith.constant 0 : index
    %c2_35 = arith.constant 2 : index
    %c1_36 = arith.constant 1 : index
    %c0_37 = arith.constant 0 : index
    %22 = vector.load %arg2[%c0_34, %c2_35, %c1_36, %c0_37] : memref<1x18x18x128xbf16, #tpu.memory_space<vmem>>, vector<1x16x16x128xbf16>
    %c0_38 = arith.constant 0 : index
    %c2_39 = arith.constant 2 : index
    %c2_40 = arith.constant 2 : index
    %c0_41 = arith.constant 0 : index
    %23 = vector.load %arg2[%c0_38, %c2_39, %c2_40, %c0_41] : memref<1x18x18x128xbf16, #tpu.memory_space<vmem>>, vector<1x16x16x128xbf16>
    %24 = tpu.concatenate %21, %22, %23 in 3 : vector<1x16x16x128xbf16>, vector<1x16x16x128xbf16>, vector<1x16x16x128xbf16> -> vector<1x16x16x384xbf16>
    %25 = vector.shape_cast %24 : vector<1x16x16x384xbf16> to vector<256x384xbf16>
    %c2_42 = arith.constant 2 : index
    %c0_43 = arith.constant 0 : index
    %c0_44 = arith.constant 0 : index
    %26 = vector.load %arg3[%c2_42, %c0_43, %c0_44] : memref<3x384x128xbf16, #tpu.memory_space<vmem>>, vector<1x384x128xbf16>
    %27 = vector.shape_cast %26 : vector<1x384x128xbf16> to vector<384x128xbf16>
    %cst_45 = arith.constant dense<0.000000e+00> : vector<256x128xf32>
    %28 = tpu.matmul %25, %27, %cst_45 {dimension_numbers = #tpu.dot_dimension_numbers<[1], [0], [0], [1], [0, 0, 1, 1], [], []>} : vector<256x384xbf16>, vector<384x128xbf16>, vector<256x128xf32> -> vector<256x128xf32>
    %29 = arith.addf %20, %28 : vector<256x128xf32>
    %cst_46 = arith.constant 0.000000e+00 : f32
    %30 = vector.broadcast %cst_46 : f32 to vector<256x128xf32>
    %31 = arith.maximumf %29, %30 : vector<256x128xf32>
    %32 = vector.shape_cast %31 : vector<256x128xf32> to vector<1x16x16x128xf32>
    %33 = arith.truncf %32 : vector<1x16x16x128xf32> to vector<1x16x16x128xbf16>
    %c0_47 = arith.constant 0 : index
    %c0_48 = arith.constant 0 : index
    %c0_49 = arith.constant 0 : index
    %c0_50 = arith.constant 0 : index
    %34 = vector.load %arg5[%c0_47, %c0_48, %c0_49, %c0_50] : memref<1x16x16x128xbf16, #tpu.memory_space<vmem>>, vector<1x16x16x128xbf16>
    tpu.vector_store %arg5[%c0_47, %c0_48, %c0_49, %c0_50], %33 {strides = array<i32>} : memref<1x16x16x128xbf16, #tpu.memory_space<vmem>>, vector<1x16x16x128xbf16>,
    return
  }
  func.func @transform_0(%arg0: i32, %arg1: i32) -> (i32, i32, i32, i32) {
    %c0_i32 = arith.constant 0 : i32
    %c0_i32_0 = arith.constant 0 : i32
    %c0_i32_1 = arith.constant 0 : i32
    %c0_i32_2 = arith.constant 0 : i32
    return %arg0, %c0_i32, %c0_i32_0, %c0_i32_1 : i32, i32, i32, i32
  }
  func.func @transform_1(%arg0: i32, %arg1: i32) -> (i32, i32, i32) {
    %c0_i32 = arith.constant 0 : i32
    %c0_i32_0 = arith.constant 0 : i32
    %c0_i32_1 = arith.constant 0 : i32
    return %c0_i32, %c0_i32_0, %arg1 : i32, i32, i32
  }
  func.func @transform_2(%arg0: i32, %arg1: i32) -> (i32, i32) {
    %c0_i32 = arith.constant 0 : i32
    %c0_i32_0 = arith.constant 0 : i32
    return %c0_i32, %arg1 : i32, i32
  }
  func.func @transform_3(%arg0: i32, %arg1: i32) -> (i32, i32, i32, i32) {
    %c0_i32 = arith.constant 0 : i32
    %c0_i32_0 = arith.constant 0 : i32
    %c0_i32_1 = arith.constant 0 : i32
    return %arg0, %c0_i32, %c0_i32_0, %arg1 : i32, i32, i32, i32
  }
}

module attributes {stable_mosaic.version = 11 : i64} {
  func.func @_conv_kernel(%arg0: i32, %arg1: i32, %arg2: memref<2x8x8x128xbf16, #tpu.memory_space<vmem>>, %arg3: memref<1x128x128xbf16, #tpu.memory_space<vmem>>, %arg4: memref<1x128xf32, #tpu.memory_space<vmem>>, %arg5: memref<2x8x8x128xbf16, #tpu.memory_space<vmem>>) attributes {dimension_semantics = [#tpu.dimension_semantics<parallel>, #tpu.dimension_semantics<parallel>], iteration_bounds = array<i64: 1, 1>, scalar_prefetch = 0 : i64, scratch_operands = 0 : i64, tpu.core_type = #tpu.core_type<tc>, window_params = [{transform_indices = @transform_0, window_bounds = array<i64: 2, 8, 8, 128>}, {transform_indices = @transform_1, window_bounds = array<i64: 1, 128, 128>}, {transform_indices = @transform_2, window_bounds = array<i64: 1, 128>}, {transform_indices = @transform_3, window_bounds = array<i64: 2, 8, 8, 128>}]} {
    %c0 = arith.constant 0 : index
    %c0_0 = arith.constant 0 : index
    %0 = vector.load %arg4[%c0, %c0_0] : memref<1x128xf32, #tpu.memory_space<vmem>>, vector<1x128xf32>
    %1 = vector.shape_cast %0 : vector<1x128xf32> to vector<1x128xf32>
    %2 = vector.broadcast %1 : vector<1x128xf32> to vector<128x128xf32>
    %c0_1 = arith.constant 0 : index
    %c0_2 = arith.constant 0 : index
    %c0_3 = arith.constant 0 : index
    %c0_4 = arith.constant 0 : index
    %3 = vector.load %arg2[%c0_1, %c0_2, %c0_3, %c0_4] : memref<2x8x8x128xbf16, #tpu.memory_space<vmem>>, vector<2x8x8x128xbf16>
    %4 = vector.shape_cast %3 : vector<2x8x8x128xbf16> to vector<128x128xbf16>
    %c0_5 = arith.constant 0 : index
    %c0_6 = arith.constant 0 : index
    %c0_7 = arith.constant 0 : index
    %5 = vector.load %arg3[%c0_5, %c0_6, %c0_7] : memref<1x128x128xbf16, #tpu.memory_space<vmem>>, vector<1x128x128xbf16>
    %6 = vector.shape_cast %5 : vector<1x128x128xbf16> to vector<128x128xbf16>
    %cst = arith.constant dense<0.000000e+00> : vector<128x128xf32>
    %7 = tpu.matmul %4, %6, %cst {dimension_numbers = #tpu.dot_dimension_numbers<[1], [0], [0], [1], [0, 0, 1, 1], [], []>} : vector<128x128xbf16>, vector<128x128xbf16>, vector<128x128xf32> -> vector<128x128xf32>
    %8 = arith.addf %2, %7 : vector<128x128xf32>
    %9 = vector.shape_cast %8 : vector<128x128xf32> to vector<2x8x8x128xf32>
    %10 = arith.truncf %9 : vector<2x8x8x128xf32> to vector<2x8x8x128xbf16>
    %c0_8 = arith.constant 0 : index
    %c0_9 = arith.constant 0 : index
    %c0_10 = arith.constant 0 : index
    %c0_11 = arith.constant 0 : index
    %11 = vector.load %arg5[%c0_8, %c0_9, %c0_10, %c0_11] : memref<2x8x8x128xbf16, #tpu.memory_space<vmem>>, vector<2x8x8x128xbf16>
    tpu.vector_store %arg5[%c0_8, %c0_9, %c0_10, %c0_11], %10 {strides = array<i32>} : memref<2x8x8x128xbf16, #tpu.memory_space<vmem>>, vector<2x8x8x128xbf16>,
    return
  }
  func.func @transform_0(%arg0: i32, %arg1: i32) -> (i32, i32, i32, i32) {
    %c0_i32 = arith.constant 0 : i32
    %c0_i32_0 = arith.constant 0 : i32
    %c0_i32_1 = arith.constant 0 : i32
    %c0_i32_2 = arith.constant 0 : i32
    return %arg0, %c0_i32, %c0_i32_0, %c0_i32_1 : i32, i32, i32, i32
  }
  func.func @transform_1(%arg0: i32, %arg1: i32) -> (i32, i32, i32) {
    %c0_i32 = arith.constant 0 : i32
    %c0_i32_0 = arith.constant 0 : i32
    %c0_i32_1 = arith.constant 0 : i32
    return %c0_i32, %c0_i32_0, %arg1 : i32, i32, i32
  }
  func.func @transform_2(%arg0: i32, %arg1: i32) -> (i32, i32) {
    %c0_i32 = arith.constant 0 : i32
    %c0_i32_0 = arith.constant 0 : i32
    return %c0_i32, %arg1 : i32, i32
  }
  func.func @transform_3(%arg0: i32, %arg1: i32) -> (i32, i32, i32, i32) {
    %c0_i32 = arith.constant 0 : i32
    %c0_i32_0 = arith.constant 0 : i32
    %c0_i32_1 = arith.constant 0 : i32
    return %arg0, %c0_i32, %c0_i32_0, %arg1 : i32, i32, i32, i32
  }
}

module attributes {stable_mosaic.version = 11 : i64} {
  func.func @_conv_kernel(%arg0: i32, %arg1: i32, %arg2: memref<2x36x9x128xbf16, #tpu.memory_space<vmem>>, %arg3: memref<3x384x128xbf16, #tpu.memory_space<vmem>>, %arg4: memref<1x128xf32, #tpu.memory_space<vmem>>, %arg5: memref<2x8x8x128xbf16, #tpu.memory_space<vmem>>) attributes {dimension_semantics = [#tpu.dimension_semantics<parallel>, #tpu.dimension_semantics<parallel>], iteration_bounds = array<i64: 1, 1>, scalar_prefetch = 0 : i64, scratch_operands = 0 : i64, tpu.core_type = #tpu.core_type<tc>, window_params = [{transform_indices = @transform_0, window_bounds = array<i64: 2, 36, 9, 128>}, {transform_indices = @transform_1, window_bounds = array<i64: 3, 384, 128>}, {transform_indices = @transform_2, window_bounds = array<i64: 1, 128>}, {transform_indices = @transform_3, window_bounds = array<i64: 2, 8, 8, 128>}]} {
    %c0 = arith.constant 0 : index
    %c0_0 = arith.constant 0 : index
    %0 = vector.load %arg4[%c0, %c0_0] : memref<1x128xf32, #tpu.memory_space<vmem>>, vector<1x128xf32>
    %1 = vector.shape_cast %0 : vector<1x128xf32> to vector<1x128xf32>
    %2 = vector.broadcast %1 : vector<1x128xf32> to vector<128x128xf32>
    %c0_1 = arith.constant 0 : index
    %c0_2 = arith.constant 0 : index
    %c0_3 = arith.constant 0 : index
    %c0_4 = arith.constant 0 : index
    %3 = vector.load %arg2[%c0_1, %c0_2, %c0_3, %c0_4] : memref<2x36x9x128xbf16, #tpu.memory_space<vmem>>, vector<2x8x8x128xbf16>
    %c0_5 = arith.constant 0 : index
    %c9 = arith.constant 9 : index
    %c0_6 = arith.constant 0 : index
    %c0_7 = arith.constant 0 : index
    %4 = vector.load %arg2[%c0_5, %c9, %c0_6, %c0_7] : memref<2x36x9x128xbf16, #tpu.memory_space<vmem>>, vector<2x8x8x128xbf16>
    %c0_8 = arith.constant 0 : index
    %c0_9 = arith.constant 0 : index
    %c1 = arith.constant 1 : index
    %c0_10 = arith.constant 0 : index
    %5 = vector.load %arg2[%c0_8, %c0_9, %c1, %c0_10] : memref<2x36x9x128xbf16, #tpu.memory_space<vmem>>, vector<2x8x8x128xbf16>
    %6 = tpu.concatenate %3, %4, %5 in 3 : vector<2x8x8x128xbf16>, vector<2x8x8x128xbf16>, vector<2x8x8x128xbf16> -> vector<2x8x8x384xbf16>
    %7 = vector.shape_cast %6 : vector<2x8x8x384xbf16> to vector<128x384xbf16>
    %c0_11 = arith.constant 0 : index
    %c0_12 = arith.constant 0 : index
    %c0_13 = arith.constant 0 : index
    %8 = vector.load %arg3[%c0_11, %c0_12, %c0_13] : memref<3x384x128xbf16, #tpu.memory_space<vmem>>, vector<1x384x128xbf16>
    %9 = vector.shape_cast %8 : vector<1x384x128xbf16> to vector<384x128xbf16>
    %cst = arith.constant dense<0.000000e+00> : vector<128x128xf32>
    %10 = tpu.matmul %7, %9, %cst {dimension_numbers = #tpu.dot_dimension_numbers<[1], [0], [0], [1], [0, 0, 1, 1], [], []>} : vector<128x384xbf16>, vector<384x128xbf16>, vector<128x128xf32> -> vector<128x128xf32>
    %11 = arith.addf %2, %10 : vector<128x128xf32>
    %c0_14 = arith.constant 0 : index
    %c18 = arith.constant 18 : index
    %c0_15 = arith.constant 0 : index
    %c0_16 = arith.constant 0 : index
    %12 = vector.load %arg2[%c0_14, %c18, %c0_15, %c0_16] : memref<2x36x9x128xbf16, #tpu.memory_space<vmem>>, vector<2x8x8x128xbf16>
    %c0_17 = arith.constant 0 : index
    %c27 = arith.constant 27 : index
    %c0_18 = arith.constant 0 : index
    %c0_19 = arith.constant 0 : index
    %13 = vector.load %arg2[%c0_17, %c27, %c0_18, %c0_19] : memref<2x36x9x128xbf16, #tpu.memory_space<vmem>>, vector<2x8x8x128xbf16>
    %c0_20 = arith.constant 0 : index
    %c18_21 = arith.constant 18 : index
    %c1_22 = arith.constant 1 : index
    %c0_23 = arith.constant 0 : index
    %14 = vector.load %arg2[%c0_20, %c18_21, %c1_22, %c0_23] : memref<2x36x9x128xbf16, #tpu.memory_space<vmem>>, vector<2x8x8x128xbf16>
    %15 = tpu.concatenate %12, %13, %14 in 3 : vector<2x8x8x128xbf16>, vector<2x8x8x128xbf16>, vector<2x8x8x128xbf16> -> vector<2x8x8x384xbf16>
    %16 = vector.shape_cast %15 : vector<2x8x8x384xbf16> to vector<128x384xbf16>
    %c1_24 = arith.constant 1 : index
    %c0_25 = arith.constant 0 : index
    %c0_26 = arith.constant 0 : index
    %17 = vector.load %arg3[%c1_24, %c0_25, %c0_26] : memref<3x384x128xbf16, #tpu.memory_space<vmem>>, vector<1x384x128xbf16>
    %18 = vector.shape_cast %17 : vector<1x384x128xbf16> to vector<384x128xbf16>
    %cst_27 = arith.constant dense<0.000000e+00> : vector<128x128xf32>
    %19 = tpu.matmul %16, %18, %cst_27 {dimension_numbers = #tpu.dot_dimension_numbers<[1], [0], [0], [1], [0, 0, 1, 1], [], []>} : vector<128x384xbf16>, vector<384x128xbf16>, vector<128x128xf32> -> vector<128x128xf32>
    %20 = arith.addf %11, %19 : vector<128x128xf32>
    %c0_28 = arith.constant 0 : index
    %c1_29 = arith.constant 1 : index
    %c0_30 = arith.constant 0 : index
    %c0_31 = arith.constant 0 : index
    %21 = vector.load %arg2[%c0_28, %c1_29, %c0_30, %c0_31] : memref<2x36x9x128xbf16, #tpu.memory_space<vmem>>, vector<2x8x8x128xbf16>
    %c0_32 = arith.constant 0 : index
    %c10 = arith.constant 10 : index
    %c0_33 = arith.constant 0 : index
    %c0_34 = arith.constant 0 : index
    %22 = vector.load %arg2[%c0_32, %c10, %c0_33, %c0_34] : memref<2x36x9x128xbf16, #tpu.memory_space<vmem>>, vector<2x8x8x128xbf16>
    %c0_35 = arith.constant 0 : index
    %c1_36 = arith.constant 1 : index
    %c1_37 = arith.constant 1 : index
    %c0_38 = arith.constant 0 : index
    %23 = vector.load %arg2[%c0_35, %c1_36, %c1_37, %c0_38] : memref<2x36x9x128xbf16, #tpu.memory_space<vmem>>, vector<2x8x8x128xbf16>
    %24 = tpu.concatenate %21, %22, %23 in 3 : vector<2x8x8x128xbf16>, vector<2x8x8x128xbf16>, vector<2x8x8x128xbf16> -> vector<2x8x8x384xbf16>
    %25 = vector.shape_cast %24 : vector<2x8x8x384xbf16> to vector<128x384xbf16>
    %c2 = arith.constant 2 : index
    %c0_39 = arith.constant 0 : index
    %c0_40 = arith.constant 0 : index
    %26 = vector.load %arg3[%c2, %c0_39, %c0_40] : memref<3x384x128xbf16, #tpu.memory_space<vmem>>, vector<1x384x128xbf16>
    %27 = vector.shape_cast %26 : vector<1x384x128xbf16> to vector<384x128xbf16>
    %cst_41 = arith.constant dense<0.000000e+00> : vector<128x128xf32>
    %28 = tpu.matmul %25, %27, %cst_41 {dimension_numbers = #tpu.dot_dimension_numbers<[1], [0], [0], [1], [0, 0, 1, 1], [], []>} : vector<128x384xbf16>, vector<384x128xbf16>, vector<128x128xf32> -> vector<128x128xf32>
    %29 = arith.addf %20, %28 : vector<128x128xf32>
    %cst_42 = arith.constant 0.000000e+00 : f32
    %30 = vector.broadcast %cst_42 : f32 to vector<128x128xf32>
    %31 = arith.maximumf %29, %30 : vector<128x128xf32>
    %32 = vector.shape_cast %31 : vector<128x128xf32> to vector<2x8x8x128xf32>
    %33 = arith.truncf %32 : vector<2x8x8x128xf32> to vector<2x8x8x128xbf16>
    %c0_43 = arith.constant 0 : index
    %c0_44 = arith.constant 0 : index
    %c0_45 = arith.constant 0 : index
    %c0_46 = arith.constant 0 : index
    %34 = vector.load %arg5[%c0_43, %c0_44, %c0_45, %c0_46] : memref<2x8x8x128xbf16, #tpu.memory_space<vmem>>, vector<2x8x8x128xbf16>
    tpu.vector_store %arg5[%c0_43, %c0_44, %c0_45, %c0_46], %33 {strides = array<i32>} : memref<2x8x8x128xbf16, #tpu.memory_space<vmem>>, vector<2x8x8x128xbf16>,
    return
  }
  func.func @transform_0(%arg0: i32, %arg1: i32) -> (i32, i32, i32, i32) {
    %c0_i32 = arith.constant 0 : i32
    %c0_i32_0 = arith.constant 0 : i32
    %c0_i32_1 = arith.constant 0 : i32
    %c0_i32_2 = arith.constant 0 : i32
    return %arg0, %c0_i32, %c0_i32_0, %c0_i32_1 : i32, i32, i32, i32
  }
  func.func @transform_1(%arg0: i32, %arg1: i32) -> (i32, i32, i32) {
    %c0_i32 = arith.constant 0 : i32
    %c0_i32_0 = arith.constant 0 : i32
    %c0_i32_1 = arith.constant 0 : i32
    return %c0_i32, %c0_i32_0, %arg1 : i32, i32, i32
  }
  func.func @transform_2(%arg0: i32, %arg1: i32) -> (i32, i32) {
    %c0_i32 = arith.constant 0 : i32
    %c0_i32_0 = arith.constant 0 : i32
    return %c0_i32, %arg1 : i32, i32
  }
  func.func @transform_3(%arg0: i32, %arg1: i32) -> (i32, i32, i32, i32) {
    %c0_i32 = arith.constant 0 : i32
    %c0_i32_0 = arith.constant 0 : i32
    %c0_i32_1 = arith.constant 0 : i32
    return %arg0, %c0_i32, %c0_i32_0, %arg1 : i32, i32, i32, i32
  }
}

module attributes {stable_mosaic.version = 11 : i64} {
  func.func @_conv_kernel(%arg0: i32, %arg1: i32, %arg2: memref<2x10x10x128xbf16, #tpu.memory_space<vmem>>, %arg3: memref<3x384x128xbf16, #tpu.memory_space<vmem>>, %arg4: memref<1x128xf32, #tpu.memory_space<vmem>>, %arg5: memref<2x8x8x128xbf16, #tpu.memory_space<vmem>>, %arg6: memref<2x8x8x128xbf16, #tpu.memory_space<vmem>>) attributes {dimension_semantics = [#tpu.dimension_semantics<parallel>, #tpu.dimension_semantics<parallel>], iteration_bounds = array<i64: 1, 1>, scalar_prefetch = 0 : i64, scratch_operands = 0 : i64, tpu.core_type = #tpu.core_type<tc>, window_params = [{transform_indices = @transform_0, window_bounds = array<i64: 2, 10, 10, 128>}, {transform_indices = @transform_1, window_bounds = array<i64: 3, 384, 128>}, {transform_indices = @transform_2, window_bounds = array<i64: 1, 128>}, {transform_indices = @transform_3, window_bounds = array<i64: 2, 8, 8, 128>}, {transform_indices = @transform_4, window_bounds = array<i64: 2, 8, 8, 128>}]} {
    %c0 = arith.constant 0 : index
    %c0_0 = arith.constant 0 : index
    %0 = vector.load %arg4[%c0, %c0_0] : memref<1x128xf32, #tpu.memory_space<vmem>>, vector<1x128xf32>
    %1 = vector.shape_cast %0 : vector<1x128xf32> to vector<1x128xf32>
    %2 = vector.broadcast %1 : vector<1x128xf32> to vector<128x128xf32>
    %c0_1 = arith.constant 0 : index
    %c0_2 = arith.constant 0 : index
    %c0_3 = arith.constant 0 : index
    %c0_4 = arith.constant 0 : index
    %3 = vector.load %arg2[%c0_1, %c0_2, %c0_3, %c0_4] : memref<2x10x10x128xbf16, #tpu.memory_space<vmem>>, vector<2x8x8x128xbf16>
    %c0_5 = arith.constant 0 : index
    %c0_6 = arith.constant 0 : index
    %c1 = arith.constant 1 : index
    %c0_7 = arith.constant 0 : index
    %4 = vector.load %arg2[%c0_5, %c0_6, %c1, %c0_7] : memref<2x10x10x128xbf16, #tpu.memory_space<vmem>>, vector<2x8x8x128xbf16>
    %c0_8 = arith.constant 0 : index
    %c0_9 = arith.constant 0 : index
    %c2 = arith.constant 2 : index
    %c0_10 = arith.constant 0 : index
    %5 = vector.load %arg2[%c0_8, %c0_9, %c2, %c0_10] : memref<2x10x10x128xbf16, #tpu.memory_space<vmem>>, vector<2x8x8x128xbf16>
    %6 = tpu.concatenate %3, %4, %5 in 3 : vector<2x8x8x128xbf16>, vector<2x8x8x128xbf16>, vector<2x8x8x128xbf16> -> vector<2x8x8x384xbf16>
    %7 = vector.shape_cast %6 : vector<2x8x8x384xbf16> to vector<128x384xbf16>
    %c0_11 = arith.constant 0 : index
    %c0_12 = arith.constant 0 : index
    %c0_13 = arith.constant 0 : index
    %8 = vector.load %arg3[%c0_11, %c0_12, %c0_13] : memref<3x384x128xbf16, #tpu.memory_space<vmem>>, vector<1x384x128xbf16>
    %9 = vector.shape_cast %8 : vector<1x384x128xbf16> to vector<384x128xbf16>
    %cst = arith.constant dense<0.000000e+00> : vector<128x128xf32>
    %10 = tpu.matmul %7, %9, %cst {dimension_numbers = #tpu.dot_dimension_numbers<[1], [0], [0], [1], [0, 0, 1, 1], [], []>} : vector<128x384xbf16>, vector<384x128xbf16>, vector<128x128xf32> -> vector<128x128xf32>
    %11 = arith.addf %2, %10 : vector<128x128xf32>
    %c0_14 = arith.constant 0 : index
    %c1_15 = arith.constant 1 : index
    %c0_16 = arith.constant 0 : index
    %c0_17 = arith.constant 0 : index
    %12 = vector.load %arg2[%c0_14, %c1_15, %c0_16, %c0_17] : memref<2x10x10x128xbf16, #tpu.memory_space<vmem>>, vector<2x8x8x128xbf16>
    %c0_18 = arith.constant 0 : index
    %c1_19 = arith.constant 1 : index
    %c1_20 = arith.constant 1 : index
    %c0_21 = arith.constant 0 : index
    %13 = vector.load %arg2[%c0_18, %c1_19, %c1_20, %c0_21] : memref<2x10x10x128xbf16, #tpu.memory_space<vmem>>, vector<2x8x8x128xbf16>
    %c0_22 = arith.constant 0 : index
    %c1_23 = arith.constant 1 : index
    %c2_24 = arith.constant 2 : index
    %c0_25 = arith.constant 0 : index
    %14 = vector.load %arg2[%c0_22, %c1_23, %c2_24, %c0_25] : memref<2x10x10x128xbf16, #tpu.memory_space<vmem>>, vector<2x8x8x128xbf16>
    %15 = tpu.concatenate %12, %13, %14 in 3 : vector<2x8x8x128xbf16>, vector<2x8x8x128xbf16>, vector<2x8x8x128xbf16> -> vector<2x8x8x384xbf16>
    %16 = vector.shape_cast %15 : vector<2x8x8x384xbf16> to vector<128x384xbf16>
    %c1_26 = arith.constant 1 : index
    %c0_27 = arith.constant 0 : index
    %c0_28 = arith.constant 0 : index
    %17 = vector.load %arg3[%c1_26, %c0_27, %c0_28] : memref<3x384x128xbf16, #tpu.memory_space<vmem>>, vector<1x384x128xbf16>
    %18 = vector.shape_cast %17 : vector<1x384x128xbf16> to vector<384x128xbf16>
    %cst_29 = arith.constant dense<0.000000e+00> : vector<128x128xf32>
    %19 = tpu.matmul %16, %18, %cst_29 {dimension_numbers = #tpu.dot_dimension_numbers<[1], [0], [0], [1], [0, 0, 1, 1], [], []>} : vector<128x384xbf16>, vector<384x128xbf16>, vector<128x128xf32> -> vector<128x128xf32>
    %20 = arith.addf %11, %19 : vector<128x128xf32>
    %c0_30 = arith.constant 0 : index
    %c2_31 = arith.constant 2 : index
    %c0_32 = arith.constant 0 : index
    %c0_33 = arith.constant 0 : index
    %21 = vector.load %arg2[%c0_30, %c2_31, %c0_32, %c0_33] : memref<2x10x10x128xbf16, #tpu.memory_space<vmem>>, vector<2x8x8x128xbf16>
    %c0_34 = arith.constant 0 : index
    %c2_35 = arith.constant 2 : index
    %c1_36 = arith.constant 1 : index
    %c0_37 = arith.constant 0 : index
    %22 = vector.load %arg2[%c0_34, %c2_35, %c1_36, %c0_37] : memref<2x10x10x128xbf16, #tpu.memory_space<vmem>>, vector<2x8x8x128xbf16>
    %c0_38 = arith.constant 0 : index
    %c2_39 = arith.constant 2 : index
    %c2_40 = arith.constant 2 : index
    %c0_41 = arith.constant 0 : index
    %23 = vector.load %arg2[%c0_38, %c2_39, %c2_40, %c0_41] : memref<2x10x10x128xbf16, #tpu.memory_space<vmem>>, vector<2x8x8x128xbf16>
    %24 = tpu.concatenate %21, %22, %23 in 3 : vector<2x8x8x128xbf16>, vector<2x8x8x128xbf16>, vector<2x8x8x128xbf16> -> vector<2x8x8x384xbf16>
    %25 = vector.shape_cast %24 : vector<2x8x8x384xbf16> to vector<128x384xbf16>
    %c2_42 = arith.constant 2 : index
    %c0_43 = arith.constant 0 : index
    %c0_44 = arith.constant 0 : index
    %26 = vector.load %arg3[%c2_42, %c0_43, %c0_44] : memref<3x384x128xbf16, #tpu.memory_space<vmem>>, vector<1x384x128xbf16>
    %27 = vector.shape_cast %26 : vector<1x384x128xbf16> to vector<384x128xbf16>
    %cst_45 = arith.constant dense<0.000000e+00> : vector<128x128xf32>
    %28 = tpu.matmul %25, %27, %cst_45 {dimension_numbers = #tpu.dot_dimension_numbers<[1], [0], [0], [1], [0, 0, 1, 1], [], []>} : vector<128x384xbf16>, vector<384x128xbf16>, vector<128x128xf32> -> vector<128x128xf32>
    %29 = arith.addf %20, %28 : vector<128x128xf32>
    %c0_46 = arith.constant 0 : index
    %c0_47 = arith.constant 0 : index
    %c0_48 = arith.constant 0 : index
    %c0_49 = arith.constant 0 : index
    %30 = vector.load %arg5[%c0_46, %c0_47, %c0_48, %c0_49] : memref<2x8x8x128xbf16, #tpu.memory_space<vmem>>, vector<2x8x8x128xbf16>
    %31 = vector.shape_cast %30 : vector<2x8x8x128xbf16> to vector<128x128xbf16>
    %32 = arith.extf %31 : vector<128x128xbf16> to vector<128x128xf32>
    %33 = arith.addf %29, %32 : vector<128x128xf32>
    %cst_50 = arith.constant 0.000000e+00 : f32
    %34 = vector.broadcast %cst_50 : f32 to vector<128x128xf32>
    %35 = arith.maximumf %33, %34 : vector<128x128xf32>
    %36 = vector.shape_cast %35 : vector<128x128xf32> to vector<2x8x8x128xf32>
    %37 = arith.truncf %36 : vector<2x8x8x128xf32> to vector<2x8x8x128xbf16>
    %c0_51 = arith.constant 0 : index
    %c0_52 = arith.constant 0 : index
    %c0_53 = arith.constant 0 : index
    %c0_54 = arith.constant 0 : index
    %38 = vector.load %arg6[%c0_51, %c0_52, %c0_53, %c0_54] : memref<2x8x8x128xbf16, #tpu.memory_space<vmem>>, vector<2x8x8x128xbf16>
    tpu.vector_store %arg6[%c0_51, %c0_52, %c0_53, %c0_54], %37 {strides = array<i32>} : memref<2x8x8x128xbf16, #tpu.memory_space<vmem>>, vector<2x8x8x128xbf16>,
    return
  }
  func.func @transform_0(%arg0: i32, %arg1: i32) -> (i32, i32, i32, i32) {
    %c0_i32 = arith.constant 0 : i32
    %c0_i32_0 = arith.constant 0 : i32
    %c0_i32_1 = arith.constant 0 : i32
    %c0_i32_2 = arith.constant 0 : i32
    return %arg0, %c0_i32, %c0_i32_0, %c0_i32_1 : i32, i32, i32, i32
  }
  func.func @transform_1(%arg0: i32, %arg1: i32) -> (i32, i32, i32) {
    %c0_i32 = arith.constant 0 : i32
    %c0_i32_0 = arith.constant 0 : i32
    %c0_i32_1 = arith.constant 0 : i32
    return %c0_i32, %c0_i32_0, %arg1 : i32, i32, i32
  }
  func.func @transform_2(%arg0: i32, %arg1: i32) -> (i32, i32) {
    %c0_i32 = arith.constant 0 : i32
    %c0_i32_0 = arith.constant 0 : i32
    return %c0_i32, %arg1 : i32, i32
  }
  func.func @transform_3(%arg0: i32, %arg1: i32) -> (i32, i32, i32, i32) {
    %c0_i32 = arith.constant 0 : i32
    %c0_i32_0 = arith.constant 0 : i32
    %c0_i32_1 = arith.constant 0 : i32
    return %arg0, %c0_i32, %c0_i32_0, %arg1 : i32, i32, i32, i32
  }
  func.func @transform_4(%arg0: i32, %arg1: i32) -> (i32, i32, i32, i32) {
    %c0_i32 = arith.constant 0 : i32
    %c0_i32_0 = arith.constant 0 : i32
    %c0_i32_1 = arith.constant 0 : i32
    return %arg0, %c0_i32, %c0_i32_0, %arg1 : i32, i32, i32, i32
  }
}

</mosaic_0001>

<bundles_post_ra>
// kernel: a_call__.6
= control target key start
LH: loop header
LB: loop body
LE: loop exit
PB: predicated region body
PF: predicated region fallthrough
CT: control target
= control target key end

     0   :  { %s1291_s12 = smov 0   ;;  %s1293_s13 = smov 0   ;;  %s1428_s0 = inlined_call_operand.vmem [shape: bf16[2,16,16,128], index: 0, kind: input, shape index: {}]   ;;  %s1429_s1 = inlined_call_operand.vmem [shape: bf16[1,128,128], index: 1, kind: input, shape index: {}]   ;;  %s1430_s2 = inlined_call_operand.vmem [shape: f32[1,128], index: 2, kind: input, shape index: {}]   ;;  %s1431_s3 = inlined_call_operand.vmem [shape: bf16[2,16,16,128], index: 3, kind: output, shape index: {}]  }
   0x1   :  { %s1295_s14 = smov 0  }
   0x2 LB: > { %s25_s15 = sadd.s32 1, %s1265_s13  ;;  %p918_p0 = scmp.ge.s32.totalorder %s1269_s14, 1  ;;  %s1269_s14 = sphi %s1295_s14, %s13_s14   ;;  %s1265_s13 = sphi %s1293_s13, %s1433_s13   ;;  %s1261_s12 = sphi %s1291_s12, %s1432_s12  }
   0x3   : > { %p27_p1 = scmp.ge.s32.totalorder %s25_s15, 2  ;;  %p168_p2 = scmp.lt.s32.totalorder %s1269_s14, 3 }
   0x5   : > { %s1435_s15 = smov (%p27_p1, %s25_s15), 0  ;;  %p169_p3 = pnand %p918_p0, %p168_p2 }
   0x6   : > { %v1223_v0 = vld [vmem:[%s1429_s1] sm:$0xff] (!%p169_p3)   ;;  %p202_p4 = scmp.lt.s32.totalorder (!%p169_p3), %s1261_s12, 1  ;;  %v1224_v1 = vld [vmem:[%s1429_s1 + $0x8] sm:$0xff] (!%p169_p3)   ;;  %v1225_v2 = vld [vmem:[%s1429_s1 + $0x10] sm:$0xff] (!%p169_p3)  }
   0x7   : > { %172 = sbr.rel (%p169_p3) target bundleno = 285 (0x11d), region = 32  ;;  %1135 = vmatprep.subr.bf16.mxu0 (!%p169_p3), %v1223_v0  ;;  %1183 = vmatprep.subr.bf16.mxu1 (!%p169_p3), %v1223_v0  ;;  %v1226_v3 = vld [vmem:[%s1429_s1 + $0x18] sm:$0xff] (!%p169_p3)   ;;  %v1227_v6 = vld [vmem:[%s1429_s1 + $0x20] sm:$0xff] (!%p169_p3)   ;;  %v1228_v7 = vld [vmem:[%s1429_s1 + $0x28] sm:$0xff] (!%p169_p3)  }
   0x8   : > { %1136 = vmatpush3.bf16.msra.mxu0 (!%p169_p3), %v1223_v0  ;;  %1191 = vmatpush3.bf16.msra.mxu1 (!%p169_p3), %v1223_v0  ;;  %v1229_v8 = vld [vmem:[%s1429_s1 + $0x30] sm:$0xff] (!%p169_p3)   ;;  %v1230_v9 = vld [vmem:[%s1429_s1 + $0x38] sm:$0xff] (!%p169_p3)   ;;  %v1362_v24 = vld [vmem:[%s1430_s2] ss:$0 sm:$0xff] (!%p169_p3) }
   0x9   : > { %1137 = vmatprep.subr.bf16.mxu0 (!%p169_p3), %v1224_v1  ;;  %1184 = vmatprep.subr.bf16.mxu1 (!%p169_p3), %v1224_v1 }
   0xc   : > { %1138 = vmatpush3.bf16.msra.mxu0 (!%p169_p3), %v1224_v1  ;;  %1192 = vmatpush3.bf16.msra.mxu1 (!%p169_p3), %v1224_v1 }
   0xd   : > { %1139 = vmatprep.subr.bf16.mxu0 (!%p169_p3), %v1225_v2  ;;  %1185 = vmatprep.subr.bf16.mxu1 (!%p169_p3), %v1225_v2 }
   0xe   : > { %s1437_s12 = smov (!%p202_p4, %s1261_s12), 1 }
   0xf   : > { %s982_s22 = sshll.u32 %s1437_s12, 7 }
  0x10   : > { %s1326_s25 = scalar_lea.vmem %s1428_s0, %s982_s22  ;;  %1140 = vmatpush3.bf16.msra.mxu0 %v1225_v2  ;;  %1193 = vmatpush3.bf16.msra.mxu1 %v1225_v2  ;;  %s1377_s17 = scalar_lea.vmem %s1431_s3, %s982_s22 }
  0x11   : > { %v1231_v4 = vld [vmem:[%s1326_s25] sm:$0xff]   ;;  %1141 = vmatprep.subr.bf16.mxu0 %v1226_v3  ;;  %1186 = vmatprep.subr.bf16.mxu1 %v1226_v3  ;;  %v1233_v10 = vld [vmem:[%s1326_s25 + $0x8] sm:$0xff]   ;;  %v1235_v12 = vld [vmem:[%s1326_s25 + $0x10] sm:$0xff]  }
  0x12   : > { %v1232_v5 = vld [vmem:[%s1326_s25 + $0x40] sm:$0xff]   ;;  %1151 = vmatprep.mubr.bf16.mxu0 %v1231_v4  ;;  %v1234_v11 = vld [vmem:[%s1326_s25 + $0x48] sm:$0xff]   ;;  %v1236_v13 = vld [vmem:[%s1326_s25 + $0x50] sm:$0xff]  }
  0x13   : > { %1167 = vmatprep.mubr.bf16.mxu1 %v1232_v5  ;;  %v1237_v14 = vld [vmem:[%s1326_s25 + $0x18] sm:$0xff]   ;;  %v1239_v16 = vld [vmem:[%s1326_s25 + $0x20] sm:$0xff]   ;;  %v1241_v18 = vld [vmem:[%s1326_s25 + $0x28] sm:$0xff]  }
  0x14   : > { %1142 = vmatpush3.bf16.msra.mxu0 %v1226_v3  ;;  %1194 = vmatpush3.bf16.msra.mxu1 %v1226_v3  ;;  %v1238_v15 = vld [vmem:[%s1326_s25 + $0x58] sm:$0xff]   ;;  %v1240_v17 = vld [vmem:[%s1326_s25 + $0x60] sm:$0xff]   ;;  %v1242_v19 = vld [vmem:[%s1326_s25 + $0x68] sm:$0xff]  }
  0x15   : > { %1143 = vmatprep.subr.bf16.mxu0 %v1227_v6  ;;  %1187 = vmatprep.subr.bf16.mxu1 %v1227_v6  ;;  %v1243_v20 = vld [vmem:[%s1326_s25 + $0x30] sm:$0xff]   ;;  %v1245_v22 = vld [vmem:[%s1326_s25 + $0x38] sm:$0xff]  }
  0x16   : > { %v1244_v21 = vld [vmem:[%s1326_s25 + $0x70] sm:$0xff]   ;;  %v1246_v23 = vld [vmem:[%s1326_s25 + $0x78] sm:$0xff]  }
  0x18   : > { %1144 = vmatpush3.bf16.msra.mxu0 %v1227_v6  ;;  %1195 = vmatpush3.bf16.msra.mxu1 %v1227_v6 }
  0x19   : > { %1145 = vmatprep.subr.bf16.mxu0 %v1228_v7  ;;  %1188 = vmatprep.subr.bf16.mxu1 %v1228_v7 }
  0x1c   : > { %1146 = vmatpush3.bf16.msra.mxu0 %v1228_v7  ;;  %1196 = vmatpush3.bf16.msra.mxu1 %v1228_v7 }
  0x1d   : > { %1147 = vmatprep.subr.bf16.mxu0 %v1229_v8  ;;  %1189 = vmatprep.subr.bf16.mxu1 %v1229_v8 }
  0x20   : > { %1148 = vmatpush3.bf16.msra.mxu0 %v1229_v8  ;;  %1197 = vmatpush3.bf16.msra.mxu1 %v1229_v8 }
  0x21   : > { %1149 = vmatprep.subr.bf16.mxu0 %v1230_v9  ;;  %1190 = vmatprep.subr.bf16.mxu1 %v1230_v9 }
  0x24   : > { %1150 = vmatpush3.bf16.msra.mxu0 %v1230_v9  ;;  %1198 = vmatpush3.bf16.msra.mxu1 %v1230_v9 }
  0x27   : > { %1152 = vmatmul.mubr.bf16.vlgmr.msra.gmra.mrb[0].mxu0 %v1233_v10  ;;  %1168 = vmatmul.mubr.bf16.vlgmr.msra.gmra.mrb[0].mxu1 %v1234_v11 }
  0x28   : > { %1155 = vmatprep.mubr.bf16.mxu0 %v1235_v12  ;;  %1171 = vmatprep.mubr.bf16.mxu1 %v1236_v13 }
  0x2f   : > { %1156 = vmatmul.mubr.bf16.gmra.mrb[4].mxu0 %v1237_v14  ;;  %1172 = vmatmul.mubr.bf16.gmra.mrb[4].mxu1 %v1238_v15 }
  0x30   : > { %1159 = vmatprep.mubr.bf16.mxu0 %v1239_v16  ;;  %1175 = vmatprep.mubr.bf16.mxu1 %v1240_v17 }
  0x37   : > { %1160 = vmatmul.mubr.bf16.gmra.mrb[8].mxu0 %v1241_v18  ;;  %1176 = vmatmul.mubr.bf16.gmra.mrb[8].mxu1 %v1242_v19 }
  0x38   : > { %1163 = vmatprep.mubr.bf16.mxu0 %v1243_v20  ;;  %1179 = vmatprep.mubr.bf16.mxu1 %v1244_v21 }
  0x3f   : > { %1164 = vmatmul.mubr.bf16.gmra.mrb[12].mxu0 %v1245_v22  ;;  %1180 = vmatmul.mubr.bf16.gmra.mrb[12].mxu1 %v1246_v23 }
  0xfa   : > { %v1153_v25 = vpop.f32.mrb[0].mxu0  ;;  %v1169_v26 = vpop.f32.mrb[0].mxu1 }
  0xfb   : > { %v585_v27 = vadd.f32 %v1153_v25, %v1362_v24  ;;  %v601_v28 = vadd.f32 %v1169_v26, %v1362_v24  ;;  %v456_v29 = vpop.f32.mrb[1].mxu0  ;;  %v520_v30 = vpop.f32.mrb[1].mxu1 }
  0xfc   : > { %v583_v31 = vadd.f32 %v1362_v24, %v456_v29  ;;  %v599_v32 = vadd.f32 %v1362_v24, %v520_v30  ;;  %v1154_v33 = vpop.f32.mrb[2].mxu0  ;;  %v1170_v34 = vpop.f32.mrb[2].mxu1 }
  0xfd   : > { %v586_v35 = vadd.f32 %v1154_v33, %v1362_v24  ;;  %v602_v36 = vadd.f32 %v1170_v34, %v1362_v24  ;;  %v459_v37 = vpop.f32.mrb[3].mxu0  ;;  %v523_v38 = vpop.f32.mrb[3].mxu1  ;;  %v617_v41 = vmax.f32 %v585_v27, 0.0  ;;  %v633_v42 = vmax.f32 %v601_v28, 0.0 }
  0xfe   : > { %v584_v39 = vadd.f32 %v1362_v24, %v459_v37  ;;  %v600_v40 = vadd.f32 %v1362_v24, %v523_v38  ;;  %v615_v45 = vmax.f32 %v583_v31, 0.0  ;;  %v631_v46 = vmax.f32 %v599_v32, 0.0 }
  0xff   : > { %v618_v43 = vmax.f32 %v586_v35, 0.0  ;;  %v634_v44 = vmax.f32 %v602_v36, 0.0 }
 0x100   : > { %v616_v47 = vmax.f32 %v584_v39, 0.0  ;;  %v632_v48 = vmax.f32 %v600_v40, 0.0 }
 0x101   : > { %v1024_v49 = vpack.c.bf16 %v618_v43, %v617_v41  ;;  %v1064_v50 = vpack.c.bf16 %v634_v44, %v633_v42 }
 0x102   : > { %v1019_v51 = vpack.c.bf16 %v616_v47, %v615_v45  ;;  %v1059_v52 = vpack.c.bf16 %v632_v48, %v631_v46  ;;  %v1157_v53 = vpop.f32.mrb[4].mxu0  ;;  %v1173_v54 = vpop.f32.mrb[4].mxu1 }
 0x103   : > { %1096 = vst [vmem:[%s1377_s17 + $0x8] sm:$0xff] %v1024_v49   ;;  %1104 = vst [vmem:[%s1377_s17 + $0x48] sm:$0xff] %v1064_v50   ;;  %v589_v55 = vadd.f32 %v1157_v53, %v1362_v24  ;;  %v605_v56 = vadd.f32 %v1173_v54, %v1362_v24  ;;  %v472_v57 = vpop.f32.mrb[5].mxu0  ;;  %v536_v58 = vpop.f32.mrb[5].mxu1 }
 0x104   : > { %1020 = vst [vmem:[%s1377_s17] sm:$0xff] %v1019_v51   ;;  %1103 = vst [vmem:[%s1377_s17 + $0x40] sm:$0xff] %v1059_v52   ;;  %v587_v59 = vadd.f32 %v1362_v24, %v472_v57  ;;  %v603_v60 = vadd.f32 %v1362_v24, %v536_v58  ;;  %v1158_v61 = vpop.f32.mrb[6].mxu0  ;;  %v1174_v62 = vpop.f32.mrb[6].mxu1 }
 0x105   : > { %v590_v63 = vadd.f32 %v1158_v61, %v1362_v24  ;;  %v606_v0 = vadd.f32 %v1174_v62, %v1362_v24  ;;  %v475_v1 = vpop.f32.mrb[7].mxu0  ;;  %v539_v2 = vpop.f32.mrb[7].mxu1  ;;  %v621_v5 = vmax.f32 %v589_v55, 0.0  ;;  %v637_v6 = vmax.f32 %v605_v56, 0.0 }
 0x106   : > { %v588_v3 = vadd.f32 %v1362_v24, %v475_v1  ;;  %v604_v4 = vadd.f32 %v1362_v24, %v539_v2  ;;  %v619_v9 = vmax.f32 %v587_v59, 0.0  ;;  %v635_v10 = vmax.f32 %v603_v60, 0.0 }
 0x107   : > { %v622_v7 = vmax.f32 %v590_v63, 0.0  ;;  %v638_v8 = vmax.f32 %v606_v0, 0.0 }
 0x108   : > { %v620_v11 = vmax.f32 %v588_v3, 0.0  ;;  %v636_v12 = vmax.f32 %v604_v4, 0.0 }
 0x109   : > { %v1034_v13 = vpack.c.bf16 %v622_v7, %v621_v5  ;;  %v1074_v14 = vpack.c.bf16 %v638_v8, %v637_v6 }
 0x10a   : > { %v1029_v15 = vpack.c.bf16 %v620_v11, %v619_v9  ;;  %v1069_v16 = vpack.c.bf16 %v636_v12, %v635_v10  ;;  %v1161_v17 = vpop.f32.mrb[8].mxu0  ;;  %v1177_v18 = vpop.f32.mrb[8].mxu1 }
 0x10b   : > { %1098 = vst [vmem:[%s1377_s17 + $0x18] sm:$0xff] %v1034_v13   ;;  %1106 = vst [vmem:[%s1377_s17 + $0x58] sm:$0xff] %v1074_v14   ;;  %v593_v19 = vadd.f32 %v1161_v17, %v1362_v24  ;;  %v609_v20 = vadd.f32 %v1177_v18, %v1362_v24  ;;  %v488_v21 = vpop.f32.mrb[9].mxu0  ;;  %v552_v22 = vpop.f32.mrb[9].mxu1 }
 0x10c   : > { %1097 = vst [vmem:[%s1377_s17 + $0x10] sm:$0xff] %v1029_v15   ;;  %1105 = vst [vmem:[%s1377_s17 + $0x50] sm:$0xff] %v1069_v16   ;;  %v591_v23 = vadd.f32 %v1362_v24, %v488_v21  ;;  %v607_v25 = vadd.f32 %v1362_v24, %v552_v22  ;;  %v1162_v26 = vpop.f32.mrb[10].mxu0  ;;  %v1178_v27 = vpop.f32.mrb[10].mxu1 }
 0x10d   : > { %v594_v28 = vadd.f32 %v1162_v26, %v1362_v24  ;;  %v610_v29 = vadd.f32 %v1178_v27, %v1362_v24  ;;  %v491_v30 = vpop.f32.mrb[11].mxu0  ;;  %v555_v31 = vpop.f32.mrb[11].mxu1  ;;  %v625_v34 = vmax.f32 %v593_v19, 0.0  ;;  %v641_v35 = vmax.f32 %v609_v20, 0.0 }
 0x10e   : > { %v592_v32 = vadd.f32 %v1362_v24, %v491_v30  ;;  %v608_v33 = vadd.f32 %v1362_v24, %v555_v31  ;;  %v623_v38 = vmax.f32 %v591_v23, 0.0  ;;  %v639_v39 = vmax.f32 %v607_v25, 0.0 }
 0x10f   : > { %v626_v36 = vmax.f32 %v594_v28, 0.0  ;;  %v642_v37 = vmax.f32 %v610_v29, 0.0 }
 0x110   : > { %v624_v40 = vmax.f32 %v592_v32, 0.0  ;;  %v640_v41 = vmax.f32 %v608_v33, 0.0 }
 0x111   : > { %v1044_v42 = vpack.c.bf16 %v626_v36, %v625_v34  ;;  %v1084_v43 = vpack.c.bf16 %v642_v37, %v641_v35 }
 0x112   : > { %v1039_v44 = vpack.c.bf16 %v624_v40, %v623_v38  ;;  %v1079_v45 = vpack.c.bf16 %v640_v41, %v639_v39  ;;  %v1165_v46 = vpop.f32.mrb[12].mxu0  ;;  %v1181_v47 = vpop.f32.mrb[12].mxu1 }
 0x113   : > { %1100 = vst [vmem:[%s1377_s17 + $0x28] sm:$0xff] %v1044_v42   ;;  %1108 = vst [vmem:[%s1377_s17 + $0x68] sm:$0xff] %v1084_v43   ;;  %v597_v48 = vadd.f32 %v1165_v46, %v1362_v24  ;;  %v613_v49 = vadd.f32 %v1181_v47, %v1362_v24  ;;  %v504_v50 = vpop.f32.mrb[13].mxu0  ;;  %v568_v51 = vpop.f32.mrb[13].mxu1 }
 0x114   : > { %1099 = vst [vmem:[%s1377_s17 + $0x20] sm:$0xff] %v1039_v44   ;;  %1107 = vst [vmem:[%s1377_s17 + $0x60] sm:$0xff] %v1079_v45   ;;  %v595_v52 = vadd.f32 %v1362_v24, %v504_v50  ;;  %v611_v53 = vadd.f32 %v1362_v24, %v568_v51  ;;  %v1166_v54 = vpop.f32.mrb[14].mxu0  ;;  %v1182_v55 = vpop.f32.mrb[14].mxu1 }
 0x115   : > { %v598_v56 = vadd.f32 %v1166_v54, %v1362_v24  ;;  %v614_v57 = vadd.f32 %v1182_v55, %v1362_v24  ;;  %v507_v58 = vpop.f32.mrb[15].mxu0  ;;  %v571_v59 = vpop.f32.mrb[15].mxu1  ;;  %v629_v62 = vmax.f32 %v597_v48, 0.0  ;;  %v645_v63 = vmax.f32 %v613_v49, 0.0 }
 0x116   : > { %v596_v60 = vadd.f32 %v1362_v24, %v507_v58  ;;  %v612_v61 = vadd.f32 %v1362_v24, %v571_v59  ;;  %v627_v2 = vmax.f32 %v595_v52, 0.0  ;;  %v643_v3 = vmax.f32 %v611_v53, 0.0 }
 0x117   : > { %v630_v0 = vmax.f32 %v598_v56, 0.0  ;;  %v646_v1 = vmax.f32 %v614_v57, 0.0 }
 0x118   : > { %v628_v4 = vmax.f32 %v596_v60, 0.0  ;;  %v644_v5 = vmax.f32 %v612_v61, 0.0 }
 0x119   : > { %v1054_v6 = vpack.c.bf16 %v630_v0, %v629_v62  ;;  %v1094_v7 = vpack.c.bf16 %v646_v1, %v645_v63 }
 0x11a   : > { %v1049_v8 = vpack.c.bf16 %v628_v4, %v627_v2  ;;  %v1089_v9 = vpack.c.bf16 %v644_v5, %v643_v3 }
 0x11b   : > { %1102 = vst [vmem:[%s1377_s17 + $0x38] sm:$0xff] %v1054_v6   ;;  %1110 = vst [vmem:[%s1377_s17 + $0x78] sm:$0xff] %v1094_v7  }
 0x11c   : > { %1101 = vst [vmem:[%s1377_s17 + $0x30] sm:$0xff] %v1049_v8   ;;  %1109 = vst [vmem:[%s1377_s17 + $0x70] sm:$0xff] %v1089_v9  }
 0x11d PF: > { %s13_s14 = sadd.s32 1, %s1269_s14   ;;  %s1432_s12 = smov %s1265_s13 }
 0x11e   : > { %p10_p5 = scmp.ge.s32.totalorder %s13_s14, 4   ;;  %s1433_s13 = smov %s1435_s15 }
 0x120   :  { %12 = sbr.rel (!%p10_p5) target bundleno = 2 (0x2), region = 68 }

// kernel: a_call__.9
= control target key start
LH: loop header
LB: loop body
LE: loop exit
PB: predicated region body
PF: predicated region fallthrough
CT: control target
= control target key end

     0   :  { %s538_s1 = inlined_call_operand.vmem [shape: bf16[1,128,128], index: 1, kind: input, shape index: {}]   ;;  %s539_s0 = inlined_call_operand.vmem [shape: bf16[2,8,8,128], index: 0, kind: input, shape index: {}]   ;;  %s540_s2 = inlined_call_operand.vmem [shape: f32[1,128], index: 2, kind: input, shape index: {}]   ;;  %s541_s3 = inlined_call_operand.vmem [shape: bf16[2,8,8,128], index: 3, kind: output, shape index: {}]  }
   0x1   :  { %v427_v0 = vld [vmem:[%s538_s1] sm:$0xff]   ;;  %v428_v1 = vld [vmem:[%s538_s1 + $0x8] sm:$0xff]   ;;  %v429_v2 = vld [vmem:[%s538_s1 + $0x10] sm:$0xff]  }
   0x2   :  { %379 = vmatprep.subr.bf16.mxu0 %v427_v0  ;;  %411 = vmatprep.subr.bf16.mxu1 %v427_v0  ;;  %v430_v3 = vld [vmem:[%s538_s1 + $0x18] sm:$0xff]   ;;  %v435_v4 = vld [vmem:[%s539_s0] sm:$0xff]   ;;  %v432_v7 = vld [vmem:[%s538_s1 + $0x28] sm:$0xff]  }
   0x3   :  { %380 = vmatpush3.bf16.msra.mxu0 %v427_v0  ;;  %419 = vmatpush3.bf16.msra.mxu1 %v427_v0  ;;  %v436_v5 = vld [vmem:[%s539_s0 + $0x20] sm:$0xff]   ;;  %v433_v8 = vld [vmem:[%s538_s1 + $0x30] sm:$0xff]   ;;  %v434_v9 = vld [vmem:[%s538_s1 + $0x38] sm:$0xff]  }
   0x4   :  { %381 = vmatprep.subr.bf16.mxu0 %v428_v1  ;;  %412 = vmatprep.subr.bf16.mxu1 %v428_v1  ;;  %v431_v6 = vld [vmem:[%s538_s1 + $0x20] sm:$0xff]   ;;  %v437_v10 = vld [vmem:[%s539_s0 + $0x8] sm:$0xff]   ;;  %v439_v12 = vld [vmem:[%s539_s0 + $0x10] sm:$0xff]  }
   0x5   :  { %395 = vmatprep.mubr.bf16.mxu0 %v435_v4  ;;  %403 = vmatprep.mubr.bf16.mxu1 %v436_v5  ;;  %v438_v11 = vld [vmem:[%s539_s0 + $0x28] sm:$0xff]   ;;  %v440_v13 = vld [vmem:[%s539_s0 + $0x30] sm:$0xff]   ;;  %v441_v14 = vld [vmem:[%s539_s0 + $0x18] sm:$0xff]  }
   0x6   :  { %v442_v15 = vld [vmem:[%s539_s0 + $0x38] sm:$0xff]   ;;  %v299_v16 = vld [vmem:[%s540_s2] ss:$0 sm:$0xff] }
   0x7   :  { %382 = vmatpush3.bf16.msra.mxu0 %v428_v1  ;;  %420 = vmatpush3.bf16.msra.mxu1 %v428_v1 }
   0x8   :  { %383 = vmatprep.subr.bf16.mxu0 %v429_v2  ;;  %413 = vmatprep.subr.bf16.mxu1 %v429_v2 }
   0xb   :  { %384 = vmatpush3.bf16.msra.mxu0 %v429_v2  ;;  %421 = vmatpush3.bf16.msra.mxu1 %v429_v2 }
   0xc   :  { %385 = vmatprep.subr.bf16.mxu0 %v430_v3  ;;  %414 = vmatprep.subr.bf16.mxu1 %v430_v3 }
   0xf   :  { %386 = vmatpush3.bf16.msra.mxu0 %v430_v3  ;;  %422 = vmatpush3.bf16.msra.mxu1 %v430_v3 }
  0x10   :  { %387 = vmatprep.subr.bf16.mxu0 %v431_v6  ;;  %415 = vmatprep.subr.bf16.mxu1 %v431_v6 }
  0x13   :  { %388 = vmatpush3.bf16.msra.mxu0 %v431_v6  ;;  %423 = vmatpush3.bf16.msra.mxu1 %v431_v6 }
  0x14   :  { %389 = vmatprep.subr.bf16.mxu0 %v432_v7  ;;  %416 = vmatprep.subr.bf16.mxu1 %v432_v7 }
  0x17   :  { %390 = vmatpush3.bf16.msra.mxu0 %v432_v7  ;;  %424 = vmatpush3.bf16.msra.mxu1 %v432_v7 }
  0x18   :  { %391 = vmatprep.subr.bf16.mxu0 %v433_v8  ;;  %417 = vmatprep.subr.bf16.mxu1 %v433_v8 }
  0x1b   :  { %392 = vmatpush3.bf16.msra.mxu0 %v433_v8  ;;  %425 = vmatpush3.bf16.msra.mxu1 %v433_v8 }
  0x1c   :  { %393 = vmatprep.subr.bf16.mxu0 %v434_v9  ;;  %418 = vmatprep.subr.bf16.mxu1 %v434_v9 }
  0x1f   :  { %394 = vmatpush3.bf16.msra.mxu0 %v434_v9  ;;  %426 = vmatpush3.bf16.msra.mxu1 %v434_v9 }
  0x22   :  { %396 = vmatmul.mubr.bf16.vlgmr.msra.gmra.mrb[0].mxu0 %v437_v10  ;;  %404 = vmatmul.mubr.bf16.vlgmr.msra.gmra.mrb[0].mxu1 %v438_v11 }
  0x23   :  { %399 = vmatprep.mubr.bf16.mxu0 %v439_v12  ;;  %407 = vmatprep.mubr.bf16.mxu1 %v440_v13 }
  0x2a   :  { %400 = vmatmul.mubr.bf16.gmra.mrb[4].mxu0 %v441_v14  ;;  %408 = vmatmul.mubr.bf16.gmra.mrb[4].mxu1 %v442_v15 }
  0xf5   :  { %v397_v17 = vpop.f32.mrb[0].mxu0  ;;  %v405_v18 = vpop.f32.mrb[0].mxu1 }
  0xf6   :  { %v184_v19 = vpop.f32.mrb[1].mxu0  ;;  %v216_v20 = vpop.f32.mrb[1].mxu1  ;;  %v249_v23 = vadd.f32 %v397_v17, %v299_v16  ;;  %v257_v24 = vadd.f32 %v405_v18, %v299_v16 }
  0xf7   :  { %v398_v21 = vpop.f32.mrb[2].mxu0  ;;  %v406_v22 = vpop.f32.mrb[2].mxu1  ;;  %v247_v29 = vadd.f32 %v299_v16, %v184_v19  ;;  %v255_v30 = vadd.f32 %v299_v16, %v216_v20 }
  0xf8   :  { %v250_v25 = vadd.f32 %v398_v21, %v299_v16  ;;  %v258_v26 = vadd.f32 %v406_v22, %v299_v16  ;;  %v187_v27 = vpop.f32.mrb[3].mxu0  ;;  %v219_v28 = vpop.f32.mrb[3].mxu1 }
  0xf9   :  { %v248_v31 = vadd.f32 %v299_v16, %v187_v27  ;;  %v256_v32 = vadd.f32 %v299_v16, %v219_v28 }
  0xfa   :  { %v324_v33 = vpack.c.bf16 %v250_v25, %v249_v23  ;;  %v344_v34 = vpack.c.bf16 %v258_v26, %v257_v24 }
  0xfb   :  { %v319_v35 = vpack.c.bf16 %v248_v31, %v247_v29  ;;  %v339_v36 = vpack.c.bf16 %v256_v32, %v255_v30 }
  0xfc   :  { %356 = vst [vmem:[%s541_s3 + $0x8] sm:$0xff] %v324_v33   ;;  %360 = vst [vmem:[%s541_s3 + $0x28] sm:$0xff] %v344_v34  }
  0xfd   :  { %320 = vst [vmem:[%s541_s3] sm:$0xff] %v319_v35   ;;  %359 = vst [vmem:[%s541_s3 + $0x20] sm:$0xff] %v339_v36   ;;  %v401_v37 = vpop.f32.mrb[4].mxu0  ;;  %v409_v38 = vpop.f32.mrb[4].mxu1 }
  0xfe   :  { %v200_v39 = vpop.f32.mrb[5].mxu0  ;;  %v232_v40 = vpop.f32.mrb[5].mxu1  ;;  %v253_v43 = vadd.f32 %v401_v37, %v299_v16  ;;  %v261_v44 = vadd.f32 %v409_v38, %v299_v16 }
  0xff   :  { %v402_v41 = vpop.f32.mrb[6].mxu0  ;;  %v410_v42 = vpop.f32.mrb[6].mxu1  ;;  %v251_v49 = vadd.f32 %v299_v16, %v200_v39  ;;  %v259_v50 = vadd.f32 %v299_v16, %v232_v40 }
 0x100   :  { %v254_v45 = vadd.f32 %v402_v41, %v299_v16  ;;  %v262_v46 = vadd.f32 %v410_v42, %v299_v16  ;;  %v203_v47 = vpop.f32.mrb[7].mxu0  ;;  %v235_v48 = vpop.f32.mrb[7].mxu1 }
 0x101   :  { %v252_v51 = vadd.f32 %v299_v16, %v203_v47  ;;  %v260_v52 = vadd.f32 %v299_v16, %v235_v48 }
 0x102   :  { %v334_v53 = vpack.c.bf16 %v254_v45, %v253_v43  ;;  %v354_v54 = vpack.c.bf16 %v262_v46, %v261_v44 }
 0x103   :  { %v329_v55 = vpack.c.bf16 %v252_v51, %v251_v49  ;;  %v349_v56 = vpack.c.bf16 %v260_v52, %v259_v50 }
 0x104   :  { %358 = vst [vmem:[%s541_s3 + $0x18] sm:$0xff] %v334_v53   ;;  %362 = vst [vmem:[%s541_s3 + $0x38] sm:$0xff] %v354_v54  }
 0x105   :  { %357 = vst [vmem:[%s541_s3 + $0x10] sm:$0xff] %v329_v55   ;;  %361 = vst [vmem:[%s541_s3 + $0x30] sm:$0xff] %v349_v56  }

// kernel: a_call__.8
= control target key start
LH: loop header
LB: loop body
LE: loop exit
PB: predicated region body
PF: predicated region fallthrough
CT: control target
= control target key end

     0   :  { %s5691_s15 = smov 0   ;;  %s5693_s16 = smov 0   ;;  %s7233_s0 = inlined_call_operand.vmem [shape: bf16[2,18,18,128], index: 0, kind: input, shape index: {}]   ;;  %s7234_s1 = inlined_call_operand.vmem [shape: bf16[3,384,128], index: 1, kind: input, shape index: {}]   ;;  %s7235_s2 = inlined_call_operand.vmem [shape: f32[1,128], index: 2, kind: input, shape index: {}]   ;;  %s7236_s3 = inlined_call_operand.vmem [shape: bf16[2,16,16,128], index: 3, kind: input, shape index: {}]   ;;  %s7237_s4 = inlined_call_operand.vmem [shape: bf16[2,16,16,128], index: 4, kind: output, shape index: {}]  }
   0x1   :  { %s5695_s17 = smov 0  }
   0x2 LB: > { %s26_s18 = sadd.s32 1, %s5660_s16  ;;  %p3933_p0 = scmp.ge.s32.totalorder %s5664_s17, 1  ;;  %s5664_s17 = sphi %s5695_s17, %s14_s17   ;;  %s5660_s16 = sphi %s5693_s16, %s7241_s16   ;;  %s5656_s15 = sphi %s5691_s15, %s7240_s15  }
   0x3   : > { %p28_p1 = scmp.ge.s32.totalorder %s26_s18, 2  ;;  %p208_p2 = scmp.lt.s32.totalorder %s5664_s17, 3 }
   0x5   : > { %s7243_s18 = smov (%p28_p1, %s26_s18), 0  ;;  %p209_p3 = pnand %p3933_p0, %p208_p2 }
   0x7   : > { %212 = sbr.rel (%p209_p3) target bundleno = 559 (0x22f), region = 36 }
   0xe   : > { %v5407_v0 = vld [vmem:[%s7234_s1 + $0x40] sm:$0xff]   ;;  %v5410_v3 = vld [vmem:[%s7234_s1 + $0x48] sm:$0xff]   ;;  %v5413_v6 = vld [vmem:[%s7234_s1 + $0x50] sm:$0xff]   ;;  %p252_p4 = scmp.lt.s32.totalorder %s5656_s15, 1  ;;  %vm753_vm0 = vcmask 1046528  }
   0xf   : > { %v5717_v1 = vld [vmem:[%s7234_s1 + $0x80] sm:$0xff]   ;;  %4622 = vmatprep.subr.bf16.mxu0 %v5407_v0  ;;  %v5730_v4 = vld [vmem:[%s7234_s1 + $0x88] sm:$0xff]   ;;  %v5742_v7 = vld [vmem:[%s7234_s1 + $0x90] sm:$0xff]   ;;  %vm496_vm1 = vsmask.f32 7424 }
  0x10   : > { %v5409_v2 = vld [vmem:[%s7234_s1] sm:$0xff]   ;;  %5174 = vmatprep.subr.bf16.mxu1 %v5717_v1  ;;  %v5412_v5 = vld [vmem:[%s7234_s1 + $0x8] sm:$0xff]   ;;  %v5415_v8 = vld [vmem:[%s7234_s1 + $0x10] sm:$0xff]   ;;  %s7245_s15 = smov (!%p252_p4, %s5656_s15), 1 }
  0x11   : > { %4623 = vmatpush3.bf16.msra.mxu0 %v5409_v2  ;;  %5182 = vmatpush3.bf16.msra.mxu1 %v5717_v1  ;;  %v5416_v9 = vld [vmem:[%s7234_s1 + $0x58] sm:$0xff]   ;;  %v5419_v12 = vld [vmem:[%s7234_s1 + $0x60] sm:$0xff]   ;;  %v5422_v15 = vld [vmem:[%s7234_s1 + $0x68] sm:$0xff]   ;;  %s5382_s5 = smul.u32 216, %s7245_s15  ;;  %s4414_s19 = sshll.u32 %s7245_s15, 7 }
  0x12   : > { %4624 = vmatprep.subr.bf16.mxu0 %v5410_v3  ;;  %5175 = vmatprep.subr.bf16.mxu1 %v5730_v4  ;;  %v5756_v10 = vld [vmem:[%s7234_s1 + $0x98] sm:$0xff]   ;;  %v5769_v13 = vld [vmem:[%s7234_s1 + $0xa0] sm:$0xff]   ;;  %v5785_v16 = vld [vmem:[%s7234_s1 + $0xa8] sm:$0xff]   ;;  %s7122_s22 = scalar_lea.vmem %s7236_s3, %s4414_s19  ;;  %s7148_s25 = scalar_lea.vmem %s7237_s4, %s4414_s19 }
  0x13   : > { %v5418_v11 = vld [vmem:[%s7234_s1 + $0x18] sm:$0xff]   ;;  %v5421_v14 = vld [vmem:[%s7234_s1 + $0x20] sm:$0xff]   ;;  %v5424_v17 = vld [vmem:[%s7234_s1 + $0x28] sm:$0xff]   ;;  %s5804_s14 = scalar_lea.vmem %s7233_s0, %s5382_s5 }
  0x14   : > { %v5425_v18 = vld [vmem:[%s7234_s1 + $0x70] sm:$0xff]   ;;  %v288_v21 = vld [vmem:[%s5804_s14] sm:$0xf]  ;;  %v289_v22 = vld [vmem:[%s5804_s14 + $0x4] sm:$0xf] }
  0x15   : > { %4625 = vmatpush3.bf16.msra.mxu0 %v5412_v5  ;;  %5183 = vmatpush3.bf16.msra.mxu1 %v5730_v4  ;;  %v5799_v19 = vld [vmem:[%s7234_s1 + $0xb0] sm:$0xff]   ;;  %v5428_v23 = vld [vmem:[%s7234_s1 + $0x78] sm:$0xff]   ;;  %v3940_v25 = vcombine.low %v288_v21, %v289_v22  ;;  %v5432_v26 = vld [vmem:[%s5804_s14 + $0x8] ss:$0 sps:$4 sm:$0x11]  }
  0x16   : > { %4626 = vmatprep.subr.bf16.mxu0 %v5413_v6  ;;  %5176 = vmatprep.subr.bf16.mxu1 %v5742_v7  ;;  %v5427_v20 = vld [vmem:[%s7234_s1 + $0x30] sm:$0xff]   ;;  %v5819_v24 = vld [vmem:[%s7234_s1 + $0xb8] sm:$0xff]   ;;  %v5823_v27 = vld [vmem:[%s5804_s14 + $0x64] sm:$0xf]  ;;  %v505_v31 = vshll.u32 %v5432_v26, 16 }
  0x17   : > { %v5430_v28 = vld [vmem:[%s7234_s1 + $0x38] sm:$0xff]   ;;  %v498_v29 = vshrl.u32 %v3940_v25, 16  ;;  %v500_v30 = vshll.u32 %v3940_v25, 16  ;;  %v344_v32 = vld [vmem:[%s5804_s14 + $0x60] sm:$0xe]  ;;  %v5441_v47 = vld [vmem:[%s7234_s1 + $0x108] sm:$0xff]  }
  0x18   : > { %v5831_v33 = vld [vmem:[%s5804_s14 + $0x68] ss:$0 sps:$4 sm:$0x11]   ;;  %v3980_v34 = vcombine.low %v344_v32, %v5823_v27  ;;  %v5439_v35 = vld [vmem:[%s7234_s1 + $0x100] sm:$0xff]   ;;  %v507_v37 = vrot.slane %v505_v31, 1  ;;  %v5451_v0 = vld [vmem:[%s7234_s1 + $0x110] sm:$0xff]  }
  0x19   : > { %4627 = vmatpush3.bf16.msra.mxu0 %v5415_v8  ;;  %5184 = vmatpush3.bf16.msra.mxu1 %v5742_v7  ;;  %v502_v36 = vrot.slane %v500_v30, 1  ;;  %v5839_v38 = vld [vmem:[%s5804_s14 + $0x70] sm:$0xf]  ;;  %v779_v40 = vrot.slane %v5831_v33, 1  ;;  %v345_v41 = vld [vmem:[%s5804_s14 + $0x6c] sm:$0xe] }
  0x1a   : > { %4628 = vmatprep.subr.bf16.mxu0 %v5416_v9  ;;  %5177 = vmatprep.subr.bf16.mxu1 %v5756_v10  ;;  %v778_v39 = vrot.slane %v3980_v34, 1  ;;  %v5844_v43 = vld [vmem:[%s5804_s14 + $0x74] ss:$0 sps:$4 sm:$0x11]   ;;  %v3981_v44 = vcombine.low %v345_v41, %v5839_v38  ;;  %v5440_v45 = vld [vmem:[%s7234_s1 + $0xc0] sm:$0xff]   ;;  %v5442_v57 = vld [vmem:[%s7234_s1 + $0xc8] sm:$0xff]  }
  0x1b   : > { %v503_v42 = vor.u32 %v502_v36, %v498_v29  ;;  %v782_v50 = vrot.slane %v5844_v43, 1  ;;  %v290_v51 = vld [vmem:[%s5804_s14 + $0xc] sm:$0xf]  ;;  %v291_v52 = vld [vmem:[%s5804_s14 + $0x10] sm:$0xf] }
  0x1c   : > { %v780_v46 = vsel %vm753_vm0, %v778_v39, %v779_v40  ;;  %v781_v49 = vrot.slane %v3981_v44, 1  ;;  %v3941_v54 = vcombine.low %v290_v51, %v291_v52  ;;  %v5444_v55 = vld [vmem:[%s5804_s14 + $0x14] ss:$0 sps:$4 sm:$0x11]   ;;  %v5864_v56 = vld [vmem:[%s5804_s14 + $0x7c] sm:$0xf] }
  0x1d   : > { %4629 = vmatpush3.bf16.msra.mxu0 %v5418_v11  ;;  %5185 = vmatpush3.bf16.msra.mxu1 %v5756_v10  ;;  %v508_v48 = vsel %vm496_vm1, %v503_v42, %v507_v37  ;;  %v517_v60 = vshll.u32 %v5444_v55, 16  ;;  %v346_v61 = vld [vmem:[%s5804_s14 + $0x78] sm:$0xe]  ;;  %v5872_v62 = vld [vmem:[%s5804_s14 + $0x80] ss:$0 sps:$4 sm:$0x11]  }
  0x1e   : > { %4630 = vmatprep.subr.bf16.mxu0 %v5419_v12  ;;  %5178 = vmatprep.subr.bf16.mxu1 %v5769_v13  ;;  %v783_v53 = vsel %vm753_vm0, %v781_v49, %v782_v50  ;;  %v510_v58 = vshrl.u32 %v3941_v54, 16  ;;  %v512_v59 = vshll.u32 %v3941_v54, 16  ;;  %v3982_v63 = vcombine.low %v346_v61, %v5864_v56  ;;  %v5879_v3 = vld [vmem:[%s5804_s14 + $0x88] sm:$0xf]  ;;  %v5452_v5 = vld [vmem:[%s7234_s1 + $0xd0] sm:$0xff]   ;;  %v5464_v37 = vld [vmem:[%s7234_s1 + $0xe0] sm:$0xff]  }
  0x1f   : > { %5062 = vmatprep.mubr.bf16.mxu1 %v780_v46  ;;  %1042 = vmatprep.mubr.bf16.mxu0 %v508_v48  ;;  %v519_v2 = vrot.slane %v517_v60, 1  ;;  %v785_v8 = vrot.slane %v5872_v62, 1  ;;  %v347_v9 = vld [vmem:[%s5804_s14 + $0x84] sm:$0xe]  ;;  %v292_v21 = vld [vmem:[%s5804_s14 + $0x18] sm:$0xf] }
  0x20   : > { %v784_v6 = vrot.slane %v3982_v63, 1  ;;  %v5888_v12 = vld [vmem:[%s5804_s14 + $0x8c] ss:$0 sps:$4 sm:$0x11]   ;;  %v293_v22 = vld [vmem:[%s5804_s14 + $0x1c] sm:$0xf] }
  0x21   : > { %4631 = vmatpush3.bf16.msra.mxu0 %v5421_v14  ;;  %5186 = vmatpush3.bf16.msra.mxu1 %v5769_v13  ;;  %v3983_v14 = vcombine.low %v347_v9, %v5879_v3  ;;  %v3942_v26 = vcombine.low %v292_v21, %v293_v22  ;;  %v5907_v29 = vld [vmem:[%s5804_s14 + $0x94] sm:$0xf]  ;;  %v348_v34 = vld [vmem:[%s5804_s14 + $0x90] sm:$0xe]  ;;  %v5465_v39 = vld [vmem:[%s7234_s1 + $0x128] sm:$0xff]  }
  0x22   : > { %4632 = vmatprep.subr.bf16.mxu0 %v5422_v15  ;;  %5179 = vmatprep.subr.bf16.mxu1 %v5785_v16  ;;  %v5453_v15 = vld [vmem:[%s7234_s1 + $0x118] sm:$0xff]   ;;  %v3984_v36 = vcombine.low %v348_v34, %v5907_v29  ;;  %v5926_v42 = vld [vmem:[%s5804_s14 + $0xa0] sm:$0xf]  ;;  %v5932_v48 = vld [vmem:[%s5804_s14 + $0xa4] ss:$0 sps:$4 sm:$0x11]  }
  0x23   : > { %v522_v30 = vshrl.u32 %v3942_v26, 16  ;;  %v524_v31 = vshll.u32 %v3942_v26, 16  ;;  %v349_v46 = vld [vmem:[%s5804_s14 + $0x9c] sm:$0xe]  ;;  %v295_v55 = vld [vmem:[%s5804_s14 + $0x28] sm:$0xf] }
  0x24   : > { %v790_v44 = vrot.slane %v3984_v36, 1  ;;  %v3985_v49 = vcombine.low %v349_v46, %v5926_v42  ;;  %v5951_v60 = vld [vmem:[%s5804_s14 + $0xac] sm:$0xf]  ;;  %v5478_v21 = vld [vmem:[%s7234_s1 + $0xf8] sm:$0xff]   ;;  %v4013_v36 = vld [vmem:[%s5804_s14 + $0x10] sm:$0xf] }
  0x25   : > { %4633 = vmatpush3.bf16.msra.mxu0 %v5424_v17  ;;  %5187 = vmatpush3.bf16.msra.mxu1 %v5785_v16  ;;  %v786_v17 = vsel %vm753_vm0, %v784_v6, %v785_v8  ;;  %v526_v40 = vrot.slane %v524_v31, 1  ;;  %v5480_v31 = vld [vmem:[%s5804_s14 + $0x38] ss:$0 sps:$4 sm:$0x11]   ;;  %v4012_v34 = vld [vmem:[%s5804_s14 + $0xc] sm:$0xf] }
  0x26   : > { %4634 = vmatprep.subr.bf16.mxu0 %v5425_v18  ;;  %5180 = vmatprep.subr.bf16.mxu1 %v5799_v19  ;;  %v793_v52 = vrot.slane %v3985_v49, 1 }
  0x29   : > { %4635 = vmatpush3.bf16.msra.mxu0 %v5427_v20  ;;  %5188 = vmatpush3.bf16.msra.mxu1 %v5799_v19  ;;  %v788_v20 = vrot.slane %v5888_v12, 1 }
  0x2a   : > { %4636 = vmatprep.subr.bf16.mxu0 %v5428_v23  ;;  %5181 = vmatprep.subr.bf16.mxu1 %v5819_v24 }
  0x2d   : > { %4637 = vmatpush3.bf16.msra.mxu0 %v5430_v28  ;;  %5189 = vmatpush3.bf16.msra.mxu1 %v5819_v24  ;;  %v5456_v28 = vld [vmem:[%s5804_s14 + $0x20] ss:$0 sps:$4 sm:$0x11]  }
  0x2e   : > { %5030 = vmatprep.subr.bf16.mxu0 %v5717_v1  ;;  %4758 = vmatprep.subr.bf16.mxu1 %v5439_v35  ;;  %v529_v32 = vshll.u32 %v5456_v28, 16  ;;  %v5915_v35 = vld [vmem:[%s5804_s14 + $0x98] ss:$0 sps:$4 sm:$0x11]   ;;  %v5985_v28 = vld [vmem:[%s5804_s14 + $0x34] sm:$0xf] }
  0x30   : > { %1043 = vmatmul.mubr.bf16.vlgmr.msra.gmra.mrb[0].mxu0 %v3940_v25  ;;  %5063 = vmatmul.mubr.bf16.vlgmr.msra.gmra.mrb[0].mxu1 %v783_v53  ;;  %v5454_v25 = vld [vmem:[%s7234_s1 + $0xd8] sm:$0xff]   ;;  %v531_v41 = vrot.slane %v529_v32, 1  ;;  %v794_v53 = vrot.slane %v5932_v48, 1  ;;  %v5483_v32 = vld [vmem:[%s7234_s1 + $0x140] sm:$0xff]  }
  0x31   : > { %5031 = vmatpush3.bf16.msra.mxu0 %v5717_v1  ;;  %4759 = vmatpush3.bf16.msra.mxu1 %v5440_v45  ;;  %v514_v1 = vrot.slane %v512_v59, 1  ;;  %v791_v45 = vrot.slane %v5915_v35, 1  ;;  %v5468_v59 = vld [vmem:[%s5804_s14 + $0x2c] ss:$0 sps:$4 sm:$0x11]  }
  0x32   : > { %5032 = vmatprep.subr.bf16.mxu0 %v5730_v4  ;;  %4760 = vmatprep.subr.bf16.mxu1 %v5441_v47  ;;  %v527_v47 = vor.u32 %v526_v40, %v522_v30  ;;  %v4076_v40 = vcombine.low %v4012_v34, %v4013_v36  ;;  %v5491_v36 = vld [vmem:[%s5804_s14 + $0x2c] ss:$0 sps:$4 sm:$0x11]  }
  0x33   : > { %v515_v11 = vor.u32 %v514_v1, %v510_v58  ;;  %5066 = vmatprep.mubr.bf16.mxu1 %v786_v17  ;;  %v792_v50 = vsel %vm753_vm0, %v790_v44, %v791_v45  ;;  %v350_v1 = vld [vmem:[%s5804_s14 + $0xa8] sm:$0xe]  ;;  %v351_v17 = vld [vmem:[%s5804_s14 + $0xb4] sm:$0xe]  ;;  %v298_v44 = vld [vmem:[%s5804_s14 + $0x3c] sm:$0xf] }
  0x34   : > { %v532_v51 = vsel %vm496_vm1, %v527_v47, %v531_v41  ;;  %v3986_v6 = vcombine.low %v350_v1, %v5951_v60  ;;  %v5482_v41 = vld [vmem:[%s5804_s14 + $0x14] ss:$0 sps:$4 sm:$0x11]   ;;  %v1574_v47 = vshrl.u32 %v4076_v40, 16  ;;  %v1576_v49 = vshll.u32 %v4076_v40, 16 }
  0x35   : > { %5033 = vmatpush3.bf16.msra.mxu0 %v5730_v4  ;;  %4761 = vmatpush3.bf16.msra.mxu1 %v5442_v57  ;;  %v520_v18 = vsel %vm496_vm1, %v515_v11, %v519_v2  ;;  %v787_v4 = vrot.slane %v3983_v14, 1  ;;  %v795_v57 = vsel %vm753_vm0, %v793_v52, %v794_v53  ;;  %v5476_v2 = vld [vmem:[%s7234_s1 + $0xf0] sm:$0xff]   ;;  %v5967_v11 = vld [vmem:[%s5804_s14 + $0xb8] sm:$0xf] }
  0x36   : > { %5034 = vmatprep.subr.bf16.mxu0 %v5742_v7  ;;  %4762 = vmatprep.subr.bf16.mxu1 %v5451_v0  ;;  %v541_v0 = vshll.u32 %v5468_v59, 16  ;;  %v796_v14 = vrot.slane %v3986_v6, 1  ;;  %v6005_v52 = vld [vmem:[%s5804_s14 + $0x44] ss:$0 sps:$4 sm:$0x11]  }
  0x37   : > { %1050 = vmatprep.mubr.bf16.mxu0 %v520_v18  ;;  %v789_v23 = vsel %vm753_vm0, %v787_v4, %v788_v20  ;;  %v5973_v4 = vld [vmem:[%s5804_s14 + $0xbc] ss:$0 sps:$4 sm:$0x11]   ;;  %v3987_v20 = vcombine.low %v351_v17, %v5967_v11  ;;  %v5487_v6 = vld [vmem:[%s5804_s14 + $0x20] ss:$0 sps:$4 sm:$0x11]  }
  0x38   : > { %1051 = vmatmul.mubr.bf16.gmra.mrb[4].mxu0 %v3941_v54  ;;  %5067 = vmatmul.mubr.bf16.gmra.mrb[4].mxu1 %v789_v23  ;;  %v294_v54 = vld [vmem:[%s5804_s14 + $0x24] sm:$0xf]  ;;  %v543_v9 = vrot.slane %v541_v0, 1 }
  0x39   : > { %5035 = vmatpush3.bf16.msra.mxu0 %v5742_v7  ;;  %4763 = vmatpush3.bf16.msra.mxu1 %v5452_v5  ;;  %v5463_v7 = vld [vmem:[%s7234_s1 + $0x120] sm:$0xff]   ;;  %v3943_v58 = vcombine.low %v294_v54, %v295_v55  ;;  %v5960_v5 = vld [vmem:[%s5804_s14 + $0xb0] ss:$0 sps:$4 sm:$0x11]   ;;  %v1578_v54 = vrot.slane %v1576_v49, 1 }
  0x3a   : > { %4764 = vmatprep.subr.bf16.mxu1 %v5453_v15  ;;  %5036 = vmatprep.subr.bf16.mxu0 %v5756_v10  ;;  %v797_v15 = vrot.slane %v5960_v5, 1  ;;  %v4014_v55 = vld [vmem:[%s5804_s14 + $0x18] sm:$0xf] }
  0x3b   : > { %5070 = vmatprep.mubr.bf16.mxu1 %v792_v50  ;;  %1058 = vmatprep.mubr.bf16.mxu0 %v532_v51  ;;  %v534_v61 = vshrl.u32 %v3943_v58, 16  ;;  %v536_v63 = vshll.u32 %v3943_v58, 16  ;;  %v1581_v50 = vshll.u32 %v5482_v41, 16  ;;  %v1579_v1 = vor.u32 %v1578_v54, %v1574_v47 }
  0x3c   : > { %v798_v22 = vsel %vm753_vm0, %v796_v14, %v797_v15  ;;  %v6022_v15 = vld [vmem:[%s5804_s14 + $0x4c] sm:$0xf] }
  0x3d   : > { %5037 = vmatpush3.bf16.msra.mxu0 %v5756_v10  ;;  %4765 = vmatpush3.bf16.msra.mxu1 %v5454_v25  ;;  %v5466_v10 = vld [vmem:[%s7234_s1 + $0xe8] sm:$0xff]   ;;  %v538_v8 = vrot.slane %v536_v63, 1  ;;  %v800_v25 = vrot.slane %v5973_v4, 1  ;;  %v304_v63 = vld [vmem:[%s5804_s14 + $0x60] sm:$0xf] }
  0x3e   : > { %5038 = vmatprep.subr.bf16.mxu0 %v5769_v13  ;;  %4766 = vmatprep.subr.bf16.mxu1 %v5463_v7 }
  0x3f   : > { %v539_v18 = vor.u32 %v538_v8, %v534_v61  ;;  %v565_v61 = vshll.u32 %v6005_v52, 16  ;;  %v5492_v8 = vld [vmem:[%s7234_s1 + $0x148] sm:$0xff]  }
  0x40   : > { %1059 = vmatmul.mubr.bf16.gmra.mrb[8].mxu0 %v3942_v26  ;;  %5071 = vmatmul.mubr.bf16.gmra.mrb[8].mxu1 %v795_v57  ;;  %v296_v26 = vld [vmem:[%s5804_s14 + $0x30] sm:$0xf]  ;;  %v4015_v57 = vld [vmem:[%s5804_s14 + $0x1c] sm:$0xf] }
  0x41   : > { %5039 = vmatpush3.bf16.msra.mxu0 %v5769_v13  ;;  %4767 = vmatpush3.bf16.msra.mxu1 %v5464_v37  ;;  %v5475_v13 = vld [vmem:[%s7234_s1 + $0x130] sm:$0xff]   ;;  %v544_v23 = vsel %vm496_vm1, %v539_v18, %v543_v9  ;;  %v3944_v30 = vcombine.low %v296_v26, %v5985_v28  ;;  %v567_v14 = vrot.slane %v565_v61, 1  ;;  %v4017_v26 = vld [vmem:[%s5804_s14 + $0x28] sm:$0xf] }
  0x42   : > { %4768 = vmatprep.subr.bf16.mxu1 %v5465_v39  ;;  %5040 = vmatprep.subr.bf16.mxu0 %v5785_v16 }
  0x43   : > { %5074 = vmatprep.mubr.bf16.mxu1 %v798_v22  ;;  %1066 = vmatprep.mubr.bf16.mxu0 %v544_v23  ;;  %v546_v37 = vshrl.u32 %v3944_v30, 16  ;;  %v548_v39 = vshll.u32 %v3944_v30, 16  ;;  %v6028_v22 = vld [vmem:[%s5804_s14 + $0x50] ss:$0 sps:$4 sm:$0x11]  }
  0x45   : > { %5041 = vmatpush3.bf16.msra.mxu0 %v5785_v16  ;;  %4769 = vmatpush3.bf16.msra.mxu1 %v5466_v10  ;;  %v5477_v16 = vld [vmem:[%s7234_s1 + $0x138] sm:$0xff]   ;;  %v550_v45 = vrot.slane %v548_v39, 1  ;;  %v5999_v10 = vld [vmem:[%s5804_s14 + $0x40] sm:$0xf] }
  0x46   : > { %5042 = vmatprep.subr.bf16.mxu0 %v5799_v19  ;;  %4770 = vmatprep.subr.bf16.mxu1 %v5475_v13  ;;  %v6002_v51 = vcombine.low %v298_v44, %v5999_v10 }
  0x47   : > { %v551_v53 = vor.u32 %v550_v45, %v546_v37  ;;  %v6040_v37 = vcombine.low %v304_v63, %v5823_v27  ;;  %v302_v27 = vld [vmem:[%s5804_s14 + $0x54] sm:$0xf] }
  0x48   : > { %1067 = vmatmul.mubr.bf16.gmra.mrb[12].mxu0 %v3943_v58  ;;  %v1583_v58 = vrot.slane %v1581_v50, 1  ;;  %v558_v59 = vshrl.u32 %v6002_v51, 16  ;;  %v560_v13 = vshll.u32 %v6002_v51, 16  ;;  %v1605_v50 = vshll.u32 %v5491_v36, 16  ;;  %v4019_v63 = vld [vmem:[%s5804_s14 + $0x34] sm:$0xf] }
  0x49   : > { %5043 = vmatpush3.bf16.msra.mxu0 %v5799_v19  ;;  %4771 = vmatpush3.bf16.msra.mxu1 %v5476_v2  ;;  %v799_v19 = vrot.slane %v3987_v20, 1  ;;  %v6014_v2 = vcombine.low %v4014_v55, %v4015_v57 }
  0x4a   : > { %5044 = vmatprep.subr.bf16.mxu0 %v5819_v24  ;;  %4772 = vmatprep.subr.bf16.mxu1 %v5477_v16  ;;  %v300_v16 = vld [vmem:[%s5804_s14 + $0x48] sm:$0xf]  ;;  %v562_v9 = vrot.slane %v560_v13, 1  ;;  %v1584_v17 = vsel %vm496_vm1, %v1579_v1, %v1583_v58  ;;  %v6060_v58 = vld [vmem:[%s5804_s14 + $0x5c] ss:$0 sps:$4 sm:$0x11]  }
  0x4b   : > { %v801_v7 = vsel %vm753_vm0, %v799_v19, %v800_v25  ;;  %v1586_v18 = vshrl.u32 %v6014_v2, 16  ;;  %v1588_v20 = vshll.u32 %v6014_v2, 16  ;;  %v6031_v19 = vcombine.low %v300_v16, %v6022_v15  ;;  %v4016_v25 = vld [vmem:[%s5804_s14 + $0x24] sm:$0xf] }
  0x4c   : > { %5075 = vmatmul.mubr.bf16.gmra.mrb[12].mxu1 %v801_v7  ;;  %v563_v23 = vor.u32 %v562_v9, %v558_v59  ;;  %v6036_v34 = vcombine.low %v4016_v25, %v4017_v26  ;;  %v4018_v59 = vld [vmem:[%s5804_s14 + $0x30] sm:$0xf]  ;;  %v1607_v61 = vrot.slane %v1605_v50, 1  ;;  %v589_v9 = vshll.u32 %v6060_v58, 16 }
  0x4d   : > { %5045 = vmatpush3.bf16.msra.mxu0 %v5819_v24  ;;  %4773 = vmatpush3.bf16.msra.mxu1 %v5478_v21  ;;  %v553_v24 = vshll.u32 %v5480_v31, 16  ;;  %v1593_v21 = vshll.u32 %v5487_v6, 16  ;;  %v1590_v7 = vrot.slane %v1588_v20, 1  ;;  %v572_v41 = vshll.u32 %v6031_v19, 16 }
  0x4e   : > { %5078 = vmatprep.subr.bf16.mxu1 %v5483_v32  ;;  %2118 = vmatprep.mubr.bf16.mxu1 %v1584_v17  ;;  %v568_v39 = vsel %vm496_vm1, %v563_v23, %v567_v14  ;;  %v1600_v47 = vshll.u32 %v6036_v34, 16  ;;  %v5496_v14 = vld [vmem:[%s5804_s14 + $0x38] ss:$0 sps:$4 sm:$0x11]   ;;  %v6075_v20 = vcombine.low %v4018_v59, %v4019_v63  ;;  %v4021_v23 = vld [vmem:[%s5804_s14 + $0x40] sm:$0xf] }
  0x4f   : > { %v555_v46 = vrot.slane %v553_v24, 1  ;;  %v1595_v31 = vrot.slane %v1593_v21, 1  ;;  %v570_v24 = vshrl.u32 %v6031_v19, 16  ;;  %v1591_v44 = vor.u32 %v1590_v7, %v1586_v18  ;;  %v308_v18 = vld [vmem:[%s5804_s14 + $0x78] sm:$0xf] }
  0x50   : > { %v574_v49 = vrot.slane %v572_v41, 1  ;;  %v1602_v55 = vrot.slane %v1600_v47, 1  ;;  %v4020_v21 = vld [vmem:[%s5804_s14 + $0x3c] sm:$0xf]  ;;  %v591_v7 = vrot.slane %v589_v9, 1  ;;  %v1612_v36 = vshll.u32 %v6075_v20, 16 }
  0x51   : > { %v556_v0 = vsel %vm496_vm1, %v551_v53, %v555_v46  ;;  %v1598_v46 = vshrl.u32 %v6036_v34, 16  ;;  %v6053_v53 = vld [vmem:[%s5804_s14 + $0x58] sm:$0xf]  ;;  %v1596_v54 = vsel %vm496_vm1, %v1591_v44, %v1595_v31  ;;  %v1617_v31 = vshll.u32 %v5496_v14, 16  ;;  %v310_v59 = vld [vmem:[%s5804_s14 + $0x84] sm:$0xf] }
  0x52   : > { %1074 = vmatprep.mubr.bf16.mxu0 %v556_v0  ;;  %v6057_v57 = vcombine.low %v302_v27, %v6053_v53  ;;  %v575_v13 = vor.u32 %v574_v49, %v570_v24  ;;  %v596_v0 = vshll.u32 %v6040_v37, 16  ;;  %v5498_v24 = vld [vmem:[%s5804_s14 + $0x44] ss:$0 sps:$4 sm:$0x11]   ;;  %v6089_v44 = vcombine.low %v4020_v21, %v4021_v23  ;;  %v4022_v27 = vld [vmem:[%s5804_s14 + $0x48] sm:$0xf] }
  0x53   : > { %1075 = vmatmul.mubr.bf16.gmra.mrb[16].mxu0 %v3944_v30  ;;  %v577_v30 = vshll.u32 %v6028_v22, 16  ;;  %v1603_v1 = vor.u32 %v1602_v55, %v1598_v46  ;;  %v1619_v41 = vrot.slane %v1617_v31, 1  ;;  %v5509_v49 = vld [vmem:[%s7234_s1 + $0x160] sm:$0xff]   ;;  %v6104_v55 = vld [vmem:[%s5804_s14 + $0x4c] sm:$0xf] }
  0x54   : > { %2119 = vmatmul.mubr.bf16.vlgmr.msra.gmra.mrb[16].mxu1 %v4076_v40  ;;  %v306_v40 = vld [vmem:[%s5804_s14 + $0x6c] sm:$0xf]  ;;  %1082 = vmatprep.mubr.bf16.mxu0 %v568_v39  ;;  %v582_v6 = vshrl.u32 %v6057_v57, 16  ;;  %v584_v16 = vshll.u32 %v6057_v57, 16  ;;  %v598_v39 = vrot.slane %v596_v0, 1  ;;  %v6108_v63 = vcombine.low %v4022_v27, %v6104_v55 }
  0x55   : > { %5079 = vmatpush3.bf16.msra.mxu1 %v5483_v32  ;;  %v579_v45 = vrot.slane %v577_v30, 1  ;;  %v5499_v32 = vld [vmem:[%s7234_s1 + $0x150] sm:$0xff]   ;;  %2126 = vmatprep.mubr.bf16.mxu1 %v1596_v54  ;;  %v6071_v17 = vcombine.low %v306_v40, %v5839_v38  ;;  %v1608_v25 = vsel %vm496_vm1, %v1603_v1, %v1607_v61  ;;  %v5504_v38 = vld [vmem:[%s7234_s1 + $0x158] sm:$0xff]   ;;  %v1610_v30 = vshrl.u32 %v6075_v20, 16 }
  0x56   : > { %5080 = vmatprep.subr.bf16.mxu1 %v5492_v8  ;;  %v586_v26 = vrot.slane %v584_v16, 1  ;;  %v601_v40 = vshll.u32 %v5831_v33, 16  ;;  %v1624_v33 = vshll.u32 %v6089_v44, 16  ;;  %v613_v54 = vshll.u32 %v5844_v43, 16  ;;  %v5514_v43 = vld [vmem:[%s7234_s1 + $0x168] sm:$0xff]  }
  0x57   : > { %v606_v46 = vshrl.u32 %v6071_v17, 16  ;;  %v608_v47 = vshll.u32 %v6071_v17, 16  ;;  %v1629_v1 = vshll.u32 %v5498_v24, 16  ;;  %v312_v16 = vld [vmem:[%s5804_s14 + $0x90] sm:$0xf]  ;;  %v1636_v31 = vshll.u32 %v6108_v63, 16 }
  0x58   : > { %v1626_v0 = vrot.slane %v1624_v33, 1  ;;  %v6122_v21 = vld [vmem:[%s5804_s14 + $0x50] ss:$0 sps:$4 sm:$0x11]  }
  0x59   : > { %5081 = vmatpush3.bf16.msra.mxu1 %v5492_v8  ;;  %v580_v8 = vsel %vm496_vm1, %v575_v13, %v579_v45  ;;  %v1614_v45 = vrot.slane %v1612_v36, 1  ;;  %v610_v61 = vrot.slane %v608_v47, 1  ;;  %v6133_v36 = vld [vmem:[%s5804_s14 + $0x58] sm:$0xf]  ;;  %v1634_v47 = vshrl.u32 %v6108_v63, 16 }
  0x5a   : > { %5082 = vmatprep.subr.bf16.mxu1 %v5499_v32  ;;  %v1638_v27 = vrot.slane %v1636_v31, 1  ;;  %v661_v31 = vshll.u32 %v5932_v48, 16 }
  0x5b   : > { %1083 = vmatmul.mubr.bf16.gmra.mrb[20].mxu0 %v6002_v51  ;;  %v594_v51 = vshrl.u32 %v6040_v37, 16  ;;  %v1615_v13 = vor.u32 %v1614_v45, %v1610_v30  ;;  %v637_v45 = vshll.u32 %v5888_v12, 16 }
  0x5c   : > { %2127 = vmatmul.mubr.bf16.gmra.mrb[20].mxu1 %v6014_v2  ;;  %1090 = vmatprep.mubr.bf16.mxu0 %v580_v8  ;;  %v587_v2 = vor.u32 %v586_v26, %v582_v6  ;;  %v615_v6 = vrot.slane %v613_v54, 1  ;;  %v611_v8 = vor.u32 %v610_v61, %v606_v46  ;;  %v625_v26 = vshll.u32 %v5872_v62, 16  ;;  %v5521_v62 = vld [vmem:[%s7234_s1 + $0x1c0] sm:$0xff]   ;;  %v314_v46 = vld [vmem:[%s5804_s14 + $0x9c] sm:$0xf] }
  0x5d   : > { %2134 = vmatprep.mubr.bf16.mxu1 %v1608_v25  ;;  %5083 = vmatpush3.bf16.msra.mxu1 %v5499_v32  ;;  %v6098_v32 = vcombine.low %v308_v18, %v5864_v56  ;;  %v1622_v56 = vshrl.u32 %v6089_v44, 16  ;;  %v1620_v9 = vsel %vm496_vm1, %v1615_v13, %v1619_v41  ;;  %v599_v14 = vor.u32 %v598_v39, %v594_v51  ;;  %v316_v13 = vld [vmem:[%s5804_s14 + $0xa8] sm:$0xf] }
  0x5e   : > { %5084 = vmatprep.subr.bf16.mxu1 %v5504_v38  ;;  %v592_v50 = vsel %vm496_vm1, %v587_v2, %v591_v7  ;;  %v603_v18 = vrot.slane %v601_v40, 1  ;;  %v4024_v7 = vld [vmem:[%s5804_s14 + $0x54] sm:$0xf]  ;;  %v6129_v51 = vsel %vm496_vm1, %v611_v8, %v615_v6  ;;  %v627_v30 = vrot.slane %v625_v26, 1  ;;  %4894 = vmatprep.subr.bf16.mxu0 %v5521_v62  ;;  %v6176_v8 = vld [vmem:[%s5804_s14 + $0x64] sm:$0xf] }
  0x5f   : > { %v618_v23 = vshrl.u32 %v6098_v32, 16  ;;  %v620_v25 = vshll.u32 %v6098_v32, 16  ;;  %v6139_v39 = vcombine.low %v312_v16, %v5907_v29  ;;  %v6149_v29 = vcombine.low %v4024_v7, %v6133_v36 }
  0x60   : > { %v604_v24 = vsel %vm496_vm1, %v599_v14, %v603_v18  ;;  %v639_v54 = vrot.slane %v637_v45, 1  ;;  %v649_v6 = vshll.u32 %v5915_v35, 16  ;;  %v318_v35 = vld [vmem:[%s5804_s14 + $0xb4] sm:$0xf]  ;;  %v673_v45 = vshll.u32 %v5960_v5, 16 }
  0x61   : > { %5085 = vmatpush3.bf16.msra.mxu1 %v5504_v38  ;;  %v1631_v38 = vrot.slane %v1629_v1, 1  ;;  %v642_v61 = vshrl.u32 %v6139_v39, 16  ;;  %v1648_v14 = vshll.u32 %v6149_v29, 16  ;;  %v6196_v48 = vcombine.low %v318_v35, %v5967_v11 }
  0x62   : > { %5086 = vmatprep.subr.bf16.mxu1 %v5509_v49 }
  0x63   : > { %1091 = vmatmul.mubr.bf16.gmra.mrb[24].mxu0 %v6031_v19  ;;  %v6118_v19 = vcombine.low %v310_v59, %v5879_v3  ;;  %v1627_v3 = vor.u32 %v1626_v0, %v1622_v56  ;;  %v5523_v59 = vld [vmem:[%s7234_s1 + $0x170] sm:$0xff]   ;;  %v644_v56 = vshll.u32 %v6139_v39, 16  ;;  %v6167_v0 = vld [vmem:[%s5804_s14 + $0x5c] ss:$0 sps:$4 sm:$0x11]   ;;  %v1650_v62 = vrot.slane %v1648_v14, 1 }
  0x64   : > { %1098 = vmatprep.mubr.bf16.mxu0 %v592_v50  ;;  %2135 = vmatmul.mubr.bf16.gmra.mrb[24].mxu1 %v6036_v34  ;;  %v622_v34 = vrot.slane %v620_v25, 1  ;;  %v678_v5 = vshrl.u32 %v6196_v48, 16 }
  0x65   : > { %2142 = vmatprep.mubr.bf16.mxu1 %v1620_v9  ;;  %5087 = vmatpush3.bf16.msra.mxu1 %v5509_v49  ;;  %v630_v41 = vshrl.u32 %v6118_v19, 16  ;;  %v632_v40 = vshll.u32 %v6118_v19, 16  ;;  %v1641_v49 = vshll.u32 %v6122_v21, 16  ;;  %v1632_v50 = vsel %vm496_vm1, %v1627_v3, %v1631_v38 }
  0x66   : > { %5088 = vmatprep.subr.bf16.mxu1 %v5514_v43  ;;  %v623_v2 = vor.u32 %v622_v34, %v618_v23  ;;  %v646_v16 = vrot.slane %v644_v56, 1  ;;  %v1639_v9 = vor.u32 %v1638_v27, %v1634_v47  ;;  %v6179_v23 = vcombine.low %v316_v13, %v5951_v60 }
  0x67   : > { %v634_v12 = vrot.slane %v632_v40, 1  ;;  %v1646_v3 = vshrl.u32 %v6149_v29, 16  ;;  %v1653_v38 = vshll.u32 %v6167_v0, 16  ;;  %v675_v27 = vrot.slane %v673_v45, 1 }
  0x68   : > { %v6154_v33 = vsel %vm496_vm1, %v623_v2, %v627_v30  ;;  %v647_v25 = vor.u32 %v646_v16, %v642_v61  ;;  %v663_v2 = vrot.slane %v661_v31, 1  ;;  %v668_v40 = vshll.u32 %v6179_v23, 16 }
  0x69   : > { %5089 = vmatpush3.bf16.msra.mxu1 %v5514_v43  ;;  %v635_v1 = vor.u32 %v634_v12, %v630_v41  ;;  %v1643_v43 = vrot.slane %v1641_v49, 1  ;;  %v666_v41 = vshrl.u32 %v6179_v23, 16  ;;  %v1651_v49 = vor.u32 %v1650_v62, %v1646_v3  ;;  %v4028_v12 = vld [vmem:[%s5804_s14 + $0x6c] sm:$0xf] }
  0x6a   : > { %5090 = vmatprep.subr.bf16.mxu1 %v5523_v59  ;;  %v670_v47 = vrot.slane %v668_v40, 1  ;;  %v685_v13 = vshll.u32 %v5973_v4, 16  ;;  %v6252_v62 = vld [vmem:[%s5804_s14 + $0x80] ss:$0 sps:$4 sm:$0x11]  }
  0x6b   : > { %1099 = vmatmul.mubr.bf16.gmra.mrb[28].mxu0 %v6057_v57  ;;  %v6163_v57 = vcombine.low %v314_v46, %v5926_v42  ;;  %v6172_v18 = vsel %vm496_vm1, %v635_v1, %v639_v54  ;;  %v4026_v42 = vld [vmem:[%s5804_s14 + $0x60] sm:$0xf]  ;;  %v1644_v60 = vsel %vm496_vm1, %v1639_v9, %v1643_v43 }
  0x6c   : > { %1106 = vmatprep.mubr.bf16.mxu0 %v604_v24  ;;  %2143 = vmatmul.mubr.bf16.gmra.mrb[28].mxu1 %v6075_v20  ;;  %v651_v20 = vrot.slane %v649_v6, 1  ;;  %v6188_v34 = vcombine.low %v4026_v42, %v6176_v8  ;;  %v687_v43 = vrot.slane %v685_v13, 1  ;;  %v6230_v42 = vld [vmem:[%s5804_s14 + $0x74] ss:$0 sps:$4 sm:$0x11]  }
  0x6d   : > { %2150 = vmatprep.mubr.bf16.mxu1 %v1632_v50  ;;  %5091 = vmatpush3.bf16.msra.mxu1 %v5523_v59  ;;  %v654_v26 = vshrl.u32 %v6163_v57, 16  ;;  %v656_v7 = vshll.u32 %v6163_v57, 16  ;;  %v1655_v50 = vrot.slane %v1653_v38, 1  ;;  %v671_v59 = vor.u32 %v670_v47, %v666_v41  ;;  %v4032_v41 = vld [vmem:[%s5804_s14 + $0x84] sm:$0xf] }
  0x6e   : > { %v6191_v30 = vsel %vm496_vm1, %v647_v25, %v651_v20  ;;  %v1660_v11 = vshll.u32 %v6188_v34, 16  ;;  %v1658_v9 = vshrl.u32 %v6188_v34, 16  ;;  %v5540_v20 = vld [vmem:[%s7234_s1 + $0x178] sm:$0xff]   ;;  %v1677_v3 = vshll.u32 %v6230_v42, 16 }
  0x6f   : > { %v658_v24 = vrot.slane %v656_v7, 1  ;;  %v6222_v1 = vsel %vm496_vm1, %v671_v59, %v675_v27  ;;  %v1656_v16 = vsel %vm496_vm1, %v1651_v49, %v1655_v50  ;;  %v4030_v7 = vld [vmem:[%s5804_s14 + $0x78] sm:$0xf]  ;;  %5092 = vmatprep.subr.bf16.mxu1 %v5540_v20  ;;  %v341_v47 = vld [vmem:[%s5804_s14 + $0x3c] sm:$0xe]  ;;  %v770_v50 = vrot.slane %v6005_v52, 1 }
  0x70   : > { %v1662_v14 = vrot.slane %v1660_v11, 1  ;;  %v3977_v49 = vcombine.low %v341_v47, %v5999_v10  ;;  %v6273_v11 = vld [vmem:[%s5804_s14 + $0x8c] ss:$0 sps:$4 sm:$0x11]   ;;  %v4034_v59 = vld [vmem:[%s5804_s14 + $0x90] sm:$0xf] }
  0x71   : > { %v659_v46 = vor.u32 %v658_v24, %v654_v26  ;;  %5093 = vmatpush3.bf16.msra.mxu1 %v5540_v20  ;;  %v6281_v10 = vld [vmem:[%s5804_s14 + $0x94] sm:$0xf]  ;;  %v6334_v47 = vld [vmem:[%s5804_s14 + $0xa4] ss:$0 sps:$4 sm:$0x11]  }
  0x72   : > { %v1663_v26 = vor.u32 %v1662_v14, %v1658_v9  ;;  %v776_v9 = vrot.slane %v6060_v58, 1 }
  0x73   : > { %1107 = vmatmul.mubr.bf16.gmra.mrb[32].mxu0 %v6040_v37  ;;  %v6204_v37 = vld [vmem:[%s5804_s14 + $0x68] ss:$0 sps:$4 sm:$0x11]   ;;  %v6212_v54 = vsel %vm496_vm1, %v659_v46, %v663_v2  ;;  %v1679_v2 = vrot.slane %v1677_v3, 1 }
  0x74   : > { %1114 = vmatprep.mubr.bf16.mxu0 %v6129_v51  ;;  %2151 = vmatmul.mubr.bf16.gmra.mrb[32].mxu1 %v6089_v44  ;;  %v6209_v51 = vld [vmem:[%s5804_s14 + $0x70] sm:$0xf]  ;;  %v680_v44 = vshll.u32 %v6196_v48, 16  ;;  %v1665_v61 = vshll.u32 %v6204_v37, 16 }
  0x75   : > { %2158 = vmatprep.mubr.bf16.mxu1 %v1644_v60  ;;  %v6219_v56 = vcombine.low %v4028_v12, %v6209_v51  ;;  %v769_v12 = vrot.slane %v3977_v49, 1 }
  0x76   : > { %v682_v6 = vrot.slane %v680_v44, 1 }
  0x77   : > { %v1672_v25 = vshll.u32 %v6219_v56, 16  ;;  %v6278_v13 = vsel %vm753_vm0, %v769_v12, %v770_v50  ;;  %v337_v12 = vld [vmem:[%s5804_s14 + $0xc] sm:$0xe] }
  0x78   : > { %v683_v4 = vor.u32 %v682_v6, %v678_v5 }
  0x79   : > { %v1674_v31 = vrot.slane %v1672_v25, 1  ;;  %v6305_v25 = vld [vmem:[%s5804_s14 + $0x98] ss:$0 sps:$4 sm:$0x11]  }
  0x7a   : > { %v6237_v35 = vsel %vm496_vm1, %v683_v4, %v687_v43  ;;  %v1701_v43 = vshll.u32 %v6273_v11, 16 }
  0x7b   : > { %1115 = vmatmul.mubr.bf16.gmra.mrb[36].mxu0 %v6071_v17  ;;  %v1667_v17 = vrot.slane %v1665_v61, 1  ;;  %v342_v61 = vld [vmem:[%s5804_s14 + $0x48] sm:$0xe] }
  0x7c   : > { %1122 = vmatprep.mubr.bf16.mxu0 %v6154_v33  ;;  %2159 = vmatmul.mubr.bf16.gmra.mrb[36].mxu1 %v6108_v63  ;;  %v6241_v33 = vld [vmem:[%s5804_s14 + $0x7c] sm:$0xf]  ;;  %v1670_v63 = vshrl.u32 %v6219_v56, 16  ;;  %v3978_v52 = vcombine.low %v342_v61, %v6022_v15  ;;  %v6294_v15 = vcombine.low %v4034_v59, %v6281_v10  ;;  %v1725_v61 = vshll.u32 %v6334_v47, 16 }
  0x7d   : > { %2166 = vmatprep.mubr.bf16.mxu1 %v1656_v16  ;;  %v1668_v38 = vsel %vm496_vm1, %v1663_v26, %v1667_v17  ;;  %v6248_v60 = vcombine.low %v4030_v7, %v6241_v33  ;;  %v1703_v17 = vrot.slane %v1701_v43, 1  ;;  %v6310_v7 = vld [vmem:[%s5804_s14 + $0xa0] sm:$0xf]  ;;  %v4066_v43 = vld [vmem:[%s5804_s14 + $0x54] sm:$0xe] }
  0x7e   : > { %v1675_v24 = vor.u32 %v1674_v31, %v1670_v63  ;;  %v1708_v26 = vshll.u32 %v6294_v15, 16  ;;  %v1706_v63 = vshrl.u32 %v6294_v15, 16 }
  0x7f   : > { %v1684_v40 = vshll.u32 %v6248_v60, 16  ;;  %v1682_v46 = vshrl.u32 %v6248_v60, 16 }
  0x80   : > { %v1680_v45 = vsel %vm496_vm1, %v1675_v24, %v1679_v2  ;;  %v1710_v3 = vrot.slane %v1708_v26, 1  ;;  %v336_v24 = vld [vmem:[%s5804_s14] sm:$0xe]  ;;  %v5626_v26 = vld [vmem:[%s5804_s14 + $0x1c] sm:$0xf] }
  0x83   : > { %1123 = vmatmul.mubr.bf16.gmra.mrb[40].mxu0 %v6098_v32  ;;  %v6258_v32 = vld [vmem:[%s5804_s14 + $0x88] sm:$0xf] }
  0x84   : > { %1130 = vmatprep.mubr.bf16.mxu0 %v6172_v18  ;;  %2167 = vmatmul.mubr.bf16.gmra.mrb[40].mxu1 %v6149_v29  ;;  %v1689_v18 = vshll.u32 %v6252_v62, 16  ;;  %v1686_v29 = vrot.slane %v1684_v40, 1  ;;  %v6266_v27 = vcombine.low %v4032_v41, %v6258_v32  ;;  %v4038_v41 = vld [vmem:[%s5804_s14 + $0xa8] sm:$0xf] }
  0x85   : > { %2174 = vmatprep.mubr.bf16.mxu1 %v1668_v38  ;;  %v1713_v38 = vshll.u32 %v6305_v25, 16 }
  0x86   : > { %v1691_v5 = vrot.slane %v1689_v18, 1  ;;  %v1696_v44 = vshll.u32 %v6266_v27, 16  ;;  %v1694_v6 = vshrl.u32 %v6266_v27, 16 }
  0x87   : > { %v1715_v18 = vrot.slane %v1713_v38, 1 }
  0x88   : > { %v1698_v4 = vrot.slane %v1696_v44, 1 }
  0x8b   : > { %1131 = vmatmul.mubr.bf16.gmra.mrb[44].mxu0 %v6118_v19  ;;  %v1687_v19 = vor.u32 %v1686_v29, %v1682_v46  ;;  %v1711_v46 = vor.u32 %v1710_v3, %v1706_v63  ;;  %v1851_v63 = vrot.slane %v6204_v37, 1 }
  0x8c   : > { %1138 = vmatprep.mubr.bf16.mxu0 %v6191_v30  ;;  %2175 = vmatmul.mubr.bf16.gmra.mrb[44].mxu1 %v6188_v34  ;;  %v773_v30 = vrot.slane %v6028_v22, 1  ;;  %v343_v34 = vld [vmem:[%s5804_s14 + $0x54] sm:$0xe]  ;;  %v772_v22 = vrot.slane %v3978_v52, 1 }
  0x8d   : > { %2182 = vmatprep.mubr.bf16.mxu1 %v1680_v45  ;;  %v3979_v16 = vcombine.low %v343_v34, %v6053_v53  ;;  %v1692_v14 = vsel %vm496_vm1, %v1687_v19, %v1691_v5  ;;  %v6331_v45 = vld [vmem:[%s5804_s14 + $0xac] sm:$0xf]  ;;  %v1845_v19 = vrot.slane %v6122_v21, 1  ;;  %v1716_v5 = vsel %vm496_vm1, %v1711_v46, %v1715_v18  ;;  %v5624_v52 = vld [vmem:[%s5804_s14 + $0x8] ss:$0 sps:$4 sm:$0x11]  }
  0x8e   : > { %v6299_v53 = vsel %vm753_vm0, %v772_v22, %v773_v30  ;;  %v6338_v49 = vcombine.low %v4038_v41, %v6331_v45  ;;  %v755_v30 = vrot.slane %v5624_v52, 1  ;;  %v338_v34 = vld [vmem:[%s5804_s14 + $0x18] sm:$0xe]  ;;  %v5625_v22 = vld [vmem:[%s5804_s14 + $0x10] sm:$0xf] }
  0x8f   : > { %v775_v20 = vrot.slane %v3979_v16, 1  ;;  %v1848_v16 = vrot.slane %v6167_v0, 1  ;;  %v4068_v41 = vld [vmem:[%s5804_s14 + $0x6c] sm:$0xe]  ;;  %v340_v52 = vld [vmem:[%s5804_s14 + $0x30] sm:$0xe] }
  0x90   : > { %v1732_v21 = vshll.u32 %v6338_v49, 16  ;;  %v4116_v18 = vcombine.low %v4068_v41, %v6209_v51  ;;  %v5525_v41 = vld [vmem:[%s7234_s1 + $0x188] sm:$0xff]  }
  0x91   : > { %v6302_v58 = vsel %vm753_vm0, %v775_v20, %v776_v9 }
  0x92   : > { %v1734_v3 = vrot.slane %v1732_v21, 1  ;;  %v5522_v21 = vld [vmem:[%s7234_s1 + $0x180] sm:$0xff]  }
  0x93   : > { %1139 = vmatmul.mubr.bf16.gmra.mrb[48].mxu0 %v6139_v39  ;;  %v1699_v39 = vor.u32 %v1698_v4, %v1694_v6  ;;  %v1727_v4 = vrot.slane %v1725_v61, 1 }
  0x94   : > { %1146 = vmatprep.mubr.bf16.mxu0 %v6212_v54  ;;  %2183 = vmatmul.mubr.bf16.gmra.mrb[48].mxu1 %v6219_v56  ;;  %v4036_v54 = vld [vmem:[%s5804_s14 + $0x9c] sm:$0xf]  ;;  %v6315_v56 = vld [vmem:[%s7234_s1 + $0x200] sm:$0xff]  }
  0x95   : > { %2190 = vmatprep.mubr.bf16.mxu1 %v1692_v14  ;;  %v1704_v31 = vsel %vm496_vm1, %v1699_v39, %v1703_v17  ;;  %v6323_v2 = vcombine.low %v4036_v54, %v6310_v7  ;;  %5126 = vmatprep.subr.bf16.mxu1 %v6315_v56  ;;  %v4067_v39 = vld [vmem:[%s5804_s14 + $0x60] sm:$0xe]  ;;  %v3974_v54 = vcombine.low %v338_v34, %v5626_v26  ;;  %v6398_v34 = vld [vmem:[%s5804_s14 + $0xbc] ss:$0 sps:$4 sm:$0x11]  }
  0x96   : > { %v4115_v0 = vcombine.low %v4067_v39, %v6176_v8  ;;  %v1854_v8 = vrot.slane %v6230_v42, 1  ;;  %v1853_v42 = vrot.slane %v4116_v18, 1  ;;  %v5524_v39 = vld [vmem:[%s7234_s1 + $0x1c8] sm:$0xff]   ;;  %v1866_v18 = vrot.slane %v6334_v47, 1  ;;  %v4197_v47 = vld [vmem:[%s5804_s14 + $0x1c] sm:$0xf] }
  0x97   : > { %v1720_v29 = vshll.u32 %v6323_v2, 16  ;;  %v1718_v50 = vshrl.u32 %v6323_v2, 16 }
  0x98   : > { %v1850_v46 = vrot.slane %v4115_v0, 1 }
  0x99   : > { %v1722_v44 = vrot.slane %v1720_v29, 1 }
  0x9a   : > { %v6390_v51 = vsel %vm753_vm0, %v1850_v46, %v1851_v63  ;;  %v3976_v63 = vcombine.low %v340_v52, %v5985_v28  ;;  %v5530_v28 = vld [vmem:[%s7234_s1 + $0x1d0] sm:$0xff]  }
  0x9b   : > { %1147 = vmatmul.mubr.bf16.gmra.mrb[52].mxu0 %v6163_v57  ;;  %v5623_v57 = vld [vmem:[%s5804_s14 + $0x4] sm:$0xf]  ;;  %v1723_v14 = vor.u32 %v1722_v44, %v1718_v50 }
  0x9c   : > { %1154 = vmatprep.mubr.bf16.mxu0 %v6222_v1  ;;  %2191 = vmatmul.mubr.bf16.gmra.mrb[52].mxu1 %v6248_v60  ;;  %v3972_v40 = vcombine.low %v336_v24, %v5623_v57  ;;  %v4065_v1 = vld [vmem:[%s5804_s14 + $0x48] sm:$0xe]  ;;  %v5627_v57 = vld [vmem:[%s5804_s14 + $0x14] ss:$0 sps:$4 sm:$0x11]  }
  0x9d   : > { %2198 = vmatprep.mubr.bf16.mxu1 %v1704_v31  ;;  %v4113_v59 = vcombine.low %v4065_v1, %v6104_v55  ;;  %v6354_v55 = vld [vmem:[%s5804_s14 + $0xb0] ss:$0 sps:$4 sm:$0x11]   ;;  %v1730_v31 = vshrl.u32 %v6338_v49, 16  ;;  %v1728_v37 = vsel %vm496_vm1, %v1723_v14, %v1727_v4  ;;  %v339_v50 = vld [vmem:[%s5804_s14 + $0x24] sm:$0xe] }
  0x9e   : > { %v754_v60 = vrot.slane %v3972_v40, 1  ;;  %v1737_v38 = vshll.u32 %v6354_v55, 16  ;;  %v758_v40 = vrot.slane %v5627_v57, 1  ;;  %v5628_v1 = vld [vmem:[%s5804_s14 + $0x20] ss:$0 sps:$4 sm:$0x11]  }
  0x9f   : > { %v1844_v6 = vrot.slane %v4113_v59, 1  ;;  %v4069_v59 = vld [vmem:[%s5804_s14 + $0x78] sm:$0xe]  ;;  %v1735_v44 = vor.u32 %v1734_v3, %v1730_v31  ;;  %v4071_v14 = vld [vmem:[%s5804_s14 + $0x90] sm:$0xe]  ;;  %v1749_v3 = vshll.u32 %v6398_v34, 16 }
  0xa0   : > { %v756_v17 = vsel %vm753_vm0, %v754_v60, %v755_v30  ;;  %v761_v60 = vrot.slane %v5628_v1, 1  ;;  %v1739_v61 = vrot.slane %v1737_v38, 1  ;;  %v4070_v30 = vld [vmem:[%s5804_s14 + $0x84] sm:$0xe]  ;;  %v4042_v4 = vld [vmem:[%s5804_s14 + $0xc0] sm:$0xf] }
  0xa1   : > { %v6361_v9 = vsel %vm753_vm0, %v1844_v6, %v1845_v19  ;;  %v1857_v19 = vrot.slane %v6252_v62, 1  ;;  %v6401_v6 = vsel %vm753_vm0, %v1853_v42, %v1854_v8  ;;  %v1860_v62 = vrot.slane %v6273_v11, 1  ;;  %v4072_v38 = vld [vmem:[%s5804_s14 + $0x9c] sm:$0xe]  ;;  %v4196_v1 = vld [vmem:[%s5804_s14 + $0x18] sm:$0xf] }
  0xa2   : > { %v1740_v26 = vsel %vm496_vm1, %v1735_v44, %v1739_v61  ;;  %v4120_v46 = vcombine.low %v4072_v38, %v6310_v7  ;;  %v4073_v7 = vld [vmem:[%s5804_s14 + $0xa8] sm:$0xe]  ;;  %v1751_v42 = vrot.slane %v1749_v3, 1  ;;  %v5545_v44 = vld [vmem:[%s5804_s14 + $0xc8] ss:$0 sps:$4 sm:$0x11]  }
  0xa3   : > { %1155 = vmatmul.mubr.bf16.gmra.mrb[56].mxu0 %v6179_v23  ;;  %v4114_v23 = vcombine.low %v4066_v43, %v6133_v36  ;;  %v6368_v36 = vld [vmem:[%s5804_s14 + $0xb8] sm:$0xf]  ;;  %v4118_v43 = vcombine.low %v4070_v30, %v6258_v32  ;;  %v4245_v38 = vld [vmem:[%s5804_s14 + $0x24] sm:$0xe] }
  0xa4   : > { %1162 = vmatprep.mubr.bf16.mxu0 %v6237_v35  ;;  %2199 = vmatmul.mubr.bf16.gmra.mrb[56].mxu1 %v6266_v27  ;;  %v4040_v35 = vld [vmem:[%s5804_s14 + $0xb4] sm:$0xf]  ;;  %v3973_v27 = vcombine.low %v337_v12, %v5625_v22  ;;  %v6414_v22 = vld [vmem:[%s5804_s14 + $0xc4] sm:$0xf] }
  0xa5   : > { %2206 = vmatprep.mubr.bf16.mxu1 %v1716_v5  ;;  %v1847_v20 = vrot.slane %v4114_v23, 1  ;;  %v6386_v12 = vcombine.low %v4040_v35, %v6368_v36  ;;  %v760_v5 = vrot.slane %v3974_v54, 1  ;;  %v5629_v23 = vld [vmem:[%s5804_s14 + $0x28] sm:$0xf]  ;;  %v1859_v11 = vrot.slane %v4118_v43, 1 }
  0xa6   : > { %v757_v29 = vrot.slane %v3973_v27, 1  ;;  %v4119_v27 = vcombine.low %v4071_v14, %v6281_v10  ;;  %v5630_v54 = vld [vmem:[%s5804_s14 + $0x2c] ss:$0 sps:$4 sm:$0x11]  }
  0xa7   : > { %v6375_v24 = vsel %vm753_vm0, %v1847_v20, %v1848_v16  ;;  %v3975_v16 = vcombine.low %v339_v50, %v5629_v23  ;;  %v1744_v35 = vshll.u32 %v6386_v12, 16  ;;  %v1863_v20 = vrot.slane %v6305_v25, 1  ;;  %v4075_v23 = vld [vmem:[%s5804_s14 + $0xc0] sm:$0xe] }
  0xa8   : > { %v764_v0 = vrot.slane %v5630_v54, 1  ;;  %v1742_v31 = vshrl.u32 %v6386_v12, 16  ;;  %v6431_v10 = vsel %vm753_vm0, %v1859_v11, %v1860_v62  ;;  %v1862_v25 = vrot.slane %v4119_v27, 1  ;;  %v5532_v62 = vld [vmem:[%s7234_s1 + $0x1d8] sm:$0xff]   ;;  %v5538_v11 = vld [vmem:[%s7234_s1 + $0x1e0] sm:$0xff]  }
  0xa9   : > { %v1746_v57 = vrot.slane %v1744_v35, 1  ;;  %v763_v8 = vrot.slane %v3975_v16, 1  ;;  %v766_v50 = vrot.slane %v3976_v63, 1  ;;  %v4123_v14 = vcombine.low %v4075_v23, %v6414_v22  ;;  %v6494_v63 = vld [vmem:[%s5804_s14 + $0x2c] ss:$0 sps:$4 sm:$0x11]  }
  0xaa   : > { %v4061_v23 = vld [vmem:[%s5804_s14 + $0x18] sm:$0xe] }
  0xab   : > { %1163 = vmatmul.mubr.bf16.gmra.mrb[60].mxu0 %v6196_v48  ;;  %v4117_v48 = vcombine.low %v4069_v59, %v6241_v33  ;;  %v1865_v59 = vrot.slane %v4120_v46, 1  ;;  %v765_v30 = vsel %vm753_vm0, %v763_v8, %v764_v0  ;;  %v4198_v0 = vld [vmem:[%s5804_s14 + $0x24] sm:$0xf] }
  0xac   : > { %5046 = vmatprep.mubr.bf16.mxu0 %v756_v17  ;;  %2207 = vmatmul.mubr.bf16.gmra.mrb[60].mxu1 %v6294_v15  ;;  %v759_v15 = vsel %vm753_vm0, %v757_v29, %v758_v40  ;;  %v762_v17 = vsel %vm753_vm0, %v760_v5, %v761_v60  ;;  %v6441_v40 = vcombine.low %v4042_v4, %v6414_v22  ;;  %v1761_v22 = vshll.u32 %v5545_v44, 16 }
  0xad   : > { %2214 = vmatprep.mubr.bf16.mxu1 %v1728_v37  ;;  %v1856_v33 = vrot.slane %v4117_v48, 1  ;;  %v5631_v37 = vld [vmem:[%s5804_s14 + $0x38] ss:$0 sps:$4 sm:$0x11]   ;;  %v6448_v60 = vsel %vm753_vm0, %v1862_v25, %v1863_v20  ;;  %v4121_v48 = vcombine.low %v4073_v7, %v6331_v45  ;;  %v1747_v5 = vor.u32 %v1746_v57, %v1742_v31  ;;  %v4199_v31 = vld [vmem:[%s5804_s14 + $0x28] sm:$0xf] }
  0xae   : > { %v767_v29 = vrot.slane %v5631_v37, 1  ;;  %v1756_v61 = vshll.u32 %v6441_v40, 16  ;;  %v6458_v52 = vsel %vm753_vm0, %v1865_v59, %v1866_v18  ;;  %v1754_v27 = vshrl.u32 %v6441_v40, 16  ;;  %v4244_v25 = vld [vmem:[%s5804_s14 + $0x18] sm:$0xe] }
  0xaf   : > { %v6417_v32 = vsel %vm753_vm0, %v1856_v33, %v1857_v19  ;;  %v1869_v19 = vrot.slane %v6354_v55, 1  ;;  %v5531_v33 = vld [vmem:[%s7234_s1 + $0x190] sm:$0xff]   ;;  %v1868_v43 = vrot.slane %v4121_v48, 1  ;;  %v1872_v55 = vrot.slane %v6398_v34, 1  ;;  %v5533_v34 = vld [vmem:[%s7234_s1 + $0x198] sm:$0xff]  }
  0xb0   : > { %v1752_v4 = vsel %vm496_vm1, %v1747_v5, %v1751_v42  ;;  %v1758_v20 = vrot.slane %v1756_v61, 1  ;;  %v1763_v57 = vrot.slane %v1761_v22, 1  ;;  %v4292_v46 = vcombine.low %v4244_v25, %v4197_v47 }
  0xb1   : > { %v6475_v16 = vsel %vm753_vm0, %v1868_v43, %v1869_v19  ;;  %v4293_v8 = vcombine.low %v4245_v38, %v4199_v31  ;;  %v2909_v37 = vrot.slane %v6494_v63, 1  ;;  %v6511_v7 = vcombine.low %v4198_v0, %v4199_v31  ;;  %v5632_v19 = vld [vmem:[%s5804_s14 + $0x10] sm:$0xf]  ;;  %v5550_v0 = vld [vmem:[%s7234_s1 + $0x1b8] sm:$0xff]  }
  0xb2   : > { %v2905_v42 = vrot.slane %v4292_v46, 1  ;;  %v6559_v31 = vld [vmem:[%s5804_s14 + $0x38] ss:$0 sps:$4 sm:$0x11]  }
  0xb3   : > { %5047 = vmatmul.mubr.bf16.vlgmr.msra.gmra.mrb[64].mxu0 %v759_v15  ;;  %v768_v15 = vsel %vm753_vm0, %v766_v50, %v767_v29  ;;  %v5541_v29 = vld [vmem:[%s7234_s1 + $0x1e8] sm:$0xff]   ;;  %v2908_v48 = vrot.slane %v4293_v8, 1  ;;  %v2664_v43 = vshll.u32 %v6511_v7, 16  ;;  %v4063_v8 = vld [vmem:[%s5804_s14 + $0x30] sm:$0xe] }
  0xb4   : > { %4895 = vmatpush3.bf16.msra.mxu0 %v5522_v21  ;;  %5050 = vmatprep.mubr.bf16.mxu0 %v762_v17  ;;  %v6471_v21 = vcombine.low %v4196_v1, %v4197_v47 }
  0xb5   : > { %2215 = vmatmul.mubr.bf16.gmra.mrb[64].mxu1 %v6323_v2  ;;  %4896 = vmatprep.subr.bf16.mxu0 %v5524_v39  ;;  %v4074_v2 = vld [vmem:[%s5804_s14 + $0xb4] sm:$0xe]  ;;  %v5553_v39 = vld [vmem:[%s5804_s14 + $0x20] ss:$0 sps:$4 sm:$0x11]  }
  0xb6   : > { %2222 = vmatprep.mubr.bf16.mxu1 %v1740_v26  ;;  %v4122_v45 = vcombine.low %v4074_v2, %v6368_v36  ;;  %v1875_v36 = vrot.slane %v5545_v44, 1  ;;  %v1874_v26 = vrot.slane %v4123_v14, 1  ;;  %v2652_v54 = vshll.u32 %v6471_v21, 16  ;;  %v5542_v44 = vld [vmem:[%s7234_s1 + $0x1a8] sm:$0xff]   ;;  %v5547_v2 = vld [vmem:[%s7234_s1 + $0x1f0] sm:$0xff]  }
  0xb7   : > { %v2906_v18 = vrot.slane %v5553_v39, 1  ;;  %v2650_v1 = vshrl.u32 %v6471_v21, 16  ;;  %v2657_v59 = vshll.u32 %v5553_v39, 16  ;;  %v2662_v14 = vshrl.u32 %v6511_v7, 16 }
  0xb8   : > { %4897 = vmatpush3.bf16.msra.mxu0 %v5525_v41  ;;  %v1871_v35 = vrot.slane %v4122_v45, 1  ;;  %v6498_v3 = vsel %vm753_vm0, %v1874_v26, %v1875_v36  ;;  %v5539_v41 = vld [vmem:[%s7234_s1 + $0x1a0] sm:$0xff]   ;;  %v2654_v50 = vrot.slane %v2652_v54, 1  ;;  %v6533_v45 = vld [vmem:[%s5804_s14 + $0x34] sm:$0xf]  ;;  %v5549_v36 = vld [vmem:[%s7234_s1 + $0x1f8] sm:$0xff]  }
  0xb9   : > { %4898 = vmatprep.subr.bf16.mxu0 %v5530_v28  ;;  %v1759_v28 = vor.u32 %v1758_v20, %v1754_v27  ;;  %v6521_v61 = vsel %vm753_vm0, %v2905_v42, %v2906_v18  ;;  %v5634_v20 = vld [vmem:[%s5804_s14 + $0x1c] sm:$0xf]  ;;  %v5635_v26 = vld [vmem:[%s5804_s14 + $0x28] sm:$0xf] }
  0xba   : > { %v6488_v17 = vsel %vm753_vm0, %v1871_v35, %v1872_v55  ;;  %v4062_v35 = vld [vmem:[%s5804_s14 + $0x24] sm:$0xe]  ;;  %v4109_v22 = vcombine.low %v4061_v23, %v5634_v20  ;;  %v5637_v18 = vld [vmem:[%s5804_s14 + $0x2c] ss:$0 sps:$4 sm:$0x11]  }
  0xbb   : > { %5051 = vmatmul.mubr.bf16.gmra.mrb[68].mxu0 %v765_v30  ;;  %v1764_v47 = vsel %vm496_vm1, %v1759_v28, %v1763_v57  ;;  %v2655_v30 = vor.u32 %v2654_v50, %v2650_v1  ;;  %v4110_v54 = vcombine.low %v4062_v35, %v5635_v26  ;;  %v4202_v57 = vld [vmem:[%s5804_s14 + $0x3c] sm:$0xf]  ;;  %v4204_v23 = vld [vmem:[%s5804_s14 + $0x48] sm:$0xf] }
  0xbc   : > { %4899 = vmatpush3.bf16.msra.mxu0 %v5531_v33  ;;  %5054 = vmatprep.mubr.bf16.mxu0 %v768_v15  ;;  %v2659_v33 = vrot.slane %v2657_v59, 1  ;;  %v1832_v38 = vrot.slane %v4109_v22, 1  ;;  %v2681_v59 = vshll.u32 %v6559_v31, 16 }
  0xbd   : > { %2223 = vmatmul.mubr.bf16.gmra.mrb[68].mxu1 %v6338_v49  ;;  %4900 = vmatprep.subr.bf16.mxu0 %v5532_v62  ;;  %v4060_v49 = vld [vmem:[%s5804_s14 + $0xc] sm:$0xe]  ;;  %v5633_v62 = vld [vmem:[%s5804_s14 + $0x14] ss:$0 sps:$4 sm:$0x11]   ;;  %v1835_v46 = vrot.slane %v4110_v54, 1 }
  0xbe   : > { %2230 = vmatprep.mubr.bf16.mxu1 %v1752_v4  ;;  %v4108_v5 = vcombine.low %v4060_v49, %v5632_v19  ;;  %v1830_v15 = vrot.slane %v5633_v62, 1  ;;  %v2666_v4 = vrot.slane %v2664_v43, 1  ;;  %v6565_v49 = vld [vmem:[%s5804_s14 + $0x40] sm:$0xf]  ;;  %v2683_v43 = vrot.slane %v2681_v59, 1  ;;  %v5570_v54 = vld [vmem:[%s7234_s1 + $0x218] sm:$0xff]  }
  0xbf   : > { %v6574_v42 = vcombine.low %v4202_v57, %v6565_v49  ;;  %v5640_v62 = vld [vmem:[%s5804_s14 + $0x38] ss:$0 sps:$4 sm:$0x11]   ;;  %v4208_v59 = vld [vmem:[%s5804_s14 + $0x60] sm:$0xf] }
  0xc0   : > { %4901 = vmatpush3.bf16.msra.mxu0 %v5533_v34  ;;  %v1829_v55 = vrot.slane %v4108_v5, 1  ;;  %v2660_v34 = vsel %vm496_vm1, %v2655_v30, %v2659_v33 }
  0xc1   : > { %4902 = vmatprep.subr.bf16.mxu0 %v5538_v11  ;;  %v2669_v11 = vshll.u32 %v6494_v63, 16  ;;  %v2667_v63 = vor.u32 %v2666_v4, %v2662_v14  ;;  %v5641_v14 = vld [vmem:[%s5804_s14 + $0x44] ss:$0 sps:$4 sm:$0x11]   ;;  %v2686_v4 = vshrl.u32 %v6574_v42, 16 }
  0xc2   : > { %v1831_v39 = vsel %vm753_vm0, %v1829_v55, %v1830_v15  ;;  %v2688_v55 = vshll.u32 %v6574_v42, 16  ;;  %v1839_v15 = vrot.slane %v5640_v62, 1 }
  0xc3   : > { %5055 = vmatmul.mubr.bf16.gmra.mrb[72].mxu0 %v6278_v13  ;;  %v6524_v13 = vsel %vm753_vm0, %v2908_v48, %v2909_v37  ;;  %v4064_v37 = vld [vmem:[%s5804_s14 + $0x3c] sm:$0xe] }
  0xc4   : > { %4903 = vmatpush3.bf16.msra.mxu0 %v5539_v41  ;;  %5058 = vmatprep.mubr.bf16.mxu0 %v6299_v53  ;;  %v4200_v53 = vld [vmem:[%s5804_s14 + $0x30] sm:$0xf]  ;;  %v5636_v41 = vld [vmem:[%s5804_s14 + $0x20] ss:$0 sps:$4 sm:$0x11]  }
  0xc5   : > { %2231 = vmatmul.mubr.bf16.gmra.mrb[72].mxu1 %v6386_v12  ;;  %4904 = vmatprep.subr.bf16.mxu0 %v5541_v29  ;;  %v5548_v12 = vld [vmem:[%s7234_s1 + $0x1b0] sm:$0xff]   ;;  %v6548_v27 = vcombine.low %v4200_v53, %v6533_v45  ;;  %v1833_v28 = vrot.slane %v5636_v41, 1  ;;  %v6585_v53 = vld [vmem:[%s5804_s14 + $0x44] ss:$0 sps:$4 sm:$0x11]  }
  0xc6   : > { %2238 = vmatprep.mubr.bf16.mxu1 %v1764_v47  ;;  %v5638_v47 = vld [vmem:[%s5804_s14 + $0x34] sm:$0xf]  ;;  %v2693_v20 = vshll.u32 %v6585_v53, 16  ;;  %v6616_v41 = vld [vmem:[%s5804_s14 + $0x58] sm:$0xf] }
  0xc7   : > { %v2676_v25 = vshll.u32 %v6548_v27, 16  ;;  %v2674_v29 = vshrl.u32 %v6548_v27, 16  ;;  %v1834_v48 = vsel %vm753_vm0, %v1832_v38, %v1833_v28  ;;  %v4111_v19 = vcombine.low %v4063_v8, %v5638_v47  ;;  %v4206_v38 = vld [vmem:[%s5804_s14 + $0x54] sm:$0xf]  ;;  %v5580_v8 = vld [vmem:[%s7234_s1 + $0x228] sm:$0xff]  }
  0xc8   : > { %4905 = vmatpush3.bf16.msra.mxu0 %v5542_v44  ;;  %v5560_v44 = vld [vmem:[%s7234_s1 + $0x208] sm:$0xff]  }
  0xc9   : > { %4906 = vmatprep.subr.bf16.mxu0 %v5547_v2  ;;  %v2678_v50 = vrot.slane %v2676_v25, 1  ;;  %v5639_v2 = vld [vmem:[%s5804_s14 + $0x40] sm:$0xf] }
  0xca   : > { %v4112_v30 = vcombine.low %v4064_v37, %v5639_v2 }
  0xcb   : > { %5059 = vmatmul.mubr.bf16.gmra.mrb[76].mxu0 %v6302_v58  ;;  %v2671_v58 = vrot.slane %v2669_v11, 1  ;;  %v2679_v33 = vor.u32 %v2678_v50, %v2674_v29  ;;  %v2690_v11 = vrot.slane %v2688_v55, 1  ;;  %v4210_v55 = vld [vmem:[%s5804_s14 + $0x6c] sm:$0xf] }
  0xcc   : > { %4907 = vmatpush3.bf16.msra.mxu0 %v5548_v12  ;;  %3194 = vmatprep.mubr.bf16.mxu0 %v2660_v34  ;;  %v6592_v12 = vld [vmem:[%s5804_s14 + $0x4c] sm:$0xf]  ;;  %v1841_v35 = vrot.slane %v4112_v30, 1  ;;  %v5565_v34 = vld [vmem:[%s7234_s1 + $0x210] sm:$0xff]  }
  0xcd   : > { %2239 = vmatmul.mubr.bf16.gmra.mrb[76].mxu1 %v6441_v40  ;;  %4908 = vmatprep.subr.bf16.mxu0 %v5549_v36  ;;  %v1836_v40 = vrot.slane %v5637_v18, 1  ;;  %v2672_v1 = vsel %vm496_vm1, %v2667_v63, %v2671_v58  ;;  %v1842_v36 = vrot.slane %v5641_v14, 1  ;;  %v6602_v22 = vcombine.low %v4204_v23, %v6592_v12  ;;  %v6611_v58 = vld [vmem:[%s5804_s14 + $0x50] ss:$0 sps:$4 sm:$0x11]  }
  0xce   : > { %5094 = vmatprep.mubr.bf16.mxu1 %v1831_v39  ;;  %v2695_v63 = vrot.slane %v2693_v20, 1  ;;  %v2705_v18 = vshll.u32 %v6611_v58, 16  ;;  %v6663_v14 = vld [vmem:[%s5804_s14 + $0x74] ss:$0 sps:$4 sm:$0x11]  }
  0xcf   : > { %v1837_v5 = vsel %vm753_vm0, %v1835_v46, %v1836_v40  ;;  %v1843_v26 = vsel %vm753_vm0, %v1841_v35, %v1842_v36  ;;  %v2700_v25 = vshll.u32 %v6602_v22, 16  ;;  %v2698_v28 = vshrl.u32 %v6602_v22, 16 }
  0xd0   : > { %4909 = vmatpush3.bf16.msra.mxu0 %v5550_v0  ;;  %v2691_v0 = vor.u32 %v2690_v11, %v2686_v4  ;;  %v4265_v40 = vcombine.low %v4206_v38, %v6616_v41  ;;  %v2707_v29 = vrot.slane %v2705_v18, 1  ;;  %v6668_v4 = vld [vmem:[%s5804_s14 + $0x7c] sm:$0xf] }
  0xd1   : > { %v2702_v46 = vrot.slane %v2700_v25, 1  ;;  %v6683_v25 = vld [vmem:[%s5804_s14 + $0x88] sm:$0xf] }
  0xd2   : > { %v2696_v57 = vsel %vm496_vm1, %v2691_v0, %v2695_v63  ;;  %v2712_v50 = vshll.u32 %v4265_v40, 16  ;;  %v2710_v47 = vshrl.u32 %v4265_v40, 16  ;;  %v4214_v63 = vld [vmem:[%s5804_s14 + $0x84] sm:$0xf] }
  0xd3   : > { %3195 = vmatmul.mubr.bf16.vlgmr.msra.gmra.mrb[80].mxu0 %v6471_v21  ;;  %v1838_v21 = vrot.slane %v4111_v19, 1  ;;  %v2703_v37 = vor.u32 %v2702_v46, %v2698_v28 }
  0xd4   : > { %3202 = vmatprep.mubr.bf16.mxu0 %v2672_v1  ;;  %v6631_v1 = vld [vmem:[%s5804_s14 + $0x5c] ss:$0 sps:$4 sm:$0x11]   ;;  %v2714_v19 = vrot.slane %v2712_v50, 1 }
  0xd5   : > { %5095 = vmatmul.mubr.bf16.vlgmr.msra.gmra.mrb[80].mxu1 %v1834_v48  ;;  %v1840_v39 = vsel %vm753_vm0, %v1838_v21, %v1839_v15  ;;  %v6636_v48 = vld [vmem:[%s5804_s14 + $0x64] sm:$0xf]  ;;  %v6655_v21 = vld [vmem:[%s5804_s14 + $0x70] sm:$0xf] }
  0xd6   : > { %5127 = vmatpush3.bf16.msra.mxu1 %v6315_v56  ;;  %5098 = vmatprep.mubr.bf16.mxu1 %v1837_v5  ;;  %v2684_v56 = vsel %vm496_vm1, %v2679_v33, %v2683_v43  ;;  %v2717_v5 = vshll.u32 %v6631_v1, 16  ;;  %v2715_v2 = vor.u32 %v2714_v19, %v2710_v47  ;;  %v6650_v33 = vld [vmem:[%s5804_s14 + $0x68] ss:$0 sps:$4 sm:$0x11]   ;;  %v4267_v23 = vcombine.low %v4210_v55, %v6655_v21  ;;  %v6703_v47 = vld [vmem:[%s5804_s14 + $0x94] sm:$0xf] }
  0xd7   : > { %5128 = vmatprep.subr.bf16.mxu1 %v5560_v44  ;;  %v6697_v50 = vld [vmem:[%s5804_s14 + $0x8c] ss:$0 sps:$4 sm:$0x11]  }
  0xd8   : > { %v2719_v30 = vrot.slane %v2717_v5, 1  ;;  %v2736_v36 = vshll.u32 %v4267_v23, 16  ;;  %v4246_v5 = vld [vmem:[%s5804_s14 + $0x30] sm:$0xe] }
  0xda   : > { %5129 = vmatpush3.bf16.msra.mxu1 %v5560_v44  ;;  %v5590_v44 = vld [vmem:[%s7234_s1 + $0x238] sm:$0xff]   ;;  %v2720_v62 = vsel %vm496_vm1, %v2715_v2, %v2719_v30  ;;  %v2738_v20 = vrot.slane %v2736_v36, 1  ;;  %v2765_v2 = vshll.u32 %v6697_v50, 16 }
  0xdb   : > { %3203 = vmatmul.mubr.bf16.gmra.mrb[84].mxu0 %v6511_v7  ;;  %5130 = vmatprep.subr.bf16.mxu1 %v5565_v34  ;;  %v5575_v7 = vld [vmem:[%s7234_s1 + $0x220] sm:$0xff]   ;;  %v4218_v36 = vld [vmem:[%s5804_s14 + $0x9c] sm:$0xf] }
  0xdc   : > { %3210 = vmatprep.mubr.bf16.mxu0 %v2684_v56  ;;  %v2734_v56 = vshrl.u32 %v4267_v23, 16 }
  0xdd   : > { %5099 = vmatmul.mubr.bf16.gmra.mrb[84].mxu1 %v1840_v39 }
  0xde   : > { %5102 = vmatprep.mubr.bf16.mxu1 %v1843_v26  ;;  %5131 = vmatpush3.bf16.msra.mxu1 %v5565_v34  ;;  %v4212_v34 = vld [vmem:[%s5804_s14 + $0x78] sm:$0xf]  ;;  %v2739_v39 = vor.u32 %v2738_v20, %v2734_v56  ;;  %v6677_v26 = vld [vmem:[%s5804_s14 + $0x80] ss:$0 sps:$4 sm:$0x11]   ;;  %v2912_v56 = vrot.slane %v6559_v31, 1 }
  0xdf   : > { %5132 = vmatprep.subr.bf16.mxu1 %v5570_v54  ;;  %v4248_v20 = vld [vmem:[%s5804_s14 + $0x48] sm:$0xe] }
  0xe2   : > { %5133 = vmatpush3.bf16.msra.mxu1 %v5570_v54 }
  0xe3   : > { %3211 = vmatmul.mubr.bf16.gmra.mrb[88].mxu0 %v6548_v27  ;;  %5134 = vmatprep.subr.bf16.mxu1 %v5575_v7  ;;  %v5585_v27 = vld [vmem:[%s7234_s1 + $0x230] sm:$0xff]  }
  0xe4   : > { %3218 = vmatprep.mubr.bf16.mxu0 %v2696_v57 }
  0xe5   : > { %5103 = vmatmul.mubr.bf16.gmra.mrb[88].mxu1 %v6361_v9  ;;  %v2708_v9 = vsel %vm496_vm1, %v2703_v37, %v2707_v29 }
  0xe6   : > { %5106 = vmatprep.mubr.bf16.mxu1 %v6375_v24  ;;  %5135 = vmatpush3.bf16.msra.mxu1 %v5575_v7  ;;  %v4266_v24 = vcombine.low %v4208_v59, %v6636_v48 }
  0xe7   : > { %5136 = vmatprep.subr.bf16.mxu1 %v5580_v8 }
  0xe8   : > { %v2724_v43 = vshll.u32 %v4266_v24, 16 }
  0xea   : > { %5137 = vmatpush3.bf16.msra.mxu1 %v5580_v8  ;;  %v2726_v15 = vrot.slane %v2724_v43, 1 }
  0xeb   : > { %3219 = vmatmul.mubr.bf16.gmra.mrb[92].mxu0 %v6574_v42  ;;  %5138 = vmatprep.subr.bf16.mxu1 %v5585_v27  ;;  %v2722_v42 = vshrl.u32 %v4266_v24, 16 }
  0xec   : > { %3226 = vmatprep.mubr.bf16.mxu0 %v2708_v9 }
  0xed   : > { %5107 = vmatmul.mubr.bf16.gmra.mrb[92].mxu1 %v6390_v51  ;;  %v2729_v51 = vshll.u32 %v6650_v33, 16 }
  0xee   : > { %5110 = vmatprep.mubr.bf16.mxu1 %v6401_v6  ;;  %5139 = vmatpush3.bf16.msra.mxu1 %v5585_v27  ;;  %v2727_v6 = vor.u32 %v2726_v15, %v2722_v42  ;;  %v4216_v27 = vld [vmem:[%s5804_s14 + $0x90] sm:$0xf]  ;;  %v4294_v42 = vcombine.low %v4246_v5, %v6533_v45  ;;  %v4247_v45 = vld [vmem:[%s5804_s14 + $0x3c] sm:$0xe] }
  0xef   : > { %5140 = vmatprep.subr.bf16.mxu1 %v5590_v44  ;;  %v2731_v35 = vrot.slane %v2729_v51, 1  ;;  %v6710_v30 = vcombine.low %v4216_v27, %v6703_v47  ;;  %v2767_v51 = vrot.slane %v2765_v2, 1  ;;  %v2918_v27 = vrot.slane %v6611_v58, 1 }
  0xf1   : > { %v2732_v11 = vsel %vm496_vm1, %v2727_v6, %v2731_v35  ;;  %v6719_v6 = vld [vmem:[%s5804_s14 + $0x98] ss:$0 sps:$4 sm:$0x11]   ;;  %v2772_v35 = vshll.u32 %v6710_v30, 16 }
  0xf2   : > { %5141 = vmatpush3.bf16.msra.mxu1 %v5590_v44 }
  0xf3   : > { %3227 = vmatmul.mubr.bf16.gmra.mrb[96].mxu0 %v6602_v22  ;;  %v2741_v22 = vshll.u32 %v6663_v14, 16 }
  0xf4   : > { %3234 = vmatprep.mubr.bf16.mxu0 %v2720_v62 }
  0xf5   : > { %5111 = vmatmul.mubr.bf16.gmra.mrb[0].mxu1 %v6417_v32  ;;  %v6673_v32 = vcombine.low %v4212_v34, %v6668_v4  ;;  %v6725_v34 = vld [vmem:[%s5804_s14 + $0xa0] sm:$0xf] }
  0xf6   : > { %5114 = vmatprep.mubr.bf16.mxu1 %v6431_v10  ;;  %v2743_v10 = vrot.slane %v2741_v22, 1  ;;  %v2774_v22 = vrot.slane %v2772_v35, 1 }
  0xf7   : > { %v2748_v54 = vshll.u32 %v6673_v32, 16 }
  0xf8   : > { %v2744_v46 = vsel %vm496_vm1, %v2739_v39, %v2743_v10  ;;  %v2777_v39 = vshll.u32 %v6719_v6, 16  ;;  %v6734_v10 = vcombine.low %v4218_v36, %v6725_v34 }
  0xf9   : > { %v2750_v18 = vrot.slane %v2748_v54, 1  ;;  %v4295_v54 = vcombine.low %v4247_v45, %v6565_v49  ;;  %v4222_v45 = vld [vmem:[%s5804_s14 + $0xb4] sm:$0xf] }
  0xfb   : > { %3235 = vmatmul.mubr.bf16.gmra.mrb[100].mxu0 %v4265_v40  ;;  %v6691_v40 = vcombine.low %v4214_v63, %v6683_v25  ;;  %v4296_v63 = vcombine.low %v4248_v20, %v6592_v12  ;;  %v2915_v12 = vrot.slane %v6585_v53, 1 }
  0xfc   : > { %3242 = vmatprep.mubr.bf16.mxu0 %v2732_v11  ;;  %v2770_v11 = vshrl.u32 %v6710_v30, 16 }
  0xfd   : > { %5115 = vmatmul.mubr.bf16.gmra.mrb[4].mxu1 %v6448_v60  ;;  %v2746_v60 = vshrl.u32 %v6673_v32, 16  ;;  %v2760_v59 = vshll.u32 %v6691_v40, 16  ;;  %v2758_v19 = vshrl.u32 %v6691_v40, 16 }
  0xfe   : > { %5118 = vmatprep.mubr.bf16.mxu1 %v6458_v52  ;;  %v2753_v52 = vshll.u32 %v6677_v26, 16 }
  0xff   : > { %v2751_v37 = vor.u32 %v2750_v18, %v2746_v60  ;;  %v6743_v60 = vld [vmem:[%s5804_s14 + $0xa4] ss:$0 sps:$4 sm:$0x11]  }
 0x100   : > { %v2755_v29 = vrot.slane %v2753_v52, 1  ;;  %v2914_v52 = vrot.slane %v4295_v54, 1  ;;  %v4252_v54 = vld [vmem:[%s5804_s14 + $0x78] sm:$0xe] }
 0x102   : > { %v2756_v44 = vsel %vm496_vm1, %v2751_v37, %v2755_v29  ;;  %v4220_v37 = vld [vmem:[%s5804_s14 + $0xa8] sm:$0xf]  ;;  %v6752_v29 = vld [vmem:[%s5804_s14 + $0xac] sm:$0xf]  ;;  %v2916_v53 = vsel %vm753_vm0, %v2914_v52, %v2915_v12 }
 0x103   : > { %v4638_v0 = vpop.f32.mrb[0].mxu0  ;;  %3243 = vmatmul.mubr.bf16.gmra.mrb[104].mxu0 %v4266_v24 }
 0x104   : > { %v4639_v38 = vpop.f32.mrb[1].mxu0  ;;  %3250 = vmatprep.mubr.bf16.mxu0 %v2744_v46  ;;  %v2784_v46 = vshll.u32 %v6734_v10, 16 }
 0x105   : > { %v6685_v7 = vadd.f32 %v4639_v38, %v4638_v0  ;;  %v4641_v28 = vpop.f32.mrb[2].mxu0  ;;  %5119 = vmatmul.mubr.bf16.gmra.mrb[8].mxu1 %v6475_v16  ;;  %v2762_v16 = vrot.slane %v2760_v59, 1  ;;  %v2917_v59 = vrot.slane %v4296_v63, 1 }
 0x106   : > { %v4642_v57 = vpop.f32.mrb[3].mxu0  ;;  %5122 = vmatprep.mubr.bf16.mxu1 %v6488_v17 }
 0x107   : > { %v6693_v8 = vadd.f32 %v4642_v57, %v4641_v28  ;;  %v2763_v15 = vor.u32 %v2762_v16, %v2758_v19  ;;  %v2775_v57 = vor.u32 %v2774_v22, %v2770_v11  ;;  %v4250_v19 = vld [vmem:[%s5804_s14 + $0x60] sm:$0xe]  ;;  %v6761_v16 = vcombine.low %v4220_v37, %v6752_v29  ;;  %v6778_v11 = vld [vmem:[%s5804_s14 + $0xb8] sm:$0xf] }
 0x108   : > { %v2919_v58 = vsel %vm753_vm0, %v2917_v59, %v2918_v27  ;;  %v2924_v22 = vrot.slane %v6650_v33, 1  ;;  %v2927_v59 = vrot.slane %v6663_v14, 1  ;;  %v6802_v27 = vld [vmem:[%s5804_s14 + $0xc4] sm:$0xf] }
 0x10b   : > { %v4644_v9 = vpop.f32.mrb[4].mxu0  ;;  %3251 = vmatmul.mubr.bf16.gmra.mrb[108].mxu0 %v4267_v23  ;;  %v2911_v23 = vrot.slane %v4294_v42, 1  ;;  %v6769_v42 = vld [vmem:[%s5804_s14 + $0xb0] ss:$0 sps:$4 sm:$0x11]  }
 0x10c   : > { %v4645_v24 = vpop.f32.mrb[5].mxu0  ;;  %3258 = vmatprep.mubr.bf16.mxu0 %v2756_v44  ;;  %v2786_v44 = vrot.slane %v2784_v46, 1 }
 0x10d   : > { %v6712_v17 = vadd.f32 %v4645_v24, %v4644_v9  ;;  %v4647_v43 = vpop.f32.mrb[6].mxu0  ;;  %5123 = vmatmul.mubr.bf16.gmra.mrb[12].mxu1 %v6498_v3  ;;  %v2768_v3 = vsel %vm496_vm1, %v2763_v15, %v2767_v51  ;;  %v2913_v31 = vsel %vm753_vm0, %v2911_v23, %v2912_v56  ;;  %v4249_v9 = vld [vmem:[%s5804_s14 + $0x54] sm:$0xe]  ;;  %v2782_v24 = vshrl.u32 %v6734_v10, 16 }
 0x10e   : > { %v4648_v55 = vpop.f32.mrb[7].mxu0  ;;  %5142 = vmatprep.mubr.bf16.mxu1 %v6521_v61  ;;  %v4297_v2 = vcombine.low %v4249_v9, %v6616_v41  ;;  %v2921_v51 = vrot.slane %v6631_v1, 1  ;;  %v4251_v41 = vld [vmem:[%s5804_s14 + $0x6c] sm:$0xe] }
 0x10f   : > { %v6715_v62 = vadd.f32 %v4648_v55, %v4647_v43  ;;  %v4298_v43 = vcombine.low %v4250_v19, %v6636_v48  ;;  %v2787_v35 = vor.u32 %v2786_v44, %v2782_v24  ;;  %v4253_v19 = vld [vmem:[%s5804_s14 + $0x84] sm:$0xe] }
 0x110   : > { %v2920_v48 = vrot.slane %v4297_v2, 1  ;;  %v4254_v2 = vld [vmem:[%s5804_s14 + $0x90] sm:$0xe] }
 0x113   : > { %v4650_v61 = vpop.f32.mrb[8].mxu0  ;;  %3259 = vmatmul.mubr.bf16.gmra.mrb[112].mxu0 %v6673_v32  ;;  %v2779_v32 = vrot.slane %v2777_v39, 1  ;;  %v4299_v39 = vcombine.low %v4251_v41, %v6655_v21  ;;  %v4300_v21 = vcombine.low %v4252_v54, %v6668_v4 }
 0x114   : > { %v4651_v0 = vpop.f32.mrb[9].mxu0  ;;  %3266 = vmatprep.mubr.bf16.mxu0 %v2768_v3  ;;  %v2923_v3 = vrot.slane %v4298_v43, 1 }
 0x115   : > { %v6740_v38 = vadd.f32 %v4651_v0, %v4650_v61  ;;  %v4653_v28 = vpop.f32.mrb[10].mxu0  ;;  %5143 = vmatmul.mubr.bf16.vlgmr.msra.gmra.mrb[80].mxu1 %v6524_v13  ;;  %v2789_v13 = vshll.u32 %v6743_v60, 16  ;;  %v2780_v5 = vsel %vm496_vm1, %v2775_v57, %v2779_v32  ;;  %v2801_v61 = vshll.u32 %v6769_v42, 16  ;;  %v6796_v57 = vld [vmem:[%s5804_s14 + $0xbc] ss:$0 sps:$4 sm:$0x11]  }
 0x116   : > { %v4654_v49 = vpop.f32.mrb[11].mxu0  ;;  %5146 = vmatprep.mubr.bf16.mxu1 %v2913_v31  ;;  %v2794_v31 = vshrl.u32 %v6761_v16, 16  ;;  %v2925_v33 = vsel %vm753_vm0, %v2923_v3, %v2924_v22  ;;  %v2926_v32 = vrot.slane %v4299_v39, 1  ;;  %v2929_v4 = vrot.slane %v4300_v21, 1 }
 0x117   : > { %v6747_v18 = vadd.f32 %v4654_v49, %v4653_v28  ;;  %v2791_v36 = vrot.slane %v2789_v13, 1  ;;  %v6789_v28 = vcombine.low %v4222_v45, %v6778_v11  ;;  %v2922_v49 = vsel %vm753_vm0, %v2920_v48, %v2921_v51  ;;  %v6827_v3 = vld [vmem:[%s5804_s14 + $0xc8] ss:$0 sps:$4 sm:$0x11]  }
 0x118   : > { %v2803_v52 = vrot.slane %v2801_v61, 1  ;;  %v2930_v13 = vrot.slane %v6677_v26, 1  ;;  %v2928_v41 = vsel %vm753_vm0, %v2926_v32, %v2927_v59  ;;  %v4302_v45 = vcombine.low %v4254_v2, %v6703_v47 }
 0x119   : > { %v2792_v0 = vsel %vm496_vm1, %v2787_v35, %v2791_v36  ;;  %v2808_v12 = vshll.u32 %v6789_v28, 16  ;;  %v2933_v22 = vrot.slane %v6697_v50, 1 }
 0x11a   : > { %v2931_v48 = vsel %vm753_vm0, %v2929_v4, %v2930_v13 }
 0x11b   : > { %3267 = vmatmul.mubr.bf16.gmra.mrb[116].mxu0 %v6691_v40  ;;  %v4656_v55 = vpop.f32.mrb[12].mxu0  ;;  %v2796_v40 = vshll.u32 %v6761_v16, 16 }
 0x11c   : > { %3274 = vmatprep.mubr.bf16.mxu0 %v2780_v5  ;;  %v4657_v15 = vpop.f32.mrb[13].mxu0 }
 0x11d   : > { %5147 = vmatmul.mubr.bf16.gmra.mrb[84].mxu1 %v2916_v53  ;;  %v6774_v23 = vadd.f32 %v4657_v15, %v4656_v55  ;;  %v4659_v56 = vpop.f32.mrb[14].mxu0  ;;  %v2798_v63 = vrot.slane %v2796_v40, 1  ;;  %v2813_v53 = vshll.u32 %v6796_v57, 16  ;;  %v2806_v55 = vshrl.u32 %v6789_v28, 16 }
 0x11e   : > { %5150 = vmatprep.mubr.bf16.mxu1 %v2919_v58  ;;  %v4660_v20 = vpop.f32.mrb[15].mxu0  ;;  %v2810_v15 = vrot.slane %v2808_v12, 1  ;;  %v4301_v40 = vcombine.low %v4253_v19, %v6683_v25 }
 0x11f   : > { %v6781_v1 = vadd.f32 %v4660_v20, %v4659_v56  ;;  %v2799_v46 = vor.u32 %v2798_v63, %v2794_v31  ;;  %v2815_v25 = vrot.slane %v2813_v53, 1  ;;  %v6833_v31 = vld [vmem:[%s5804_s14 + $0xd0] sm:$0xf]  ;;  %v2935_v63 = vrot.slane %v4302_v45, 1 }
 0x120   : > { %v2811_v39 = vor.u32 %v2810_v15, %v2806_v55  ;;  %v6858_v15 = vld [vmem:[%s5804_s14 + $0xd4] ss:$0 sps:$4 sm:$0x11]  }
 0x121   : > { %v2804_v14 = vsel %vm496_vm1, %v2799_v46, %v2803_v52  ;;  %v2825_v46 = vshll.u32 %v6827_v3, 16  ;;  %v4256_v52 = vld [vmem:[%s5804_s14 + $0xa8] sm:$0xe] }
 0x122   : > { %v2816_v59 = vsel %vm496_vm1, %v2811_v39, %v2815_v25  ;;  %v4258_v25 = vld [vmem:[%s5804_s14 + $0xc0] sm:$0xe] }
 0x123   : > { %3275 = vmatmul.mubr.bf16.gmra.mrb[120].mxu0 %v6710_v30  ;;  %v4224_v30 = vld [vmem:[%s5804_s14 + $0xc0] sm:$0xf]  ;;  %v2827_v55 = vrot.slane %v2825_v46, 1 }
 0x124   : > { %3282 = vmatprep.mubr.bf16.mxu0 %v2792_v0  ;;  %v6813_v51 = vcombine.low %v4224_v30, %v6802_v27  ;;  %v4226_v0 = vld [vmem:[%s5804_s14 + $0xcc] sm:$0xf] }
 0x125   : > { %5151 = vmatmul.mubr.bf16.gmra.mrb[88].mxu1 %v2922_v49  ;;  %v2936_v49 = vrot.slane %v6719_v6, 1  ;;  %v6844_v4 = vcombine.low %v4226_v0, %v6833_v31 }
 0x126   : > { %v4662_v37 = vpop.f32.mrb[16].mxu0  ;;  %5154 = vmatprep.mubr.bf16.mxu1 %v2925_v33  ;;  %v2820_v61 = vshll.u32 %v6813_v51, 16  ;;  %v4255_v33 = vld [vmem:[%s5804_s14 + $0x9c] sm:$0xe]  ;;  %v2818_v30 = vshrl.u32 %v6813_v51, 16 }
 0x127   : > { %v4663_v9 = vpop.f32.mrb[17].mxu0  ;;  %v4774_v44 = vpop.f32.mrb[16].mxu1  ;;  %v2937_v2 = vsel %vm753_vm0, %v2935_v63, %v2936_v49  ;;  %v2830_v0 = vshrl.u32 %v6844_v4, 16  ;;  %v2837_v63 = vshll.u32 %v6858_v15, 16 }
 0x128   : > { %v6806_v5 = vadd.f32 %v4663_v9, %v4662_v37  ;;  %v4665_v24 = vpop.f32.mrb[18].mxu0  ;;  %v4775_v43 = vpop.f32.mrb[17].mxu1  ;;  %v2822_v9 = vrot.slane %v2820_v61, 1 }
 0x129   : > { %v4666_v58 = vpop.f32.mrb[19].mxu0  ;;  %v6817_v35 = vadd.f32 %v4775_v43, %v4774_v44  ;;  %v4777_v36 = vpop.f32.mrb[18].mxu1  ;;  %v4303_v44 = vcombine.low %v4255_v33, %v6725_v34 }
 0x12a   : > { %v6815_v26 = vadd.f32 %v4666_v58, %v4665_v24  ;;  %v4778_v56 = vpop.f32.mrb[19].mxu1  ;;  %v4304_v58 = vcombine.low %v4256_v52, %v6752_v29  ;;  %v2942_v29 = vrot.slane %v6769_v42, 1  ;;  %v4306_v52 = vcombine.low %v4258_v25, %v6802_v27 }
 0x12b   : > { %3283 = vmatmul.mubr.bf16.gmra.mrb[124].mxu0 %v6734_v10  ;;  %v6824_v20 = vadd.f32 %v4778_v56, %v4777_v36  ;;  %v2932_v10 = vrot.slane %v4301_v40, 1  ;;  %v2832_v36 = vshll.u32 %v6844_v4, 16 }
 0x12c   : > { %3290 = vmatprep.mubr.bf16.mxu0 %v2804_v14  ;;  %v2823_v14 = vor.u32 %v2822_v9, %v2818_v30  ;;  %v2941_v56 = vrot.slane %v4304_v58, 1 }
 0x12d   : > { %5155 = vmatmul.mubr.bf16.gmra.mrb[92].mxu1 %v2928_v41  ;;  %v2934_v24 = vsel %vm753_vm0, %v2932_v10, %v2933_v22  ;;  %v2938_v41 = vrot.slane %v4303_v44, 1  ;;  %v2948_v44 = vrot.slane %v6827_v3, 1 }
 0x12e   : > { %v4668_v54 = vpop.f32.mrb[20].mxu0  ;;  %5158 = vmatprep.mubr.bf16.mxu1 %v2931_v48  ;;  %v4257_v48 = vld [vmem:[%s5804_s14 + $0xb4] sm:$0xe]  ;;  %v2828_v10 = vsel %vm496_vm1, %v2823_v14, %v2827_v55  ;;  %v2943_v46 = vsel %vm753_vm0, %v2941_v56, %v2942_v29 }
 0x12f   : > { %v4669_v47 = vpop.f32.mrb[21].mxu0  ;;  %v4780_v50 = vpop.f32.mrb[20].mxu1 }
 0x130   : > { %v6837_v21 = vadd.f32 %v4669_v47, %v4668_v54  ;;  %v4671_v32 = vpop.f32.mrb[22].mxu0  ;;  %v4781_v37 = vpop.f32.mrb[21].mxu1  ;;  %v2834_v47 = vrot.slane %v2832_v36, 1 }
 0x131   : > { %v4672_v12 = vpop.f32.mrb[23].mxu0  ;;  %v6848_v13 = vadd.f32 %v4781_v37, %v4780_v50  ;;  %v4783_v19 = vpop.f32.mrb[22].mxu1 }
 0x132   : > { %v6846_v6 = vadd.f32 %v4672_v12, %v4671_v32  ;;  %v4784_v53 = vpop.f32.mrb[23].mxu1  ;;  %v4305_v32 = vcombine.low %v4257_v48, %v6778_v11  ;;  %v2835_v37 = vor.u32 %v2834_v47, %v2830_v0 }
 0x133   : > { %3291 = vmatmul.mubr.bf16.gmra.mrb[128].mxu0 %v6761_v16  ;;  %v6855_v43 = vadd.f32 %v4784_v53, %v4783_v19  ;;  %v2939_v16 = vrot.slane %v6743_v60, 1  ;;  %v2945_v19 = vrot.slane %v6796_v57, 1 }
 0x134   : > { %3298 = vmatprep.mubr.bf16.mxu0 %v2816_v59  ;;  %v2839_v59 = vrot.slane %v2837_v63, 1  ;;  %v2944_v9 = vrot.slane %v4305_v32, 1 }
 0x135   : > { %5159 = vmatmul.mubr.bf16.gmra.mrb[0].mxu1 %v2934_v24  ;;  %v2940_v33 = vsel %vm753_vm0, %v2938_v41, %v2939_v16  ;;  %v2947_v24 = vrot.slane %v4306_v52, 1 }
 0x136   : > { %v4674_v34 = vpop.f32.mrb[24].mxu0  ;;  %5162 = vmatprep.mubr.bf16.mxu1 %v2937_v2  ;;  %v2840_v55 = vsel %vm496_vm1, %v2835_v37, %v2839_v59  ;;  %v2946_v57 = vsel %vm753_vm0, %v2944_v9, %v2945_v19 }
 0x137   : > { %v4675_v40 = vpop.f32.mrb[25].mxu0  ;;  %v4786_v39 = vpop.f32.mrb[24].mxu1  ;;  %v2949_v3 = vsel %vm753_vm0, %v2947_v24, %v2948_v44 }
 0x138   : > { %v6864_v45 = vadd.f32 %v4675_v40, %v4674_v34  ;;  %v4677_v22 = vpop.f32.mrb[26].mxu0  ;;  %v4787_v54 = vpop.f32.mrb[25].mxu1 }
 0x139   : > { %v4678_v61 = vpop.f32.mrb[27].mxu0  ;;  %v6872_v49 = vadd.f32 %v4787_v54, %v4786_v39  ;;  %v4789_v42 = vpop.f32.mrb[26].mxu1 }
 0x13a   : > { %v6870_v60 = vadd.f32 %v4678_v61, %v4677_v22  ;;  %v4790_v50 = vpop.f32.mrb[27].mxu1  ;;  %v2951_v22 = vrot.slane %v6858_v15, 1 }
 0x13b   : > { %3299 = vmatmul.mubr.bf16.gmra.mrb[132].mxu0 %v6789_v28  ;;  %v6879_v12 = vadd.f32 %v4790_v50, %v4789_v42  ;;  %v4259_v28 = vld [vmem:[%s5804_s14 + $0xcc] sm:$0xe] }
 0x13c   : > { %3306 = vmatprep.mubr.bf16.mxu0 %v2828_v10  ;;  %v4307_v16 = vcombine.low %v4259_v28, %v6833_v31 }
 0x13d   : > { %5163 = vmatmul.mubr.bf16.gmra.mrb[4].mxu1 %v2940_v33 }
 0x13e   : > { %v4680_v30 = vpop.f32.mrb[28].mxu0  ;;  %5166 = vmatprep.mubr.bf16.mxu1 %v2943_v46  ;;  %v2950_v48 = vrot.slane %v4307_v16, 1 }
 0x13f   : > { %v4681_v11 = vpop.f32.mrb[29].mxu0  ;;  %v4792_v27 = vpop.f32.mrb[28].mxu1 }
 0x140   : > { %v6884_v53 = vadd.f32 %v4681_v11, %v4680_v30  ;;  %v4683_v2 = vpop.f32.mrb[30].mxu0  ;;  %v4793_v14 = vpop.f32.mrb[29].mxu1  ;;  %v2952_v63 = vsel %vm753_vm0, %v2950_v48, %v2951_v22 }
 0x141   : > { %v4684_v58 = vpop.f32.mrb[31].mxu0  ;;  %v6889_v34 = vadd.f32 %v4793_v14, %v4792_v27  ;;  %v4795_v41 = vpop.f32.mrb[30].mxu1 }
 0x142   : > { %v6887_v36 = vadd.f32 %v4684_v58, %v4683_v2  ;;  %v4796_v40 = vpop.f32.mrb[31].mxu1 }
 0x143   : > { %3307 = vmatmul.mubr.bf16.gmra.mrb[136].mxu0 %v6813_v51  ;;  %v6895_v56 = vadd.f32 %v4796_v40, %v4795_v41 }
 0x144   : > { %3314 = vmatprep.mubr.bf16.mxu0 %v2840_v55 }
 0x145   : > { %5167 = vmatmul.mubr.bf16.gmra.mrb[8].mxu1 %v2946_v57 }
 0x146   : > { %v4686_v29 = vpop.f32.mrb[32].mxu0  ;;  %5170 = vmatprep.mubr.bf16.mxu1 %v2949_v3 }
 0x147   : > { %v4687_v39 = vpop.f32.mrb[33].mxu0  ;;  %v4798_v54 = vpop.f32.mrb[32].mxu1 }
 0x148   : > { %v4688_v25 = vadd.f32 %v4687_v39, %v4686_v29  ;;  %v4689_v61 = vpop.f32.mrb[34].mxu0  ;;  %v4799_v31 = vpop.f32.mrb[33].mxu1 }
 0x149   : > { %v4690_v10 = vpop.f32.mrb[35].mxu0  ;;  %v6898_v47 = vadd.f32 %v4799_v31, %v4798_v54  ;;  %v4801_v51 = vpop.f32.mrb[34].mxu1 }
 0x14a   : > { %v4691_v0 = vadd.f32 %v4690_v10, %v4689_v61  ;;  %v4802_v42 = vpop.f32.mrb[35].mxu1 }
 0x14b   : > { %3315 = vmatmul.mubr.bf16.gmra.mrb[140].mxu0 %v6844_v4  ;;  %v6902_v33 = vadd.f32 %v4802_v42, %v4801_v51 }
 0x14d   : > { %5171 = vmatmul.mubr.bf16.gmra.mrb[12].mxu1 %v2952_v63 }
 0x14e   : > { %v4692_v32 = vpop.f32.mrb[36].mxu0 }
 0x14f   : > { %v4693_v15 = vpop.f32.mrb[37].mxu0  ;;  %v4804_v52 = vpop.f32.mrb[36].mxu1 }
 0x150   : > { %v4694_v50 = vadd.f32 %v4693_v15, %v4692_v32  ;;  %v4695_v46 = vpop.f32.mrb[38].mxu0  ;;  %v4805_v59 = vpop.f32.mrb[37].mxu1 }
 0x151   : > { %v4696_v37 = vpop.f32.mrb[39].mxu0  ;;  %v6904_v9 = vadd.f32 %v4805_v59, %v4804_v52  ;;  %v4807_v19 = vpop.f32.mrb[38].mxu1  ;;  %v6925_v59 = vld [vmem:[%s7235_s2] ss:$0 sm:$0xff] }
 0x152   : > { %v4697_v30 = vadd.f32 %v4696_v37, %v4695_v46  ;;  %v4808_v11 = vpop.f32.mrb[39].mxu1 }
 0x153   : > { %v6906_v24 = vadd.f32 %v4808_v11, %v4807_v19 }
 0x156   : > { %v4698_v44 = vpop.f32.mrb[40].mxu0 }
 0x157   : > { %v4699_v28 = vpop.f32.mrb[41].mxu0  ;;  %v4810_v27 = vpop.f32.mrb[40].mxu1 }
 0x158   : > { %v4700_v4 = vadd.f32 %v4699_v28, %v4698_v44  ;;  %v4701_v2 = vpop.f32.mrb[42].mxu0  ;;  %v4811_v14 = vpop.f32.mrb[41].mxu1  ;;  %v5274_v44 = vadd.f32 %v4688_v25, %v6925_v59 }
 0x159   : > { %v4702_v58 = vpop.f32.mrb[43].mxu0  ;;  %v6908_v41 = vadd.f32 %v4811_v14, %v4810_v27  ;;  %v4813_v57 = vpop.f32.mrb[42].mxu1  ;;  %v5282_v14 = vadd.f32 %v4691_v0, %v6925_v59 }
 0x15a   : > { %v4703_v55 = vadd.f32 %v4702_v58, %v4701_v2  ;;  %v4814_v16 = vpop.f32.mrb[43].mxu1 }
 0x15b   : > { %v6910_v40 = vadd.f32 %v4814_v16, %v4813_v57 }
 0x15e   : > { %v4704_v3 = vpop.f32.mrb[44].mxu0 }
 0x15f   : > { %v4705_v29 = vpop.f32.mrb[45].mxu0  ;;  %v4816_v39 = vpop.f32.mrb[44].mxu1 }
 0x160   : > { %v6912_v48 = vadd.f32 %v4705_v29, %v4704_v3  ;;  %v4707_v22 = vpop.f32.mrb[46].mxu0  ;;  %v4817_v54 = vpop.f32.mrb[45].mxu1 }
 0x161   : > { %v4708_v61 = vpop.f32.mrb[47].mxu0  ;;  %v6916_v31 = vadd.f32 %v4817_v54, %v4816_v39  ;;  %v4819_v51 = vpop.f32.mrb[46].mxu1 }
 0x162   : > { %v6914_v10 = vadd.f32 %v4708_v61, %v4707_v22  ;;  %v4820_v63 = vpop.f32.mrb[47].mxu1 }
 0x163   : > { %v6918_v42 = vadd.f32 %v4820_v63, %v4819_v51  ;;  %v5270_v63 = vadd.f32 %v4694_v50, %v6925_v59 }
 0x166   : > { %v4710_v32 = vpop.f32.mrb[48].mxu0 }
 0x167   : > { %v4711_v15 = vpop.f32.mrb[49].mxu0  ;;  %v4822_v46 = vpop.f32.mrb[48].mxu1 }
 0x168   : > { %v6920_v52 = vadd.f32 %v4711_v15, %v4710_v32  ;;  %v4713_v37 = vpop.f32.mrb[50].mxu0  ;;  %v4823_v19 = vpop.f32.mrb[49].mxu1 }
 0x169   : > { %v4714_v11 = vpop.f32.mrb[51].mxu0  ;;  %v4824_v28 = vadd.f32 %v4823_v19, %v4822_v46  ;;  %v4825_v2 = vpop.f32.mrb[50].mxu1 }
 0x16a   : > { %v6928_v27 = vadd.f32 %v4714_v11, %v4713_v37  ;;  %v4826_v58 = vpop.f32.mrb[51].mxu1  ;;  %v5278_v37 = vadd.f32 %v4697_v30, %v6925_v59 }
 0x16b   : > { %v6931_v57 = vadd.f32 %v5274_v44, %v4824_v28  ;;  %v4827_v16 = vadd.f32 %v4826_v58, %v4825_v2 }
 0x16d   : > { %v6933_v3 = vadd.f32 %v5282_v14, %v4827_v16 }
 0x16e   : > { %v4716_v29 = vpop.f32.mrb[52].mxu0 }
 0x16f   : > { %v4717_v22 = vpop.f32.mrb[53].mxu0  ;;  %v4828_v39 = vpop.f32.mrb[52].mxu1 }
 0x170   : > { %v6935_v61 = vadd.f32 %v4717_v22, %v4716_v29  ;;  %v4719_v54 = vpop.f32.mrb[54].mxu0  ;;  %v4829_v51 = vpop.f32.mrb[53].mxu1  ;;  %v5290_v22 = vadd.f32 %v4700_v4, %v6925_v59 }
 0x171   : > { %v4720_v25 = vpop.f32.mrb[55].mxu0  ;;  %v4830_v32 = vadd.f32 %v4829_v51, %v4828_v39  ;;  %v4831_v15 = vpop.f32.mrb[54].mxu1 }
 0x172   : > { %v6938_v46 = vadd.f32 %v4720_v25, %v4719_v54  ;;  %v4832_v0 = vpop.f32.mrb[55].mxu1  ;;  %v5298_v25 = vadd.f32 %v4703_v55, %v6925_v59 }
 0x173   : > { %v6941_v19 = vadd.f32 %v5270_v63, %v4830_v32  ;;  %v4833_v11 = vadd.f32 %v4832_v0, %v4831_v15 }
 0x175   : > { %v6943_v44 = vadd.f32 %v5278_v37, %v4833_v11 }
 0x176   : > { %v4722_v28 = vpop.f32.mrb[56].mxu0 }
 0x177   : > { %7238 = vst [vmem:[#allocation2_spill] sm:$0xff] %v6943_v44  ;;  %v4723_v2 = vpop.f32.mrb[57].mxu0  ;;  %v4834_v58 = vpop.f32.mrb[56].mxu1 }
 0x178   : > { %v6945_v14 = vadd.f32 %v4723_v2, %v4722_v28  ;;  %v4725_v16 = vpop.f32.mrb[58].mxu0  ;;  %v4835_v29 = vpop.f32.mrb[57].mxu1 }
 0x179   : > { %v4726_v50 = vpop.f32.mrb[59].mxu0  ;;  %v4836_v39 = vadd.f32 %v4835_v29, %v4834_v58  ;;  %v4837_v54 = vpop.f32.mrb[58].mxu1  ;;  %v5286_v58 = vadd.f32 %v6912_v48, %v6925_v59  ;;  %v5195_v48 = vadd.f32 %v6685_v7, %v6925_v59  ;;  %v5306_v7 = vadd.f32 %v6920_v52, %v6925_v59 }
 0x17a   : > { %v6948_v51 = vadd.f32 %v4726_v50, %v4725_v16  ;;  %v4838_v30 = vpop.f32.mrb[59].mxu1 }
 0x17b   : > { %v6951_v63 = vadd.f32 %v5290_v22, %v4836_v39  ;;  %v4839_v32 = vadd.f32 %v4838_v30, %v4837_v54  ;;  %v5294_v22 = vadd.f32 %v6914_v10, %v6925_v59  ;;  %v5190_v30 = vadd.f32 %v6712_v17, %v6925_v59 }
 0x17d   : > { %v6953_v15 = vadd.f32 %v5298_v25, %v4839_v32 }
 0x17e   : > { %v4728_v0 = vpop.f32.mrb[60].mxu0 }
 0x17f   : > { %v4729_v37 = vpop.f32.mrb[61].mxu0  ;;  %v4840_v11 = vpop.f32.mrb[60].mxu1 }
 0x180   : > { %v6955_v28 = vadd.f32 %v4729_v37, %v4728_v0  ;;  %v4731_v2 = vpop.f32.mrb[62].mxu0  ;;  %v4841_v44 = vpop.f32.mrb[61].mxu1  ;;  %v5200_v37 = vadd.f32 %v6715_v62, %v6925_v59 }
 0x181   : > { %v4732_v4 = vpop.f32.mrb[63].mxu0  ;;  %v4842_v16 = vadd.f32 %v4841_v44, %v4840_v11  ;;  %v4843_v29 = vpop.f32.mrb[62].mxu1 }
 0x182   : > { %v6959_v50 = vadd.f32 %v4732_v4, %v4731_v2  ;;  %v4844_v55 = vpop.f32.mrb[63].mxu1  ;;  %v5205_v4 = vadd.f32 %v6693_v8, %v6925_v59  ;;  %v5314_v8 = vadd.f32 %v6928_v27, %v6925_v59  ;;  %v5220_v27 = vadd.f32 %v6781_v1, %v6925_v59 }
 0x183   : > { %v6963_v39 = vadd.f32 %v5286_v58, %v4842_v16  ;;  %v4845_v54 = vadd.f32 %v4844_v55, %v4843_v29 }
 0x185   : > { %v6967_v25 = vadd.f32 %v5294_v22, %v4845_v54 }
 0x186   : > { %v5048_v32 = vpop.f32.mrb[64].mxu0 }
 0x187   : > { %v5191_v44 = vadd.f32 %v5190_v30, %v5048_v32  ;;  %v1205_v0 = vpop.f32.mrb[65].mxu0 }
 0x188   : > { %v4846_v11 = vpop.f32.mrb[64].mxu1  ;;  %v5196_v2 = vadd.f32 %v5195_v48, %v1205_v0  ;;  %v5049_v10 = vpop.f32.mrb[66].mxu0 }
 0x189   : > { %v6976_v58 = vadd.f32 %v5191_v44, %v6848_v13  ;;  %v4847_v17 = vpop.f32.mrb[65].mxu1  ;;  %v5201_v16 = vadd.f32 %v5200_v37, %v5049_v10  ;;  %v1208_v29 = vpop.f32.mrb[67].mxu0 }
 0x18a   : > { %v6981_v55 = vadd.f32 %v5196_v2, %v6817_v35  ;;  %v4848_v22 = vadd.f32 %v4847_v17, %v4846_v11  ;;  %v4849_v62 = vpop.f32.mrb[66].mxu1  ;;  %v5206_v54 = vadd.f32 %v5205_v4, %v1208_v29  ;;  %v5210_v35 = vadd.f32 %v6774_v23, %v6925_v59 }
 0x18b   : > { %v6984_v30 = vadd.f32 %v5201_v16, %v6855_v43  ;;  %v4850_v32 = vpop.f32.mrb[67].mxu1  ;;  %v5215_v43 = vadd.f32 %v6740_v38, %v6925_v59  ;;  %v5302_v38 = vadd.f32 %v6935_v61, %v6925_v59 }
 0x18c   : > { %v6988_v13 = vadd.f32 %v5306_v7, %v4848_v22  ;;  %v6991_v48 = vadd.f32 %v5206_v54, %v6824_v20  ;;  %v4851_v44 = vadd.f32 %v4850_v32, %v4849_v62  ;;  %v5225_v20 = vadd.f32 %v6747_v18, %v6925_v59 }
 0x18d   : > { %v5310_v18 = vadd.f32 %v6938_v46, %v6925_v59  ;;  %v5240_v46 = vadd.f32 %v6846_v6, %v6925_v59 }
 0x18e   : > { %v6995_v52 = vadd.f32 %v5314_v8, %v4851_v44  ;;  %v5052_v0 = vpop.f32.mrb[68].mxu0 }
 0x18f   : > { %v5211_v37 = vadd.f32 %v5210_v35, %v5052_v0  ;;  %v1221_v11 = vpop.f32.mrb[69].mxu0 }
 0x190   : > { %v4852_v2 = vpop.f32.mrb[68].mxu1  ;;  %v5216_v10 = vadd.f32 %v5215_v43, %v1221_v11  ;;  %v5053_v4 = vpop.f32.mrb[70].mxu0 }
 0x191   : > { %v7004_v17 = vadd.f32 %v5211_v37, %v6889_v34  ;;  %v4853_v23 = vpop.f32.mrb[69].mxu1  ;;  %v5221_v16 = vadd.f32 %v5220_v27, %v5053_v4  ;;  %v1224_v29 = vpop.f32.mrb[71].mxu0 }
 0x192   : > { %v7009_v7 = vadd.f32 %v5216_v10, %v6872_v49  ;;  %v4854_v22 = vadd.f32 %v4853_v23, %v4852_v2  ;;  %v4855_v1 = vpop.f32.mrb[70].mxu1  ;;  %v5226_v62 = vadd.f32 %v5225_v20, %v1224_v29  ;;  %v5230_v49 = vadd.f32 %v6837_v21, %v6925_v59 }
 0x193   : > { %v7012_v54 = vadd.f32 %v5221_v16, %v6895_v56  ;;  %v4856_v32 = vpop.f32.mrb[71].mxu1  ;;  %v5235_v56 = vadd.f32 %v6806_v5, %v6925_v59  ;;  %v5322_v5 = vadd.f32 %v6945_v14, %v6925_v59 }
 0x194   : > { %v7016_v34 = vadd.f32 %v5302_v38, %v4854_v22  ;;  %v7019_v8 = vadd.f32 %v5226_v62, %v6879_v12  ;;  %v4857_v44 = vadd.f32 %v4856_v32, %v4855_v1  ;;  %v5245_v12 = vadd.f32 %v6815_v26, %v6925_v59 }
 0x195   : > { %v5330_v26 = vadd.f32 %v6948_v51, %v6925_v59  ;;  %v5260_v51 = vadd.f32 %v6887_v36, %v6925_v59 }
 0x196   : > { %v7023_v61 = vadd.f32 %v5310_v18, %v4857_v44  ;;  %v5056_v35 = vpop.f32.mrb[72].mxu0 }
 0x197   : > { %v5231_v0 = vadd.f32 %v5230_v49, %v5056_v35  ;;  %v1237_v43 = vpop.f32.mrb[73].mxu0 }
 0x198   : > { %v4858_v37 = vpop.f32.mrb[72].mxu1  ;;  %v5236_v11 = vadd.f32 %v5235_v56, %v1237_v43  ;;  %v5057_v27 = vpop.f32.mrb[74].mxu0 }
 0x199   : > { %v7032_v2 = vadd.f32 %v5231_v0, %v6904_v9  ;;  %v4859_v21 = vpop.f32.mrb[73].mxu1  ;;  %v5241_v10 = vadd.f32 %v5240_v46, %v5057_v27  ;;  %v1240_v4 = vpop.f32.mrb[75].mxu0 }
 0x19a   : > { %v7037_v20 = vadd.f32 %v5236_v11, %v6898_v47  ;;  %v4860_v23 = vadd.f32 %v4859_v21, %v4858_v37  ;;  %v4861_v6 = vpop.f32.mrb[74].mxu1  ;;  %v5246_v16 = vadd.f32 %v5245_v12, %v1240_v4  ;;  %v5250_v47 = vadd.f32 %v6884_v53, %v6925_v59 }
 0x19b   : > { %v7040_v29 = vadd.f32 %v5241_v10, %v6906_v24  ;;  %v4862_v38 = vpop.f32.mrb[75].mxu1  ;;  %v5255_v24 = vadd.f32 %v6864_v45, %v6925_v59  ;;  %v5318_v45 = vadd.f32 %v6955_v28, %v6925_v59 }
 0x19c   : > { %v7044_v9 = vadd.f32 %v5322_v5, %v4860_v23  ;;  %v7047_v22 = vadd.f32 %v5246_v16, %v6902_v33  ;;  %v4863_v1 = vadd.f32 %v4862_v38, %v4861_v6  ;;  %v5265_v33 = vadd.f32 %v6870_v60, %v6925_v59 }
 0x19d   : > { %v5326_v60 = vadd.f32 %v6959_v50, %v6925_v59 }
 0x19e   : > { %v7051_v14 = vadd.f32 %v5330_v26, %v4863_v1  ;;  %v5060_v62 = vpop.f32.mrb[76].mxu0 }
 0x19f   : > { %v5251_v32 = vadd.f32 %v5250_v47, %v5060_v62  ;;  %v1253_v18 = vpop.f32.mrb[77].mxu0 }
 0x1a0   : > { %v4864_v44 = vpop.f32.mrb[76].mxu1  ;;  %v5256_v49 = vadd.f32 %v5255_v24, %v1253_v18  ;;  %v5061_v35 = vpop.f32.mrb[78].mxu0 }
 0x1a1   : > { %v7060_v56 = vadd.f32 %v5251_v32, %v6916_v31  ;;  %v4865_v53 = vpop.f32.mrb[77].mxu1  ;;  %v5261_v0 = vadd.f32 %v5260_v51, %v5061_v35  ;;  %v1256_v43 = vpop.f32.mrb[79].mxu0 }
 0x1a2   : > { %v7065_v46 = vadd.f32 %v5256_v49, %v6908_v41  ;;  %v4866_v37 = vadd.f32 %v4865_v53, %v4864_v44  ;;  %v4867_v36 = vpop.f32.mrb[78].mxu1  ;;  %v5266_v11 = vadd.f32 %v5265_v33, %v1256_v43 }
 0x1a3   : > { %v7068_v27 = vadd.f32 %v5261_v0, %v6918_v42  ;;  %v4868_v12 = vpop.f32.mrb[79].mxu1 }
 0x1a4   : > { %v7072_v31 = vadd.f32 %v5318_v45, %v4866_v37  ;;  %v5267_v21 = vadd.f32 %v5266_v11, %v6910_v40  ;;  %v4869_v10 = vadd.f32 %v4868_v12, %v4867_v36 }
 0x1a6   : > { %v7075_v4 = vadd.f32 %v5326_v60, %v4869_v10  ;;  %v4910_v28 = vpop.f32.mrb[80].mxu0 }
 0x1a7   : > { %v4911_v41 = vpop.f32.mrb[81].mxu0 }
 0x1a8   : > { %v4912_v5 = vadd.f32 %v4911_v41, %v4910_v28  ;;  %v4913_v23 = vpop.f32.mrb[82].mxu0 }
 0x1a9   : > { %v4914_v6 = vpop.f32.mrb[83].mxu0 }
 0x1aa   : > { %v4915_v16 = vadd.f32 %v4914_v6, %v4913_v23  ;;  %v7078_v42 = vadd.f32 %v6981_v55, %v4912_v5 }
 0x1ac   : > { %v7081_v38 = vadd.f32 %v6991_v48, %v4915_v16 }
 0x1ae   : > { %v4916_v59 = vpop.f32.mrb[84].mxu0 }
 0x1af   : > { %v4917_v50 = vpop.f32.mrb[85].mxu0 }
 0x1b0   : > { %v4918_v26 = vadd.f32 %v4917_v50, %v4916_v59  ;;  %v4919_v1 = vpop.f32.mrb[86].mxu0 }
 0x1b1   : > { %v4920_v40 = vpop.f32.mrb[87].mxu0 }
 0x1b2   : > { %v4921_v47 = vadd.f32 %v4920_v40, %v4919_v1  ;;  %v5193_v62 = vadd.f32 %v6976_v58, %v4918_v26 }
 0x1b4   : > { %v7085_v24 = vadd.f32 %v6984_v30, %v4921_v47 }
 0x1b6   : > { %v4922_v32 = vpop.f32.mrb[88].mxu0 }
 0x1b7   : > { %v4923_v18 = vpop.f32.mrb[89].mxu0 }
 0x1b8   : > { %v4924_v51 = vadd.f32 %v4923_v18, %v4922_v32  ;;  %v4925_v44 = vpop.f32.mrb[90].mxu0 }
 0x1b9   : > { %v4926_v55 = vpop.f32.mrb[91].mxu0 }
 0x1ba   : > { %v4927_v49 = vadd.f32 %v4926_v55, %v4925_v44  ;;  %v7088_v48 = vadd.f32 %v7009_v7, %v4924_v51 }
 0x1bc   : > { %v7091_v35 = vadd.f32 %v7019_v8, %v4927_v49 }
 0x1be   : > { %v4928_v33 = vpop.f32.mrb[92].mxu0 }
 0x1bf   : > { %v4929_v53 = vpop.f32.mrb[93].mxu0 }
 0x1c0   : > { %v4930_v0 = vadd.f32 %v4929_v53, %v4928_v33  ;;  %v4931_v43 = vpop.f32.mrb[94].mxu0  ;;  %v4449_v33 = vld [vmem:[%s7122_s22] sm:$0xff]  }
 0x1c1   : > { %v4932_v58 = vpop.f32.mrb[95].mxu0 }
 0x1c2   : > { %v4933_v45 = vadd.f32 %v4932_v58, %v4931_v43  ;;  %v7094_v30 = vadd.f32 %v7004_v17, %v4930_v0 }
 0x1c4   : > { %v7097_v37 = vadd.f32 %v7012_v54, %v4933_v45 }
 0x1c6   : > { %v4934_v36 = vpop.f32.mrb[96].mxu0 }
 0x1c7   : > { %v4935_v11 = vpop.f32.mrb[97].mxu0 }
 0x1c8   : > { %v4936_v12 = vadd.f32 %v4935_v11, %v4934_v36  ;;  %v4937_v7 = vpop.f32.mrb[98].mxu0  ;;  %v4450_v36 = vunpack.c.l.bf16 %v4449_v33 }
 0x1c9   : > { %v4938_v60 = vpop.f32.mrb[99].mxu0 }
 0x1ca   : > { %v4939_v10 = vadd.f32 %v4938_v60, %v4937_v7  ;;  %v7100_v8 = vadd.f32 %v7037_v20, %v4936_v12 }
 0x1cc   : > { %v7103_v28 = vadd.f32 %v7047_v22, %v4939_v10 }
 0x1ce   : > { %v4940_v41 = vpop.f32.mrb[100].mxu0 }
 0x1cf   : > { %v4941_v5 = vpop.f32.mrb[101].mxu0 }
 0x1d0   : > { %v4942_v17 = vadd.f32 %v4941_v5, %v4940_v41  ;;  %v4943_v23 = vpop.f32.mrb[102].mxu0 }
 0x1d1   : > { %v4944_v6 = vpop.f32.mrb[103].mxu0 }
 0x1d2   : > { %v4945_v54 = vadd.f32 %v4944_v6, %v4943_v23  ;;  %v7106_v16 = vadd.f32 %v7032_v2, %v4942_v17 }
 0x1d4   : > { %v7109_v59 = vadd.f32 %v7040_v29, %v4945_v54 }
 0x1d6   : > { %v4946_v50 = vpop.f32.mrb[104].mxu0 }
 0x1d7   : > { %v4947_v20 = vpop.f32.mrb[105].mxu0 }
 0x1d8   : > { %v4948_v26 = vadd.f32 %v4947_v20, %v4946_v50  ;;  %v4949_v1 = vpop.f32.mrb[106].mxu0  ;;  %v4594_v20 = vld [vmem:[%s7122_s22 + $0x18] sm:$0xff]  }
 0x1d9   : > { %v4950_v22 = vpop.f32.mrb[107].mxu0 }
 0x1da   : > { %v4951_v40 = vadd.f32 %v4950_v22, %v4949_v1  ;;  %v7112_v47 = vadd.f32 %v7065_v46, %v4948_v26 }
 0x1dc   : > { %v7114_v32 = vadd.f32 %v5267_v21, %v4951_v40  ;;  %v4592_v21 = vld [vmem:[%s7122_s22 + $0x8] sm:$0xff]  }
 0x1dd   : > { %v4454_v0 = vunpack.c.l.bf16 %v4592_v21  ;;  %v4455_v60 = vunpack.c.h.bf16 %v4592_v21 }
 0x1de   : > { %v4952_v18 = vpop.f32.mrb[108].mxu0 }
 0x1df   : > { %v4953_v51 = vpop.f32.mrb[109].mxu0 }
 0x1e0   : > { %v4954_v2 = vadd.f32 %v4953_v51, %v4952_v18  ;;  %v4955_v44 = vpop.f32.mrb[110].mxu0 }
 0x1e1   : > { %v4956_v55 = vpop.f32.mrb[111].mxu0 }
 0x1e2   : > { %v4957_v29 = vadd.f32 %v4956_v55, %v4955_v44  ;;  %v7125_v46 = vadd.f32 %v7060_v56, %v4954_v2 }
 0x1e4   : > { %v7129_v49 = vadd.f32 %v7068_v27, %v4957_v29  ;;  %v4451_v27 = vunpack.c.h.bf16 %v4449_v33 }
 0x1e6   : > { %v4958_v53 = vpop.f32.mrb[112].mxu0 }
 0x1e7   : > { %v4959_v43 = vpop.f32.mrb[113].mxu0 }
 0x1e8   : > { %v5144_v58 = vpop.f32.mrb[80].mxu1  ;;  %v4960_v45 = vadd.f32 %v4959_v43, %v4958_v53  ;;  %v4961_v11 = vpop.f32.mrb[114].mxu0 }
 0x1e9   : > { %v5194_v12 = vadd.f32 %v5193_v62, %v5144_v58  ;;  %v3357_v7 = vpop.f32.mrb[81].mxu1  ;;  %v4962_v10 = vpop.f32.mrb[115].mxu0 }
 0x1ea   : > { %v5199_v56 = vadd.f32 %v7078_v42, %v3357_v7  ;;  %v5145_v41 = vpop.f32.mrb[82].mxu1  ;;  %v4963_v5 = vadd.f32 %v4962_v10, %v4961_v11  ;;  %v7134_v17 = vadd.f32 %v6931_v57, %v4960_v45  ;;  %v4593_v42 = vld [vmem:[%s7122_s22 + $0x10] sm:$0xff]   ;;  %v4462_v57 = vunpack.c.l.bf16 %v4594_v20 }
 0x1eb   : > { %v3582_v23 = vadd.f32 %v5194_v12, %v4454_v0  ;;  %v5204_v6 = vadd.f32 %v7085_v24, %v5145_v41  ;;  %v3360_v54 = vpop.f32.mrb[83].mxu1  ;;  %v4458_v55 = vunpack.c.l.bf16 %v4593_v42  ;;  %v4463_v0 = vunpack.c.h.bf16 %v4594_v20 }
 0x1ec   : > { %v3580_v50 = vadd.f32 %v5199_v56, %v4450_v36  ;;  %v5209_v62 = vadd.f32 %v7081_v38, %v3360_v54  ;;  %v7140_v26 = vadd.f32 %v6933_v3, %v4963_v5  ;;  %v4459_v58 = vunpack.c.h.bf16 %v4593_v42  ;;  %v4596_v5 = vld [vmem:[%s7122_s22 + $0x28] sm:$0xff]  }
 0x1ed   : > { %v3583_v1 = vadd.f32 %v5204_v6, %v4455_v60  ;;  %v3614_v18 = vmax.f32 %v3582_v23, 0.0  ;;  %v4470_v20 = vunpack.c.l.bf16 %v4596_v5 }
 0x1ee   : > { %v3581_v22 = vadd.f32 %v5209_v62, %v4451_v27  ;;  %v4964_v40 = vpop.f32.mrb[116].mxu0  ;;  %v3612_v44 = vmax.f32 %v3580_v50, 0.0  ;;  %v7239_v27 = vld [vmem:[#allocation2_spill] sm:$0xff] }
 0x1ef   : > { %v3615_v51 = vmax.f32 %v3583_v1, 0.0  ;;  %v4965_v2 = vpop.f32.mrb[117].mxu0 }
 0x1f0   : > { %v3613_v38 = vmax.f32 %v3581_v22, 0.0  ;;  %v5148_v24 = vpop.f32.mrb[84].mxu1  ;;  %v4966_v3 = vadd.f32 %v4965_v2, %v4964_v40  ;;  %v4967_v29 = vpop.f32.mrb[118].mxu0 }
 0x1f1   : > { %v4520_v21 = vpack.c.bf16 %v3615_v51, %v3614_v18  ;;  %v5214_v33 = vadd.f32 %v7094_v30, %v5148_v24  ;;  %v3373_v53 = vpop.f32.mrb[85].mxu1  ;;  %v4968_v43 = vpop.f32.mrb[119].mxu0 }
 0x1f2   : > { %v4515_v45 = vpack.c.bf16 %v3613_v38, %v3612_v44  ;;  %v5219_v36 = vadd.f32 %v7088_v48, %v3373_v53  ;;  %v5149_v11 = vpop.f32.mrb[86].mxu1  ;;  %v4969_v12 = vadd.f32 %v4968_v43, %v4967_v29  ;;  %v7153_v7 = vadd.f32 %v6941_v19, %v4966_v3  ;;  %v4595_v48 = vld [vmem:[%s7122_s22 + $0x20] sm:$0xff]  }
 0x1f3   : > { %4607 = vst [vmem:[%s7148_s25 + $0x8] sm:$0xff] %v4520_v21   ;;  %v3586_v60 = vadd.f32 %v5214_v33, %v4462_v57  ;;  %v5224_v10 = vadd.f32 %v7097_v37, %v5149_v11  ;;  %v3376_v56 = vpop.f32.mrb[87].mxu1  ;;  %v4466_v18 = vunpack.c.l.bf16 %v4595_v48  ;;  %v4471_v44 = vunpack.c.h.bf16 %v4596_v5 }
 0x1f4   : > { %4516 = vst [vmem:[%s7148_s25] sm:$0xff] %v4515_v45   ;;  %v3584_v30 = vadd.f32 %v5219_v36, %v4458_v55  ;;  %v5229_v41 = vadd.f32 %v7091_v35, %v3376_v56  ;;  %v7161_v23 = vadd.f32 %v7239_v27, %v4969_v12  ;;  %v4467_v24 = vunpack.c.h.bf16 %v4595_v48  ;;  %v4598_v45 = vld [vmem:[%s7122_s22 + $0x38] sm:$0xff]  }
 0x1f5   : > { %v3587_v6 = vadd.f32 %v5224_v10, %v4463_v0  ;;  %v3618_v62 = vmax.f32 %v3586_v60, 0.0  ;;  %v4478_v56 = vunpack.c.l.bf16 %v4598_v45 }
 0x1f6   : > { %v3585_v54 = vadd.f32 %v5229_v41, %v4459_v58  ;;  %v4970_v50 = vpop.f32.mrb[120].mxu0  ;;  %v3616_v42 = vmax.f32 %v3584_v30, 0.0 }
 0x1f7   : > { %v3619_v19 = vmax.f32 %v3587_v6, 0.0  ;;  %v4971_v1 = vpop.f32.mrb[121].mxu0 }
 0x1f8   : > { %v3617_v22 = vmax.f32 %v3585_v54, 0.0  ;;  %v5152_v37 = vpop.f32.mrb[88].mxu1  ;;  %v4972_v40 = vadd.f32 %v4971_v1, %v4970_v50  ;;  %v4973_v51 = vpop.f32.mrb[122].mxu0  ;;  %v4479_v50 = vunpack.c.h.bf16 %v4598_v45 }
 0x1f9   : > { %v4530_v35 = vpack.c.bf16 %v3619_v19, %v3618_v62  ;;  %v5234_v57 = vadd.f32 %v7106_v16, %v5152_v37  ;;  %v3389_v2 = vpop.f32.mrb[89].mxu1  ;;  %v4974_v38 = vpop.f32.mrb[123].mxu0 }
 0x1fa   : > { %v4525_v3 = vpack.c.bf16 %v3617_v22, %v3616_v42  ;;  %v5239_v55 = vadd.f32 %v7100_v8, %v3389_v2  ;;  %v5153_v29 = vpop.f32.mrb[90].mxu1  ;;  %v4975_v21 = vadd.f32 %v4974_v38, %v4973_v51  ;;  %v7167_v33 = vadd.f32 %v6951_v63, %v4972_v40  ;;  %v4597_v8 = vld [vmem:[%s7122_s22 + $0x30] sm:$0xff]   ;;  %v4599_v38 = vld [vmem:[%s7122_s22 + $0x40] sm:$0xff]  }
 0x1fb   : > { %4609 = vst [vmem:[%s7148_s25 + $0x18] sm:$0xff] %v4530_v35   ;;  %v3590_v53 = vadd.f32 %v5234_v57, %v4470_v20  ;;  %v5244_v0 = vadd.f32 %v7109_v59, %v5153_v29  ;;  %v3392_v43 = vpop.f32.mrb[91].mxu1  ;;  %v4474_v6 = vunpack.c.l.bf16 %v4597_v8  ;;  %v4475_v19 = vunpack.c.h.bf16 %v4597_v8  ;;  %v4600_v57 = vld [vmem:[%s7122_s22 + $0x48] sm:$0xff]  }
 0x1fc   : > { %4608 = vst [vmem:[%s7148_s25 + $0x10] sm:$0xff] %v4525_v3   ;;  %v3588_v16 = vadd.f32 %v5239_v55, %v4466_v18  ;;  %v5249_v58 = vadd.f32 %v7103_v28, %v3392_v43  ;;  %v7175_v36 = vadd.f32 %v6953_v15, %v4975_v21  ;;  %v4486_v29 = vunpack.c.l.bf16 %v4600_v57 }
 0x1fd   : > { %v3591_v11 = vadd.f32 %v5244_v0, %v4471_v44  ;;  %v3622_v10 = vmax.f32 %v3590_v53, 0.0  ;;  %v4482_v43 = vunpack.c.l.bf16 %v4599_v38  ;;  %v4487_v45 = vunpack.c.h.bf16 %v4600_v57 }
 0x1fe   : > { %v3589_v12 = vadd.f32 %v5249_v58, %v4467_v24  ;;  %v4976_v60 = vpop.f32.mrb[124].mxu0  ;;  %v3620_v41 = vmax.f32 %v3588_v16, 0.0  ;;  %v4483_v8 = vunpack.c.h.bf16 %v4599_v38 }
 0x1ff   : > { %v3623_v63 = vmax.f32 %v3591_v11, 0.0  ;;  %v4977_v30 = vpop.f32.mrb[125].mxu0 }
 0x200   : > { %v3621_v5 = vmax.f32 %v3589_v12, 0.0  ;;  %v5156_v59 = vpop.f32.mrb[92].mxu1  ;;  %v4978_v27 = vadd.f32 %v4977_v30, %v4976_v60  ;;  %v4979_v48 = vpop.f32.mrb[126].mxu0 }
 0x201   : > { %v4540_v28 = vpack.c.bf16 %v3623_v63, %v3622_v10  ;;  %v5254_v15 = vadd.f32 %v7125_v46, %v5156_v59  ;;  %v3405_v54 = vpop.f32.mrb[93].mxu1  ;;  %v4980_v62 = vpop.f32.mrb[127].mxu0 }
 0x202   : > { %v4535_v20 = vpack.c.bf16 %v3621_v5, %v3620_v41  ;;  %v5259_v1 = vadd.f32 %v7112_v47, %v3405_v54  ;;  %v5157_v42 = vpop.f32.mrb[94].mxu1  ;;  %v4981_v22 = vadd.f32 %v4980_v62, %v4979_v48  ;;  %v5288_v37 = vadd.f32 %v6963_v39, %v4978_v27  ;;  %v4602_v27 = vld [vmem:[%s7122_s22 + $0x58] sm:$0xff]  }
 0x203   : > { %4611 = vst [vmem:[%s7148_s25 + $0x28] sm:$0xff] %v4540_v28   ;;  %v3594_v40 = vadd.f32 %v5254_v15, %v4478_v56  ;;  %v5264_v18 = vadd.f32 %v7129_v49, %v5157_v42  ;;  %v3408_v51 = vpop.f32.mrb[95].mxu1 }
 0x204   : > { %4610 = vst [vmem:[%s7148_s25 + $0x20] sm:$0xff] %v4535_v20   ;;  %v3592_v46 = vadd.f32 %v5259_v1, %v4474_v6  ;;  %v5269_v35 = vadd.f32 %v7114_v32, %v3408_v51  ;;  %v5296_v2 = vadd.f32 %v6967_v25, %v4981_v22 }
 0x205   : > { %v3595_v44 = vadd.f32 %v5264_v18, %v4479_v50  ;;  %v3626_v3 = vmax.f32 %v3594_v40, 0.0  ;;  %v4494_v50 = vunpack.c.l.bf16 %v4602_v27  ;;  %v4495_v18 = vunpack.c.h.bf16 %v4602_v27 }
 0x206   : > { %v3593_v24 = vadd.f32 %v5269_v35, %v4475_v19  ;;  %v4982_v47 = vpop.f32.mrb[128].mxu0  ;;  %v3624_v21 = vmax.f32 %v3592_v46, 0.0 }
 0x207   : > { %v3627_v55 = vmax.f32 %v3595_v44, 0.0  ;;  %v4983_v39 = vpop.f32.mrb[129].mxu0 }
 0x208   : > { %v3625_v53 = vmax.f32 %v3593_v24, 0.0  ;;  %v5160_v49 = vpop.f32.mrb[0].mxu1  ;;  %v4984_v0 = vadd.f32 %v4983_v39, %v4982_v47  ;;  %v4985_v16 = vpop.f32.mrb[130].mxu0  ;;  %v4604_v39 = vld [vmem:[%s7122_s22 + $0x68] sm:$0xff]  }
 0x209   : > { %v4550_v32 = vpack.c.bf16 %v3627_v55, %v3626_v3  ;;  %v5273_v58 = vadd.f32 %v7153_v7, %v5160_v49  ;;  %v3421_v25 = vpop.f32.mrb[1].mxu1  ;;  %v4986_v11 = vpop.f32.mrb[131].mxu0  ;;  %v4603_v49 = vld [vmem:[%s7122_s22 + $0x60] sm:$0xff]  }
 0x20a   : > { %v4545_v12 = vpack.c.bf16 %v3625_v53, %v3624_v21  ;;  %v5277_v60 = vadd.f32 %v7134_v17, %v3421_v25  ;;  %v5161_v10 = vpop.f32.mrb[2].mxu1  ;;  %v4987_v63 = vadd.f32 %v4986_v11, %v4985_v16  ;;  %v7191_v56 = vadd.f32 %v6988_v13, %v4984_v0  ;;  %v4601_v17 = vld [vmem:[%s7122_s22 + $0x50] sm:$0xff]  }
 0x20b   : > { %4613 = vst [vmem:[%s7148_s25 + $0x38] sm:$0xff] %v4550_v32   ;;  %v3598_v30 = vadd.f32 %v5273_v58, %v4486_v29  ;;  %v5281_v41 = vadd.f32 %v7161_v23, %v5161_v10  ;;  %v3424_v5 = vpop.f32.mrb[3].mxu1  ;;  %v4490_v42 = vunpack.c.l.bf16 %v4601_v17  ;;  %v4491_v46 = vunpack.c.h.bf16 %v4601_v17 }
 0x20c   : > { %4612 = vst [vmem:[%s7148_s25 + $0x30] sm:$0xff] %v4545_v12   ;;  %v3596_v7 = vadd.f32 %v5277_v60, %v4482_v43  ;;  %v5285_v59 = vadd.f32 %v7140_v26, %v3424_v5  ;;  %v7199_v6 = vadd.f32 %v6995_v52, %v4987_v63  ;;  %v4502_v32 = vunpack.c.l.bf16 %v4604_v39 }
 0x20d   : > { %v3599_v48 = vadd.f32 %v5281_v41, %v4487_v45  ;;  %v3630_v54 = vmax.f32 %v3598_v30, 0.0  ;;  %v4498_v11 = vunpack.c.l.bf16 %v4603_v49  ;;  %v4499_v63 = vunpack.c.h.bf16 %v4603_v49 }
 0x20e   : > { %v3597_v28 = vadd.f32 %v5285_v59, %v4483_v8  ;;  %v4988_v15 = vpop.f32.mrb[132].mxu0  ;;  %v3628_v19 = vmax.f32 %v3596_v7, 0.0 }
 0x20f   : > { %v3631_v13 = vmax.f32 %v3599_v48, 0.0  ;;  %v4989_v62 = vpop.f32.mrb[133].mxu0 }
 0x210   : > { %v3629_v20 = vmax.f32 %v3597_v28, 0.0  ;;  %v5164_v23 = vpop.f32.mrb[4].mxu1  ;;  %v4990_v1 = vadd.f32 %v4989_v62, %v4988_v15  ;;  %v4991_v22 = vpop.f32.mrb[134].mxu0 }
 0x211   : > { %v4560_v26 = vpack.c.bf16 %v3631_v13, %v3630_v54  ;;  %v5289_v40 = vadd.f32 %v5288_v37, %v5164_v23  ;;  %v3437_v52 = vpop.f32.mrb[5].mxu1  ;;  %v4992_v51 = vpop.f32.mrb[135].mxu0 }
 0x212   : > { %v4555_v35 = vpack.c.bf16 %v3629_v20, %v3628_v19  ;;  %v5293_v57 = vadd.f32 %v7167_v33, %v3437_v52  ;;  %v5165_v44 = vpop.f32.mrb[6].mxu1  ;;  %v4993_v38 = vadd.f32 %v4992_v51, %v4991_v22  ;;  %v5304_v24 = vadd.f32 %v7016_v34, %v4990_v1 }
 0x213   : > { %4615 = vst [vmem:[%s7148_s25 + $0x48] sm:$0xff] %v4560_v26   ;;  %v3602_v47 = vadd.f32 %v5289_v40, %v4494_v50  ;;  %v5297_v3 = vadd.f32 %v5296_v2, %v5165_v44  ;;  %v3440_v55 = vpop.f32.mrb[7].mxu1  ;;  %v4605_v50 = vld [vmem:[%s7122_s22 + $0x70] sm:$0xff]  }
 0x214   : > { %4614 = vst [vmem:[%s7148_s25 + $0x40] sm:$0xff] %v4555_v35   ;;  %v3600_v29 = vadd.f32 %v5293_v57, %v4490_v42  ;;  %v5301_v37 = vadd.f32 %v7175_v36, %v3440_v55  ;;  %v5312_v21 = vadd.f32 %v7023_v61, %v4993_v38  ;;  %v4503_v61 = vunpack.c.h.bf16 %v4604_v39 }
 0x215   : > { %v3603_v53 = vadd.f32 %v5297_v3, %v4495_v18  ;;  %v3634_v33 = vmax.f32 %v3602_v47, 0.0  ;;  %v4506_v40 = vunpack.c.l.bf16 %v4605_v50 }
 0x216   : > { %v3601_v0 = vadd.f32 %v5301_v37, %v4491_v46  ;;  %v4994_v43 = vpop.f32.mrb[136].mxu0  ;;  %v3632_v34 = vmax.f32 %v3600_v29, 0.0  ;;  %v4507_v46 = vunpack.c.h.bf16 %v4605_v50 }
 0x217   : > { %v3635_v16 = vmax.f32 %v3603_v53, 0.0  ;;  %v4995_v58 = vpop.f32.mrb[137].mxu0 }
 0x218   : > { %v3633_v25 = vmax.f32 %v3601_v0, 0.0  ;;  %v5168_v2 = vpop.f32.mrb[8].mxu1  ;;  %v4996_v45 = vadd.f32 %v4995_v58, %v4994_v43  ;;  %v4997_v8 = vpop.f32.mrb[138].mxu0 }
 0x219   : > { %v4570_v36 = vpack.c.bf16 %v3635_v16, %v3634_v33  ;;  %v5305_v12 = vadd.f32 %v5304_v24, %v5168_v2  ;;  %v3453_v60 = vpop.f32.mrb[9].mxu1  ;;  %v4998_v10 = vpop.f32.mrb[139].mxu0 }
 0x21a   : > { %v4565_v30 = vpack.c.bf16 %v3633_v25, %v3632_v34  ;;  %v5309_v41 = vadd.f32 %v7191_v56, %v3453_v60  ;;  %v5169_v5 = vpop.f32.mrb[10].mxu1  ;;  %v4999_v7 = vadd.f32 %v4998_v10, %v4997_v8  ;;  %v5324_v59 = vadd.f32 %v7044_v9, %v4996_v45  ;;  %v4606_v56 = vld [vmem:[%s7122_s22 + $0x78] sm:$0xff]  }
 0x21b   : > { %4617 = vst [vmem:[%s7148_s25 + $0x58] sm:$0xff] %v4570_v36   ;;  %v3606_v27 = vadd.f32 %v5305_v12, %v4502_v32  ;;  %v5313_v48 = vadd.f32 %v5312_v21, %v5169_v5  ;;  %v3456_v17 = vpop.f32.mrb[11].mxu1  ;;  %v4511_v47 = vunpack.c.h.bf16 %v4606_v56 }
 0x21c   : > { %4616 = vst [vmem:[%s7148_s25 + $0x50] sm:$0xff] %v4565_v30   ;;  %v3604_v28 = vadd.f32 %v5309_v41, %v4498_v11  ;;  %v5317_v15 = vadd.f32 %v7199_v6, %v3456_v17  ;;  %v5332_v54 = vadd.f32 %v7051_v14, %v4999_v7  ;;  %v4510_v6 = vunpack.c.l.bf16 %v4606_v56 }
 0x21d   : > { %v3607_v13 = vadd.f32 %v5313_v48, %v4503_v61  ;;  %v3638_v20 = vmax.f32 %v3606_v27, 0.0 }
 0x21e   : > { %v3605_v62 = vadd.f32 %v5317_v15, %v4499_v63  ;;  %v5000_v19 = vpop.f32.mrb[140].mxu0  ;;  %v3636_v42 = vmax.f32 %v3604_v28, 0.0 }
 0x21f   : > { %v3639_v23 = vmax.f32 %v3607_v13, 0.0  ;;  %v5001_v1 = vpop.f32.mrb[141].mxu0 }
 0x220   : > { %v3637_v9 = vmax.f32 %v3605_v62, 0.0  ;;  %v5172_v22 = vpop.f32.mrb[12].mxu1  ;;  %v5002_v26 = vadd.f32 %v5001_v1, %v5000_v19  ;;  %v5003_v52 = vpop.f32.mrb[142].mxu0 }
 0x221   : > { %v4580_v18 = vpack.c.bf16 %v3639_v23, %v3638_v20  ;;  %v3469_v51 = vpop.f32.mrb[13].mxu1  ;;  %v5004_v14 = vpop.f32.mrb[143].mxu0 }
 0x222   : > { %v4575_v35 = vpack.c.bf16 %v3637_v9, %v3636_v42  ;;  %v5320_v57 = vadd.f32 %v7072_v31, %v5002_v26  ;;  %v5325_v44 = vadd.f32 %v5324_v59, %v3469_v51  ;;  %v5173_v38 = vpop.f32.mrb[14].mxu1  ;;  %v5005_v24 = vadd.f32 %v5004_v14, %v5003_v52 }
 0x223   : > { %4619 = vst [vmem:[%s7148_s25 + $0x68] sm:$0xff] %v4580_v18   ;;  %v3472_v3 = vpop.f32.mrb[15].mxu1 }
 0x224   : > { %4618 = vst [vmem:[%s7148_s25 + $0x60] sm:$0xff] %v4575_v35   ;;  %v5321_v55 = vadd.f32 %v5320_v57, %v5172_v22  ;;  %v3608_v29 = vadd.f32 %v5325_v44, %v4506_v40  ;;  %v5328_v37 = vadd.f32 %v7075_v4, %v5005_v24  ;;  %v5333_v39 = vadd.f32 %v5332_v54, %v3472_v3 }
 0x226   : > { %v3610_v21 = vadd.f32 %v5321_v55, %v4510_v6  ;;  %v5329_v53 = vadd.f32 %v5328_v37, %v5173_v38  ;;  %v3609_v49 = vadd.f32 %v5333_v39, %v4507_v46  ;;  %v3640_v0 = vmax.f32 %v3608_v29, 0.0 }
 0x228   : > { %v3611_v43 = vadd.f32 %v5329_v53, %v4511_v47  ;;  %v3641_v31 = vmax.f32 %v3609_v49, 0.0  ;;  %v3642_v33 = vmax.f32 %v3610_v21, 0.0 }
 0x22a   : > { %v3643_v16 = vmax.f32 %v3611_v43, 0.0  ;;  %v4585_v32 = vpack.c.bf16 %v3641_v31, %v3640_v0 }
 0x22c   : > { %v4590_v58 = vpack.c.bf16 %v3643_v16, %v3642_v33  ;;  %4620 = vst [vmem:[%s7148_s25 + $0x70] sm:$0xff] %v4585_v32  }
 0x22e   : > { %4621 = vst [vmem:[%s7148_s25 + $0x78] sm:$0xff] %v4590_v58  }
 0x22f PF: > { %s14_s17 = sadd.s32 1, %s5664_s17   ;;  %s7240_s15 = smov %s5660_s16 }
 0x230   : > { %p11_p5 = scmp.ge.s32.totalorder %s14_s17, 4   ;;  %s7241_s16 = smov %s7243_s18 }
 0x232   :  { %13 = sbr.rel (!%p11_p5) target bundleno = 2 (0x2), region = 79 }

// kernel: a_call__.7
= control target key start
LH: loop header
LB: loop body
LE: loop exit
PB: predicated region body
PF: predicated region fallthrough
CT: control target
= control target key end

     0   :  { %s5432_s12 = smov 0   ;;  %s5434_s13 = smov 0   ;;  %s6940_s0 = inlined_call_operand.vmem [shape: bf16[2,18,18,128], index: 0, kind: input, shape index: {}]   ;;  %s6941_s1 = inlined_call_operand.vmem [shape: bf16[3,384,128], index: 1, kind: input, shape index: {}]   ;;  %s6942_s2 = inlined_call_operand.vmem [shape: f32[1,128], index: 2, kind: input, shape index: {}]   ;;  %s6943_s3 = inlined_call_operand.vmem [shape: bf16[2,16,16,128], index: 3, kind: output, shape index: {}]  }
   0x1   :  { %s5436_s14 = smov 0  }
   0x2 LB: > { %s25_s15 = sadd.s32 1, %s5406_s13  ;;  %p3761_p0 = scmp.ge.s32.totalorder %s5410_s14, 1  ;;  %s5410_s14 = sphi %s5436_s14, %s13_s14   ;;  %s5406_s13 = sphi %s5434_s13, %s6947_s13   ;;  %s5402_s12 = sphi %s5432_s12, %s6946_s12  }
   0x3   : > { %p27_p1 = scmp.ge.s32.totalorder %s25_s15, 2  ;;  %p168_p2 = scmp.lt.s32.totalorder %s5410_s14, 3 }
   0x5   : > { %s6949_s15 = smov (%p27_p1, %s25_s15), 0  ;;  %p169_p3 = pnand %p3761_p0, %p168_p2 }
   0x7   : > { %172 = sbr.rel (%p169_p3) target bundleno = 557 (0x22d), region = 32 }
   0xe   : > { %v5153_v0 = vld [vmem:[%s6941_s1 + $0x40] sm:$0xff]   ;;  %v5156_v3 = vld [vmem:[%s6941_s1 + $0x48] sm:$0xff]   ;;  %v5159_v6 = vld [vmem:[%s6941_s1 + $0x50] sm:$0xff]   ;;  %p202_p4 = scmp.lt.s32.totalorder %s5402_s12, 1  ;;  %vm695_vm0 = vcmask 1046528  }
   0xf   : > { %v5458_v1 = vld [vmem:[%s6941_s1 + $0x80] sm:$0xff]   ;;  %4368 = vmatprep.subr.bf16.mxu0 %v5153_v0  ;;  %v5471_v4 = vld [vmem:[%s6941_s1 + $0x88] sm:$0xff]   ;;  %v5483_v7 = vld [vmem:[%s6941_s1 + $0x90] sm:$0xff]   ;;  %vm438_vm1 = vsmask.f32 7424 }
  0x10   : > { %v5155_v2 = vld [vmem:[%s6941_s1] sm:$0xff]   ;;  %4920 = vmatprep.subr.bf16.mxu1 %v5458_v1  ;;  %v5158_v5 = vld [vmem:[%s6941_s1 + $0x8] sm:$0xff]   ;;  %v5161_v8 = vld [vmem:[%s6941_s1 + $0x10] sm:$0xff]   ;;  %s6951_s12 = smov (!%p202_p4, %s5402_s12), 1 }
  0x11   : > { %4369 = vmatpush3.bf16.msra.mxu0 %v5155_v2  ;;  %4928 = vmatpush3.bf16.msra.mxu1 %v5458_v1  ;;  %v5162_v9 = vld [vmem:[%s6941_s1 + $0x58] sm:$0xff]   ;;  %v5165_v12 = vld [vmem:[%s6941_s1 + $0x60] sm:$0xff]   ;;  %v5168_v15 = vld [vmem:[%s6941_s1 + $0x68] sm:$0xff]   ;;  %s5128_s27 = smul.u32 216, %s6951_s12  ;;  %s4240_s4 = sshll.u32 %s6951_s12, 7 }
  0x12   : > { %4370 = vmatprep.subr.bf16.mxu0 %v5156_v3  ;;  %4921 = vmatprep.subr.bf16.mxu1 %v5471_v4  ;;  %v5497_v10 = vld [vmem:[%s6941_s1 + $0x98] sm:$0xff]   ;;  %v5510_v13 = vld [vmem:[%s6941_s1 + $0xa0] sm:$0xff]   ;;  %v5526_v16 = vld [vmem:[%s6941_s1 + $0xa8] sm:$0xff]   ;;  %s6873_s7 = scalar_lea.vmem %s6943_s3, %s4240_s4 }
  0x13   : > { %v5164_v11 = vld [vmem:[%s6941_s1 + $0x18] sm:$0xff]   ;;  %v5167_v14 = vld [vmem:[%s6941_s1 + $0x20] sm:$0xff]   ;;  %v5170_v17 = vld [vmem:[%s6941_s1 + $0x28] sm:$0xff]   ;;  %s5545_s9 = scalar_lea.vmem %s6940_s0, %s5128_s27 }
  0x14   : > { %v5171_v18 = vld [vmem:[%s6941_s1 + $0x70] sm:$0xff]   ;;  %v230_v21 = vld [vmem:[%s5545_s9] sm:$0xf]  ;;  %v231_v22 = vld [vmem:[%s5545_s9 + $0x4] sm:$0xf] }
  0x15   : > { %4371 = vmatpush3.bf16.msra.mxu0 %v5158_v5  ;;  %4929 = vmatpush3.bf16.msra.mxu1 %v5471_v4  ;;  %v5540_v19 = vld [vmem:[%s6941_s1 + $0xb0] sm:$0xff]   ;;  %v5174_v23 = vld [vmem:[%s6941_s1 + $0x78] sm:$0xff]   ;;  %v3766_v25 = vcombine.low %v230_v21, %v231_v22  ;;  %v5178_v26 = vld [vmem:[%s5545_s9 + $0x8] ss:$0 sps:$4 sm:$0x11]  }
  0x16   : > { %4372 = vmatprep.subr.bf16.mxu0 %v5159_v6  ;;  %4922 = vmatprep.subr.bf16.mxu1 %v5483_v7  ;;  %v5173_v20 = vld [vmem:[%s6941_s1 + $0x30] sm:$0xff]   ;;  %v5560_v24 = vld [vmem:[%s6941_s1 + $0xb8] sm:$0xff]   ;;  %v5564_v27 = vld [vmem:[%s5545_s9 + $0x64] sm:$0xf]  ;;  %v447_v31 = vshll.u32 %v5178_v26, 16 }
  0x17   : > { %v5176_v28 = vld [vmem:[%s6941_s1 + $0x38] sm:$0xff]   ;;  %v440_v29 = vshrl.u32 %v3766_v25, 16  ;;  %v442_v30 = vshll.u32 %v3766_v25, 16  ;;  %v286_v32 = vld [vmem:[%s5545_s9 + $0x60] sm:$0xe]  ;;  %v5187_v47 = vld [vmem:[%s6941_s1 + $0x108] sm:$0xff]  }
  0x18   : > { %v5572_v33 = vld [vmem:[%s5545_s9 + $0x68] ss:$0 sps:$4 sm:$0x11]   ;;  %v3806_v34 = vcombine.low %v286_v32, %v5564_v27  ;;  %v5185_v35 = vld [vmem:[%s6941_s1 + $0x100] sm:$0xff]   ;;  %v449_v37 = vrot.slane %v447_v31, 1  ;;  %v5197_v0 = vld [vmem:[%s6941_s1 + $0x110] sm:$0xff]  }
  0x19   : > { %4373 = vmatpush3.bf16.msra.mxu0 %v5161_v8  ;;  %4930 = vmatpush3.bf16.msra.mxu1 %v5483_v7  ;;  %v444_v36 = vrot.slane %v442_v30, 1  ;;  %v5580_v38 = vld [vmem:[%s5545_s9 + $0x70] sm:$0xf]  ;;  %v721_v40 = vrot.slane %v5572_v33, 1  ;;  %v287_v41 = vld [vmem:[%s5545_s9 + $0x6c] sm:$0xe] }
  0x1a   : > { %4374 = vmatprep.subr.bf16.mxu0 %v5162_v9  ;;  %4923 = vmatprep.subr.bf16.mxu1 %v5497_v10  ;;  %v720_v39 = vrot.slane %v3806_v34, 1  ;;  %v5585_v43 = vld [vmem:[%s5545_s9 + $0x74] ss:$0 sps:$4 sm:$0x11]   ;;  %v3807_v44 = vcombine.low %v287_v41, %v5580_v38  ;;  %v5186_v45 = vld [vmem:[%s6941_s1 + $0xc0] sm:$0xff]   ;;  %v5188_v57 = vld [vmem:[%s6941_s1 + $0xc8] sm:$0xff]  }
  0x1b   : > { %v445_v42 = vor.u32 %v444_v36, %v440_v29  ;;  %v724_v50 = vrot.slane %v5585_v43, 1  ;;  %v232_v51 = vld [vmem:[%s5545_s9 + $0xc] sm:$0xf]  ;;  %v233_v52 = vld [vmem:[%s5545_s9 + $0x10] sm:$0xf] }
  0x1c   : > { %v722_v46 = vsel %vm695_vm0, %v720_v39, %v721_v40  ;;  %v723_v49 = vrot.slane %v3807_v44, 1  ;;  %v3767_v54 = vcombine.low %v232_v51, %v233_v52  ;;  %v5190_v55 = vld [vmem:[%s5545_s9 + $0x14] ss:$0 sps:$4 sm:$0x11]   ;;  %v5605_v56 = vld [vmem:[%s5545_s9 + $0x7c] sm:$0xf] }
  0x1d   : > { %4375 = vmatpush3.bf16.msra.mxu0 %v5164_v11  ;;  %4931 = vmatpush3.bf16.msra.mxu1 %v5497_v10  ;;  %v450_v48 = vsel %vm438_vm1, %v445_v42, %v449_v37  ;;  %v459_v60 = vshll.u32 %v5190_v55, 16  ;;  %v288_v61 = vld [vmem:[%s5545_s9 + $0x78] sm:$0xe]  ;;  %v5613_v62 = vld [vmem:[%s5545_s9 + $0x80] ss:$0 sps:$4 sm:$0x11]  }
  0x1e   : > { %4376 = vmatprep.subr.bf16.mxu0 %v5165_v12  ;;  %4924 = vmatprep.subr.bf16.mxu1 %v5510_v13  ;;  %v725_v53 = vsel %vm695_vm0, %v723_v49, %v724_v50  ;;  %v452_v58 = vshrl.u32 %v3767_v54, 16  ;;  %v454_v59 = vshll.u32 %v3767_v54, 16  ;;  %v3808_v63 = vcombine.low %v288_v61, %v5605_v56  ;;  %v5620_v3 = vld [vmem:[%s5545_s9 + $0x88] sm:$0xf]  ;;  %v5198_v5 = vld [vmem:[%s6941_s1 + $0xd0] sm:$0xff]   ;;  %v5210_v37 = vld [vmem:[%s6941_s1 + $0xe0] sm:$0xff]  }
  0x1f   : > { %4808 = vmatprep.mubr.bf16.mxu1 %v722_v46  ;;  %984 = vmatprep.mubr.bf16.mxu0 %v450_v48  ;;  %v461_v2 = vrot.slane %v459_v60, 1  ;;  %v727_v8 = vrot.slane %v5613_v62, 1  ;;  %v289_v9 = vld [vmem:[%s5545_s9 + $0x84] sm:$0xe]  ;;  %v234_v21 = vld [vmem:[%s5545_s9 + $0x18] sm:$0xf] }
  0x20   : > { %v726_v6 = vrot.slane %v3808_v63, 1  ;;  %v5629_v12 = vld [vmem:[%s5545_s9 + $0x8c] ss:$0 sps:$4 sm:$0x11]   ;;  %v235_v22 = vld [vmem:[%s5545_s9 + $0x1c] sm:$0xf] }
  0x21   : > { %4377 = vmatpush3.bf16.msra.mxu0 %v5167_v14  ;;  %4932 = vmatpush3.bf16.msra.mxu1 %v5510_v13  ;;  %v3809_v14 = vcombine.low %v289_v9, %v5620_v3  ;;  %v3768_v26 = vcombine.low %v234_v21, %v235_v22  ;;  %v5648_v29 = vld [vmem:[%s5545_s9 + $0x94] sm:$0xf]  ;;  %v290_v34 = vld [vmem:[%s5545_s9 + $0x90] sm:$0xe]  ;;  %v5211_v39 = vld [vmem:[%s6941_s1 + $0x128] sm:$0xff]  }
  0x22   : > { %4378 = vmatprep.subr.bf16.mxu0 %v5168_v15  ;;  %4925 = vmatprep.subr.bf16.mxu1 %v5526_v16  ;;  %v5199_v15 = vld [vmem:[%s6941_s1 + $0x118] sm:$0xff]   ;;  %v3810_v36 = vcombine.low %v290_v34, %v5648_v29  ;;  %v5667_v42 = vld [vmem:[%s5545_s9 + $0xa0] sm:$0xf]  ;;  %v5673_v48 = vld [vmem:[%s5545_s9 + $0xa4] ss:$0 sps:$4 sm:$0x11]  }
  0x23   : > { %v464_v30 = vshrl.u32 %v3768_v26, 16  ;;  %v466_v31 = vshll.u32 %v3768_v26, 16  ;;  %v291_v46 = vld [vmem:[%s5545_s9 + $0x9c] sm:$0xe]  ;;  %v237_v55 = vld [vmem:[%s5545_s9 + $0x28] sm:$0xf] }
  0x24   : > { %v732_v44 = vrot.slane %v3810_v36, 1  ;;  %v3811_v49 = vcombine.low %v291_v46, %v5667_v42  ;;  %v5692_v60 = vld [vmem:[%s5545_s9 + $0xac] sm:$0xf]  ;;  %v5224_v21 = vld [vmem:[%s6941_s1 + $0xf8] sm:$0xff]   ;;  %v3839_v36 = vld [vmem:[%s5545_s9 + $0x10] sm:$0xf] }
  0x25   : > { %4379 = vmatpush3.bf16.msra.mxu0 %v5170_v17  ;;  %4933 = vmatpush3.bf16.msra.mxu1 %v5526_v16  ;;  %v728_v17 = vsel %vm695_vm0, %v726_v6, %v727_v8  ;;  %v468_v40 = vrot.slane %v466_v31, 1  ;;  %v5226_v31 = vld [vmem:[%s5545_s9 + $0x38] ss:$0 sps:$4 sm:$0x11]   ;;  %v3838_v34 = vld [vmem:[%s5545_s9 + $0xc] sm:$0xf] }
  0x26   : > { %4380 = vmatprep.subr.bf16.mxu0 %v5171_v18  ;;  %4926 = vmatprep.subr.bf16.mxu1 %v5540_v19  ;;  %v735_v52 = vrot.slane %v3811_v49, 1 }
  0x29   : > { %4381 = vmatpush3.bf16.msra.mxu0 %v5173_v20  ;;  %4934 = vmatpush3.bf16.msra.mxu1 %v5540_v19  ;;  %v730_v20 = vrot.slane %v5629_v12, 1 }
  0x2a   : > { %4382 = vmatprep.subr.bf16.mxu0 %v5174_v23  ;;  %4927 = vmatprep.subr.bf16.mxu1 %v5560_v24 }
  0x2d   : > { %4383 = vmatpush3.bf16.msra.mxu0 %v5176_v28  ;;  %4935 = vmatpush3.bf16.msra.mxu1 %v5560_v24  ;;  %v5202_v28 = vld [vmem:[%s5545_s9 + $0x20] ss:$0 sps:$4 sm:$0x11]  }
  0x2e   : > { %4776 = vmatprep.subr.bf16.mxu0 %v5458_v1  ;;  %4504 = vmatprep.subr.bf16.mxu1 %v5185_v35  ;;  %v471_v32 = vshll.u32 %v5202_v28, 16  ;;  %v5656_v35 = vld [vmem:[%s5545_s9 + $0x98] ss:$0 sps:$4 sm:$0x11]   ;;  %v5726_v28 = vld [vmem:[%s5545_s9 + $0x34] sm:$0xf] }
  0x30   : > { %985 = vmatmul.mubr.bf16.vlgmr.msra.gmra.mrb[0].mxu0 %v3766_v25  ;;  %4809 = vmatmul.mubr.bf16.vlgmr.msra.gmra.mrb[0].mxu1 %v725_v53  ;;  %v5200_v25 = vld [vmem:[%s6941_s1 + $0xd8] sm:$0xff]   ;;  %v473_v41 = vrot.slane %v471_v32, 1  ;;  %v736_v53 = vrot.slane %v5673_v48, 1  ;;  %v5229_v32 = vld [vmem:[%s6941_s1 + $0x140] sm:$0xff]  }
  0x31   : > { %4777 = vmatpush3.bf16.msra.mxu0 %v5458_v1  ;;  %4505 = vmatpush3.bf16.msra.mxu1 %v5186_v45  ;;  %v456_v1 = vrot.slane %v454_v59, 1  ;;  %v733_v45 = vrot.slane %v5656_v35, 1  ;;  %v5214_v59 = vld [vmem:[%s5545_s9 + $0x2c] ss:$0 sps:$4 sm:$0x11]  }
  0x32   : > { %4778 = vmatprep.subr.bf16.mxu0 %v5471_v4  ;;  %4506 = vmatprep.subr.bf16.mxu1 %v5187_v47  ;;  %v469_v47 = vor.u32 %v468_v40, %v464_v30  ;;  %v3902_v40 = vcombine.low %v3838_v34, %v3839_v36  ;;  %v5237_v36 = vld [vmem:[%s5545_s9 + $0x2c] ss:$0 sps:$4 sm:$0x11]  }
  0x33   : > { %v457_v11 = vor.u32 %v456_v1, %v452_v58  ;;  %4812 = vmatprep.mubr.bf16.mxu1 %v728_v17  ;;  %v734_v50 = vsel %vm695_vm0, %v732_v44, %v733_v45  ;;  %v292_v1 = vld [vmem:[%s5545_s9 + $0xa8] sm:$0xe]  ;;  %v293_v17 = vld [vmem:[%s5545_s9 + $0xb4] sm:$0xe]  ;;  %v240_v44 = vld [vmem:[%s5545_s9 + $0x3c] sm:$0xf] }
  0x34   : > { %v474_v51 = vsel %vm438_vm1, %v469_v47, %v473_v41  ;;  %v3812_v6 = vcombine.low %v292_v1, %v5692_v60  ;;  %v5228_v41 = vld [vmem:[%s5545_s9 + $0x14] ss:$0 sps:$4 sm:$0x11]   ;;  %v1516_v47 = vshrl.u32 %v3902_v40, 16  ;;  %v1518_v49 = vshll.u32 %v3902_v40, 16 }
  0x35   : > { %4779 = vmatpush3.bf16.msra.mxu0 %v5471_v4  ;;  %4507 = vmatpush3.bf16.msra.mxu1 %v5188_v57  ;;  %v462_v18 = vsel %vm438_vm1, %v457_v11, %v461_v2  ;;  %v729_v4 = vrot.slane %v3809_v14, 1  ;;  %v737_v57 = vsel %vm695_vm0, %v735_v52, %v736_v53  ;;  %v5222_v2 = vld [vmem:[%s6941_s1 + $0xf0] sm:$0xff]   ;;  %v5708_v11 = vld [vmem:[%s5545_s9 + $0xb8] sm:$0xf] }
  0x36   : > { %4780 = vmatprep.subr.bf16.mxu0 %v5483_v7  ;;  %4508 = vmatprep.subr.bf16.mxu1 %v5197_v0  ;;  %v483_v0 = vshll.u32 %v5214_v59, 16  ;;  %v738_v14 = vrot.slane %v3812_v6, 1  ;;  %v5746_v52 = vld [vmem:[%s5545_s9 + $0x44] ss:$0 sps:$4 sm:$0x11]  }
  0x37   : > { %992 = vmatprep.mubr.bf16.mxu0 %v462_v18  ;;  %v731_v23 = vsel %vm695_vm0, %v729_v4, %v730_v20  ;;  %v5714_v4 = vld [vmem:[%s5545_s9 + $0xbc] ss:$0 sps:$4 sm:$0x11]   ;;  %v3813_v20 = vcombine.low %v293_v17, %v5708_v11  ;;  %v5233_v6 = vld [vmem:[%s5545_s9 + $0x20] ss:$0 sps:$4 sm:$0x11]  }
  0x38   : > { %993 = vmatmul.mubr.bf16.gmra.mrb[4].mxu0 %v3767_v54  ;;  %4813 = vmatmul.mubr.bf16.gmra.mrb[4].mxu1 %v731_v23  ;;  %v236_v54 = vld [vmem:[%s5545_s9 + $0x24] sm:$0xf]  ;;  %v485_v9 = vrot.slane %v483_v0, 1 }
  0x39   : > { %4781 = vmatpush3.bf16.msra.mxu0 %v5483_v7  ;;  %4509 = vmatpush3.bf16.msra.mxu1 %v5198_v5  ;;  %v5209_v7 = vld [vmem:[%s6941_s1 + $0x120] sm:$0xff]   ;;  %v3769_v58 = vcombine.low %v236_v54, %v237_v55  ;;  %v5701_v5 = vld [vmem:[%s5545_s9 + $0xb0] ss:$0 sps:$4 sm:$0x11]   ;;  %v1520_v54 = vrot.slane %v1518_v49, 1 }
  0x3a   : > { %4510 = vmatprep.subr.bf16.mxu1 %v5199_v15  ;;  %4782 = vmatprep.subr.bf16.mxu0 %v5497_v10  ;;  %v739_v15 = vrot.slane %v5701_v5, 1  ;;  %v3840_v55 = vld [vmem:[%s5545_s9 + $0x18] sm:$0xf] }
  0x3b   : > { %4816 = vmatprep.mubr.bf16.mxu1 %v734_v50  ;;  %1000 = vmatprep.mubr.bf16.mxu0 %v474_v51  ;;  %v476_v61 = vshrl.u32 %v3769_v58, 16  ;;  %v478_v63 = vshll.u32 %v3769_v58, 16  ;;  %v1523_v50 = vshll.u32 %v5228_v41, 16  ;;  %v1521_v1 = vor.u32 %v1520_v54, %v1516_v47 }
  0x3c   : > { %v740_v22 = vsel %vm695_vm0, %v738_v14, %v739_v15  ;;  %v5763_v15 = vld [vmem:[%s5545_s9 + $0x4c] sm:$0xf] }
  0x3d   : > { %4783 = vmatpush3.bf16.msra.mxu0 %v5497_v10  ;;  %4511 = vmatpush3.bf16.msra.mxu1 %v5200_v25  ;;  %v5212_v10 = vld [vmem:[%s6941_s1 + $0xe8] sm:$0xff]   ;;  %v480_v8 = vrot.slane %v478_v63, 1  ;;  %v742_v25 = vrot.slane %v5714_v4, 1  ;;  %v246_v63 = vld [vmem:[%s5545_s9 + $0x60] sm:$0xf] }
  0x3e   : > { %4784 = vmatprep.subr.bf16.mxu0 %v5510_v13  ;;  %4512 = vmatprep.subr.bf16.mxu1 %v5209_v7 }
  0x3f   : > { %v481_v18 = vor.u32 %v480_v8, %v476_v61  ;;  %v507_v61 = vshll.u32 %v5746_v52, 16  ;;  %v5238_v8 = vld [vmem:[%s6941_s1 + $0x148] sm:$0xff]  }
  0x40   : > { %1001 = vmatmul.mubr.bf16.gmra.mrb[8].mxu0 %v3768_v26  ;;  %4817 = vmatmul.mubr.bf16.gmra.mrb[8].mxu1 %v737_v57  ;;  %v238_v26 = vld [vmem:[%s5545_s9 + $0x30] sm:$0xf]  ;;  %v3841_v57 = vld [vmem:[%s5545_s9 + $0x1c] sm:$0xf] }
  0x41   : > { %4785 = vmatpush3.bf16.msra.mxu0 %v5510_v13  ;;  %4513 = vmatpush3.bf16.msra.mxu1 %v5210_v37  ;;  %v5221_v13 = vld [vmem:[%s6941_s1 + $0x130] sm:$0xff]   ;;  %v486_v23 = vsel %vm438_vm1, %v481_v18, %v485_v9  ;;  %v3770_v30 = vcombine.low %v238_v26, %v5726_v28  ;;  %v509_v14 = vrot.slane %v507_v61, 1  ;;  %v3843_v26 = vld [vmem:[%s5545_s9 + $0x28] sm:$0xf] }
  0x42   : > { %4514 = vmatprep.subr.bf16.mxu1 %v5211_v39  ;;  %4786 = vmatprep.subr.bf16.mxu0 %v5526_v16 }
  0x43   : > { %4820 = vmatprep.mubr.bf16.mxu1 %v740_v22  ;;  %1008 = vmatprep.mubr.bf16.mxu0 %v486_v23  ;;  %v488_v37 = vshrl.u32 %v3770_v30, 16  ;;  %v490_v39 = vshll.u32 %v3770_v30, 16  ;;  %v5769_v22 = vld [vmem:[%s5545_s9 + $0x50] ss:$0 sps:$4 sm:$0x11]  }
  0x45   : > { %4787 = vmatpush3.bf16.msra.mxu0 %v5526_v16  ;;  %4515 = vmatpush3.bf16.msra.mxu1 %v5212_v10  ;;  %v5223_v16 = vld [vmem:[%s6941_s1 + $0x138] sm:$0xff]   ;;  %v492_v45 = vrot.slane %v490_v39, 1  ;;  %v5740_v10 = vld [vmem:[%s5545_s9 + $0x40] sm:$0xf] }
  0x46   : > { %4788 = vmatprep.subr.bf16.mxu0 %v5540_v19  ;;  %4516 = vmatprep.subr.bf16.mxu1 %v5221_v13  ;;  %v5743_v51 = vcombine.low %v240_v44, %v5740_v10 }
  0x47   : > { %v493_v53 = vor.u32 %v492_v45, %v488_v37  ;;  %v5781_v37 = vcombine.low %v246_v63, %v5564_v27  ;;  %v244_v27 = vld [vmem:[%s5545_s9 + $0x54] sm:$0xf] }
  0x48   : > { %1009 = vmatmul.mubr.bf16.gmra.mrb[12].mxu0 %v3769_v58  ;;  %v1525_v58 = vrot.slane %v1523_v50, 1  ;;  %v500_v59 = vshrl.u32 %v5743_v51, 16  ;;  %v502_v13 = vshll.u32 %v5743_v51, 16  ;;  %v1547_v50 = vshll.u32 %v5237_v36, 16  ;;  %v3845_v63 = vld [vmem:[%s5545_s9 + $0x34] sm:$0xf] }
  0x49   : > { %4789 = vmatpush3.bf16.msra.mxu0 %v5540_v19  ;;  %4517 = vmatpush3.bf16.msra.mxu1 %v5222_v2  ;;  %v741_v19 = vrot.slane %v3813_v20, 1  ;;  %v5755_v2 = vcombine.low %v3840_v55, %v3841_v57 }
  0x4a   : > { %4790 = vmatprep.subr.bf16.mxu0 %v5560_v24  ;;  %4518 = vmatprep.subr.bf16.mxu1 %v5223_v16  ;;  %v242_v16 = vld [vmem:[%s5545_s9 + $0x48] sm:$0xf]  ;;  %v504_v9 = vrot.slane %v502_v13, 1  ;;  %v1526_v17 = vsel %vm438_vm1, %v1521_v1, %v1525_v58  ;;  %v5801_v58 = vld [vmem:[%s5545_s9 + $0x5c] ss:$0 sps:$4 sm:$0x11]  }
  0x4b   : > { %v743_v7 = vsel %vm695_vm0, %v741_v19, %v742_v25  ;;  %v1528_v18 = vshrl.u32 %v5755_v2, 16  ;;  %v1530_v20 = vshll.u32 %v5755_v2, 16  ;;  %v5772_v19 = vcombine.low %v242_v16, %v5763_v15  ;;  %v3842_v25 = vld [vmem:[%s5545_s9 + $0x24] sm:$0xf] }
  0x4c   : > { %4821 = vmatmul.mubr.bf16.gmra.mrb[12].mxu1 %v743_v7  ;;  %v505_v23 = vor.u32 %v504_v9, %v500_v59  ;;  %v5777_v34 = vcombine.low %v3842_v25, %v3843_v26  ;;  %v3844_v59 = vld [vmem:[%s5545_s9 + $0x30] sm:$0xf]  ;;  %v1549_v61 = vrot.slane %v1547_v50, 1  ;;  %v531_v9 = vshll.u32 %v5801_v58, 16 }
  0x4d   : > { %4791 = vmatpush3.bf16.msra.mxu0 %v5560_v24  ;;  %4519 = vmatpush3.bf16.msra.mxu1 %v5224_v21  ;;  %v495_v24 = vshll.u32 %v5226_v31, 16  ;;  %v1535_v21 = vshll.u32 %v5233_v6, 16  ;;  %v1532_v7 = vrot.slane %v1530_v20, 1  ;;  %v514_v41 = vshll.u32 %v5772_v19, 16 }
  0x4e   : > { %4824 = vmatprep.subr.bf16.mxu1 %v5229_v32  ;;  %2060 = vmatprep.mubr.bf16.mxu1 %v1526_v17  ;;  %v510_v39 = vsel %vm438_vm1, %v505_v23, %v509_v14  ;;  %v1542_v47 = vshll.u32 %v5777_v34, 16  ;;  %v5242_v14 = vld [vmem:[%s5545_s9 + $0x38] ss:$0 sps:$4 sm:$0x11]   ;;  %v5816_v20 = vcombine.low %v3844_v59, %v3845_v63  ;;  %v3847_v23 = vld [vmem:[%s5545_s9 + $0x40] sm:$0xf] }
  0x4f   : > { %v497_v46 = vrot.slane %v495_v24, 1  ;;  %v1537_v31 = vrot.slane %v1535_v21, 1  ;;  %v512_v24 = vshrl.u32 %v5772_v19, 16  ;;  %v1533_v44 = vor.u32 %v1532_v7, %v1528_v18  ;;  %v250_v18 = vld [vmem:[%s5545_s9 + $0x78] sm:$0xf] }
  0x50   : > { %v516_v49 = vrot.slane %v514_v41, 1  ;;  %v1544_v55 = vrot.slane %v1542_v47, 1  ;;  %v3846_v21 = vld [vmem:[%s5545_s9 + $0x3c] sm:$0xf]  ;;  %v533_v7 = vrot.slane %v531_v9, 1  ;;  %v1554_v36 = vshll.u32 %v5816_v20, 16 }
  0x51   : > { %v498_v0 = vsel %vm438_vm1, %v493_v53, %v497_v46  ;;  %v1540_v46 = vshrl.u32 %v5777_v34, 16  ;;  %v5794_v53 = vld [vmem:[%s5545_s9 + $0x58] sm:$0xf]  ;;  %v1538_v54 = vsel %vm438_vm1, %v1533_v44, %v1537_v31  ;;  %v1559_v31 = vshll.u32 %v5242_v14, 16  ;;  %v252_v59 = vld [vmem:[%s5545_s9 + $0x84] sm:$0xf] }
  0x52   : > { %1016 = vmatprep.mubr.bf16.mxu0 %v498_v0  ;;  %v5798_v57 = vcombine.low %v244_v27, %v5794_v53  ;;  %v517_v13 = vor.u32 %v516_v49, %v512_v24  ;;  %v538_v0 = vshll.u32 %v5781_v37, 16  ;;  %v5244_v24 = vld [vmem:[%s5545_s9 + $0x44] ss:$0 sps:$4 sm:$0x11]   ;;  %v5830_v44 = vcombine.low %v3846_v21, %v3847_v23  ;;  %v3848_v27 = vld [vmem:[%s5545_s9 + $0x48] sm:$0xf] }
  0x53   : > { %1017 = vmatmul.mubr.bf16.gmra.mrb[16].mxu0 %v3770_v30  ;;  %v519_v30 = vshll.u32 %v5769_v22, 16  ;;  %v1545_v1 = vor.u32 %v1544_v55, %v1540_v46  ;;  %v1561_v41 = vrot.slane %v1559_v31, 1  ;;  %v5255_v49 = vld [vmem:[%s6941_s1 + $0x160] sm:$0xff]   ;;  %v5845_v55 = vld [vmem:[%s5545_s9 + $0x4c] sm:$0xf] }
  0x54   : > { %2061 = vmatmul.mubr.bf16.vlgmr.msra.gmra.mrb[16].mxu1 %v3902_v40  ;;  %v248_v40 = vld [vmem:[%s5545_s9 + $0x6c] sm:$0xf]  ;;  %1024 = vmatprep.mubr.bf16.mxu0 %v510_v39  ;;  %v524_v6 = vshrl.u32 %v5798_v57, 16  ;;  %v526_v16 = vshll.u32 %v5798_v57, 16  ;;  %v540_v39 = vrot.slane %v538_v0, 1  ;;  %v5849_v63 = vcombine.low %v3848_v27, %v5845_v55 }
  0x55   : > { %4825 = vmatpush3.bf16.msra.mxu1 %v5229_v32  ;;  %v521_v45 = vrot.slane %v519_v30, 1  ;;  %v5245_v32 = vld [vmem:[%s6941_s1 + $0x150] sm:$0xff]   ;;  %2068 = vmatprep.mubr.bf16.mxu1 %v1538_v54  ;;  %v5812_v17 = vcombine.low %v248_v40, %v5580_v38  ;;  %v1550_v25 = vsel %vm438_vm1, %v1545_v1, %v1549_v61  ;;  %v5250_v38 = vld [vmem:[%s6941_s1 + $0x158] sm:$0xff]   ;;  %v1552_v30 = vshrl.u32 %v5816_v20, 16 }
  0x56   : > { %4826 = vmatprep.subr.bf16.mxu1 %v5238_v8  ;;  %v528_v26 = vrot.slane %v526_v16, 1  ;;  %v543_v40 = vshll.u32 %v5572_v33, 16  ;;  %v1566_v33 = vshll.u32 %v5830_v44, 16  ;;  %v555_v54 = vshll.u32 %v5585_v43, 16  ;;  %v5260_v43 = vld [vmem:[%s6941_s1 + $0x168] sm:$0xff]  }
  0x57   : > { %v548_v46 = vshrl.u32 %v5812_v17, 16  ;;  %v550_v47 = vshll.u32 %v5812_v17, 16  ;;  %v1571_v1 = vshll.u32 %v5244_v24, 16  ;;  %v254_v16 = vld [vmem:[%s5545_s9 + $0x90] sm:$0xf]  ;;  %v1578_v31 = vshll.u32 %v5849_v63, 16 }
  0x58   : > { %v1568_v0 = vrot.slane %v1566_v33, 1  ;;  %v5863_v21 = vld [vmem:[%s5545_s9 + $0x50] ss:$0 sps:$4 sm:$0x11]  }
  0x59   : > { %4827 = vmatpush3.bf16.msra.mxu1 %v5238_v8  ;;  %v522_v8 = vsel %vm438_vm1, %v517_v13, %v521_v45  ;;  %v1556_v45 = vrot.slane %v1554_v36, 1  ;;  %v552_v61 = vrot.slane %v550_v47, 1  ;;  %v5874_v36 = vld [vmem:[%s5545_s9 + $0x58] sm:$0xf]  ;;  %v1576_v47 = vshrl.u32 %v5849_v63, 16 }
  0x5a   : > { %4828 = vmatprep.subr.bf16.mxu1 %v5245_v32  ;;  %v1580_v27 = vrot.slane %v1578_v31, 1  ;;  %v603_v31 = vshll.u32 %v5673_v48, 16 }
  0x5b   : > { %1025 = vmatmul.mubr.bf16.gmra.mrb[20].mxu0 %v5743_v51  ;;  %v536_v51 = vshrl.u32 %v5781_v37, 16  ;;  %v1557_v13 = vor.u32 %v1556_v45, %v1552_v30  ;;  %v579_v45 = vshll.u32 %v5629_v12, 16 }
  0x5c   : > { %2069 = vmatmul.mubr.bf16.gmra.mrb[20].mxu1 %v5755_v2  ;;  %1032 = vmatprep.mubr.bf16.mxu0 %v522_v8  ;;  %v529_v2 = vor.u32 %v528_v26, %v524_v6  ;;  %v557_v6 = vrot.slane %v555_v54, 1  ;;  %v553_v8 = vor.u32 %v552_v61, %v548_v46  ;;  %v567_v26 = vshll.u32 %v5613_v62, 16  ;;  %v5267_v62 = vld [vmem:[%s6941_s1 + $0x1c0] sm:$0xff]   ;;  %v256_v46 = vld [vmem:[%s5545_s9 + $0x9c] sm:$0xf] }
  0x5d   : > { %2076 = vmatprep.mubr.bf16.mxu1 %v1550_v25  ;;  %4829 = vmatpush3.bf16.msra.mxu1 %v5245_v32  ;;  %v5839_v32 = vcombine.low %v250_v18, %v5605_v56  ;;  %v1564_v56 = vshrl.u32 %v5830_v44, 16  ;;  %v1562_v9 = vsel %vm438_vm1, %v1557_v13, %v1561_v41  ;;  %v541_v14 = vor.u32 %v540_v39, %v536_v51  ;;  %v258_v13 = vld [vmem:[%s5545_s9 + $0xa8] sm:$0xf] }
  0x5e   : > { %4830 = vmatprep.subr.bf16.mxu1 %v5250_v38  ;;  %v534_v50 = vsel %vm438_vm1, %v529_v2, %v533_v7  ;;  %v545_v18 = vrot.slane %v543_v40, 1  ;;  %v3850_v7 = vld [vmem:[%s5545_s9 + $0x54] sm:$0xf]  ;;  %v5870_v51 = vsel %vm438_vm1, %v553_v8, %v557_v6  ;;  %v569_v30 = vrot.slane %v567_v26, 1  ;;  %4640 = vmatprep.subr.bf16.mxu0 %v5267_v62  ;;  %v5917_v8 = vld [vmem:[%s5545_s9 + $0x64] sm:$0xf] }
  0x5f   : > { %v560_v23 = vshrl.u32 %v5839_v32, 16  ;;  %v562_v25 = vshll.u32 %v5839_v32, 16  ;;  %v5880_v39 = vcombine.low %v254_v16, %v5648_v29  ;;  %v5890_v29 = vcombine.low %v3850_v7, %v5874_v36 }
  0x60   : > { %v546_v24 = vsel %vm438_vm1, %v541_v14, %v545_v18  ;;  %v581_v54 = vrot.slane %v579_v45, 1  ;;  %v591_v6 = vshll.u32 %v5656_v35, 16  ;;  %v260_v35 = vld [vmem:[%s5545_s9 + $0xb4] sm:$0xf]  ;;  %v615_v45 = vshll.u32 %v5701_v5, 16 }
  0x61   : > { %4831 = vmatpush3.bf16.msra.mxu1 %v5250_v38  ;;  %v1573_v38 = vrot.slane %v1571_v1, 1  ;;  %v584_v61 = vshrl.u32 %v5880_v39, 16  ;;  %v1590_v14 = vshll.u32 %v5890_v29, 16  ;;  %v5937_v48 = vcombine.low %v260_v35, %v5708_v11 }
  0x62   : > { %4832 = vmatprep.subr.bf16.mxu1 %v5255_v49 }
  0x63   : > { %1033 = vmatmul.mubr.bf16.gmra.mrb[24].mxu0 %v5772_v19  ;;  %v5859_v19 = vcombine.low %v252_v59, %v5620_v3  ;;  %v1569_v3 = vor.u32 %v1568_v0, %v1564_v56  ;;  %v5269_v59 = vld [vmem:[%s6941_s1 + $0x170] sm:$0xff]   ;;  %v586_v56 = vshll.u32 %v5880_v39, 16  ;;  %v5908_v0 = vld [vmem:[%s5545_s9 + $0x5c] ss:$0 sps:$4 sm:$0x11]   ;;  %v1592_v62 = vrot.slane %v1590_v14, 1 }
  0x64   : > { %1040 = vmatprep.mubr.bf16.mxu0 %v534_v50  ;;  %2077 = vmatmul.mubr.bf16.gmra.mrb[24].mxu1 %v5777_v34  ;;  %v564_v34 = vrot.slane %v562_v25, 1  ;;  %v620_v5 = vshrl.u32 %v5937_v48, 16 }
  0x65   : > { %2084 = vmatprep.mubr.bf16.mxu1 %v1562_v9  ;;  %4833 = vmatpush3.bf16.msra.mxu1 %v5255_v49  ;;  %v572_v41 = vshrl.u32 %v5859_v19, 16  ;;  %v574_v40 = vshll.u32 %v5859_v19, 16  ;;  %v1583_v49 = vshll.u32 %v5863_v21, 16  ;;  %v1574_v50 = vsel %vm438_vm1, %v1569_v3, %v1573_v38 }
  0x66   : > { %4834 = vmatprep.subr.bf16.mxu1 %v5260_v43  ;;  %v565_v2 = vor.u32 %v564_v34, %v560_v23  ;;  %v588_v16 = vrot.slane %v586_v56, 1  ;;  %v1581_v9 = vor.u32 %v1580_v27, %v1576_v47  ;;  %v5920_v23 = vcombine.low %v258_v13, %v5692_v60 }
  0x67   : > { %v576_v12 = vrot.slane %v574_v40, 1  ;;  %v1588_v3 = vshrl.u32 %v5890_v29, 16  ;;  %v1595_v38 = vshll.u32 %v5908_v0, 16  ;;  %v617_v27 = vrot.slane %v615_v45, 1 }
  0x68   : > { %v5895_v33 = vsel %vm438_vm1, %v565_v2, %v569_v30  ;;  %v589_v25 = vor.u32 %v588_v16, %v584_v61  ;;  %v605_v2 = vrot.slane %v603_v31, 1  ;;  %v610_v40 = vshll.u32 %v5920_v23, 16 }
  0x69   : > { %4835 = vmatpush3.bf16.msra.mxu1 %v5260_v43  ;;  %v577_v1 = vor.u32 %v576_v12, %v572_v41  ;;  %v1585_v43 = vrot.slane %v1583_v49, 1  ;;  %v608_v41 = vshrl.u32 %v5920_v23, 16  ;;  %v1593_v49 = vor.u32 %v1592_v62, %v1588_v3  ;;  %v3854_v12 = vld [vmem:[%s5545_s9 + $0x6c] sm:$0xf] }
  0x6a   : > { %4836 = vmatprep.subr.bf16.mxu1 %v5269_v59  ;;  %v612_v47 = vrot.slane %v610_v40, 1  ;;  %v627_v13 = vshll.u32 %v5714_v4, 16  ;;  %v5993_v62 = vld [vmem:[%s5545_s9 + $0x80] ss:$0 sps:$4 sm:$0x11]  }
  0x6b   : > { %1041 = vmatmul.mubr.bf16.gmra.mrb[28].mxu0 %v5798_v57  ;;  %v5904_v57 = vcombine.low %v256_v46, %v5667_v42  ;;  %v5913_v18 = vsel %vm438_vm1, %v577_v1, %v581_v54  ;;  %v3852_v42 = vld [vmem:[%s5545_s9 + $0x60] sm:$0xf]  ;;  %v1586_v60 = vsel %vm438_vm1, %v1581_v9, %v1585_v43 }
  0x6c   : > { %1048 = vmatprep.mubr.bf16.mxu0 %v546_v24  ;;  %2085 = vmatmul.mubr.bf16.gmra.mrb[28].mxu1 %v5816_v20  ;;  %v593_v20 = vrot.slane %v591_v6, 1  ;;  %v5929_v34 = vcombine.low %v3852_v42, %v5917_v8  ;;  %v629_v43 = vrot.slane %v627_v13, 1  ;;  %v5971_v42 = vld [vmem:[%s5545_s9 + $0x74] ss:$0 sps:$4 sm:$0x11]  }
  0x6d   : > { %2092 = vmatprep.mubr.bf16.mxu1 %v1574_v50  ;;  %4837 = vmatpush3.bf16.msra.mxu1 %v5269_v59  ;;  %v596_v26 = vshrl.u32 %v5904_v57, 16  ;;  %v598_v7 = vshll.u32 %v5904_v57, 16  ;;  %v1597_v50 = vrot.slane %v1595_v38, 1  ;;  %v613_v59 = vor.u32 %v612_v47, %v608_v41  ;;  %v3858_v41 = vld [vmem:[%s5545_s9 + $0x84] sm:$0xf] }
  0x6e   : > { %v5932_v30 = vsel %vm438_vm1, %v589_v25, %v593_v20  ;;  %v1602_v11 = vshll.u32 %v5929_v34, 16  ;;  %v1600_v9 = vshrl.u32 %v5929_v34, 16  ;;  %v5286_v20 = vld [vmem:[%s6941_s1 + $0x178] sm:$0xff]   ;;  %v1619_v3 = vshll.u32 %v5971_v42, 16 }
  0x6f   : > { %v600_v24 = vrot.slane %v598_v7, 1  ;;  %v5963_v1 = vsel %vm438_vm1, %v613_v59, %v617_v27  ;;  %v1598_v16 = vsel %vm438_vm1, %v1593_v49, %v1597_v50  ;;  %v3856_v7 = vld [vmem:[%s5545_s9 + $0x78] sm:$0xf]  ;;  %4838 = vmatprep.subr.bf16.mxu1 %v5286_v20  ;;  %v283_v47 = vld [vmem:[%s5545_s9 + $0x3c] sm:$0xe]  ;;  %v712_v50 = vrot.slane %v5746_v52, 1 }
  0x70   : > { %v1604_v14 = vrot.slane %v1602_v11, 1  ;;  %v3803_v49 = vcombine.low %v283_v47, %v5740_v10  ;;  %v6014_v11 = vld [vmem:[%s5545_s9 + $0x8c] ss:$0 sps:$4 sm:$0x11]   ;;  %v3860_v59 = vld [vmem:[%s5545_s9 + $0x90] sm:$0xf] }
  0x71   : > { %v601_v46 = vor.u32 %v600_v24, %v596_v26  ;;  %4839 = vmatpush3.bf16.msra.mxu1 %v5286_v20  ;;  %v6022_v10 = vld [vmem:[%s5545_s9 + $0x94] sm:$0xf]  ;;  %v6075_v47 = vld [vmem:[%s5545_s9 + $0xa4] ss:$0 sps:$4 sm:$0x11]  }
  0x72   : > { %v1605_v26 = vor.u32 %v1604_v14, %v1600_v9  ;;  %v718_v9 = vrot.slane %v5801_v58, 1 }
  0x73   : > { %1049 = vmatmul.mubr.bf16.gmra.mrb[32].mxu0 %v5781_v37  ;;  %v5945_v37 = vld [vmem:[%s5545_s9 + $0x68] ss:$0 sps:$4 sm:$0x11]   ;;  %v5953_v54 = vsel %vm438_vm1, %v601_v46, %v605_v2  ;;  %v1621_v2 = vrot.slane %v1619_v3, 1 }
  0x74   : > { %1056 = vmatprep.mubr.bf16.mxu0 %v5870_v51  ;;  %2093 = vmatmul.mubr.bf16.gmra.mrb[32].mxu1 %v5830_v44  ;;  %v5950_v51 = vld [vmem:[%s5545_s9 + $0x70] sm:$0xf]  ;;  %v622_v44 = vshll.u32 %v5937_v48, 16  ;;  %v1607_v61 = vshll.u32 %v5945_v37, 16 }
  0x75   : > { %2100 = vmatprep.mubr.bf16.mxu1 %v1586_v60  ;;  %v5960_v56 = vcombine.low %v3854_v12, %v5950_v51  ;;  %v711_v12 = vrot.slane %v3803_v49, 1 }
  0x76   : > { %v624_v6 = vrot.slane %v622_v44, 1 }
  0x77   : > { %v1614_v25 = vshll.u32 %v5960_v56, 16  ;;  %v6019_v13 = vsel %vm695_vm0, %v711_v12, %v712_v50  ;;  %v279_v12 = vld [vmem:[%s5545_s9 + $0xc] sm:$0xe] }
  0x78   : > { %v625_v4 = vor.u32 %v624_v6, %v620_v5 }
  0x79   : > { %v1616_v31 = vrot.slane %v1614_v25, 1  ;;  %v6046_v25 = vld [vmem:[%s5545_s9 + $0x98] ss:$0 sps:$4 sm:$0x11]  }
  0x7a   : > { %v5978_v35 = vsel %vm438_vm1, %v625_v4, %v629_v43  ;;  %v1643_v43 = vshll.u32 %v6014_v11, 16 }
  0x7b   : > { %1057 = vmatmul.mubr.bf16.gmra.mrb[36].mxu0 %v5812_v17  ;;  %v1609_v17 = vrot.slane %v1607_v61, 1  ;;  %v284_v61 = vld [vmem:[%s5545_s9 + $0x48] sm:$0xe] }
  0x7c   : > { %1064 = vmatprep.mubr.bf16.mxu0 %v5895_v33  ;;  %2101 = vmatmul.mubr.bf16.gmra.mrb[36].mxu1 %v5849_v63  ;;  %v5982_v33 = vld [vmem:[%s5545_s9 + $0x7c] sm:$0xf]  ;;  %v1612_v63 = vshrl.u32 %v5960_v56, 16  ;;  %v3804_v52 = vcombine.low %v284_v61, %v5763_v15  ;;  %v6035_v15 = vcombine.low %v3860_v59, %v6022_v10  ;;  %v1667_v61 = vshll.u32 %v6075_v47, 16 }
  0x7d   : > { %2108 = vmatprep.mubr.bf16.mxu1 %v1598_v16  ;;  %v1610_v38 = vsel %vm438_vm1, %v1605_v26, %v1609_v17  ;;  %v5989_v60 = vcombine.low %v3856_v7, %v5982_v33  ;;  %v1645_v17 = vrot.slane %v1643_v43, 1  ;;  %v6051_v7 = vld [vmem:[%s5545_s9 + $0xa0] sm:$0xf]  ;;  %v3892_v43 = vld [vmem:[%s5545_s9 + $0x54] sm:$0xe] }
  0x7e   : > { %v1617_v24 = vor.u32 %v1616_v31, %v1612_v63  ;;  %v1650_v26 = vshll.u32 %v6035_v15, 16  ;;  %v1648_v63 = vshrl.u32 %v6035_v15, 16 }
  0x7f   : > { %v1626_v40 = vshll.u32 %v5989_v60, 16  ;;  %v1624_v46 = vshrl.u32 %v5989_v60, 16 }
  0x80   : > { %v1622_v45 = vsel %vm438_vm1, %v1617_v24, %v1621_v2  ;;  %v1652_v3 = vrot.slane %v1650_v26, 1  ;;  %v278_v24 = vld [vmem:[%s5545_s9] sm:$0xe]  ;;  %v5372_v26 = vld [vmem:[%s5545_s9 + $0x1c] sm:$0xf] }
  0x83   : > { %1065 = vmatmul.mubr.bf16.gmra.mrb[40].mxu0 %v5839_v32  ;;  %v5999_v32 = vld [vmem:[%s5545_s9 + $0x88] sm:$0xf] }
  0x84   : > { %1072 = vmatprep.mubr.bf16.mxu0 %v5913_v18  ;;  %2109 = vmatmul.mubr.bf16.gmra.mrb[40].mxu1 %v5890_v29  ;;  %v1631_v18 = vshll.u32 %v5993_v62, 16  ;;  %v1628_v29 = vrot.slane %v1626_v40, 1  ;;  %v6007_v27 = vcombine.low %v3858_v41, %v5999_v32  ;;  %v3864_v41 = vld [vmem:[%s5545_s9 + $0xa8] sm:$0xf] }
  0x85   : > { %2116 = vmatprep.mubr.bf16.mxu1 %v1610_v38  ;;  %v1655_v38 = vshll.u32 %v6046_v25, 16 }
  0x86   : > { %v1633_v5 = vrot.slane %v1631_v18, 1  ;;  %v1638_v44 = vshll.u32 %v6007_v27, 16  ;;  %v1636_v6 = vshrl.u32 %v6007_v27, 16 }
  0x87   : > { %v1657_v18 = vrot.slane %v1655_v38, 1 }
  0x88   : > { %v1640_v4 = vrot.slane %v1638_v44, 1 }
  0x8b   : > { %1073 = vmatmul.mubr.bf16.gmra.mrb[44].mxu0 %v5859_v19  ;;  %v1629_v19 = vor.u32 %v1628_v29, %v1624_v46  ;;  %v1653_v46 = vor.u32 %v1652_v3, %v1648_v63  ;;  %v1793_v63 = vrot.slane %v5945_v37, 1 }
  0x8c   : > { %1080 = vmatprep.mubr.bf16.mxu0 %v5932_v30  ;;  %2117 = vmatmul.mubr.bf16.gmra.mrb[44].mxu1 %v5929_v34  ;;  %v715_v30 = vrot.slane %v5769_v22, 1  ;;  %v285_v34 = vld [vmem:[%s5545_s9 + $0x54] sm:$0xe]  ;;  %v714_v22 = vrot.slane %v3804_v52, 1 }
  0x8d   : > { %2124 = vmatprep.mubr.bf16.mxu1 %v1622_v45  ;;  %v3805_v16 = vcombine.low %v285_v34, %v5794_v53  ;;  %v1634_v14 = vsel %vm438_vm1, %v1629_v19, %v1633_v5  ;;  %v6072_v45 = vld [vmem:[%s5545_s9 + $0xac] sm:$0xf]  ;;  %v1787_v19 = vrot.slane %v5863_v21, 1  ;;  %v1658_v5 = vsel %vm438_vm1, %v1653_v46, %v1657_v18  ;;  %v5370_v52 = vld [vmem:[%s5545_s9 + $0x8] ss:$0 sps:$4 sm:$0x11]  }
  0x8e   : > { %v6040_v53 = vsel %vm695_vm0, %v714_v22, %v715_v30  ;;  %v6079_v49 = vcombine.low %v3864_v41, %v6072_v45  ;;  %v697_v30 = vrot.slane %v5370_v52, 1  ;;  %v280_v34 = vld [vmem:[%s5545_s9 + $0x18] sm:$0xe]  ;;  %v5371_v22 = vld [vmem:[%s5545_s9 + $0x10] sm:$0xf] }
  0x8f   : > { %v717_v20 = vrot.slane %v3805_v16, 1  ;;  %v1790_v16 = vrot.slane %v5908_v0, 1  ;;  %v3894_v41 = vld [vmem:[%s5545_s9 + $0x6c] sm:$0xe]  ;;  %v282_v52 = vld [vmem:[%s5545_s9 + $0x30] sm:$0xe] }
  0x90   : > { %v1674_v21 = vshll.u32 %v6079_v49, 16  ;;  %v3942_v18 = vcombine.low %v3894_v41, %v5950_v51  ;;  %v5271_v41 = vld [vmem:[%s6941_s1 + $0x188] sm:$0xff]  }
  0x91   : > { %v6043_v58 = vsel %vm695_vm0, %v717_v20, %v718_v9 }
  0x92   : > { %v1676_v3 = vrot.slane %v1674_v21, 1  ;;  %v5268_v21 = vld [vmem:[%s6941_s1 + $0x180] sm:$0xff]  }
  0x93   : > { %1081 = vmatmul.mubr.bf16.gmra.mrb[48].mxu0 %v5880_v39  ;;  %v1641_v39 = vor.u32 %v1640_v4, %v1636_v6  ;;  %v1669_v4 = vrot.slane %v1667_v61, 1 }
  0x94   : > { %1088 = vmatprep.mubr.bf16.mxu0 %v5953_v54  ;;  %2125 = vmatmul.mubr.bf16.gmra.mrb[48].mxu1 %v5960_v56  ;;  %v3862_v54 = vld [vmem:[%s5545_s9 + $0x9c] sm:$0xf]  ;;  %v6056_v56 = vld [vmem:[%s6941_s1 + $0x200] sm:$0xff]  }
  0x95   : > { %2132 = vmatprep.mubr.bf16.mxu1 %v1634_v14  ;;  %v1646_v31 = vsel %vm438_vm1, %v1641_v39, %v1645_v17  ;;  %v6064_v2 = vcombine.low %v3862_v54, %v6051_v7  ;;  %4872 = vmatprep.subr.bf16.mxu1 %v6056_v56  ;;  %v3893_v39 = vld [vmem:[%s5545_s9 + $0x60] sm:$0xe]  ;;  %v3800_v54 = vcombine.low %v280_v34, %v5372_v26  ;;  %v6139_v34 = vld [vmem:[%s5545_s9 + $0xbc] ss:$0 sps:$4 sm:$0x11]  }
  0x96   : > { %v3941_v0 = vcombine.low %v3893_v39, %v5917_v8  ;;  %v1796_v8 = vrot.slane %v5971_v42, 1  ;;  %v1795_v42 = vrot.slane %v3942_v18, 1  ;;  %v5270_v39 = vld [vmem:[%s6941_s1 + $0x1c8] sm:$0xff]   ;;  %v1808_v18 = vrot.slane %v6075_v47, 1  ;;  %v4023_v47 = vld [vmem:[%s5545_s9 + $0x1c] sm:$0xf] }
  0x97   : > { %v1662_v29 = vshll.u32 %v6064_v2, 16  ;;  %v1660_v50 = vshrl.u32 %v6064_v2, 16 }
  0x98   : > { %v1792_v46 = vrot.slane %v3941_v0, 1 }
  0x99   : > { %v1664_v44 = vrot.slane %v1662_v29, 1 }
  0x9a   : > { %v6131_v51 = vsel %vm695_vm0, %v1792_v46, %v1793_v63  ;;  %v3802_v63 = vcombine.low %v282_v52, %v5726_v28  ;;  %v5276_v28 = vld [vmem:[%s6941_s1 + $0x1d0] sm:$0xff]  }
  0x9b   : > { %1089 = vmatmul.mubr.bf16.gmra.mrb[52].mxu0 %v5904_v57  ;;  %v5369_v57 = vld [vmem:[%s5545_s9 + $0x4] sm:$0xf]  ;;  %v1665_v14 = vor.u32 %v1664_v44, %v1660_v50 }
  0x9c   : > { %1096 = vmatprep.mubr.bf16.mxu0 %v5963_v1  ;;  %2133 = vmatmul.mubr.bf16.gmra.mrb[52].mxu1 %v5989_v60  ;;  %v3798_v40 = vcombine.low %v278_v24, %v5369_v57  ;;  %v3891_v1 = vld [vmem:[%s5545_s9 + $0x48] sm:$0xe]  ;;  %v5373_v57 = vld [vmem:[%s5545_s9 + $0x14] ss:$0 sps:$4 sm:$0x11]  }
  0x9d   : > { %2140 = vmatprep.mubr.bf16.mxu1 %v1646_v31  ;;  %v3939_v59 = vcombine.low %v3891_v1, %v5845_v55  ;;  %v6095_v55 = vld [vmem:[%s5545_s9 + $0xb0] ss:$0 sps:$4 sm:$0x11]   ;;  %v1672_v31 = vshrl.u32 %v6079_v49, 16  ;;  %v1670_v37 = vsel %vm438_vm1, %v1665_v14, %v1669_v4  ;;  %v281_v50 = vld [vmem:[%s5545_s9 + $0x24] sm:$0xe] }
  0x9e   : > { %v696_v60 = vrot.slane %v3798_v40, 1  ;;  %v1679_v38 = vshll.u32 %v6095_v55, 16  ;;  %v700_v40 = vrot.slane %v5373_v57, 1  ;;  %v5374_v1 = vld [vmem:[%s5545_s9 + $0x20] ss:$0 sps:$4 sm:$0x11]  }
  0x9f   : > { %v1786_v6 = vrot.slane %v3939_v59, 1  ;;  %v3895_v59 = vld [vmem:[%s5545_s9 + $0x78] sm:$0xe]  ;;  %v1677_v44 = vor.u32 %v1676_v3, %v1672_v31  ;;  %v3897_v14 = vld [vmem:[%s5545_s9 + $0x90] sm:$0xe]  ;;  %v1691_v3 = vshll.u32 %v6139_v34, 16 }
  0xa0   : > { %v698_v17 = vsel %vm695_vm0, %v696_v60, %v697_v30  ;;  %v703_v60 = vrot.slane %v5374_v1, 1  ;;  %v1681_v61 = vrot.slane %v1679_v38, 1  ;;  %v3896_v30 = vld [vmem:[%s5545_s9 + $0x84] sm:$0xe]  ;;  %v3868_v4 = vld [vmem:[%s5545_s9 + $0xc0] sm:$0xf] }
  0xa1   : > { %v6102_v9 = vsel %vm695_vm0, %v1786_v6, %v1787_v19  ;;  %v1799_v19 = vrot.slane %v5993_v62, 1  ;;  %v6142_v6 = vsel %vm695_vm0, %v1795_v42, %v1796_v8  ;;  %v1802_v62 = vrot.slane %v6014_v11, 1  ;;  %v3898_v38 = vld [vmem:[%s5545_s9 + $0x9c] sm:$0xe]  ;;  %v4022_v1 = vld [vmem:[%s5545_s9 + $0x18] sm:$0xf] }
  0xa2   : > { %v1682_v26 = vsel %vm438_vm1, %v1677_v44, %v1681_v61  ;;  %v3946_v46 = vcombine.low %v3898_v38, %v6051_v7  ;;  %v3899_v7 = vld [vmem:[%s5545_s9 + $0xa8] sm:$0xe]  ;;  %v1693_v42 = vrot.slane %v1691_v3, 1  ;;  %v5291_v44 = vld [vmem:[%s5545_s9 + $0xc8] ss:$0 sps:$4 sm:$0x11]  }
  0xa3   : > { %1097 = vmatmul.mubr.bf16.gmra.mrb[56].mxu0 %v5920_v23  ;;  %v3940_v23 = vcombine.low %v3892_v43, %v5874_v36  ;;  %v6109_v36 = vld [vmem:[%s5545_s9 + $0xb8] sm:$0xf]  ;;  %v3944_v43 = vcombine.low %v3896_v30, %v5999_v32  ;;  %v4071_v38 = vld [vmem:[%s5545_s9 + $0x24] sm:$0xe] }
  0xa4   : > { %1104 = vmatprep.mubr.bf16.mxu0 %v5978_v35  ;;  %2141 = vmatmul.mubr.bf16.gmra.mrb[56].mxu1 %v6007_v27  ;;  %v3866_v35 = vld [vmem:[%s5545_s9 + $0xb4] sm:$0xf]  ;;  %v3799_v27 = vcombine.low %v279_v12, %v5371_v22  ;;  %v6155_v22 = vld [vmem:[%s5545_s9 + $0xc4] sm:$0xf] }
  0xa5   : > { %2148 = vmatprep.mubr.bf16.mxu1 %v1658_v5  ;;  %v1789_v20 = vrot.slane %v3940_v23, 1  ;;  %v6127_v12 = vcombine.low %v3866_v35, %v6109_v36  ;;  %v702_v5 = vrot.slane %v3800_v54, 1  ;;  %v5375_v23 = vld [vmem:[%s5545_s9 + $0x28] sm:$0xf]  ;;  %v1801_v11 = vrot.slane %v3944_v43, 1 }
  0xa6   : > { %v699_v29 = vrot.slane %v3799_v27, 1  ;;  %v3945_v27 = vcombine.low %v3897_v14, %v6022_v10  ;;  %v5376_v54 = vld [vmem:[%s5545_s9 + $0x2c] ss:$0 sps:$4 sm:$0x11]  }
  0xa7   : > { %v6116_v24 = vsel %vm695_vm0, %v1789_v20, %v1790_v16  ;;  %v3801_v16 = vcombine.low %v281_v50, %v5375_v23  ;;  %v1686_v35 = vshll.u32 %v6127_v12, 16  ;;  %v1805_v20 = vrot.slane %v6046_v25, 1  ;;  %v3901_v23 = vld [vmem:[%s5545_s9 + $0xc0] sm:$0xe] }
  0xa8   : > { %v706_v0 = vrot.slane %v5376_v54, 1  ;;  %v1684_v31 = vshrl.u32 %v6127_v12, 16  ;;  %v6172_v10 = vsel %vm695_vm0, %v1801_v11, %v1802_v62  ;;  %v1804_v25 = vrot.slane %v3945_v27, 1  ;;  %v5278_v62 = vld [vmem:[%s6941_s1 + $0x1d8] sm:$0xff]   ;;  %v5284_v11 = vld [vmem:[%s6941_s1 + $0x1e0] sm:$0xff]  }
  0xa9   : > { %v1688_v57 = vrot.slane %v1686_v35, 1  ;;  %v705_v8 = vrot.slane %v3801_v16, 1  ;;  %v708_v50 = vrot.slane %v3802_v63, 1  ;;  %v3949_v14 = vcombine.low %v3901_v23, %v6155_v22  ;;  %v6235_v63 = vld [vmem:[%s5545_s9 + $0x2c] ss:$0 sps:$4 sm:$0x11]  }
  0xaa   : > { %v3887_v23 = vld [vmem:[%s5545_s9 + $0x18] sm:$0xe] }
  0xab   : > { %1105 = vmatmul.mubr.bf16.gmra.mrb[60].mxu0 %v5937_v48  ;;  %v3943_v48 = vcombine.low %v3895_v59, %v5982_v33  ;;  %v1807_v59 = vrot.slane %v3946_v46, 1  ;;  %v707_v30 = vsel %vm695_vm0, %v705_v8, %v706_v0  ;;  %v4024_v0 = vld [vmem:[%s5545_s9 + $0x24] sm:$0xf] }
  0xac   : > { %4792 = vmatprep.mubr.bf16.mxu0 %v698_v17  ;;  %2149 = vmatmul.mubr.bf16.gmra.mrb[60].mxu1 %v6035_v15  ;;  %v701_v15 = vsel %vm695_vm0, %v699_v29, %v700_v40  ;;  %v704_v17 = vsel %vm695_vm0, %v702_v5, %v703_v60  ;;  %v6182_v40 = vcombine.low %v3868_v4, %v6155_v22  ;;  %v1703_v22 = vshll.u32 %v5291_v44, 16 }
  0xad   : > { %2156 = vmatprep.mubr.bf16.mxu1 %v1670_v37  ;;  %v1798_v33 = vrot.slane %v3943_v48, 1  ;;  %v5377_v37 = vld [vmem:[%s5545_s9 + $0x38] ss:$0 sps:$4 sm:$0x11]   ;;  %v6189_v60 = vsel %vm695_vm0, %v1804_v25, %v1805_v20  ;;  %v3947_v48 = vcombine.low %v3899_v7, %v6072_v45  ;;  %v1689_v5 = vor.u32 %v1688_v57, %v1684_v31  ;;  %v4025_v31 = vld [vmem:[%s5545_s9 + $0x28] sm:$0xf] }
  0xae   : > { %v709_v29 = vrot.slane %v5377_v37, 1  ;;  %v1698_v61 = vshll.u32 %v6182_v40, 16  ;;  %v6199_v52 = vsel %vm695_vm0, %v1807_v59, %v1808_v18  ;;  %v1696_v27 = vshrl.u32 %v6182_v40, 16  ;;  %v4070_v25 = vld [vmem:[%s5545_s9 + $0x18] sm:$0xe] }
  0xaf   : > { %v6158_v32 = vsel %vm695_vm0, %v1798_v33, %v1799_v19  ;;  %v1811_v19 = vrot.slane %v6095_v55, 1  ;;  %v5277_v33 = vld [vmem:[%s6941_s1 + $0x190] sm:$0xff]   ;;  %v1810_v43 = vrot.slane %v3947_v48, 1  ;;  %v1814_v55 = vrot.slane %v6139_v34, 1  ;;  %v5279_v34 = vld [vmem:[%s6941_s1 + $0x198] sm:$0xff]  }
  0xb0   : > { %v1694_v4 = vsel %vm438_vm1, %v1689_v5, %v1693_v42  ;;  %v1700_v20 = vrot.slane %v1698_v61, 1  ;;  %v1705_v57 = vrot.slane %v1703_v22, 1  ;;  %v4118_v46 = vcombine.low %v4070_v25, %v4023_v47 }
  0xb1   : > { %v6216_v16 = vsel %vm695_vm0, %v1810_v43, %v1811_v19  ;;  %v4119_v8 = vcombine.low %v4071_v38, %v4025_v31  ;;  %v2851_v37 = vrot.slane %v6235_v63, 1  ;;  %v6252_v7 = vcombine.low %v4024_v0, %v4025_v31  ;;  %v5378_v19 = vld [vmem:[%s5545_s9 + $0x10] sm:$0xf]  ;;  %v5296_v0 = vld [vmem:[%s6941_s1 + $0x1b8] sm:$0xff]  }
  0xb2   : > { %v2847_v42 = vrot.slane %v4118_v46, 1  ;;  %v6300_v31 = vld [vmem:[%s5545_s9 + $0x38] ss:$0 sps:$4 sm:$0x11]  }
  0xb3   : > { %4793 = vmatmul.mubr.bf16.vlgmr.msra.gmra.mrb[64].mxu0 %v701_v15  ;;  %v710_v15 = vsel %vm695_vm0, %v708_v50, %v709_v29  ;;  %v5287_v29 = vld [vmem:[%s6941_s1 + $0x1e8] sm:$0xff]   ;;  %v2850_v48 = vrot.slane %v4119_v8, 1  ;;  %v2606_v43 = vshll.u32 %v6252_v7, 16  ;;  %v3889_v8 = vld [vmem:[%s5545_s9 + $0x30] sm:$0xe] }
  0xb4   : > { %4641 = vmatpush3.bf16.msra.mxu0 %v5268_v21  ;;  %4796 = vmatprep.mubr.bf16.mxu0 %v704_v17  ;;  %v6212_v21 = vcombine.low %v4022_v1, %v4023_v47 }
  0xb5   : > { %2157 = vmatmul.mubr.bf16.gmra.mrb[64].mxu1 %v6064_v2  ;;  %4642 = vmatprep.subr.bf16.mxu0 %v5270_v39  ;;  %v3900_v2 = vld [vmem:[%s5545_s9 + $0xb4] sm:$0xe]  ;;  %v5299_v39 = vld [vmem:[%s5545_s9 + $0x20] ss:$0 sps:$4 sm:$0x11]  }
  0xb6   : > { %2164 = vmatprep.mubr.bf16.mxu1 %v1682_v26  ;;  %v3948_v45 = vcombine.low %v3900_v2, %v6109_v36  ;;  %v1817_v36 = vrot.slane %v5291_v44, 1  ;;  %v1816_v26 = vrot.slane %v3949_v14, 1  ;;  %v2594_v54 = vshll.u32 %v6212_v21, 16  ;;  %v5288_v44 = vld [vmem:[%s6941_s1 + $0x1a8] sm:$0xff]   ;;  %v5293_v2 = vld [vmem:[%s6941_s1 + $0x1f0] sm:$0xff]  }
  0xb7   : > { %v2848_v18 = vrot.slane %v5299_v39, 1  ;;  %v2592_v1 = vshrl.u32 %v6212_v21, 16  ;;  %v2599_v59 = vshll.u32 %v5299_v39, 16  ;;  %v2604_v14 = vshrl.u32 %v6252_v7, 16 }
  0xb8   : > { %4643 = vmatpush3.bf16.msra.mxu0 %v5271_v41  ;;  %v1813_v35 = vrot.slane %v3948_v45, 1  ;;  %v6239_v3 = vsel %vm695_vm0, %v1816_v26, %v1817_v36  ;;  %v5285_v41 = vld [vmem:[%s6941_s1 + $0x1a0] sm:$0xff]   ;;  %v2596_v50 = vrot.slane %v2594_v54, 1  ;;  %v6274_v45 = vld [vmem:[%s5545_s9 + $0x34] sm:$0xf]  ;;  %v5295_v36 = vld [vmem:[%s6941_s1 + $0x1f8] sm:$0xff]  }
  0xb9   : > { %4644 = vmatprep.subr.bf16.mxu0 %v5276_v28  ;;  %v1701_v28 = vor.u32 %v1700_v20, %v1696_v27  ;;  %v6262_v61 = vsel %vm695_vm0, %v2847_v42, %v2848_v18  ;;  %v5380_v20 = vld [vmem:[%s5545_s9 + $0x1c] sm:$0xf]  ;;  %v5381_v26 = vld [vmem:[%s5545_s9 + $0x28] sm:$0xf] }
  0xba   : > { %v6229_v17 = vsel %vm695_vm0, %v1813_v35, %v1814_v55  ;;  %v3888_v35 = vld [vmem:[%s5545_s9 + $0x24] sm:$0xe]  ;;  %v3935_v22 = vcombine.low %v3887_v23, %v5380_v20  ;;  %v5383_v18 = vld [vmem:[%s5545_s9 + $0x2c] ss:$0 sps:$4 sm:$0x11]  }
  0xbb   : > { %4797 = vmatmul.mubr.bf16.gmra.mrb[68].mxu0 %v707_v30  ;;  %v1706_v47 = vsel %vm438_vm1, %v1701_v28, %v1705_v57  ;;  %v2597_v30 = vor.u32 %v2596_v50, %v2592_v1  ;;  %v3936_v54 = vcombine.low %v3888_v35, %v5381_v26  ;;  %v4028_v57 = vld [vmem:[%s5545_s9 + $0x3c] sm:$0xf]  ;;  %v4030_v23 = vld [vmem:[%s5545_s9 + $0x48] sm:$0xf] }
  0xbc   : > { %4645 = vmatpush3.bf16.msra.mxu0 %v5277_v33  ;;  %4800 = vmatprep.mubr.bf16.mxu0 %v710_v15  ;;  %v2601_v33 = vrot.slane %v2599_v59, 1  ;;  %v1774_v38 = vrot.slane %v3935_v22, 1  ;;  %v2623_v59 = vshll.u32 %v6300_v31, 16 }
  0xbd   : > { %2165 = vmatmul.mubr.bf16.gmra.mrb[68].mxu1 %v6079_v49  ;;  %4646 = vmatprep.subr.bf16.mxu0 %v5278_v62  ;;  %v3886_v49 = vld [vmem:[%s5545_s9 + $0xc] sm:$0xe]  ;;  %v5379_v62 = vld [vmem:[%s5545_s9 + $0x14] ss:$0 sps:$4 sm:$0x11]   ;;  %v1777_v46 = vrot.slane %v3936_v54, 1 }
  0xbe   : > { %2172 = vmatprep.mubr.bf16.mxu1 %v1694_v4  ;;  %v3934_v5 = vcombine.low %v3886_v49, %v5378_v19  ;;  %v1772_v15 = vrot.slane %v5379_v62, 1  ;;  %v2608_v4 = vrot.slane %v2606_v43, 1  ;;  %v6306_v49 = vld [vmem:[%s5545_s9 + $0x40] sm:$0xf]  ;;  %v2625_v43 = vrot.slane %v2623_v59, 1  ;;  %v5316_v54 = vld [vmem:[%s6941_s1 + $0x218] sm:$0xff]  }
  0xbf   : > { %v6315_v42 = vcombine.low %v4028_v57, %v6306_v49  ;;  %v5386_v62 = vld [vmem:[%s5545_s9 + $0x38] ss:$0 sps:$4 sm:$0x11]   ;;  %v4034_v59 = vld [vmem:[%s5545_s9 + $0x60] sm:$0xf] }
  0xc0   : > { %4647 = vmatpush3.bf16.msra.mxu0 %v5279_v34  ;;  %v1771_v55 = vrot.slane %v3934_v5, 1  ;;  %v2602_v34 = vsel %vm438_vm1, %v2597_v30, %v2601_v33 }
  0xc1   : > { %4648 = vmatprep.subr.bf16.mxu0 %v5284_v11  ;;  %v2611_v11 = vshll.u32 %v6235_v63, 16  ;;  %v2609_v63 = vor.u32 %v2608_v4, %v2604_v14  ;;  %v5387_v14 = vld [vmem:[%s5545_s9 + $0x44] ss:$0 sps:$4 sm:$0x11]   ;;  %v2628_v4 = vshrl.u32 %v6315_v42, 16 }
  0xc2   : > { %v1773_v39 = vsel %vm695_vm0, %v1771_v55, %v1772_v15  ;;  %v2630_v55 = vshll.u32 %v6315_v42, 16  ;;  %v1781_v15 = vrot.slane %v5386_v62, 1 }
  0xc3   : > { %4801 = vmatmul.mubr.bf16.gmra.mrb[72].mxu0 %v6019_v13  ;;  %v6265_v13 = vsel %vm695_vm0, %v2850_v48, %v2851_v37  ;;  %v3890_v37 = vld [vmem:[%s5545_s9 + $0x3c] sm:$0xe] }
  0xc4   : > { %4649 = vmatpush3.bf16.msra.mxu0 %v5285_v41  ;;  %4804 = vmatprep.mubr.bf16.mxu0 %v6040_v53  ;;  %v4026_v53 = vld [vmem:[%s5545_s9 + $0x30] sm:$0xf]  ;;  %v5382_v41 = vld [vmem:[%s5545_s9 + $0x20] ss:$0 sps:$4 sm:$0x11]  }
  0xc5   : > { %2173 = vmatmul.mubr.bf16.gmra.mrb[72].mxu1 %v6127_v12  ;;  %4650 = vmatprep.subr.bf16.mxu0 %v5287_v29  ;;  %v5294_v12 = vld [vmem:[%s6941_s1 + $0x1b0] sm:$0xff]   ;;  %v6289_v27 = vcombine.low %v4026_v53, %v6274_v45  ;;  %v1775_v28 = vrot.slane %v5382_v41, 1  ;;  %v6326_v53 = vld [vmem:[%s5545_s9 + $0x44] ss:$0 sps:$4 sm:$0x11]  }
  0xc6   : > { %2180 = vmatprep.mubr.bf16.mxu1 %v1706_v47  ;;  %v5384_v47 = vld [vmem:[%s5545_s9 + $0x34] sm:$0xf]  ;;  %v2635_v20 = vshll.u32 %v6326_v53, 16  ;;  %v6357_v41 = vld [vmem:[%s5545_s9 + $0x58] sm:$0xf] }
  0xc7   : > { %v2618_v25 = vshll.u32 %v6289_v27, 16  ;;  %v2616_v29 = vshrl.u32 %v6289_v27, 16  ;;  %v1776_v48 = vsel %vm695_vm0, %v1774_v38, %v1775_v28  ;;  %v3937_v19 = vcombine.low %v3889_v8, %v5384_v47  ;;  %v4032_v38 = vld [vmem:[%s5545_s9 + $0x54] sm:$0xf]  ;;  %v5326_v8 = vld [vmem:[%s6941_s1 + $0x228] sm:$0xff]  }
  0xc8   : > { %4651 = vmatpush3.bf16.msra.mxu0 %v5288_v44  ;;  %v5306_v44 = vld [vmem:[%s6941_s1 + $0x208] sm:$0xff]  }
  0xc9   : > { %4652 = vmatprep.subr.bf16.mxu0 %v5293_v2  ;;  %v2620_v50 = vrot.slane %v2618_v25, 1  ;;  %v5385_v2 = vld [vmem:[%s5545_s9 + $0x40] sm:$0xf] }
  0xca   : > { %v3938_v30 = vcombine.low %v3890_v37, %v5385_v2 }
  0xcb   : > { %4805 = vmatmul.mubr.bf16.gmra.mrb[76].mxu0 %v6043_v58  ;;  %v2613_v58 = vrot.slane %v2611_v11, 1  ;;  %v2621_v33 = vor.u32 %v2620_v50, %v2616_v29  ;;  %v2632_v11 = vrot.slane %v2630_v55, 1  ;;  %v4036_v55 = vld [vmem:[%s5545_s9 + $0x6c] sm:$0xf] }
  0xcc   : > { %4653 = vmatpush3.bf16.msra.mxu0 %v5294_v12  ;;  %3136 = vmatprep.mubr.bf16.mxu0 %v2602_v34  ;;  %v6333_v12 = vld [vmem:[%s5545_s9 + $0x4c] sm:$0xf]  ;;  %v1783_v35 = vrot.slane %v3938_v30, 1  ;;  %v5311_v34 = vld [vmem:[%s6941_s1 + $0x210] sm:$0xff]  }
  0xcd   : > { %2181 = vmatmul.mubr.bf16.gmra.mrb[76].mxu1 %v6182_v40  ;;  %4654 = vmatprep.subr.bf16.mxu0 %v5295_v36  ;;  %v1778_v40 = vrot.slane %v5383_v18, 1  ;;  %v2614_v1 = vsel %vm438_vm1, %v2609_v63, %v2613_v58  ;;  %v1784_v36 = vrot.slane %v5387_v14, 1  ;;  %v6343_v22 = vcombine.low %v4030_v23, %v6333_v12  ;;  %v6352_v58 = vld [vmem:[%s5545_s9 + $0x50] ss:$0 sps:$4 sm:$0x11]  }
  0xce   : > { %4840 = vmatprep.mubr.bf16.mxu1 %v1773_v39  ;;  %v2637_v63 = vrot.slane %v2635_v20, 1  ;;  %v2647_v18 = vshll.u32 %v6352_v58, 16  ;;  %v6404_v14 = vld [vmem:[%s5545_s9 + $0x74] ss:$0 sps:$4 sm:$0x11]  }
  0xcf   : > { %v1779_v5 = vsel %vm695_vm0, %v1777_v46, %v1778_v40  ;;  %v1785_v26 = vsel %vm695_vm0, %v1783_v35, %v1784_v36  ;;  %v2642_v25 = vshll.u32 %v6343_v22, 16  ;;  %v2640_v28 = vshrl.u32 %v6343_v22, 16 }
  0xd0   : > { %4655 = vmatpush3.bf16.msra.mxu0 %v5296_v0  ;;  %v2633_v0 = vor.u32 %v2632_v11, %v2628_v4  ;;  %v4091_v40 = vcombine.low %v4032_v38, %v6357_v41  ;;  %v2649_v29 = vrot.slane %v2647_v18, 1  ;;  %v6409_v4 = vld [vmem:[%s5545_s9 + $0x7c] sm:$0xf] }
  0xd1   : > { %v2644_v46 = vrot.slane %v2642_v25, 1  ;;  %v6424_v25 = vld [vmem:[%s5545_s9 + $0x88] sm:$0xf] }
  0xd2   : > { %v2638_v57 = vsel %vm438_vm1, %v2633_v0, %v2637_v63  ;;  %v2654_v50 = vshll.u32 %v4091_v40, 16  ;;  %v2652_v47 = vshrl.u32 %v4091_v40, 16  ;;  %v4040_v63 = vld [vmem:[%s5545_s9 + $0x84] sm:$0xf] }
  0xd3   : > { %3137 = vmatmul.mubr.bf16.vlgmr.msra.gmra.mrb[80].mxu0 %v6212_v21  ;;  %v1780_v21 = vrot.slane %v3937_v19, 1  ;;  %v2645_v37 = vor.u32 %v2644_v46, %v2640_v28 }
  0xd4   : > { %3144 = vmatprep.mubr.bf16.mxu0 %v2614_v1  ;;  %v6372_v1 = vld [vmem:[%s5545_s9 + $0x5c] ss:$0 sps:$4 sm:$0x11]   ;;  %v2656_v19 = vrot.slane %v2654_v50, 1 }
  0xd5   : > { %4841 = vmatmul.mubr.bf16.vlgmr.msra.gmra.mrb[80].mxu1 %v1776_v48  ;;  %v1782_v39 = vsel %vm695_vm0, %v1780_v21, %v1781_v15  ;;  %v6377_v48 = vld [vmem:[%s5545_s9 + $0x64] sm:$0xf]  ;;  %v6396_v21 = vld [vmem:[%s5545_s9 + $0x70] sm:$0xf] }
  0xd6   : > { %4873 = vmatpush3.bf16.msra.mxu1 %v6056_v56  ;;  %4844 = vmatprep.mubr.bf16.mxu1 %v1779_v5  ;;  %v2626_v56 = vsel %vm438_vm1, %v2621_v33, %v2625_v43  ;;  %v2659_v5 = vshll.u32 %v6372_v1, 16  ;;  %v2657_v2 = vor.u32 %v2656_v19, %v2652_v47  ;;  %v6391_v33 = vld [vmem:[%s5545_s9 + $0x68] ss:$0 sps:$4 sm:$0x11]   ;;  %v4093_v23 = vcombine.low %v4036_v55, %v6396_v21  ;;  %v6444_v47 = vld [vmem:[%s5545_s9 + $0x94] sm:$0xf] }
  0xd7   : > { %4874 = vmatprep.subr.bf16.mxu1 %v5306_v44  ;;  %v6438_v50 = vld [vmem:[%s5545_s9 + $0x8c] ss:$0 sps:$4 sm:$0x11]  }
  0xd8   : > { %v2661_v30 = vrot.slane %v2659_v5, 1  ;;  %v2678_v36 = vshll.u32 %v4093_v23, 16  ;;  %v4072_v5 = vld [vmem:[%s5545_s9 + $0x30] sm:$0xe] }
  0xda   : > { %4875 = vmatpush3.bf16.msra.mxu1 %v5306_v44  ;;  %v5336_v44 = vld [vmem:[%s6941_s1 + $0x238] sm:$0xff]   ;;  %v2662_v62 = vsel %vm438_vm1, %v2657_v2, %v2661_v30  ;;  %v2680_v20 = vrot.slane %v2678_v36, 1  ;;  %v2707_v2 = vshll.u32 %v6438_v50, 16 }
  0xdb   : > { %3145 = vmatmul.mubr.bf16.gmra.mrb[84].mxu0 %v6252_v7  ;;  %4876 = vmatprep.subr.bf16.mxu1 %v5311_v34  ;;  %v5321_v7 = vld [vmem:[%s6941_s1 + $0x220] sm:$0xff]   ;;  %v4044_v36 = vld [vmem:[%s5545_s9 + $0x9c] sm:$0xf] }
  0xdc   : > { %3152 = vmatprep.mubr.bf16.mxu0 %v2626_v56  ;;  %v2676_v56 = vshrl.u32 %v4093_v23, 16 }
  0xdd   : > { %4845 = vmatmul.mubr.bf16.gmra.mrb[84].mxu1 %v1782_v39 }
  0xde   : > { %4848 = vmatprep.mubr.bf16.mxu1 %v1785_v26  ;;  %4877 = vmatpush3.bf16.msra.mxu1 %v5311_v34  ;;  %v4038_v34 = vld [vmem:[%s5545_s9 + $0x78] sm:$0xf]  ;;  %v2681_v39 = vor.u32 %v2680_v20, %v2676_v56  ;;  %v6418_v26 = vld [vmem:[%s5545_s9 + $0x80] ss:$0 sps:$4 sm:$0x11]   ;;  %v2854_v56 = vrot.slane %v6300_v31, 1 }
  0xdf   : > { %4878 = vmatprep.subr.bf16.mxu1 %v5316_v54  ;;  %v4074_v20 = vld [vmem:[%s5545_s9 + $0x48] sm:$0xe] }
  0xe2   : > { %4879 = vmatpush3.bf16.msra.mxu1 %v5316_v54 }
  0xe3   : > { %3153 = vmatmul.mubr.bf16.gmra.mrb[88].mxu0 %v6289_v27  ;;  %4880 = vmatprep.subr.bf16.mxu1 %v5321_v7  ;;  %v5331_v27 = vld [vmem:[%s6941_s1 + $0x230] sm:$0xff]  }
  0xe4   : > { %3160 = vmatprep.mubr.bf16.mxu0 %v2638_v57 }
  0xe5   : > { %4849 = vmatmul.mubr.bf16.gmra.mrb[88].mxu1 %v6102_v9  ;;  %v2650_v9 = vsel %vm438_vm1, %v2645_v37, %v2649_v29 }
  0xe6   : > { %4852 = vmatprep.mubr.bf16.mxu1 %v6116_v24  ;;  %4881 = vmatpush3.bf16.msra.mxu1 %v5321_v7  ;;  %v4092_v24 = vcombine.low %v4034_v59, %v6377_v48 }
  0xe7   : > { %4882 = vmatprep.subr.bf16.mxu1 %v5326_v8 }
  0xe8   : > { %v2666_v43 = vshll.u32 %v4092_v24, 16 }
  0xea   : > { %4883 = vmatpush3.bf16.msra.mxu1 %v5326_v8  ;;  %v2668_v15 = vrot.slane %v2666_v43, 1 }
  0xeb   : > { %3161 = vmatmul.mubr.bf16.gmra.mrb[92].mxu0 %v6315_v42  ;;  %4884 = vmatprep.subr.bf16.mxu1 %v5331_v27  ;;  %v2664_v42 = vshrl.u32 %v4092_v24, 16 }
  0xec   : > { %3168 = vmatprep.mubr.bf16.mxu0 %v2650_v9 }
  0xed   : > { %4853 = vmatmul.mubr.bf16.gmra.mrb[92].mxu1 %v6131_v51  ;;  %v2671_v51 = vshll.u32 %v6391_v33, 16 }
  0xee   : > { %4856 = vmatprep.mubr.bf16.mxu1 %v6142_v6  ;;  %4885 = vmatpush3.bf16.msra.mxu1 %v5331_v27  ;;  %v2669_v6 = vor.u32 %v2668_v15, %v2664_v42  ;;  %v4042_v27 = vld [vmem:[%s5545_s9 + $0x90] sm:$0xf]  ;;  %v4120_v42 = vcombine.low %v4072_v5, %v6274_v45  ;;  %v4073_v45 = vld [vmem:[%s5545_s9 + $0x3c] sm:$0xe] }
  0xef   : > { %4886 = vmatprep.subr.bf16.mxu1 %v5336_v44  ;;  %v2673_v35 = vrot.slane %v2671_v51, 1  ;;  %v6451_v30 = vcombine.low %v4042_v27, %v6444_v47  ;;  %v2709_v51 = vrot.slane %v2707_v2, 1  ;;  %v2860_v27 = vrot.slane %v6352_v58, 1 }
  0xf1   : > { %v2674_v11 = vsel %vm438_vm1, %v2669_v6, %v2673_v35  ;;  %v6460_v6 = vld [vmem:[%s5545_s9 + $0x98] ss:$0 sps:$4 sm:$0x11]   ;;  %v2714_v35 = vshll.u32 %v6451_v30, 16 }
  0xf2   : > { %4887 = vmatpush3.bf16.msra.mxu1 %v5336_v44 }
  0xf3   : > { %3169 = vmatmul.mubr.bf16.gmra.mrb[96].mxu0 %v6343_v22  ;;  %v2683_v22 = vshll.u32 %v6404_v14, 16 }
  0xf4   : > { %3176 = vmatprep.mubr.bf16.mxu0 %v2662_v62 }
  0xf5   : > { %4857 = vmatmul.mubr.bf16.gmra.mrb[0].mxu1 %v6158_v32  ;;  %v6414_v32 = vcombine.low %v4038_v34, %v6409_v4  ;;  %v6466_v34 = vld [vmem:[%s5545_s9 + $0xa0] sm:$0xf] }
  0xf6   : > { %4860 = vmatprep.mubr.bf16.mxu1 %v6172_v10  ;;  %v2685_v10 = vrot.slane %v2683_v22, 1  ;;  %v2716_v22 = vrot.slane %v2714_v35, 1 }
  0xf7   : > { %v2690_v54 = vshll.u32 %v6414_v32, 16 }
  0xf8   : > { %v2686_v46 = vsel %vm438_vm1, %v2681_v39, %v2685_v10  ;;  %v2719_v39 = vshll.u32 %v6460_v6, 16  ;;  %v6475_v10 = vcombine.low %v4044_v36, %v6466_v34 }
  0xf9   : > { %v2692_v18 = vrot.slane %v2690_v54, 1  ;;  %v4121_v54 = vcombine.low %v4073_v45, %v6306_v49  ;;  %v4048_v45 = vld [vmem:[%s5545_s9 + $0xb4] sm:$0xf] }
  0xfb   : > { %3177 = vmatmul.mubr.bf16.gmra.mrb[100].mxu0 %v4091_v40  ;;  %v6432_v40 = vcombine.low %v4040_v63, %v6424_v25  ;;  %v4122_v63 = vcombine.low %v4074_v20, %v6333_v12  ;;  %v2857_v12 = vrot.slane %v6326_v53, 1 }
  0xfc   : > { %3184 = vmatprep.mubr.bf16.mxu0 %v2674_v11  ;;  %v2712_v11 = vshrl.u32 %v6451_v30, 16 }
  0xfd   : > { %4861 = vmatmul.mubr.bf16.gmra.mrb[4].mxu1 %v6189_v60  ;;  %v2688_v60 = vshrl.u32 %v6414_v32, 16  ;;  %v2702_v59 = vshll.u32 %v6432_v40, 16  ;;  %v2700_v19 = vshrl.u32 %v6432_v40, 16 }
  0xfe   : > { %4864 = vmatprep.mubr.bf16.mxu1 %v6199_v52  ;;  %v2695_v52 = vshll.u32 %v6418_v26, 16 }
  0xff   : > { %v2693_v37 = vor.u32 %v2692_v18, %v2688_v60  ;;  %v6484_v60 = vld [vmem:[%s5545_s9 + $0xa4] ss:$0 sps:$4 sm:$0x11]  }
 0x100   : > { %v2697_v29 = vrot.slane %v2695_v52, 1  ;;  %v2856_v52 = vrot.slane %v4121_v54, 1  ;;  %v4078_v54 = vld [vmem:[%s5545_s9 + $0x78] sm:$0xe] }
 0x102   : > { %v2698_v44 = vsel %vm438_vm1, %v2693_v37, %v2697_v29  ;;  %v4046_v37 = vld [vmem:[%s5545_s9 + $0xa8] sm:$0xf]  ;;  %v6493_v29 = vld [vmem:[%s5545_s9 + $0xac] sm:$0xf]  ;;  %v2858_v53 = vsel %vm695_vm0, %v2856_v52, %v2857_v12 }
 0x103   : > { %v4384_v0 = vpop.f32.mrb[0].mxu0  ;;  %3185 = vmatmul.mubr.bf16.gmra.mrb[104].mxu0 %v4092_v24 }
 0x104   : > { %v4385_v38 = vpop.f32.mrb[1].mxu0  ;;  %3192 = vmatprep.mubr.bf16.mxu0 %v2686_v46  ;;  %v2726_v46 = vshll.u32 %v6475_v10, 16 }
 0x105   : > { %v6426_v7 = vadd.f32 %v4385_v38, %v4384_v0  ;;  %v4387_v28 = vpop.f32.mrb[2].mxu0  ;;  %4865 = vmatmul.mubr.bf16.gmra.mrb[8].mxu1 %v6216_v16  ;;  %v2704_v16 = vrot.slane %v2702_v59, 1  ;;  %v2859_v59 = vrot.slane %v4122_v63, 1 }
 0x106   : > { %v4388_v57 = vpop.f32.mrb[3].mxu0  ;;  %4868 = vmatprep.mubr.bf16.mxu1 %v6229_v17 }
 0x107   : > { %v6434_v8 = vadd.f32 %v4388_v57, %v4387_v28  ;;  %v2705_v15 = vor.u32 %v2704_v16, %v2700_v19  ;;  %v2717_v57 = vor.u32 %v2716_v22, %v2712_v11  ;;  %v4076_v19 = vld [vmem:[%s5545_s9 + $0x60] sm:$0xe]  ;;  %v6502_v16 = vcombine.low %v4046_v37, %v6493_v29  ;;  %v6519_v11 = vld [vmem:[%s5545_s9 + $0xb8] sm:$0xf] }
 0x108   : > { %v2861_v58 = vsel %vm695_vm0, %v2859_v59, %v2860_v27  ;;  %v2866_v22 = vrot.slane %v6391_v33, 1  ;;  %v2869_v59 = vrot.slane %v6404_v14, 1  ;;  %v6543_v27 = vld [vmem:[%s5545_s9 + $0xc4] sm:$0xf] }
 0x10b   : > { %v4390_v9 = vpop.f32.mrb[4].mxu0  ;;  %3193 = vmatmul.mubr.bf16.gmra.mrb[108].mxu0 %v4093_v23  ;;  %v2853_v23 = vrot.slane %v4120_v42, 1  ;;  %v6510_v42 = vld [vmem:[%s5545_s9 + $0xb0] ss:$0 sps:$4 sm:$0x11]  }
 0x10c   : > { %v4391_v24 = vpop.f32.mrb[5].mxu0  ;;  %3200 = vmatprep.mubr.bf16.mxu0 %v2698_v44  ;;  %v2728_v44 = vrot.slane %v2726_v46, 1 }
 0x10d   : > { %v6453_v17 = vadd.f32 %v4391_v24, %v4390_v9  ;;  %v4393_v43 = vpop.f32.mrb[6].mxu0  ;;  %4869 = vmatmul.mubr.bf16.gmra.mrb[12].mxu1 %v6239_v3  ;;  %v2710_v3 = vsel %vm438_vm1, %v2705_v15, %v2709_v51  ;;  %v2855_v31 = vsel %vm695_vm0, %v2853_v23, %v2854_v56  ;;  %v4075_v9 = vld [vmem:[%s5545_s9 + $0x54] sm:$0xe]  ;;  %v2724_v24 = vshrl.u32 %v6475_v10, 16 }
 0x10e   : > { %v4394_v55 = vpop.f32.mrb[7].mxu0  ;;  %4888 = vmatprep.mubr.bf16.mxu1 %v6262_v61  ;;  %v4123_v2 = vcombine.low %v4075_v9, %v6357_v41  ;;  %v2863_v51 = vrot.slane %v6372_v1, 1  ;;  %v4077_v41 = vld [vmem:[%s5545_s9 + $0x6c] sm:$0xe] }
 0x10f   : > { %v6456_v62 = vadd.f32 %v4394_v55, %v4393_v43  ;;  %v4124_v43 = vcombine.low %v4076_v19, %v6377_v48  ;;  %v2729_v35 = vor.u32 %v2728_v44, %v2724_v24  ;;  %v4079_v19 = vld [vmem:[%s5545_s9 + $0x84] sm:$0xe] }
 0x110   : > { %v2862_v48 = vrot.slane %v4123_v2, 1  ;;  %v4080_v2 = vld [vmem:[%s5545_s9 + $0x90] sm:$0xe] }
 0x113   : > { %v4396_v61 = vpop.f32.mrb[8].mxu0  ;;  %3201 = vmatmul.mubr.bf16.gmra.mrb[112].mxu0 %v6414_v32  ;;  %v2721_v32 = vrot.slane %v2719_v39, 1  ;;  %v4125_v39 = vcombine.low %v4077_v41, %v6396_v21  ;;  %v4126_v21 = vcombine.low %v4078_v54, %v6409_v4 }
 0x114   : > { %v4397_v0 = vpop.f32.mrb[9].mxu0  ;;  %3208 = vmatprep.mubr.bf16.mxu0 %v2710_v3  ;;  %v2865_v3 = vrot.slane %v4124_v43, 1 }
 0x115   : > { %v6481_v38 = vadd.f32 %v4397_v0, %v4396_v61  ;;  %v4399_v28 = vpop.f32.mrb[10].mxu0  ;;  %4889 = vmatmul.mubr.bf16.vlgmr.msra.gmra.mrb[80].mxu1 %v6265_v13  ;;  %v2731_v13 = vshll.u32 %v6484_v60, 16  ;;  %v2722_v5 = vsel %vm438_vm1, %v2717_v57, %v2721_v32  ;;  %v2743_v61 = vshll.u32 %v6510_v42, 16  ;;  %v6537_v57 = vld [vmem:[%s5545_s9 + $0xbc] ss:$0 sps:$4 sm:$0x11]  }
 0x116   : > { %v4400_v49 = vpop.f32.mrb[11].mxu0  ;;  %4892 = vmatprep.mubr.bf16.mxu1 %v2855_v31  ;;  %v2736_v31 = vshrl.u32 %v6502_v16, 16  ;;  %v2867_v33 = vsel %vm695_vm0, %v2865_v3, %v2866_v22  ;;  %v2868_v32 = vrot.slane %v4125_v39, 1  ;;  %v2871_v4 = vrot.slane %v4126_v21, 1 }
 0x117   : > { %v6488_v18 = vadd.f32 %v4400_v49, %v4399_v28  ;;  %v2733_v36 = vrot.slane %v2731_v13, 1  ;;  %v6530_v28 = vcombine.low %v4048_v45, %v6519_v11  ;;  %v2864_v49 = vsel %vm695_vm0, %v2862_v48, %v2863_v51  ;;  %v6568_v3 = vld [vmem:[%s5545_s9 + $0xc8] ss:$0 sps:$4 sm:$0x11]  }
 0x118   : > { %v2745_v52 = vrot.slane %v2743_v61, 1  ;;  %v2872_v13 = vrot.slane %v6418_v26, 1  ;;  %v2870_v41 = vsel %vm695_vm0, %v2868_v32, %v2869_v59  ;;  %v4128_v45 = vcombine.low %v4080_v2, %v6444_v47 }
 0x119   : > { %v2734_v0 = vsel %vm438_vm1, %v2729_v35, %v2733_v36  ;;  %v2750_v12 = vshll.u32 %v6530_v28, 16  ;;  %v2875_v22 = vrot.slane %v6438_v50, 1 }
 0x11a   : > { %v2873_v48 = vsel %vm695_vm0, %v2871_v4, %v2872_v13 }
 0x11b   : > { %3209 = vmatmul.mubr.bf16.gmra.mrb[116].mxu0 %v6432_v40  ;;  %v4402_v55 = vpop.f32.mrb[12].mxu0  ;;  %v2738_v40 = vshll.u32 %v6502_v16, 16 }
 0x11c   : > { %3216 = vmatprep.mubr.bf16.mxu0 %v2722_v5  ;;  %v4403_v15 = vpop.f32.mrb[13].mxu0 }
 0x11d   : > { %4893 = vmatmul.mubr.bf16.gmra.mrb[84].mxu1 %v2858_v53  ;;  %v6515_v23 = vadd.f32 %v4403_v15, %v4402_v55  ;;  %v4405_v56 = vpop.f32.mrb[14].mxu0  ;;  %v2740_v63 = vrot.slane %v2738_v40, 1  ;;  %v2755_v53 = vshll.u32 %v6537_v57, 16  ;;  %v2748_v55 = vshrl.u32 %v6530_v28, 16 }
 0x11e   : > { %4896 = vmatprep.mubr.bf16.mxu1 %v2861_v58  ;;  %v4406_v20 = vpop.f32.mrb[15].mxu0  ;;  %v2752_v15 = vrot.slane %v2750_v12, 1  ;;  %v4127_v40 = vcombine.low %v4079_v19, %v6424_v25 }
 0x11f   : > { %v6522_v1 = vadd.f32 %v4406_v20, %v4405_v56  ;;  %v2741_v46 = vor.u32 %v2740_v63, %v2736_v31  ;;  %v2757_v25 = vrot.slane %v2755_v53, 1  ;;  %v6574_v31 = vld [vmem:[%s5545_s9 + $0xd0] sm:$0xf]  ;;  %v2877_v63 = vrot.slane %v4128_v45, 1 }
 0x120   : > { %v2753_v39 = vor.u32 %v2752_v15, %v2748_v55  ;;  %v6599_v15 = vld [vmem:[%s5545_s9 + $0xd4] ss:$0 sps:$4 sm:$0x11]  }
 0x121   : > { %v2746_v14 = vsel %vm438_vm1, %v2741_v46, %v2745_v52  ;;  %v2767_v46 = vshll.u32 %v6568_v3, 16  ;;  %v4082_v52 = vld [vmem:[%s5545_s9 + $0xa8] sm:$0xe] }
 0x122   : > { %v2758_v59 = vsel %vm438_vm1, %v2753_v39, %v2757_v25  ;;  %v4084_v25 = vld [vmem:[%s5545_s9 + $0xc0] sm:$0xe] }
 0x123   : > { %3217 = vmatmul.mubr.bf16.gmra.mrb[120].mxu0 %v6451_v30  ;;  %v4050_v30 = vld [vmem:[%s5545_s9 + $0xc0] sm:$0xf]  ;;  %v2769_v55 = vrot.slane %v2767_v46, 1 }
 0x124   : > { %3224 = vmatprep.mubr.bf16.mxu0 %v2734_v0  ;;  %v6554_v51 = vcombine.low %v4050_v30, %v6543_v27  ;;  %v4052_v0 = vld [vmem:[%s5545_s9 + $0xcc] sm:$0xf] }
 0x125   : > { %4897 = vmatmul.mubr.bf16.gmra.mrb[88].mxu1 %v2864_v49  ;;  %v2878_v49 = vrot.slane %v6460_v6, 1  ;;  %v6585_v4 = vcombine.low %v4052_v0, %v6574_v31 }
 0x126   : > { %v4408_v37 = vpop.f32.mrb[16].mxu0  ;;  %4900 = vmatprep.mubr.bf16.mxu1 %v2867_v33  ;;  %v2762_v61 = vshll.u32 %v6554_v51, 16  ;;  %v4081_v33 = vld [vmem:[%s5545_s9 + $0x9c] sm:$0xe]  ;;  %v2760_v30 = vshrl.u32 %v6554_v51, 16 }
 0x127   : > { %v4409_v9 = vpop.f32.mrb[17].mxu0  ;;  %v4520_v44 = vpop.f32.mrb[16].mxu1  ;;  %v2879_v2 = vsel %vm695_vm0, %v2877_v63, %v2878_v49  ;;  %v2772_v0 = vshrl.u32 %v6585_v4, 16  ;;  %v2779_v63 = vshll.u32 %v6599_v15, 16 }
 0x128   : > { %v6547_v5 = vadd.f32 %v4409_v9, %v4408_v37  ;;  %v4411_v24 = vpop.f32.mrb[18].mxu0  ;;  %v4521_v43 = vpop.f32.mrb[17].mxu1  ;;  %v2764_v9 = vrot.slane %v2762_v61, 1 }
 0x129   : > { %v4412_v58 = vpop.f32.mrb[19].mxu0  ;;  %v6558_v35 = vadd.f32 %v4521_v43, %v4520_v44  ;;  %v4523_v36 = vpop.f32.mrb[18].mxu1  ;;  %v4129_v44 = vcombine.low %v4081_v33, %v6466_v34 }
 0x12a   : > { %v6556_v26 = vadd.f32 %v4412_v58, %v4411_v24  ;;  %v4524_v56 = vpop.f32.mrb[19].mxu1  ;;  %v4130_v58 = vcombine.low %v4082_v52, %v6493_v29  ;;  %v2884_v29 = vrot.slane %v6510_v42, 1  ;;  %v4132_v52 = vcombine.low %v4084_v25, %v6543_v27 }
 0x12b   : > { %3225 = vmatmul.mubr.bf16.gmra.mrb[124].mxu0 %v6475_v10  ;;  %v6565_v20 = vadd.f32 %v4524_v56, %v4523_v36  ;;  %v2874_v10 = vrot.slane %v4127_v40, 1  ;;  %v2774_v36 = vshll.u32 %v6585_v4, 16 }
 0x12c   : > { %3232 = vmatprep.mubr.bf16.mxu0 %v2746_v14  ;;  %v2765_v14 = vor.u32 %v2764_v9, %v2760_v30  ;;  %v2883_v56 = vrot.slane %v4130_v58, 1 }
 0x12d   : > { %4901 = vmatmul.mubr.bf16.gmra.mrb[92].mxu1 %v2870_v41  ;;  %v2876_v24 = vsel %vm695_vm0, %v2874_v10, %v2875_v22  ;;  %v2880_v41 = vrot.slane %v4129_v44, 1  ;;  %v2890_v44 = vrot.slane %v6568_v3, 1 }
 0x12e   : > { %v4414_v54 = vpop.f32.mrb[20].mxu0  ;;  %4904 = vmatprep.mubr.bf16.mxu1 %v2873_v48  ;;  %v4083_v48 = vld [vmem:[%s5545_s9 + $0xb4] sm:$0xe]  ;;  %v2770_v10 = vsel %vm438_vm1, %v2765_v14, %v2769_v55  ;;  %v2885_v46 = vsel %vm695_vm0, %v2883_v56, %v2884_v29 }
 0x12f   : > { %v4415_v47 = vpop.f32.mrb[21].mxu0  ;;  %v4526_v50 = vpop.f32.mrb[20].mxu1 }
 0x130   : > { %v6578_v21 = vadd.f32 %v4415_v47, %v4414_v54  ;;  %v4417_v32 = vpop.f32.mrb[22].mxu0  ;;  %v4527_v37 = vpop.f32.mrb[21].mxu1  ;;  %v2776_v47 = vrot.slane %v2774_v36, 1 }
 0x131   : > { %v4418_v12 = vpop.f32.mrb[23].mxu0  ;;  %v6589_v13 = vadd.f32 %v4527_v37, %v4526_v50  ;;  %v4529_v19 = vpop.f32.mrb[22].mxu1 }
 0x132   : > { %v6587_v6 = vadd.f32 %v4418_v12, %v4417_v32  ;;  %v4530_v53 = vpop.f32.mrb[23].mxu1  ;;  %v4131_v32 = vcombine.low %v4083_v48, %v6519_v11  ;;  %v2777_v37 = vor.u32 %v2776_v47, %v2772_v0 }
 0x133   : > { %3233 = vmatmul.mubr.bf16.gmra.mrb[128].mxu0 %v6502_v16  ;;  %v6596_v43 = vadd.f32 %v4530_v53, %v4529_v19  ;;  %v2881_v16 = vrot.slane %v6484_v60, 1  ;;  %v2887_v19 = vrot.slane %v6537_v57, 1 }
 0x134   : > { %3240 = vmatprep.mubr.bf16.mxu0 %v2758_v59  ;;  %v2781_v59 = vrot.slane %v2779_v63, 1  ;;  %v2886_v9 = vrot.slane %v4131_v32, 1 }
 0x135   : > { %4905 = vmatmul.mubr.bf16.gmra.mrb[0].mxu1 %v2876_v24  ;;  %v2882_v33 = vsel %vm695_vm0, %v2880_v41, %v2881_v16  ;;  %v2889_v24 = vrot.slane %v4132_v52, 1 }
 0x136   : > { %v4420_v34 = vpop.f32.mrb[24].mxu0  ;;  %4908 = vmatprep.mubr.bf16.mxu1 %v2879_v2  ;;  %v2782_v55 = vsel %vm438_vm1, %v2777_v37, %v2781_v59  ;;  %v2888_v57 = vsel %vm695_vm0, %v2886_v9, %v2887_v19 }
 0x137   : > { %v4421_v40 = vpop.f32.mrb[25].mxu0  ;;  %v4532_v39 = vpop.f32.mrb[24].mxu1  ;;  %v2891_v3 = vsel %vm695_vm0, %v2889_v24, %v2890_v44 }
 0x138   : > { %v6605_v45 = vadd.f32 %v4421_v40, %v4420_v34  ;;  %v4423_v22 = vpop.f32.mrb[26].mxu0  ;;  %v4533_v54 = vpop.f32.mrb[25].mxu1 }
 0x139   : > { %v4424_v61 = vpop.f32.mrb[27].mxu0  ;;  %v6613_v49 = vadd.f32 %v4533_v54, %v4532_v39  ;;  %v4535_v42 = vpop.f32.mrb[26].mxu1 }
 0x13a   : > { %v6611_v60 = vadd.f32 %v4424_v61, %v4423_v22  ;;  %v4536_v50 = vpop.f32.mrb[27].mxu1  ;;  %v2893_v22 = vrot.slane %v6599_v15, 1 }
 0x13b   : > { %3241 = vmatmul.mubr.bf16.gmra.mrb[132].mxu0 %v6530_v28  ;;  %v6620_v12 = vadd.f32 %v4536_v50, %v4535_v42  ;;  %v4085_v28 = vld [vmem:[%s5545_s9 + $0xcc] sm:$0xe] }
 0x13c   : > { %3248 = vmatprep.mubr.bf16.mxu0 %v2770_v10  ;;  %v4133_v16 = vcombine.low %v4085_v28, %v6574_v31 }
 0x13d   : > { %4909 = vmatmul.mubr.bf16.gmra.mrb[4].mxu1 %v2882_v33 }
 0x13e   : > { %v4426_v30 = vpop.f32.mrb[28].mxu0  ;;  %4912 = vmatprep.mubr.bf16.mxu1 %v2885_v46  ;;  %v2892_v48 = vrot.slane %v4133_v16, 1 }
 0x13f   : > { %v4427_v11 = vpop.f32.mrb[29].mxu0  ;;  %v4538_v27 = vpop.f32.mrb[28].mxu1 }
 0x140   : > { %v6625_v53 = vadd.f32 %v4427_v11, %v4426_v30  ;;  %v4429_v2 = vpop.f32.mrb[30].mxu0  ;;  %v4539_v14 = vpop.f32.mrb[29].mxu1  ;;  %v2894_v63 = vsel %vm695_vm0, %v2892_v48, %v2893_v22 }
 0x141   : > { %v4430_v58 = vpop.f32.mrb[31].mxu0  ;;  %v6630_v34 = vadd.f32 %v4539_v14, %v4538_v27  ;;  %v4541_v41 = vpop.f32.mrb[30].mxu1 }
 0x142   : > { %v6628_v36 = vadd.f32 %v4430_v58, %v4429_v2  ;;  %v4542_v40 = vpop.f32.mrb[31].mxu1 }
 0x143   : > { %3249 = vmatmul.mubr.bf16.gmra.mrb[136].mxu0 %v6554_v51  ;;  %v6636_v56 = vadd.f32 %v4542_v40, %v4541_v41 }
 0x144   : > { %3256 = vmatprep.mubr.bf16.mxu0 %v2782_v55 }
 0x145   : > { %4913 = vmatmul.mubr.bf16.gmra.mrb[8].mxu1 %v2888_v57 }
 0x146   : > { %v4432_v29 = vpop.f32.mrb[32].mxu0  ;;  %4916 = vmatprep.mubr.bf16.mxu1 %v2891_v3 }
 0x147   : > { %v4433_v39 = vpop.f32.mrb[33].mxu0  ;;  %v4544_v54 = vpop.f32.mrb[32].mxu1 }
 0x148   : > { %v4434_v25 = vadd.f32 %v4433_v39, %v4432_v29  ;;  %v4435_v61 = vpop.f32.mrb[34].mxu0  ;;  %v4545_v31 = vpop.f32.mrb[33].mxu1 }
 0x149   : > { %v4436_v10 = vpop.f32.mrb[35].mxu0  ;;  %v6639_v47 = vadd.f32 %v4545_v31, %v4544_v54  ;;  %v4547_v51 = vpop.f32.mrb[34].mxu1 }
 0x14a   : > { %v4437_v0 = vadd.f32 %v4436_v10, %v4435_v61  ;;  %v4548_v42 = vpop.f32.mrb[35].mxu1 }
 0x14b   : > { %3257 = vmatmul.mubr.bf16.gmra.mrb[140].mxu0 %v6585_v4  ;;  %v6643_v33 = vadd.f32 %v4548_v42, %v4547_v51 }
 0x14d   : > { %4917 = vmatmul.mubr.bf16.gmra.mrb[12].mxu1 %v2894_v63 }
 0x14e   : > { %v4438_v32 = vpop.f32.mrb[36].mxu0 }
 0x14f   : > { %v4439_v15 = vpop.f32.mrb[37].mxu0  ;;  %v4550_v52 = vpop.f32.mrb[36].mxu1 }
 0x150   : > { %v4440_v50 = vadd.f32 %v4439_v15, %v4438_v32  ;;  %v4441_v46 = vpop.f32.mrb[38].mxu0  ;;  %v4551_v59 = vpop.f32.mrb[37].mxu1 }
 0x151   : > { %v4442_v37 = vpop.f32.mrb[39].mxu0  ;;  %v6645_v9 = vadd.f32 %v4551_v59, %v4550_v52  ;;  %v4553_v19 = vpop.f32.mrb[38].mxu1  ;;  %v6666_v59 = vld [vmem:[%s6942_s2] ss:$0 sm:$0xff] }
 0x152   : > { %v4443_v30 = vadd.f32 %v4442_v37, %v4441_v46  ;;  %v4554_v11 = vpop.f32.mrb[39].mxu1 }
 0x153   : > { %v6647_v24 = vadd.f32 %v4554_v11, %v4553_v19 }
 0x156   : > { %v4444_v44 = vpop.f32.mrb[40].mxu0 }
 0x157   : > { %v4445_v28 = vpop.f32.mrb[41].mxu0  ;;  %v4556_v27 = vpop.f32.mrb[40].mxu1 }
 0x158   : > { %v4446_v4 = vadd.f32 %v4445_v28, %v4444_v44  ;;  %v4447_v2 = vpop.f32.mrb[42].mxu0  ;;  %v4557_v14 = vpop.f32.mrb[41].mxu1  ;;  %v5020_v44 = vadd.f32 %v4434_v25, %v6666_v59 }
 0x159   : > { %v4448_v58 = vpop.f32.mrb[43].mxu0  ;;  %v6649_v41 = vadd.f32 %v4557_v14, %v4556_v27  ;;  %v4559_v57 = vpop.f32.mrb[42].mxu1  ;;  %v5028_v14 = vadd.f32 %v4437_v0, %v6666_v59 }
 0x15a   : > { %v4449_v55 = vadd.f32 %v4448_v58, %v4447_v2  ;;  %v4560_v16 = vpop.f32.mrb[43].mxu1 }
 0x15b   : > { %v6651_v40 = vadd.f32 %v4560_v16, %v4559_v57 }
 0x15e   : > { %v4450_v3 = vpop.f32.mrb[44].mxu0 }
 0x15f   : > { %v4451_v29 = vpop.f32.mrb[45].mxu0  ;;  %v4562_v39 = vpop.f32.mrb[44].mxu1 }
 0x160   : > { %v6653_v48 = vadd.f32 %v4451_v29, %v4450_v3  ;;  %v4453_v22 = vpop.f32.mrb[46].mxu0  ;;  %v4563_v54 = vpop.f32.mrb[45].mxu1 }
 0x161   : > { %v4454_v61 = vpop.f32.mrb[47].mxu0  ;;  %v6657_v31 = vadd.f32 %v4563_v54, %v4562_v39  ;;  %v4565_v51 = vpop.f32.mrb[46].mxu1 }
 0x162   : > { %v6655_v10 = vadd.f32 %v4454_v61, %v4453_v22  ;;  %v4566_v63 = vpop.f32.mrb[47].mxu1 }
 0x163   : > { %v6659_v42 = vadd.f32 %v4566_v63, %v4565_v51  ;;  %v5016_v63 = vadd.f32 %v4440_v50, %v6666_v59 }
 0x166   : > { %v4456_v32 = vpop.f32.mrb[48].mxu0 }
 0x167   : > { %v4457_v15 = vpop.f32.mrb[49].mxu0  ;;  %v4568_v46 = vpop.f32.mrb[48].mxu1 }
 0x168   : > { %v6661_v52 = vadd.f32 %v4457_v15, %v4456_v32  ;;  %v4459_v37 = vpop.f32.mrb[50].mxu0  ;;  %v4569_v19 = vpop.f32.mrb[49].mxu1 }
 0x169   : > { %v4460_v11 = vpop.f32.mrb[51].mxu0  ;;  %v4570_v28 = vadd.f32 %v4569_v19, %v4568_v46  ;;  %v4571_v2 = vpop.f32.mrb[50].mxu1 }
 0x16a   : > { %v6669_v27 = vadd.f32 %v4460_v11, %v4459_v37  ;;  %v4572_v58 = vpop.f32.mrb[51].mxu1  ;;  %v5024_v37 = vadd.f32 %v4443_v30, %v6666_v59 }
 0x16b   : > { %v6672_v57 = vadd.f32 %v5020_v44, %v4570_v28  ;;  %v4573_v16 = vadd.f32 %v4572_v58, %v4571_v2 }
 0x16d   : > { %v6674_v3 = vadd.f32 %v5028_v14, %v4573_v16 }
 0x16e   : > { %v4462_v29 = vpop.f32.mrb[52].mxu0 }
 0x16f   : > { %v4463_v22 = vpop.f32.mrb[53].mxu0  ;;  %v4574_v39 = vpop.f32.mrb[52].mxu1 }
 0x170   : > { %v6676_v61 = vadd.f32 %v4463_v22, %v4462_v29  ;;  %v4465_v54 = vpop.f32.mrb[54].mxu0  ;;  %v4575_v51 = vpop.f32.mrb[53].mxu1  ;;  %v5036_v22 = vadd.f32 %v4446_v4, %v6666_v59 }
 0x171   : > { %v4466_v25 = vpop.f32.mrb[55].mxu0  ;;  %v4576_v32 = vadd.f32 %v4575_v51, %v4574_v39  ;;  %v4577_v15 = vpop.f32.mrb[54].mxu1 }
 0x172   : > { %v6679_v46 = vadd.f32 %v4466_v25, %v4465_v54  ;;  %v4578_v0 = vpop.f32.mrb[55].mxu1  ;;  %v5044_v25 = vadd.f32 %v4449_v55, %v6666_v59 }
 0x173   : > { %v6682_v19 = vadd.f32 %v5016_v63, %v4576_v32  ;;  %v4579_v11 = vadd.f32 %v4578_v0, %v4577_v15 }
 0x175   : > { %v6684_v44 = vadd.f32 %v5024_v37, %v4579_v11 }
 0x176   : > { %v4468_v28 = vpop.f32.mrb[56].mxu0 }
 0x177   : > { %6944 = vst [vmem:[#allocation2_spill] sm:$0xff] %v6684_v44  ;;  %v4469_v2 = vpop.f32.mrb[57].mxu0  ;;  %v4580_v58 = vpop.f32.mrb[56].mxu1 }
 0x178   : > { %v6686_v14 = vadd.f32 %v4469_v2, %v4468_v28  ;;  %v4471_v16 = vpop.f32.mrb[58].mxu0  ;;  %v4581_v29 = vpop.f32.mrb[57].mxu1 }
 0x179   : > { %v4472_v50 = vpop.f32.mrb[59].mxu0  ;;  %v4582_v39 = vadd.f32 %v4581_v29, %v4580_v58  ;;  %v4583_v54 = vpop.f32.mrb[58].mxu1  ;;  %v5032_v58 = vadd.f32 %v6653_v48, %v6666_v59  ;;  %v4941_v48 = vadd.f32 %v6426_v7, %v6666_v59  ;;  %v5052_v7 = vadd.f32 %v6661_v52, %v6666_v59 }
 0x17a   : > { %v6689_v51 = vadd.f32 %v4472_v50, %v4471_v16  ;;  %v4584_v30 = vpop.f32.mrb[59].mxu1 }
 0x17b   : > { %v6692_v63 = vadd.f32 %v5036_v22, %v4582_v39  ;;  %v4585_v32 = vadd.f32 %v4584_v30, %v4583_v54  ;;  %v5040_v22 = vadd.f32 %v6655_v10, %v6666_v59  ;;  %v4936_v30 = vadd.f32 %v6453_v17, %v6666_v59 }
 0x17d   : > { %v6694_v15 = vadd.f32 %v5044_v25, %v4585_v32 }
 0x17e   : > { %v4474_v0 = vpop.f32.mrb[60].mxu0 }
 0x17f   : > { %v4475_v37 = vpop.f32.mrb[61].mxu0  ;;  %v4586_v11 = vpop.f32.mrb[60].mxu1 }
 0x180   : > { %v6696_v28 = vadd.f32 %v4475_v37, %v4474_v0  ;;  %v4477_v2 = vpop.f32.mrb[62].mxu0  ;;  %v4587_v44 = vpop.f32.mrb[61].mxu1  ;;  %v4946_v37 = vadd.f32 %v6456_v62, %v6666_v59 }
 0x181   : > { %v4478_v4 = vpop.f32.mrb[63].mxu0  ;;  %v4588_v16 = vadd.f32 %v4587_v44, %v4586_v11  ;;  %v4589_v29 = vpop.f32.mrb[62].mxu1 }
 0x182   : > { %v6700_v50 = vadd.f32 %v4478_v4, %v4477_v2  ;;  %v4590_v55 = vpop.f32.mrb[63].mxu1  ;;  %v4951_v4 = vadd.f32 %v6434_v8, %v6666_v59  ;;  %v5060_v8 = vadd.f32 %v6669_v27, %v6666_v59  ;;  %v4966_v27 = vadd.f32 %v6522_v1, %v6666_v59 }
 0x183   : > { %v6704_v39 = vadd.f32 %v5032_v58, %v4588_v16  ;;  %v4591_v54 = vadd.f32 %v4590_v55, %v4589_v29 }
 0x185   : > { %v6708_v25 = vadd.f32 %v5040_v22, %v4591_v54 }
 0x186   : > { %v4794_v32 = vpop.f32.mrb[64].mxu0 }
 0x187   : > { %v4937_v44 = vadd.f32 %v4936_v30, %v4794_v32  ;;  %v1147_v0 = vpop.f32.mrb[65].mxu0 }
 0x188   : > { %v4592_v11 = vpop.f32.mrb[64].mxu1  ;;  %v4942_v2 = vadd.f32 %v4941_v48, %v1147_v0  ;;  %v4795_v10 = vpop.f32.mrb[66].mxu0 }
 0x189   : > { %v6717_v58 = vadd.f32 %v4937_v44, %v6589_v13  ;;  %v4593_v17 = vpop.f32.mrb[65].mxu1  ;;  %v4947_v16 = vadd.f32 %v4946_v37, %v4795_v10  ;;  %v1150_v29 = vpop.f32.mrb[67].mxu0 }
 0x18a   : > { %v6722_v55 = vadd.f32 %v4942_v2, %v6558_v35  ;;  %v4594_v22 = vadd.f32 %v4593_v17, %v4592_v11  ;;  %v4595_v62 = vpop.f32.mrb[66].mxu1  ;;  %v4952_v54 = vadd.f32 %v4951_v4, %v1150_v29  ;;  %v4956_v35 = vadd.f32 %v6515_v23, %v6666_v59 }
 0x18b   : > { %v6725_v30 = vadd.f32 %v4947_v16, %v6596_v43  ;;  %v4596_v32 = vpop.f32.mrb[67].mxu1  ;;  %v4961_v43 = vadd.f32 %v6481_v38, %v6666_v59  ;;  %v5048_v38 = vadd.f32 %v6676_v61, %v6666_v59 }
 0x18c   : > { %v6729_v13 = vadd.f32 %v5052_v7, %v4594_v22  ;;  %v6732_v48 = vadd.f32 %v4952_v54, %v6565_v20  ;;  %v4597_v44 = vadd.f32 %v4596_v32, %v4595_v62  ;;  %v4971_v20 = vadd.f32 %v6488_v18, %v6666_v59 }
 0x18d   : > { %v5056_v18 = vadd.f32 %v6679_v46, %v6666_v59  ;;  %v4986_v46 = vadd.f32 %v6587_v6, %v6666_v59 }
 0x18e   : > { %v6736_v52 = vadd.f32 %v5060_v8, %v4597_v44  ;;  %v4798_v0 = vpop.f32.mrb[68].mxu0 }
 0x18f   : > { %v4957_v37 = vadd.f32 %v4956_v35, %v4798_v0  ;;  %v1163_v11 = vpop.f32.mrb[69].mxu0 }
 0x190   : > { %v4598_v2 = vpop.f32.mrb[68].mxu1  ;;  %v4962_v10 = vadd.f32 %v4961_v43, %v1163_v11  ;;  %v4799_v4 = vpop.f32.mrb[70].mxu0 }
 0x191   : > { %v6745_v17 = vadd.f32 %v4957_v37, %v6630_v34  ;;  %v4599_v23 = vpop.f32.mrb[69].mxu1  ;;  %v4967_v16 = vadd.f32 %v4966_v27, %v4799_v4  ;;  %v1166_v29 = vpop.f32.mrb[71].mxu0 }
 0x192   : > { %v6750_v7 = vadd.f32 %v4962_v10, %v6613_v49  ;;  %v4600_v22 = vadd.f32 %v4599_v23, %v4598_v2  ;;  %v4601_v1 = vpop.f32.mrb[70].mxu1  ;;  %v4972_v62 = vadd.f32 %v4971_v20, %v1166_v29  ;;  %v4976_v49 = vadd.f32 %v6578_v21, %v6666_v59 }
 0x193   : > { %v6753_v54 = vadd.f32 %v4967_v16, %v6636_v56  ;;  %v4602_v32 = vpop.f32.mrb[71].mxu1  ;;  %v4981_v56 = vadd.f32 %v6547_v5, %v6666_v59  ;;  %v5068_v5 = vadd.f32 %v6686_v14, %v6666_v59 }
 0x194   : > { %v6757_v34 = vadd.f32 %v5048_v38, %v4600_v22  ;;  %v6760_v8 = vadd.f32 %v4972_v62, %v6620_v12  ;;  %v4603_v44 = vadd.f32 %v4602_v32, %v4601_v1  ;;  %v4991_v12 = vadd.f32 %v6556_v26, %v6666_v59 }
 0x195   : > { %v5076_v26 = vadd.f32 %v6689_v51, %v6666_v59  ;;  %v5006_v51 = vadd.f32 %v6628_v36, %v6666_v59 }
 0x196   : > { %v6764_v61 = vadd.f32 %v5056_v18, %v4603_v44  ;;  %v4802_v35 = vpop.f32.mrb[72].mxu0 }
 0x197   : > { %v4977_v0 = vadd.f32 %v4976_v49, %v4802_v35  ;;  %v1179_v43 = vpop.f32.mrb[73].mxu0 }
 0x198   : > { %v4604_v37 = vpop.f32.mrb[72].mxu1  ;;  %v4982_v11 = vadd.f32 %v4981_v56, %v1179_v43  ;;  %v4803_v27 = vpop.f32.mrb[74].mxu0 }
 0x199   : > { %v6773_v2 = vadd.f32 %v4977_v0, %v6645_v9  ;;  %v4605_v21 = vpop.f32.mrb[73].mxu1  ;;  %v4987_v10 = vadd.f32 %v4986_v46, %v4803_v27  ;;  %v1182_v4 = vpop.f32.mrb[75].mxu0 }
 0x19a   : > { %v6778_v20 = vadd.f32 %v4982_v11, %v6639_v47  ;;  %v4606_v23 = vadd.f32 %v4605_v21, %v4604_v37  ;;  %v4607_v6 = vpop.f32.mrb[74].mxu1  ;;  %v4992_v16 = vadd.f32 %v4991_v12, %v1182_v4  ;;  %v4996_v47 = vadd.f32 %v6625_v53, %v6666_v59 }
 0x19b   : > { %v6781_v29 = vadd.f32 %v4987_v10, %v6647_v24  ;;  %v4608_v38 = vpop.f32.mrb[75].mxu1  ;;  %v5001_v24 = vadd.f32 %v6605_v45, %v6666_v59  ;;  %v5064_v45 = vadd.f32 %v6696_v28, %v6666_v59 }
 0x19c   : > { %v6785_v9 = vadd.f32 %v5068_v5, %v4606_v23  ;;  %v6788_v22 = vadd.f32 %v4992_v16, %v6643_v33  ;;  %v4609_v1 = vadd.f32 %v4608_v38, %v4607_v6  ;;  %v5011_v33 = vadd.f32 %v6611_v60, %v6666_v59 }
 0x19d   : > { %v5072_v60 = vadd.f32 %v6700_v50, %v6666_v59 }
 0x19e   : > { %v6792_v14 = vadd.f32 %v5076_v26, %v4609_v1  ;;  %v4806_v62 = vpop.f32.mrb[76].mxu0 }
 0x19f   : > { %v4997_v32 = vadd.f32 %v4996_v47, %v4806_v62  ;;  %v1195_v18 = vpop.f32.mrb[77].mxu0 }
 0x1a0   : > { %v4610_v44 = vpop.f32.mrb[76].mxu1  ;;  %v5002_v49 = vadd.f32 %v5001_v24, %v1195_v18  ;;  %v4807_v35 = vpop.f32.mrb[78].mxu0 }
 0x1a1   : > { %v6801_v56 = vadd.f32 %v4997_v32, %v6657_v31  ;;  %v4611_v53 = vpop.f32.mrb[77].mxu1  ;;  %v5007_v0 = vadd.f32 %v5006_v51, %v4807_v35  ;;  %v1198_v43 = vpop.f32.mrb[79].mxu0 }
 0x1a2   : > { %v6806_v46 = vadd.f32 %v5002_v49, %v6649_v41  ;;  %v4612_v37 = vadd.f32 %v4611_v53, %v4610_v44  ;;  %v4613_v36 = vpop.f32.mrb[78].mxu1  ;;  %v5012_v11 = vadd.f32 %v5011_v33, %v1198_v43 }
 0x1a3   : > { %v6809_v27 = vadd.f32 %v5007_v0, %v6659_v42  ;;  %v4614_v12 = vpop.f32.mrb[79].mxu1 }
 0x1a4   : > { %v6813_v31 = vadd.f32 %v5064_v45, %v4612_v37  ;;  %v5013_v21 = vadd.f32 %v5012_v11, %v6651_v40  ;;  %v4615_v10 = vadd.f32 %v4614_v12, %v4613_v36 }
 0x1a6   : > { %v6816_v4 = vadd.f32 %v5072_v60, %v4615_v10  ;;  %v4656_v28 = vpop.f32.mrb[80].mxu0 }
 0x1a7   : > { %v4657_v41 = vpop.f32.mrb[81].mxu0 }
 0x1a8   : > { %v4658_v5 = vadd.f32 %v4657_v41, %v4656_v28  ;;  %v4659_v23 = vpop.f32.mrb[82].mxu0 }
 0x1a9   : > { %v4660_v6 = vpop.f32.mrb[83].mxu0 }
 0x1aa   : > { %v4661_v16 = vadd.f32 %v4660_v6, %v4659_v23  ;;  %v6819_v42 = vadd.f32 %v6722_v55, %v4658_v5 }
 0x1ac   : > { %v6822_v38 = vadd.f32 %v6732_v48, %v4661_v16 }
 0x1ae   : > { %v4662_v59 = vpop.f32.mrb[84].mxu0 }
 0x1af   : > { %v4663_v50 = vpop.f32.mrb[85].mxu0 }
 0x1b0   : > { %v4664_v26 = vadd.f32 %v4663_v50, %v4662_v59  ;;  %v4665_v1 = vpop.f32.mrb[86].mxu0 }
 0x1b1   : > { %v4666_v40 = vpop.f32.mrb[87].mxu0 }
 0x1b2   : > { %v4667_v47 = vadd.f32 %v4666_v40, %v4665_v1  ;;  %v4939_v62 = vadd.f32 %v6717_v58, %v4664_v26 }
 0x1b4   : > { %v4949_v24 = vadd.f32 %v6725_v30, %v4667_v47 }
 0x1b6   : > { %v4668_v32 = vpop.f32.mrb[88].mxu0 }
 0x1b7   : > { %v4669_v18 = vpop.f32.mrb[89].mxu0 }
 0x1b8   : > { %v4670_v51 = vadd.f32 %v4669_v18, %v4668_v32  ;;  %v4671_v44 = vpop.f32.mrb[90].mxu0 }
 0x1b9   : > { %v4672_v49 = vpop.f32.mrb[91].mxu0 }
 0x1ba   : > { %v4673_v55 = vadd.f32 %v4672_v49, %v4671_v44  ;;  %v6827_v35 = vadd.f32 %v6750_v7, %v4670_v51 }
 0x1bc   : > { %v6830_v48 = vadd.f32 %v6760_v8, %v4673_v55 }
 0x1be   : > { %v4674_v33 = vpop.f32.mrb[92].mxu0 }
 0x1bf   : > { %v4675_v53 = vpop.f32.mrb[93].mxu0 }
 0x1c0   : > { %v4676_v0 = vadd.f32 %v4675_v53, %v4674_v33  ;;  %v4677_v43 = vpop.f32.mrb[94].mxu0 }
 0x1c1   : > { %v4678_v45 = vpop.f32.mrb[95].mxu0 }
 0x1c2   : > { %v4679_v58 = vadd.f32 %v4678_v45, %v4677_v43  ;;  %v6833_v30 = vadd.f32 %v6745_v17, %v4676_v0 }
 0x1c4   : > { %v6836_v37 = vadd.f32 %v6753_v54, %v4679_v58 }
 0x1c6   : > { %v4680_v36 = vpop.f32.mrb[96].mxu0 }
 0x1c7   : > { %v4681_v11 = vpop.f32.mrb[97].mxu0 }
 0x1c8   : > { %v4682_v12 = vadd.f32 %v4681_v11, %v4680_v36  ;;  %v4683_v7 = vpop.f32.mrb[98].mxu0 }
 0x1c9   : > { %v4684_v60 = vpop.f32.mrb[99].mxu0 }
 0x1ca   : > { %v4685_v10 = vadd.f32 %v4684_v60, %v4683_v7  ;;  %v6839_v8 = vadd.f32 %v6778_v20, %v4682_v12 }
 0x1cc   : > { %v6842_v28 = vadd.f32 %v6788_v22, %v4685_v10 }
 0x1ce   : > { %v4686_v41 = vpop.f32.mrb[100].mxu0 }
 0x1cf   : > { %v4687_v5 = vpop.f32.mrb[101].mxu0 }
 0x1d0   : > { %v4688_v23 = vadd.f32 %v4687_v5, %v4686_v41  ;;  %v4689_v17 = vpop.f32.mrb[102].mxu0 }
 0x1d1   : > { %v4690_v6 = vpop.f32.mrb[103].mxu0 }
 0x1d2   : > { %v4691_v16 = vadd.f32 %v4690_v6, %v4689_v17  ;;  %v6845_v54 = vadd.f32 %v6773_v2, %v4688_v23 }
 0x1d4   : > { %v6848_v59 = vadd.f32 %v6781_v29, %v4691_v16 }
 0x1d6   : > { %v4692_v50 = vpop.f32.mrb[104].mxu0 }
 0x1d7   : > { %v4693_v26 = vpop.f32.mrb[105].mxu0 }
 0x1d8   : > { %v4694_v1 = vadd.f32 %v4693_v26, %v4692_v50  ;;  %v4695_v20 = vpop.f32.mrb[106].mxu0 }
 0x1d9   : > { %v4696_v40 = vpop.f32.mrb[107].mxu0 }
 0x1da   : > { %v4697_v47 = vadd.f32 %v4696_v40, %v4695_v20  ;;  %v6851_v22 = vadd.f32 %v6806_v46, %v4694_v1 }
 0x1dc   : > { %v6853_v32 = vadd.f32 %v5013_v21, %v4697_v47 }
 0x1de   : > { %v4698_v18 = vpop.f32.mrb[108].mxu0 }
 0x1df   : > { %v4699_v51 = vpop.f32.mrb[109].mxu0 }
 0x1e0   : > { %v4700_v44 = vadd.f32 %v4699_v51, %v4698_v18  ;;  %v4701_v49 = vpop.f32.mrb[110].mxu0 }
 0x1e1   : > { %v4702_v2 = vpop.f32.mrb[111].mxu0 }
 0x1e2   : > { %v4703_v55 = vadd.f32 %v4702_v2, %v4701_v49  ;;  %v6856_v29 = vadd.f32 %v6801_v56, %v4700_v44  ;;  %v6945_v2 = vld [vmem:[#allocation2_spill] sm:$0xff] }
 0x1e4   : > { %v6859_v33 = vadd.f32 %v6809_v27, %v4703_v55 }
 0x1e6   : > { %v4704_v53 = vpop.f32.mrb[112].mxu0 }
 0x1e7   : > { %v4705_v0 = vpop.f32.mrb[113].mxu0 }
 0x1e8   : > { %v4890_v43 = vpop.f32.mrb[80].mxu1  ;;  %v4706_v46 = vadd.f32 %v4705_v0, %v4704_v53  ;;  %v4707_v45 = vpop.f32.mrb[114].mxu0 }
 0x1e9   : > { %v4940_v21 = vadd.f32 %v4939_v62, %v4890_v43  ;;  %v3299_v58 = vpop.f32.mrb[81].mxu1  ;;  %v4708_v36 = vpop.f32.mrb[115].mxu0 }
 0x1ea   : > { %v4945_v11 = vadd.f32 %v6819_v42, %v3299_v58  ;;  %v4891_v12 = vpop.f32.mrb[82].mxu1  ;;  %v4709_v7 = vadd.f32 %v4708_v36, %v4707_v45  ;;  %v6863_v60 = vadd.f32 %v6672_v57, %v4706_v46 }
 0x1eb   : > { %v4950_v56 = vadd.f32 %v4949_v24, %v4891_v12  ;;  %v3302_v10 = vpop.f32.mrb[83].mxu1  ;;  %v3460_v5 = vmax.f32 %v4940_v21, 0.0 }
 0x1ec   : > { %v4955_v27 = vadd.f32 %v6822_v38, %v3302_v10  ;;  %v6868_v41 = vadd.f32 %v6674_v3, %v4709_v7  ;;  %v3458_v62 = vmax.f32 %v4945_v11, 0.0 }
 0x1ed   : > { %v3461_v23 = vmax.f32 %v4950_v56, 0.0 }
 0x1ee   : > { %v3459_v57 = vmax.f32 %v4955_v27, 0.0  ;;  %v4710_v42 = vpop.f32.mrb[116].mxu0 }
 0x1ef   : > { %v4281_v17 = vpack.c.bf16 %v3461_v23, %v3460_v5  ;;  %v4711_v24 = vpop.f32.mrb[117].mxu0 }
 0x1f0   : > { %v4276_v6 = vpack.c.bf16 %v3459_v57, %v3458_v62  ;;  %v4894_v16 = vpop.f32.mrb[84].mxu1  ;;  %v4712_v38 = vadd.f32 %v4711_v24, %v4710_v42  ;;  %v4713_v50 = vpop.f32.mrb[118].mxu0 }
 0x1f1   : > { %4353 = vst [vmem:[%s6873_s7 + $0x8] sm:$0xff] %v4281_v17   ;;  %v4960_v3 = vadd.f32 %v6833_v30, %v4894_v16  ;;  %v3315_v26 = vpop.f32.mrb[85].mxu1  ;;  %v4714_v1 = vpop.f32.mrb[119].mxu0 }
 0x1f2   : > { %4277 = vst [vmem:[%s6873_s7] sm:$0xff] %v4276_v6   ;;  %v4965_v20 = vadd.f32 %v6827_v35, %v3315_v26  ;;  %v4895_v40 = vpop.f32.mrb[86].mxu1  ;;  %v4715_v47 = vadd.f32 %v4714_v1, %v4713_v50  ;;  %v6880_v18 = vadd.f32 %v6682_v19, %v4712_v38 }
 0x1f3   : > { %v4970_v51 = vadd.f32 %v6836_v37, %v4895_v40  ;;  %v3318_v44 = vpop.f32.mrb[87].mxu1  ;;  %v3464_v30 = vmax.f32 %v4960_v3, 0.0 }
 0x1f4   : > { %v4975_v49 = vadd.f32 %v6830_v48, %v3318_v44  ;;  %v6885_v55 = vadd.f32 %v6945_v2, %v4715_v47  ;;  %v3462_v0 = vmax.f32 %v4965_v20, 0.0 }
 0x1f5   : > { %v3465_v53 = vmax.f32 %v4970_v51, 0.0 }
 0x1f6   : > { %v3463_v43 = vmax.f32 %v4975_v49, 0.0  ;;  %v4716_v35 = vpop.f32.mrb[120].mxu0 }
 0x1f7   : > { %v4291_v46 = vpack.c.bf16 %v3465_v53, %v3464_v30  ;;  %v4717_v45 = vpop.f32.mrb[121].mxu0 }
 0x1f8   : > { %v4286_v21 = vpack.c.bf16 %v3463_v43, %v3462_v0  ;;  %v4898_v19 = vpop.f32.mrb[88].mxu1  ;;  %v4718_v58 = vadd.f32 %v4717_v45, %v4716_v35  ;;  %v4719_v36 = vpop.f32.mrb[122].mxu0 }
 0x1f9   : > { %4355 = vst [vmem:[%s6873_s7 + $0x18] sm:$0xff] %v4291_v46   ;;  %v4980_v37 = vadd.f32 %v6845_v54, %v4898_v19  ;;  %v3331_v11 = vpop.f32.mrb[89].mxu1  ;;  %v4720_v48 = vpop.f32.mrb[123].mxu0 }
 0x1fa   : > { %4354 = vst [vmem:[%s6873_s7 + $0x10] sm:$0xff] %v4286_v21   ;;  %v4985_v12 = vadd.f32 %v6839_v8, %v3331_v11  ;;  %v4899_v7 = vpop.f32.mrb[90].mxu1  ;;  %v4721_v56 = vadd.f32 %v4720_v48, %v4719_v36  ;;  %v6892_v10 = vadd.f32 %v6692_v63, %v4718_v58 }
 0x1fb   : > { %v4990_v27 = vadd.f32 %v6848_v59, %v4899_v7  ;;  %v3334_v5 = vpop.f32.mrb[91].mxu1  ;;  %v3468_v54 = vmax.f32 %v4980_v37, 0.0 }
 0x1fc   : > { %v4995_v23 = vadd.f32 %v6842_v28, %v3334_v5  ;;  %v6897_v62 = vadd.f32 %v6694_v15, %v4721_v56  ;;  %v3466_v42 = vmax.f32 %v4985_v12, 0.0 }
 0x1fd   : > { %v3469_v57 = vmax.f32 %v4990_v27, 0.0 }
 0x1fe   : > { %v3467_v17 = vmax.f32 %v4995_v23, 0.0  ;;  %v4722_v8 = vpop.f32.mrb[124].mxu0 }
 0x1ff   : > { %v4301_v24 = vpack.c.bf16 %v3469_v57, %v3468_v54  ;;  %v4723_v6 = vpop.f32.mrb[125].mxu0 }
 0x200   : > { %v4296_v16 = vpack.c.bf16 %v3467_v17, %v3466_v42  ;;  %v4902_v63 = vpop.f32.mrb[92].mxu1  ;;  %v4724_v38 = vadd.f32 %v4723_v6, %v4722_v8  ;;  %v4725_v50 = vpop.f32.mrb[126].mxu0 }
 0x201   : > { %4357 = vst [vmem:[%s6873_s7 + $0x28] sm:$0xff] %v4301_v24   ;;  %v5000_v59 = vadd.f32 %v6856_v29, %v4902_v63  ;;  %v3347_v3 = vpop.f32.mrb[93].mxu1  ;;  %v4726_v28 = vpop.f32.mrb[127].mxu0 }
 0x202   : > { %4356 = vst [vmem:[%s6873_s7 + $0x20] sm:$0xff] %v4296_v16   ;;  %v5005_v15 = vadd.f32 %v6851_v22, %v3347_v3  ;;  %v4903_v26 = vpop.f32.mrb[94].mxu1  ;;  %v4727_v1 = vadd.f32 %v4726_v28, %v4725_v50  ;;  %v5034_v20 = vadd.f32 %v6704_v39, %v4724_v38 }
 0x203   : > { %v5010_v40 = vadd.f32 %v6859_v33, %v4903_v26  ;;  %v3350_v47 = vpop.f32.mrb[95].mxu1  ;;  %v3472_v49 = vmax.f32 %v5000_v59, 0.0 }
 0x204   : > { %v5015_v51 = vadd.f32 %v6853_v32, %v3350_v47  ;;  %v5042_v44 = vadd.f32 %v6708_v25, %v4727_v1  ;;  %v3470_v2 = vmax.f32 %v5005_v15, 0.0 }
 0x205   : > { %v3473_v29 = vmax.f32 %v5010_v40, 0.0 }
 0x206   : > { %v3471_v30 = vmax.f32 %v5015_v51, 0.0  ;;  %v4728_v53 = vpop.f32.mrb[128].mxu0 }
 0x207   : > { %v4311_v0 = vpack.c.bf16 %v3473_v29, %v3472_v49  ;;  %v4729_v22 = vpop.f32.mrb[129].mxu0 }
 0x208   : > { %v4306_v43 = vpack.c.bf16 %v3471_v30, %v3470_v2  ;;  %v4906_v35 = vpop.f32.mrb[0].mxu1  ;;  %v4730_v46 = vadd.f32 %v4729_v22, %v4728_v53  ;;  %v4731_v39 = vpop.f32.mrb[130].mxu0 }
 0x209   : > { %4359 = vst [vmem:[%s6873_s7 + $0x38] sm:$0xff] %v4311_v0   ;;  %v5019_v33 = vadd.f32 %v6880_v18, %v4906_v35  ;;  %v3363_v45 = vpop.f32.mrb[1].mxu1  ;;  %v4732_v21 = vpop.f32.mrb[131].mxu0 }
 0x20a   : > { %4358 = vst [vmem:[%s6873_s7 + $0x30] sm:$0xff] %v4306_v43   ;;  %v5023_v25 = vadd.f32 %v6863_v60, %v3363_v45  ;;  %v4907_v32 = vpop.f32.mrb[2].mxu1  ;;  %v4733_v19 = vadd.f32 %v4732_v21, %v4731_v39  ;;  %v5054_v58 = vadd.f32 %v6729_v13, %v4730_v46 }
 0x20b   : > { %v5027_v36 = vadd.f32 %v6885_v55, %v4907_v32  ;;  %v3366_v37 = vpop.f32.mrb[3].mxu1  ;;  %v3476_v12 = vmax.f32 %v5019_v33, 0.0 }
 0x20c   : > { %v5031_v11 = vadd.f32 %v6868_v41, %v3366_v37  ;;  %v5062_v48 = vadd.f32 %v6736_v52, %v4733_v19  ;;  %v3474_v7 = vmax.f32 %v5023_v25, 0.0 }
 0x20d   : > { %v3477_v18 = vmax.f32 %v5027_v36, 0.0 }
 0x20e   : > { %v3475_v56 = vmax.f32 %v5031_v11, 0.0  ;;  %v4734_v27 = vpop.f32.mrb[132].mxu0 }
 0x20f   : > { %v4321_v5 = vpack.c.bf16 %v3477_v18, %v3476_v12  ;;  %v4735_v60 = vpop.f32.mrb[133].mxu0 }
 0x210   : > { %v4316_v23 = vpack.c.bf16 %v3475_v56, %v3474_v7  ;;  %v4910_v54 = vpop.f32.mrb[4].mxu1  ;;  %v4736_v57 = vadd.f32 %v4735_v60, %v4734_v27  ;;  %v4737_v13 = vpop.f32.mrb[134].mxu0 }
 0x211   : > { %4361 = vst [vmem:[%s6873_s7 + $0x48] sm:$0xff] %v4321_v5   ;;  %v5035_v42 = vadd.f32 %v5034_v20, %v4910_v54  ;;  %v3379_v55 = vpop.f32.mrb[5].mxu1  ;;  %v4738_v17 = vpop.f32.mrb[135].mxu0 }
 0x212   : > { %4360 = vst [vmem:[%s6873_s7 + $0x40] sm:$0xff] %v4316_v23   ;;  %v5039_v41 = vadd.f32 %v6892_v10, %v3379_v55  ;;  %v4911_v52 = vpop.f32.mrb[6].mxu1  ;;  %v4739_v8 = vadd.f32 %v4738_v17, %v4737_v13  ;;  %v5050_v24 = vadd.f32 %v6757_v34, %v4736_v57 }
 0x213   : > { %v5043_v6 = vadd.f32 %v5042_v44, %v4911_v52  ;;  %v3382_v16 = vpop.f32.mrb[7].mxu1  ;;  %v3480_v50 = vmax.f32 %v5035_v42, 0.0 }
 0x214   : > { %v5047_v63 = vadd.f32 %v6897_v62, %v3382_v16  ;;  %v5058_v38 = vadd.f32 %v6764_v61, %v4739_v8  ;;  %v3478_v3 = vmax.f32 %v5039_v41, 0.0 }
 0x215   : > { %v3481_v59 = vmax.f32 %v5043_v6, 0.0 }
 0x216   : > { %v3479_v28 = vmax.f32 %v5047_v63, 0.0  ;;  %v4740_v15 = vpop.f32.mrb[136].mxu0 }
 0x217   : > { %v4331_v26 = vpack.c.bf16 %v3481_v59, %v3480_v50  ;;  %v4741_v1 = vpop.f32.mrb[137].mxu0 }
 0x218   : > { %v4326_v10 = vpack.c.bf16 %v3479_v28, %v3478_v3  ;;  %v4914_v20 = vpop.f32.mrb[8].mxu1  ;;  %v4742_v40 = vadd.f32 %v4741_v1, %v4740_v15  ;;  %v4743_v47 = vpop.f32.mrb[138].mxu0 }
 0x219   : > { %4363 = vst [vmem:[%s6873_s7 + $0x58] sm:$0xff] %v4331_v26   ;;  %v5051_v34 = vadd.f32 %v5050_v24, %v4914_v20  ;;  %v3395_v51 = vpop.f32.mrb[9].mxu1  ;;  %v4744_v44 = vpop.f32.mrb[139].mxu0 }
 0x21a   : > { %4362 = vst [vmem:[%s6873_s7 + $0x50] sm:$0xff] %v4326_v10   ;;  %v5055_v62 = vadd.f32 %v5054_v58, %v3395_v51  ;;  %v4915_v49 = vpop.f32.mrb[10].mxu1  ;;  %v4745_v61 = vadd.f32 %v4744_v44, %v4743_v47  ;;  %v5070_v29 = vadd.f32 %v6785_v9, %v4742_v40 }
 0x21b   : > { %v5059_v2 = vadd.f32 %v5058_v38, %v4915_v49  ;;  %v3398_v30 = vpop.f32.mrb[11].mxu1  ;;  %v3484_v22 = vmax.f32 %v5051_v34, 0.0 }
 0x21c   : > { %v5063_v53 = vadd.f32 %v5062_v48, %v3398_v30  ;;  %v5078_v0 = vadd.f32 %v6792_v14, %v4745_v61  ;;  %v3482_v35 = vmax.f32 %v5055_v62, 0.0 }
 0x21d   : > { %v3485_v43 = vmax.f32 %v5059_v2, 0.0 }
 0x21e   : > { %v3483_v46 = vmax.f32 %v5063_v53, 0.0  ;;  %v4746_v39 = vpop.f32.mrb[140].mxu0 }
 0x21f   : > { %v4341_v33 = vpack.c.bf16 %v3485_v43, %v3484_v22  ;;  %v4747_v45 = vpop.f32.mrb[141].mxu0 }
 0x220   : > { %v4336_v21 = vpack.c.bf16 %v3483_v46, %v3482_v35  ;;  %v4918_v25 = vpop.f32.mrb[12].mxu1  ;;  %v4748_v32 = vadd.f32 %v4747_v45, %v4746_v39  ;;  %v4749_v19 = vpop.f32.mrb[142].mxu0 }
 0x221   : > { %4365 = vst [vmem:[%s6873_s7 + $0x68] sm:$0xff] %v4341_v33   ;;  %v3411_v9 = vpop.f32.mrb[13].mxu1  ;;  %v4750_v58 = vpop.f32.mrb[143].mxu0 }
 0x222   : > { %4364 = vst [vmem:[%s6873_s7 + $0x60] sm:$0xff] %v4336_v21   ;;  %v5066_v36 = vadd.f32 %v6813_v31, %v4748_v32  ;;  %v5071_v14 = vadd.f32 %v5070_v29, %v3411_v9  ;;  %v4919_v37 = vpop.f32.mrb[14].mxu1  ;;  %v4751_v11 = vadd.f32 %v4750_v58, %v4749_v19 }
 0x223   : > { %v3414_v48 = vpop.f32.mrb[15].mxu1 }
 0x224   : > { %v5067_v12 = vadd.f32 %v5066_v36, %v4918_v25  ;;  %v5074_v18 = vadd.f32 %v6816_v4, %v4751_v11  ;;  %v5079_v7 = vadd.f32 %v5078_v0, %v3414_v48  ;;  %v3486_v56 = vmax.f32 %v5071_v14, 0.0 }
 0x226   : > { %v5075_v27 = vadd.f32 %v5074_v18, %v4919_v37  ;;  %v3487_v5 = vmax.f32 %v5079_v7, 0.0  ;;  %v3488_v60 = vmax.f32 %v5067_v12, 0.0 }
 0x228   : > { %v3489_v23 = vmax.f32 %v5075_v27, 0.0  ;;  %v4346_v54 = vpack.c.bf16 %v3487_v5, %v3486_v56 }
 0x22a   : > { %v4351_v57 = vpack.c.bf16 %v3489_v23, %v3488_v60  ;;  %4366 = vst [vmem:[%s6873_s7 + $0x70] sm:$0xff] %v4346_v54  }
 0x22c   : > { %4367 = vst [vmem:[%s6873_s7 + $0x78] sm:$0xff] %v4351_v57  }
 0x22d PF: > { %s13_s14 = sadd.s32 1, %s5410_s14   ;;  %s6946_s12 = smov %s5406_s13 }
 0x22e   : > { %p10_p5 = scmp.ge.s32.totalorder %s13_s14, 4   ;;  %s6947_s13 = smov %s6949_s15 }
 0x230   :  { %12 = sbr.rel (!%p10_p5) target bundleno = 2 (0x2), region = 72 }

// kernel: a_call__.10
= control target key start
LH: loop header
LB: loop body
LE: loop exit
PB: predicated region body
PF: predicated region fallthrough
CT: control target
= control target key end

     0   :  { %s4452_s1 = inlined_call_operand.vmem [shape: bf16[3,384,128], index: 1, kind: input, shape index: {}]   ;;  %s4453_s0 = inlined_call_operand.vmem [shape: bf16[2,36,9,128], index: 0, kind: input, shape index: {}]   ;;  %s4454_s2 = inlined_call_operand.vmem [shape: f32[1,128], index: 2, kind: input, shape index: {}]   ;;  %s4455_s3 = inlined_call_operand.vmem [shape: bf16[2,8,8,128], index: 3, kind: output, shape index: {}]  }
   0x1   :  { %v3191_v0 = vld [vmem:[%s4452_s1 + $0x40] sm:$0xff]   ;;  %v3194_v3 = vld [vmem:[%s4452_s1 + $0x48] sm:$0xff]   ;;  %v3197_v6 = vld [vmem:[%s4452_s1 + $0x50] sm:$0xff]  }
   0x2   :  { %v3192_v1 = vld [vmem:[%s4452_s1 + $0x80] sm:$0xff]   ;;  %2743 = vmatprep.subr.bf16.mxu0 %v3191_v0  ;;  %v3195_v4 = vld [vmem:[%s4452_s1 + $0x88] sm:$0xff]   ;;  %v3198_v7 = vld [vmem:[%s4452_s1 + $0x90] sm:$0xff]  }
   0x3   :  { %v3193_v2 = vld [vmem:[%s4452_s1] sm:$0xff]   ;;  %2983 = vmatprep.subr.bf16.mxu1 %v3192_v1  ;;  %v3196_v5 = vld [vmem:[%s4452_s1 + $0x8] sm:$0xff]   ;;  %v3199_v8 = vld [vmem:[%s4452_s1 + $0x10] sm:$0xff]  }
   0x4   :  { %2744 = vmatpush3.bf16.msra.mxu0 %v3193_v2  ;;  %2984 = vmatpush3.bf16.msra.mxu1 %v3192_v1  ;;  %v3200_v9 = vld [vmem:[%s4452_s1 + $0x58] sm:$0xff]   ;;  %v3203_v12 = vld [vmem:[%s4452_s1 + $0x60] sm:$0xff]   ;;  %v3206_v15 = vld [vmem:[%s4452_s1 + $0x68] sm:$0xff]  }
   0x5   :  { %2745 = vmatprep.subr.bf16.mxu0 %v3194_v3  ;;  %2985 = vmatprep.subr.bf16.mxu1 %v3195_v4  ;;  %v3201_v10 = vld [vmem:[%s4452_s1 + $0x98] sm:$0xff]   ;;  %v3204_v13 = vld [vmem:[%s4452_s1 + $0xa0] sm:$0xff]   ;;  %v3207_v16 = vld [vmem:[%s4452_s1 + $0xa8] sm:$0xff]  }
   0x6   :  { %v3202_v11 = vld [vmem:[%s4452_s1 + $0x18] sm:$0xff]   ;;  %v3205_v14 = vld [vmem:[%s4452_s1 + $0x20] sm:$0xff]   ;;  %v3208_v17 = vld [vmem:[%s4452_s1 + $0x28] sm:$0xff]  }
   0x7   :  { %v3209_v18 = vld [vmem:[%s4452_s1 + $0x70] sm:$0xff]   ;;  %v3212_v21 = vld [vmem:[%s4452_s1 + $0x78] sm:$0xff]   ;;  %v22_v24 = vld [vmem:[%s4453_s0] sm:$0xf] }
   0x8   :  { %2746 = vmatpush3.bf16.msra.mxu0 %v3196_v5  ;;  %2986 = vmatpush3.bf16.msra.mxu1 %v3195_v4  ;;  %v3210_v19 = vld [vmem:[%s4452_s1 + $0xb0] sm:$0xff]   ;;  %v3213_v22 = vld [vmem:[%s4452_s1 + $0xb8] sm:$0xff]   ;;  %v23_v25 = vld [vmem:[%s4453_s0 + $0x8] sm:$0xf] }
   0x9   :  { %2747 = vmatprep.subr.bf16.mxu0 %v3197_v6  ;;  %2987 = vmatprep.subr.bf16.mxu1 %v3198_v7  ;;  %v3211_v20 = vld [vmem:[%s4452_s1 + $0x30] sm:$0xff]   ;;  %v55_v26 = vld [vmem:[%s4453_s0 + $0x4] sm:$0x1]  ;;  %v3214_v27 = vld [vmem:[%s4452_s1 + $0x38] sm:$0xff]   ;;  %v2328_v47 = vcombine.low %v22_v24, %v23_v25 }
   0xa   :  { %v3215_v23 = vld [vmem:[%s4453_s0 + $0x48] ss:$8 sps:$4 sm:$0xff]   ;;  %v56_v28 = vld [vmem:[%s4453_s0 + $0xc] sm:$0x1]  ;;  %v2312_v29 = vcombine.low %v22_v24, %v55_v26  ;;  %v3474_v31 = vld [vmem:[%s4453_s0 + $0x18] sm:$0xf] }
   0xb   :  { %583 = vmatprep.mubr.bf16.mxu0 %v3215_v23  ;;  %v3469_v30 = vld [vmem:[%s4453_s0 + $0x10] sm:$0xf]  ;;  %v2313_v32 = vcombine.low %v23_v25, %v56_v28  ;;  %v57_v33 = vld [vmem:[%s4453_s0 + $0x14] sm:$0x1]  ;;  %v58_v34 = vld [vmem:[%s4453_s0 + $0x1c] sm:$0x1] }
   0xc   :  { %2748 = vmatpush3.bf16.msra.mxu0 %v3199_v8  ;;  %2988 = vmatpush3.bf16.msra.mxu1 %v3198_v7  ;;  %v152_v35 = vshrl.u32 %v2312_v29, 16  ;;  %v154_v36 = vshll.u32 %v2312_v29, 16  ;;  %v2314_v37 = vcombine.low %v3469_v30, %v57_v33  ;;  %v2315_v38 = vcombine.low %v3474_v31, %v58_v34  ;;  %v3221_v39 = vld [vmem:[%s4452_s1 + $0x100] sm:$0xff]   ;;  %v3225_v59 = vld [vmem:[%s4452_s1 + $0x108] sm:$0xff]   ;;  %v3523_v4 = vld [vmem:[%s4453_s0 + $0x30] sm:$0xf] }
   0xd   :  { %2749 = vmatprep.subr.bf16.mxu0 %v3200_v9  ;;  %2989 = vmatprep.subr.bf16.mxu1 %v3201_v10  ;;  %v3222_v40 = vld [vmem:[%s4452_s1 + $0x1c0] sm:$0xff]   ;;  %v159_v41 = vshrl.u32 %v2313_v32, 16  ;;  %v161_v42 = vshll.u32 %v2313_v32, 16  ;;  %v3510_v62 = vld [vmem:[%s4453_s0 + $0x28] sm:$0xf]  ;;  %v2331_v8 = vcombine.low %v3469_v30, %v3474_v31  ;;  %v3235_v30 = vld [vmem:[%s4452_s1 + $0xd0] sm:$0xff]  }
   0xe   :  { %v156_v43 = vrot.slane %v154_v36, 1  ;;  %v166_v44 = vshrl.u32 %v2314_v37, 16  ;;  %v168_v45 = vshll.u32 %v2314_v37, 16  ;;  %v173_v48 = vshrl.u32 %v2315_v38, 16  ;;  %v3224_v52 = vld [vmem:[%s4452_s1 + $0x180] sm:$0xff]   ;;  %v3226_v7 = vld [vmem:[%s4452_s1 + $0xc8] sm:$0xff]  }
   0xf   :  { %v163_v46 = vrot.slane %v161_v42, 1  ;;  %v175_v49 = vshll.u32 %v2315_v38, 16  ;;  %v3223_v56 = vld [vmem:[%s4452_s1 + $0xc0] sm:$0xff]   ;;  %v60_v0 = vld [vmem:[%s4453_s0 + $0x2c] sm:$0x1]  ;;  %v3237_v32 = vld [vmem:[%s4452_s1 + $0x118] sm:$0xff]  }
  0x10   :  { %2750 = vmatpush3.bf16.msra.mxu0 %v3202_v11  ;;  %2990 = vmatpush3.bf16.msra.mxu1 %v3201_v10  ;;  %v157_v50 = vor.u32 %v156_v43, %v152_v35  ;;  %v170_v51 = vrot.slane %v168_v45, 1  ;;  %v3227_v60 = vld [vmem:[%s4453_s0 + $0x58] ss:$8 sps:$4 sm:$0xff]   ;;  %v59_v63 = vld [vmem:[%s4453_s0 + $0x24] sm:$0x1]  ;;  %v2317_v3 = vcombine.low %v3510_v62, %v60_v0 }
  0x11   :  { %2751 = vmatprep.subr.bf16.mxu0 %v3203_v12  ;;  %2991 = vmatprep.subr.bf16.mxu1 %v3204_v13  ;;  %v164_v53 = vor.u32 %v163_v46, %v159_v41  ;;  %v177_v54 = vrot.slane %v175_v49, 1  ;;  %v3505_v61 = vld [vmem:[%s4453_s0 + $0x20] sm:$0xf]  ;;  %v3528_v5 = vld [vmem:[%s4453_s0 + $0x38] sm:$0xf] }
  0x12   :  { %v171_v55 = vor.u32 %v170_v51, %v166_v44  ;;  %v2316_v2 = vcombine.low %v3505_v61, %v59_v63  ;;  %v61_v6 = vld [vmem:[%s4453_s0 + $0x34] sm:$0x1]  ;;  %v62_v9 = vld [vmem:[%s4453_s0 + $0x3c] sm:$0x1]  ;;  %v3239_v35 = vld [vmem:[%s4453_s0 + $0x68] ss:$8 sps:$4 sm:$0xff]  }
  0x13   :  { %v2330_v57 = vcombine.low %v157_v50, %v164_v53  ;;  %v178_v58 = vor.u32 %v177_v54, %v173_v48  ;;  %v2318_v10 = vcombine.low %v3523_v4, %v61_v6  ;;  %v3238_v34 = vld [vmem:[%s4452_s1 + $0xd8] sm:$0xff]   ;;  %v3567_v36 = vld [vmem:[%s4453_s0 + $0x120] sm:$0xf]  ;;  %v3572_v37 = vld [vmem:[%s4453_s0 + $0x128] sm:$0xf] }
  0x14   :  { %2752 = vmatpush3.bf16.msra.mxu0 %v3205_v14  ;;  %2992 = vmatpush3.bf16.msra.mxu1 %v3204_v13  ;;  %v180_v11 = vshrl.u32 %v2316_v2, 16  ;;  %v182_v12 = vshll.u32 %v2316_v2, 16  ;;  %v187_v13 = vshrl.u32 %v2317_v3, 16  ;;  %v189_v14 = vshll.u32 %v2317_v3, 16  ;;  %v63_v38 = vld [vmem:[%s4453_s0 + $0x124] sm:$0x1] }
  0x15   :  { %2753 = vmatprep.subr.bf16.mxu0 %v3206_v15  ;;  %2993 = vmatprep.subr.bf16.mxu1 %v3207_v16  ;;  %v2333_v1 = vcombine.low %v171_v55, %v178_v58  ;;  %v3233_v15 = vld [vmem:[%s4452_s1 + $0x110] sm:$0xff]   ;;  %v2320_v42 = vcombine.low %v3567_v36, %v63_v38  ;;  %v3592_v45 = vld [vmem:[%s4453_s0 + $0x138] sm:$0xf]  ;;  %v3245_v53 = vld [vmem:[%s4452_s1 + $0x120] sm:$0xff]  }
  0x16   :  { %2999 = vmatprep.mubr.bf16.mxu1 %v2330_v57  ;;  %v3587_v44 = vld [vmem:[%s4453_s0 + $0x130] sm:$0xf]  ;;  %v65_v46 = vld [vmem:[%s4453_s0 + $0x134] sm:$0x1]  ;;  %v3247_v63 = vld [vmem:[%s4452_s1 + $0xe0] sm:$0xff]  }
  0x17   :  { %v2322_v48 = vcombine.low %v3587_v44, %v65_v46  ;;  %v208_v49 = vshrl.u32 %v2320_v42, 16  ;;  %v210_v50 = vshll.u32 %v2320_v42, 16  ;;  %v3246_v54 = vld [vmem:[%s4452_s1 + $0x1d0] sm:$0xff]   ;;  %v3260_v42 = vld [vmem:[%s4452_s1 + $0x198] sm:$0xff]  }
  0x18   :  { %2754 = vmatpush3.bf16.msra.mxu0 %v3208_v17  ;;  %2994 = vmatpush3.bf16.msra.mxu1 %v3207_v16  ;;  %v3234_v16 = vld [vmem:[%s4452_s1 + $0x1c8] sm:$0xff]   ;;  %v2319_v17 = vcombine.low %v3528_v5, %v62_v9  ;;  %v3248_v2 = vld [vmem:[%s4452_s1 + $0x190] sm:$0xff]  }
  0x19   :  { %2755 = vmatprep.subr.bf16.mxu0 %v3209_v18  ;;  %2995 = vmatprep.subr.bf16.mxu1 %v3210_v19  ;;  %v194_v18 = vshrl.u32 %v2318_v10, 16  ;;  %v224_v57 = vshll.u32 %v2322_v48, 16  ;;  %v212_v58 = vrot.slane %v210_v50, 1  ;;  %v3250_v9 = vld [vmem:[%s4452_s1 + $0xe8] sm:$0xff]   ;;  %v2340_v50 = vcombine.low %v3567_v36, %v3572_v37  ;;  %v3695_v36 = vld [vmem:[%s4453_s0 + $0x98] sm:$0xf] }
  0x1a   :  { %v201_v23 = vshrl.u32 %v2319_v17, 16  ;;  %v203_v24 = vshll.u32 %v2319_v17, 16 }
  0x1b   :  { %v213_v0 = vor.u32 %v212_v58, %v208_v49  ;;  %v3262_v49 = vld [vmem:[%s4452_s1 + $0xf8] sm:$0xff]  }
  0x1c   :  { %2756 = vmatpush3.bf16.msra.mxu0 %v3211_v20  ;;  %2996 = vmatpush3.bf16.msra.mxu1 %v3210_v19  ;;  %v196_v19 = vshll.u32 %v2318_v10, 16  ;;  %v184_v20 = vrot.slane %v182_v12, 1  ;;  %v205_v29 = vrot.slane %v203_v24, 1  ;;  %v2337_v10 = vcombine.low %v3523_v4, %v3528_v5  ;;  %v3251_v12 = vld [vmem:[%s4453_s0 + $0x78] ss:$8 sps:$4 sm:$0xff]  }
  0x1d   :  { %2757 = vmatprep.subr.bf16.mxu0 %v3212_v21  ;;  %2997 = vmatprep.subr.bf16.mxu1 %v3213_v22  ;;  %v191_v21 = vrot.slane %v189_v14, 1  ;;  %v3633_v14 = vld [vmem:[%s4453_s0 + $0x148] sm:$0xf]  ;;  %v67_v4 = vld [vmem:[%s4453_s0 + $0x144] sm:$0x1] }
  0x1e   :  { %v185_v25 = vor.u32 %v184_v20, %v180_v11  ;;  %v206_v33 = vor.u32 %v205_v29, %v201_v23  ;;  %v68_v5 = vld [vmem:[%s4453_s0 + $0x14c] sm:$0x1]  ;;  %v69_v20 = vld [vmem:[%s4453_s0 + $0x154] sm:$0x1]  ;;  %v3270_v58 = vld [vmem:[%s4453_s0 + $0x178] ss:$8 sps:$4 sm:$0xff]  }
  0x1f   :  { %v192_v26 = vor.u32 %v191_v21, %v187_v13  ;;  %v3628_v13 = vld [vmem:[%s4453_s0 + $0x140] sm:$0xf]  ;;  %v2325_v17 = vcombine.low %v3633_v14, %v68_v5  ;;  %v70_v21 = vld [vmem:[%s4453_s0 + $0x15c] sm:$0x1] }
  0x20   :  { %2758 = vmatpush3.bf16.msra.mxu0 %v3214_v27  ;;  %2998 = vmatpush3.bf16.msra.mxu1 %v3213_v22  ;;  %v198_v22 = vrot.slane %v196_v19, 1  ;;  %v3236_v27 = vld [vmem:[%s4452_s1 + $0x188] sm:$0xff]   ;;  %v3651_v19 = vld [vmem:[%s4453_s0 + $0x158] sm:$0xf] }
  0x21   :  { %2823 = vmatprep.subr.bf16.mxu1 %v3221_v39  ;;  %2903 = vmatprep.subr.bf16.mxu0 %v3222_v40  ;;  %v2336_v31 = vcombine.low %v185_v25, %v192_v26  ;;  %v64_v39 = vld [vmem:[%s4453_s0 + $0x12c] sm:$0x1]  ;;  %v2334_v40 = vcombine.low %v3505_v61, %v3510_v62  ;;  %v243_v25 = vshrl.u32 %v2325_v17, 16  ;;  %v245_v26 = vshll.u32 %v2325_v17, 16  ;;  %v3302_v17 = vld [vmem:[%s4452_s1 + $0x160] sm:$0xff]  }
  0x22   :  { %v199_v28 = vor.u32 %v198_v22, %v194_v18  ;;  %v2321_v43 = vcombine.low %v3572_v37, %v64_v39  ;;  %v3646_v18 = vld [vmem:[%s4453_s0 + $0x150] sm:$0xf]  ;;  %v2327_v29 = vcombine.low %v3651_v19, %v70_v21  ;;  %v3267_v37 = vld [vmem:[%s4452_s1 + $0x140] sm:$0xff]   ;;  %v3802_v21 = vld [vmem:[%s4453_s0 + $0x8] sm:$0xf] }
  0x23   :  { %584 = vmatmul.mubr.bf16.vlgmr.msra.gmra.mrb[0].mxu0 %v2328_v47  ;;  %3000 = vmatmul.mubr.bf16.vlgmr.msra.gmra.mrb[0].mxu1 %v2333_v1  ;;  %v66_v47 = vld [vmem:[%s4453_s0 + $0x13c] sm:$0x1]  ;;  %v2326_v22 = vcombine.low %v3646_v18, %v69_v20  ;;  %v3259_v39 = vld [vmem:[%s4452_s1 + $0xf0] sm:$0xff]   ;;  %v3797_v20 = vld [vmem:[%s4453_s0 + $0xc8] sm:$0xf] }
  0x24   :  { %2904 = vmatpush3.bf16.msra.mxu0 %v3224_v52  ;;  %591 = vmatprep.mubr.bf16.mxu0 %v3227_v60  ;;  %v2339_v41 = vcombine.low %v199_v28, %v206_v33  ;;  %v215_v51 = vshrl.u32 %v2321_v43, 16  ;;  %v217_v52 = vshll.u32 %v2321_v43, 16  ;;  %v2323_v55 = vcombine.low %v3592_v45, %v66_v47  ;;  %v3258_v28 = vld [vmem:[%s4452_s1 + $0x1d8] sm:$0xff]  }
  0x25   :  { %2824 = vmatpush3.bf16.msra.mxu1 %v3223_v56  ;;  %2905 = vmatprep.subr.bf16.mxu0 %v3234_v16  ;;  %v222_v56 = vshrl.u32 %v2322_v48, 16  ;;  %v226_v60 = vrot.slane %v224_v57, 1  ;;  %v2324_v16 = vcombine.low %v3628_v13, %v67_v4  ;;  %v247_v33 = vrot.slane %v245_v26, 1  ;;  %v3261_v47 = vld [vmem:[%s4452_s1 + $0x138] sm:$0xff]   ;;  %v3269_v57 = vld [vmem:[%s4452_s1 + $0x1a0] sm:$0xff]  }
  0x26   :  { %2825 = vmatprep.subr.bf16.mxu1 %v3225_v59  ;;  %3003 = vmatprep.mubr.bf16.mxu1 %v2336_v31  ;;  %v219_v59 = vrot.slane %v217_v52, 1  ;;  %v229_v61 = vshrl.u32 %v2323_v55, 16  ;;  %v231_v62 = vshll.u32 %v2323_v55, 16  ;;  %v252_v31 = vshll.u32 %v2326_v22, 16  ;;  %v3263_v52 = vld [vmem:[%s4453_s0 + $0x168] ss:$8 sps:$4 sm:$0xff]  }
  0x27   :  { %v227_v3 = vor.u32 %v226_v60, %v222_v56  ;;  %v236_v23 = vshrl.u32 %v2324_v16, 16  ;;  %v238_v24 = vshll.u32 %v2324_v16, 16  ;;  %v259_v38 = vshll.u32 %v2327_v29, 16  ;;  %v3690_v55 = vld [vmem:[%s4453_s0 + $0x90] sm:$0xf]  ;;  %v3268_v56 = vld [vmem:[%s4452_s1 + $0x1e0] sm:$0xff]  }
  0x28   :  { %2906 = vmatpush3.bf16.msra.mxu0 %v3236_v27  ;;  %v220_v1 = vor.u32 %v219_v59, %v215_v51  ;;  %v233_v6 = vrot.slane %v231_v62, 1  ;;  %v3257_v27 = vld [vmem:[%s4452_s1 + $0x130] sm:$0xff]   ;;  %v2343_v59 = vcombine.low %v3587_v44, %v3592_v45  ;;  %v2488_v60 = vcombine.low %v3690_v55, %v3695_v36  ;;  %v3276_v62 = vld [vmem:[%s4452_s1 + $0x148] sm:$0xff]   ;;  %v3725_v44 = vld [vmem:[%s4453_s0 + $0xa0] sm:$0xf] }
  0x29   :  { %2826 = vmatpush3.bf16.msra.mxu1 %v3226_v7  ;;  %2907 = vmatprep.subr.bf16.mxu0 %v3246_v54  ;;  %v3249_v7 = vld [vmem:[%s4452_s1 + $0x128] sm:$0xff]   ;;  %v261_v46 = vrot.slane %v259_v38, 1  ;;  %v3294_v4 = vld [vmem:[%s4452_s1 + $0x158] sm:$0xff]  }
  0x2a   :  { %2827 = vmatprep.subr.bf16.mxu1 %v3233_v15  ;;  %v234_v11 = vor.u32 %v233_v6, %v229_v61  ;;  %v3271_v61 = vld [vmem:[%s4453_s0 + $0xe8] ss:$8 sps:$4 sm:$0xff]   ;;  %v3296_v16 = vld [vmem:[%s4452_s1 + $0x1b8] sm:$0xff]  }
  0x2b   :  { %592 = vmatmul.mubr.bf16.gmra.mrb[4].mxu0 %v2331_v8  ;;  %3004 = vmatmul.mubr.bf16.gmra.mrb[4].mxu1 %v2339_v41  ;;  %v2342_v8 = vcombine.low %v213_v0, %v220_v1  ;;  %v248_v41 = vor.u32 %v247_v33, %v243_v25  ;;  %v3278_v45 = vld [vmem:[%s4452_s1 + $0x1a8] sm:$0xff]   ;;  %v3297_v26 = vld [vmem:[%s4453_s0 + $0x1f8] ss:$8 sps:$4 sm:$0xff]  }
  0x2c   :  { %599 = vmatprep.mubr.bf16.mxu0 %v3239_v35  ;;  %2908 = vmatpush3.bf16.msra.mxu0 %v3248_v2  ;;  %v2345_v15 = vcombine.low %v227_v3, %v234_v11  ;;  %v257_v35 = vshrl.u32 %v2327_v29, 16  ;;  %v3733_v0 = vld [vmem:[%s4453_s0 + $0xa8] sm:$0xf]  ;;  %v3280_v2 = vld [vmem:[%s4453_s0 + $0xf8] ss:$8 sps:$4 sm:$0xff]   ;;  %v2346_v3 = vcombine.low %v3628_v13, %v3633_v14  ;;  %v2349_v14 = vcombine.low %v3646_v18, %v3651_v19 }
  0x2d   :  { %2828 = vmatpush3.bf16.msra.mxu1 %v3235_v30  ;;  %3007 = vmatprep.mubr.bf16.mxu1 %v2342_v8  ;;  %v250_v30 = vshrl.u32 %v2326_v22, 16  ;;  %v3279_v1 = vld [vmem:[%s4453_s0 + $0x188] ss:$8 sps:$4 sm:$0xff]   ;;  %v2491_v6 = vcombine.low %v3725_v44, %v3733_v0  ;;  %v3792_v19 = vld [vmem:[%s4453_s0 + $0xc0] sm:$0xf] }
  0x2e   :  { %2829 = vmatprep.subr.bf16.mxu1 %v3237_v32  ;;  %v240_v32 = vrot.slane %v238_v24, 1  ;;  %2909 = vmatprep.subr.bf16.mxu0 %v3258_v28  ;;  %v262_v51 = vor.u32 %v261_v46, %v257_v35  ;;  %v3286_v8 = vld [vmem:[%s4452_s1 + $0x1f0] sm:$0xff]   ;;  %v3814_v24 = vld [vmem:[%s4452_s1 + $0x200] sm:$0xff]   ;;  %v2497_v25 = vcombine.low %v3792_v19, %v3797_v20  ;;  %v3852_v33 = vld [vmem:[%s4452_s1 + $0x208] sm:$0xff]  }
  0x2f   :  { %v3760_v11 = vld [vmem:[%s4453_s0 + $0xb0] sm:$0xf]  ;;  %v3306_v28 = vld [vmem:[%s4453_s0 + $0x60] ss:$8 sps:$4 sm:$0xff]   ;;  %v2410_v35 = vld [vmem:[%s4453_s0 + $0xa4] sm:$0x1] }
  0x30   :  { %2910 = vmatpush3.bf16.msra.mxu0 %v3260_v42  ;;  %v3289_v13 = vld [vmem:[%s4453_s0 + $0x108] ss:$8 sps:$4 sm:$0xff]   ;;  %v3881_v46 = vcombine.low %v3725_v44, %v2410_v35 }
  0x31   :  { %2830 = vmatpush3.bf16.msra.mxu1 %v3238_v34  ;;  %v254_v34 = vrot.slane %v252_v31, 1  ;;  %2911 = vmatprep.subr.bf16.mxu0 %v3268_v56  ;;  %v3298_v18 = vld [vmem:[%s4453_s0 + $0x50] ss:$8 sps:$4 sm:$0xff]   ;;  %v3842_v31 = vld [vmem:[%s4453_s0 + $0x20] sm:$0xf] }
  0x32   :  { %2831 = vmatprep.subr.bf16.mxu1 %v3245_v53  ;;  %v3264_v53 = vld [vmem:[%s4453_s0 + $0xd8] ss:$8 sps:$4 sm:$0xff]   ;;  %v3807_v22 = vld [vmem:[%s4453_s0 + $0x10] sm:$0xf]  ;;  %v906_v44 = vshrl.u32 %v3881_v46, 16 }
  0x33   :  { %600 = vmatmul.mubr.bf16.gmra.mrb[8].mxu0 %v2334_v40  ;;  %3008 = vmatmul.mubr.bf16.gmra.mrb[8].mxu1 %v2345_v15  ;;  %v241_v40 = vor.u32 %v240_v32, %v236_v23  ;;  %v255_v43 = vor.u32 %v254_v34, %v250_v30  ;;  %v3295_v15 = vld [vmem:[%s4452_s1 + $0x1f8] sm:$0xff]   ;;  %v2648_v23 = vcombine.low %v3802_v21, %v3807_v22  ;;  %v3831_v29 = vld [vmem:[%s4453_s0 + $0x1b0] sm:$0xf]  ;;  %v3923_v56 = vld [vmem:[%s4452_s1 + $0x220] sm:$0xff]  }
  0x34   :  { %607 = vmatprep.mubr.bf16.mxu0 %v3251_v12  ;;  %2912 = vmatpush3.bf16.msra.mxu0 %v3269_v57  ;;  %v3765_v12 = vld [vmem:[%s4453_s0 + $0xb8] sm:$0xf]  ;;  %v3320_v34 = vld [vmem:[%s4452_s1 + $0x170] sm:$0xff]  }
  0x35   :  { %2832 = vmatpush3.bf16.msra.mxu1 %v3247_v63  ;;  %v2348_v48 = vcombine.low %v241_v40, %v248_v41  ;;  %v2351_v54 = vcombine.low %v255_v43, %v262_v51  ;;  %v3277_v63 = vld [vmem:[%s4452_s1 + $0x1e8] sm:$0xff]   ;;  %v2494_v5 = vcombine.low %v3760_v11, %v3765_v12  ;;  %v3837_v30 = vld [vmem:[%s4453_s0 + $0x18] sm:$0xf]  ;;  %v3878_v43 = vld [vmem:[%s4452_s1 + $0x210] sm:$0xff]  }
  0x36   :  { %2833 = vmatprep.subr.bf16.mxu1 %v3249_v7  ;;  %2913 = vmatprep.subr.bf16.mxu0 %v3277_v63  ;;  %v3285_v7 = vld [vmem:[%s4452_s1 + $0x150] sm:$0xff]   ;;  %v3847_v32 = vld [vmem:[%s4453_s0 + $0x1b8] sm:$0xf]  ;;  %v2651_v38 = vcombine.low %v3837_v30, %v3842_v31  ;;  %v3901_v51 = vld [vmem:[%s4453_s0 + $0x28] sm:$0xf] }
  0x37   :  { %3011 = vmatprep.mubr.bf16.mxu1 %v2348_v48  ;;  %v2500_v40 = vcombine.low %v3831_v29, %v3847_v32  ;;  %v3305_v41 = vld [vmem:[%s4453_s0 + $0x208] ss:$8 sps:$4 sm:$0xff]  }
  0x38   :  { %2914 = vmatpush3.bf16.msra.mxu0 %v3278_v45  ;;  %v3316_v42 = vld [vmem:[%s4453_s0 + $0x70] ss:$8 sps:$4 sm:$0xff]   ;;  %v3326_v63 = vld [vmem:[%s4453_s0 + $0x80] ss:$8 sps:$4 sm:$0xff]  }
  0x39   :  { %2834 = vmatpush3.bf16.msra.mxu1 %v3250_v9  ;;  %2915 = vmatprep.subr.bf16.mxu0 %v3286_v8  ;;  %v3287_v9 = vld [vmem:[%s4452_s1 + $0x1b0] sm:$0xff]   ;;  %v3963_v8 = vld [vmem:[%s4453_s0 + $0x38] sm:$0xf] }
  0x3a   :  { %2835 = vmatprep.subr.bf16.mxu1 %v3257_v27  ;;  %v3310_v27 = vld [vmem:[%s4452_s1 + $0x168] sm:$0xff]  }
  0x3b   :  { %608 = vmatmul.mubr.bf16.gmra.mrb[12].mxu0 %v2337_v10  ;;  %3012 = vmatmul.mubr.bf16.gmra.mrb[12].mxu1 %v2351_v54  ;;  %v3288_v10 = vld [vmem:[%s4453_s0 + $0x198] ss:$8 sps:$4 sm:$0xff]  }
  0x3c   :  { %615 = vmatprep.mubr.bf16.mxu0 %v3263_v52  ;;  %1324 = vmatprep.mubr.bf16.mxu1 %v3264_v53  ;;  %v3906_v52 = vld [vmem:[%s4453_s0 + $0x30] sm:$0xf]  ;;  %v3911_v53 = vld [vmem:[%s4453_s0 + $0x1c8] sm:$0xf]  ;;  %v3917_v54 = vld [vmem:[%s4452_s1 + $0x218] sm:$0xff]  }
  0x3d   :  { %2836 = vmatpush3.bf16.msra.mxu1 %v3259_v39  ;;  %2916 = vmatpush3.bf16.msra.mxu0 %v3287_v9  ;;  %v2411_v39 = vld [vmem:[%s4453_s0 + $0xac] sm:$0x1]  ;;  %v3968_v9 = vld [vmem:[%s4453_s0 + $0x40] sm:$0xf] }
  0x3e   :  { %2837 = vmatprep.subr.bf16.mxu1 %v3261_v47  ;;  %2917 = vmatprep.subr.bf16.mxu0 %v3295_v15  ;;  %v3330_v47 = vld [vmem:[%s4452_s1 + $0x178] sm:$0xff]   ;;  %v3887_v48 = vcombine.low %v3733_v0, %v2411_v39  ;;  %v2418_v15 = vld [vmem:[%s4453_s0 + $0x1c4] sm:$0x1] }
  0x40   :  { %v915_v57 = vshll.u32 %v3887_v48, 16  ;;  %v913_v0 = vshrl.u32 %v3887_v48, 16 }
  0x41   :  { %2838 = vmatpush3.bf16.msra.mxu1 %v3262_v49  ;;  %2918 = vmatpush3.bf16.msra.mxu0 %v3296_v16  ;;  %v2412_v49 = vld [vmem:[%s4453_s0 + $0xb4] sm:$0x1]  ;;  %v2419_v16 = vld [vmem:[%s4453_s0 + $0x1cc] sm:$0x1] }
  0x42   :  { %3015 = vmatprep.subr.bf16.mxu1 %v3267_v37  ;;  %3047 = vmatprep.subr.bf16.mxu0 %v3814_v24 }
  0x43   :  { %616 = vmatmul.mubr.bf16.gmra.mrb[16].mxu0 %v2340_v50  ;;  %v3896_v50 = vld [vmem:[%s4453_s0 + $0x1c0] sm:$0xf] }
  0x44   :  { %623 = vmatprep.mubr.bf16.mxu0 %v3270_v58  ;;  %1325 = vmatmul.mubr.bf16.vlgmr.msra.gmra.mrb[16].mxu1 %v2488_v60  ;;  %v3927_v58 = vcombine.low %v3760_v11, %v2412_v49  ;;  %v2503_v60 = vcombine.low %v3896_v50, %v3911_v53  ;;  %v2408_v11 = vld [vmem:[%s4453_s0 + $0x94] sm:$0x1]  ;;  %v4027_v48 = vcombine.low %v3896_v50, %v2418_v15 }
  0x45   :  { %3016 = vmatpush3.bf16.msra.mxu1 %v3267_v37  ;;  %1332 = vmatprep.mubr.bf16.mxu1 %v3271_v61  ;;  %v908_v37 = vshll.u32 %v3881_v46, 16  ;;  %v2413_v61 = vld [vmem:[%s4453_s0 + $0xbc] sm:$0x1]  ;;  %v4030_v49 = vcombine.low %v3911_v53, %v2419_v16  ;;  %v4047_v53 = vld [vmem:[%s4453_s0 + $0x1e0] sm:$0xf]  ;;  %v4098_v15 = vld [vmem:[%s4452_s1 + $0x230] sm:$0xff]  }
  0x46   :  { %3017 = vmatprep.subr.bf16.mxu1 %v3276_v62  ;;  %v920_v39 = vshrl.u32 %v3927_v58, 16  ;;  %v2573_v16 = vld [vmem:[%s4453_s0 + $0x34] sm:$0x1] }
  0x47   :  { %v910_v45 = vrot.slane %v908_v37, 1  ;;  %v4052_v37 = vld [vmem:[%s4453_s0 + $0x1e8] sm:$0xf] }
  0x49   :  { %3018 = vmatpush3.bf16.msra.mxu1 %v3276_v62  ;;  %v3315_v62 = vld [vmem:[%s4453_s0 + $0x218] ss:$8 sps:$4 sm:$0xff]  }
  0x4a   :  { %3019 = vmatprep.subr.bf16.mxu1 %v3285_v7 }
  0x4b   :  { %624 = vmatmul.mubr.bf16.gmra.mrb[20].mxu0 %v2343_v59  ;;  %v2654_v59 = vcombine.low %v3901_v51, %v3906_v52 }
  0x4c   :  { %631 = vmatprep.mubr.bf16.mxu0 %v3279_v1  ;;  %1333 = vmatmul.mubr.bf16.gmra.mrb[20].mxu1 %v2491_v6  ;;  %v917_v1 = vrot.slane %v915_v57, 1  ;;  %v3955_v6 = vcombine.low %v3765_v12, %v2413_v61  ;;  %v2415_v12 = vld [vmem:[%s4453_s0 + $0xcc] sm:$0x1]  ;;  %v2571_v61 = vld [vmem:[%s4453_s0 + $0x24] sm:$0x1] }
  0x4d   :  { %1340 = vmatprep.mubr.bf16.mxu1 %v3280_v2  ;;  %3020 = vmatpush3.bf16.msra.mxu1 %v3285_v7  ;;  %v922_v2 = vshll.u32 %v3927_v58, 16  ;;  %v2414_v7 = vld [vmem:[%s4453_s0 + $0xc4] sm:$0x1] }
  0x4e   :  { %3021 = vmatprep.subr.bf16.mxu1 %v3294_v4 }
  0x51   :  { %3022 = vmatpush3.bf16.msra.mxu1 %v3294_v4  ;;  %v2424_v4 = vcombine.low %v3690_v55, %v2408_v11  ;;  %v971_v11 = vshll.u32 %v4030_v49, 16 }
  0x52   :  { %3023 = vmatprep.subr.bf16.mxu1 %v3302_v17 }
  0x53   :  { %632 = vmatmul.mubr.bf16.gmra.mrb[24].mxu0 %v2346_v3  ;;  %v3952_v3 = vld [vmem:[%s4453_s0 + $0x1d0] sm:$0xf] }
  0x54   :  { %639 = vmatprep.mubr.bf16.mxu0 %v3288_v10  ;;  %1341 = vmatmul.mubr.bf16.gmra.mrb[24].mxu1 %v2494_v5  ;;  %v3973_v10 = vld [vmem:[%s4453_s0 + $0x1d8] sm:$0xf]  ;;  %v2417_v5 = vld [vmem:[%s4453_s0 + $0x1bc] sm:$0x1] }
  0x55   :  { %1348 = vmatprep.mubr.bf16.mxu1 %v3289_v13  ;;  %3024 = vmatpush3.bf16.msra.mxu1 %v3302_v17  ;;  %v2416_v13 = vld [vmem:[%s4453_s0 + $0x1b4] sm:$0x1]  ;;  %v2657_v17 = vcombine.low %v3963_v8, %v3968_v9  ;;  %v2506_v55 = vcombine.low %v3952_v3, %v3973_v10 }
  0x56   :  { %3025 = vmatprep.subr.bf16.mxu1 %v3310_v27 }
  0x59   :  { %3026 = vmatpush3.bf16.msra.mxu1 %v3310_v27  ;;  %v3337_v27 = vld [vmem:[%s4453_s0 + $0x170] ss:$8 sps:$4 sm:$0xff]  }
  0x5a   :  { %3027 = vmatprep.subr.bf16.mxu1 %v3320_v34 }
  0x5b   :  { %640 = vmatmul.mubr.bf16.gmra.mrb[28].mxu0 %v2349_v14  ;;  %v2409_v14 = vld [vmem:[%s4453_s0 + $0x9c] sm:$0x1] }
  0x5c   :  { %2065 = vmatprep.mubr.bf16.mxu0 %v3298_v18  ;;  %1349 = vmatmul.mubr.bf16.gmra.mrb[28].mxu1 %v2497_v25  ;;  %v2425_v18 = vcombine.low %v3695_v36, %v2409_v14  ;;  %v3325_v25 = vld [vmem:[%s4453_s0 + $0x228] ss:$8 sps:$4 sm:$0xff]   ;;  %v2572_v14 = vld [vmem:[%s4453_s0 + $0x2c] sm:$0x1] }
  0x5d   :  { %1356 = vmatprep.mubr.bf16.mxu1 %v3297_v26  ;;  %3028 = vmatpush3.bf16.msra.mxu1 %v3320_v34  ;;  %v894_v26 = vshll.u32 %v2424_v4, 16  ;;  %v892_v34 = vshrl.u32 %v2424_v4, 16 }
  0x5e   :  { %3029 = vmatprep.subr.bf16.mxu1 %v3330_v47  ;;  %v899_v35 = vshrl.u32 %v2425_v18, 16  ;;  %v901_v36 = vshll.u32 %v2425_v18, 16  ;;  %v4108_v18 = vld [vmem:[%s4453_s0 + $0x138] sm:$0xf] }
  0x60   :  { %v903_v46 = vrot.slane %v901_v36, 1 }
  0x61   :  { %3030 = vmatpush3.bf16.msra.mxu1 %v3330_v47  ;;  %v4024_v47 = vcombine.low %v3847_v32, %v2417_v5  ;;  %v927_v32 = vshrl.u32 %v3955_v6, 16 }
  0x62   :  { %3079 = vmatprep.subr.bf16.mxu1 %v3814_v24  ;;  %v904_v58 = vor.u32 %v903_v46, %v899_v35 }
  0x63   :  { %2066 = vmatmul.mubr.bf16.vlgmr.msra.gmra.mrb[32].mxu0 %v2648_v23  ;;  %v929_v23 = vshll.u32 %v3955_v6, 16 }
  0x64   :  { %3048 = vmatpush3.bf16.msra.mxu0 %v3814_v24  ;;  %2073 = vmatprep.mubr.bf16.mxu0 %v3306_v28  ;;  %v4011_v28 = vcombine.low %v3792_v19, %v2414_v7  ;;  %v924_v19 = vrot.slane %v922_v2, 1 }
  0x65   :  { %3049 = vmatprep.subr.bf16.mxu0 %v3852_v33  ;;  %1357 = vmatmul.mubr.bf16.gmra.mrb[32].mxu1 %v2500_v40  ;;  %v4015_v40 = vcombine.low %v3797_v20, %v2415_v12  ;;  %v4035_v20 = vld [vmem:[%s4453_s0 + $0x128] sm:$0xf]  ;;  %v2420_v12 = vld [vmem:[%s4453_s0 + $0x1d4] sm:$0x1]  ;;  %v931_v5 = vrot.slane %v929_v23, 1 }
  0x66   :  { %1364 = vmatprep.mubr.bf16.mxu1 %v3305_v41  ;;  %v4018_v41 = vcombine.low %v3831_v29, %v2416_v13  ;;  %v4040_v29 = vld [vmem:[%s4453_s0 + $0x130] sm:$0xf]  ;;  %v936_v50 = vshll.u32 %v4011_v28, 16  ;;  %v2421_v13 = vld [vmem:[%s4453_s0 + $0x1dc] sm:$0x1] }
  0x67   :  { %v943_v2 = vshll.u32 %v4015_v40, 16  ;;  %v2660_v7 = vcombine.low %v4035_v20, %v4040_v29 }
  0x68   :  { %3050 = vmatpush3.bf16.msra.mxu0 %v3852_v33  ;;  %v950_v6 = vshll.u32 %v4018_v41, 16  ;;  %v938_v23 = vrot.slane %v936_v50, 1  ;;  %v4131_v50 = vcombine.low %v3952_v3, %v2420_v12  ;;  %v2423_v3 = vld [vmem:[%s4453_s0 + $0x1ec] sm:$0x1] }
  0x69   :  { %3051 = vmatprep.subr.bf16.mxu0 %v3878_v43 }
  0x6b   :  { %2074 = vmatmul.mubr.bf16.gmra.mrb[36].mxu0 %v2651_v38  ;;  %v896_v38 = vrot.slane %v894_v26, 1 }
  0x6c   :  { %2081 = vmatprep.mubr.bf16.mxu0 %v3316_v42  ;;  %3052 = vmatpush3.bf16.msra.mxu0 %v3878_v43  ;;  %v2570_v42 = vld [vmem:[%s4453_s0 + $0x1c] sm:$0x1] }
  0x6d   :  { %3053 = vmatprep.subr.bf16.mxu0 %v3917_v54  ;;  %1365 = vmatmul.mubr.bf16.gmra.mrb[36].mxu1 %v2503_v60  ;;  %v897_v57 = vor.u32 %v896_v38, %v892_v34  ;;  %v4059_v60 = vor.u32 %v910_v45, %v906_v44  ;;  %v957_v44 = vshll.u32 %v4024_v47, 16  ;;  %v964_v45 = vshll.u32 %v4027_v48, 16 }
  0x6e   :  { %1372 = vmatprep.mubr.bf16.mxu1 %v3315_v62  ;;  %v4065_v62 = vcombine.low %v3837_v30, %v2570_v42  ;;  %v2509_v30 = vcombine.low %v4047_v53, %v4052_v37  ;;  %v945_v34 = vrot.slane %v943_v2, 1  ;;  %v932_v42 = vor.u32 %v931_v5, %v927_v32  ;;  %v3347_v2 = vld [vmem:[%s4453_s0 + $0x190] ss:$8 sps:$4 sm:$0xff]  }
  0x6f   :  { %v2490_v4 = vcombine.low %v897_v57, %v904_v58  ;;  %v4144_v32 = vcombine.low %v3906_v52, %v2573_v16  ;;  %v948_v57 = vshrl.u32 %v4018_v41, 16  ;;  %v952_v58 = vrot.slane %v950_v6, 1  ;;  %v2569_v41 = vld [vmem:[%s4453_s0 + $0x14] sm:$0x1]  ;;  %v4188_v5 = vld [vmem:[%s4453_s0 + $0x150] sm:$0xf] }
  0x70   :  { %3054 = vmatpush3.bf16.msra.mxu0 %v3917_v54  ;;  %v1647_v35 = vshrl.u32 %v4065_v62, 16  ;;  %v955_v52 = vshrl.u32 %v4024_v47, 16 }
  0x71   :  { %3055 = vmatprep.subr.bf16.mxu0 %v3923_v56 }
  0x73   :  { %2082 = vmatmul.mubr.bf16.gmra.mrb[40].mxu0 %v2654_v59  ;;  %v4057_v59 = vld [vmem:[%s4452_s1 + $0x228] sm:$0xff]  }
  0x74   :  { %2089 = vmatprep.mubr.bf16.mxu0 %v3326_v63  ;;  %3056 = vmatpush3.bf16.msra.mxu0 %v3923_v56  ;;  %v4067_v63 = vor.u32 %v917_v1, %v913_v0  ;;  %v3342_v0 = vld [vmem:[%s4453_s0 + $0x180] ss:$8 sps:$4 sm:$0xff]   ;;  %v4084_v1 = vcombine.low %v3842_v31, %v2571_v61  ;;  %v1649_v31 = vshll.u32 %v4065_v62, 16  ;;  %v2581_v62 = vld [vmem:[%s4453_s0 + $0x154] sm:$0x1] }
  0x75   :  { %1373 = vmatmul.mubr.bf16.gmra.mrb[40].mxu1 %v2506_v55  ;;  %3057 = vmatprep.subr.bf16.mxu0 %v4057_v59  ;;  %v4113_v55 = vld [vmem:[%s4453_s0 + $0x140] sm:$0xf] }
  0x76   :  { %1380 = vmatprep.mubr.bf16.mxu1 %v3325_v25  ;;  %v4119_v25 = vld [vmem:[%s4452_s1 + $0x238] sm:$0xff]   ;;  %v2493_v26 = vcombine.low %v4059_v60, %v4067_v63  ;;  %v1654_v36 = vshrl.u32 %v4084_v1, 16  ;;  %v1656_v38 = vshll.u32 %v4084_v1, 16  ;;  %v4128_v46 = vrot.slane %v1649_v31, 1 }
  0x77   :  { %v959_v63 = vrot.slane %v957_v44, 1  ;;  %v4192_v31 = vcombine.low %v4052_v37, %v2423_v3  ;;  %v2574_v37 = vld [vmem:[%s4453_s0 + $0x3c] sm:$0x1] }
  0x78   :  { %3058 = vmatpush3.bf16.msra.mxu0 %v4057_v59  ;;  %v1658_v6 = vrot.slane %v1656_v38, 1  ;;  %v4254_v1 = vcombine.low %v3963_v8, %v2574_v37  ;;  %v2551_v8 = vld [vmem:[%s4453_s0 + $0x160] sm:$0xf] }
  0x79   :  { %3059 = vmatprep.subr.bf16.mxu0 %v4098_v15 }
  0x7b   :  { %2090 = vmatmul.mubr.bf16.gmra.mrb[44].mxu0 %v2657_v17  ;;  %v934_v17 = vshrl.u32 %v4011_v28, 16  ;;  %v941_v28 = vshrl.u32 %v4015_v40, 16  ;;  %v4137_v40 = vcombine.low %v3901_v51, %v2572_v14  ;;  %v2663_v51 = vcombine.low %v4108_v18, %v4113_v55 }
  0x7c   :  { %2097 = vmatprep.mubr.bf16.mxu0 %v3337_v27  ;;  %v925_v27 = vor.u32 %v924_v19, %v920_v39  ;;  %3060 = vmatpush3.bf16.msra.mxu0 %v4098_v15  ;;  %v4134_v39 = vcombine.low %v3973_v10, %v2421_v13  ;;  %v2422_v19 = vld [vmem:[%s4453_s0 + $0x1e4] sm:$0x1]  ;;  %v2576_v10 = vld [vmem:[%s4453_s0 + $0x12c] sm:$0x1]  ;;  %v1670_v13 = vshll.u32 %v4144_v32, 16 }
  0x7d   :  { %1381 = vmatmul.mubr.bf16.gmra.mrb[44].mxu1 %v2509_v30  ;;  %3061 = vmatprep.subr.bf16.mxu0 %v4119_v25  ;;  %v4155_v60 = vor.u32 %v938_v23, %v934_v17  ;;  %v4157_v61 = vor.u32 %v945_v34, %v941_v28  ;;  %v2568_v30 = vld [vmem:[%s4453_s0 + $0xc] sm:$0x1]  ;;  %v1663_v12 = vshll.u32 %v4137_v40, 16  ;;  %v4178_v14 = vcombine.low %v4047_v53, %v2422_v19 }
  0x7e   :  { %3031 = vmatprep.mubr.bf16.mxu1 %v2490_v4  ;;  %v985_v47 = vshll.u32 %v4134_v39, 16  ;;  %v4173_v44 = vcombine.low %v3802_v21, %v2568_v30  ;;  %v4183_v4 = vld [vmem:[%s4453_s0 + $0x148] sm:$0xf]  ;;  %v2585_v21 = vcombine.low %v3807_v22, %v2569_v41  ;;  %v4195_v53 = vcombine.low %v4035_v20, %v2576_v10  ;;  %v2577_v20 = vld [vmem:[%s4453_s0 + $0x134] sm:$0x1] }
  0x7f   :  { %v2499_v16 = vcombine.low %v4155_v60, %v4157_v61  ;;  %v953_v23 = vor.u32 %v952_v58, %v948_v57  ;;  %v962_v22 = vshrl.u32 %v4027_v48, 16  ;;  %v973_v34 = vrot.slane %v971_v11, 1  ;;  %v3352_v48 = vld [vmem:[%s4453_s0 + $0x1a0] ss:$8 sps:$4 sm:$0xff]  }
  0x80   :  { %3062 = vmatpush3.bf16.msra.mxu0 %v4119_v25  ;;  %v1635_v17 = vshll.u32 %v4173_v44, 16  ;;  %v1642_v28 = vshll.u32 %v2585_v21, 16  ;;  %v2666_v38 = vcombine.low %v4183_v4, %v4188_v5  ;;  %v976_v19 = vshrl.u32 %v4131_v50, 16 }
  0x81   :  { %v983_v10 = vshrl.u32 %v4134_v39, 16  ;;  %v1640_v11 = vshrl.u32 %v2585_v21, 16  ;;  %v992_v58 = vshll.u32 %v4178_v14, 16  ;;  %v999_v60 = vshll.u32 %v4192_v31, 16 }
  0x82   :  { %v1644_v57 = vrot.slane %v1642_v28, 1  ;;  %v4228_v61 = vcombine.low %v4040_v29, %v2577_v20  ;;  %v2579_v29 = vld [vmem:[%s4453_s0 + $0x144] sm:$0x1]  ;;  %v1691_v30 = vshll.u32 %v4195_v53, 16  ;;  %v4278_v21 = vcombine.low %v4188_v5, %v2581_v62 }
  0x83   :  { %2098 = vmatmul.mubr.bf16.gmra.mrb[48].mxu0 %v2660_v7  ;;  %v2496_v7 = vcombine.low %v925_v27, %v932_v42  ;;  %v960_v27 = vor.u32 %v959_v63, %v955_v52  ;;  %v2575_v42 = vld [vmem:[%s4453_s0 + $0x44] sm:$0x1]  ;;  %v4237_v52 = vor.u32 %v4128_v46, %v1647_v35  ;;  %v4241_v63 = vor.u32 %v1658_v6, %v1654_v36  ;;  %v2550_v6 = vld [vmem:[%s4453_s0 + $0x158] sm:$0xf] }
  0x84   :  { %2105 = vmatprep.mubr.bf16.mxu0 %v3342_v0  ;;  %v978_v0 = vshll.u32 %v4131_v50, 16  ;;  %v2578_v50 = vld [vmem:[%s4453_s0 + $0x13c] sm:$0x1]  ;;  %v4257_v35 = vcombine.low %v3968_v9, %v2575_v42  ;;  %v2669_v28 = vcombine.low %v2550_v6, %v2551_v8  ;;  %v1668_v5 = vshrl.u32 %v4144_v32, 16 }
  0x85   :  { %3032 = vmatmul.mubr.bf16.vlgmr.msra.gmra.mrb[0].mxu1 %v2493_v26  ;;  %v966_v26 = vrot.slane %v964_v45, 1  ;;  %v1637_v45 = vrot.slane %v1635_v17, 1  ;;  %v2502_v39 = vcombine.low %v953_v23, %v960_v27  ;;  %v4261_v41 = vcombine.low %v4108_v18, %v2578_v50 }
  0x86   :  { %3087 = vmatpush3.bf16.msra.mxu1 %v3814_v24  ;;  %3035 = vmatprep.mubr.bf16.mxu1 %v2496_v7  ;;  %v969_v24 = vshrl.u32 %v4030_v49, 16  ;;  %v980_v3 = vrot.slane %v978_v0, 1  ;;  %v1633_v49 = vshrl.u32 %v4173_v44, 16  ;;  %v2580_v7 = vld [vmem:[%s4453_s0 + $0x14c] sm:$0x1]  ;;  %v1645_v0 = vor.u32 %v1644_v57, %v1640_v11 }
  0x87   :  { %3080 = vmatprep.subr.bf16.mxu1 %v3852_v33  ;;  %v4271_v44 = vcombine.low %v4113_v55, %v2579_v29  ;;  %v4275_v18 = vcombine.low %v4183_v4, %v2580_v7  ;;  %v990_v17 = vshrl.u32 %v4178_v14, 16  ;;  %v994_v23 = vrot.slane %v992_v58, 1 }
  0x88   :  { %v981_v36 = vor.u32 %v980_v3, %v976_v19  ;;  %v1638_v9 = vor.u32 %v1637_v45, %v1633_v49  ;;  %v997_v27 = vshrl.u32 %v4192_v31, 16  ;;  %v1001_v55 = vrot.slane %v999_v60, 1 }
  0x89   :  { %v1665_v4 = vrot.slane %v1663_v12, 1  ;;  %v1672_v20 = vrot.slane %v1670_v13, 1  ;;  %v1689_v14 = vshrl.u32 %v4195_v53, 16  ;;  %v1696_v31 = vshrl.u32 %v4228_v61, 16 }
  0x8a   :  { %3088 = vmatpush3.bf16.msra.mxu1 %v3852_v33  ;;  %v967_v33 = vor.u32 %v966_v26, %v962_v22  ;;  %v2650_v37 = vcombine.low %v1638_v9, %v1645_v0  ;;  %v1693_v26 = vrot.slane %v1691_v30, 1  ;;  %v1684_v12 = vshll.u32 %v4257_v35, 16 }
  0x8b   :  { %2106 = vmatmul.mubr.bf16.gmra.mrb[52].mxu0 %v2663_v51  ;;  %v987_v51 = vrot.slane %v985_v47, 1  ;;  %3081 = vmatprep.subr.bf16.mxu1 %v3878_v43  ;;  %v1698_v47 = vshll.u32 %v4228_v61, 16  ;;  %v995_v32 = vor.u32 %v994_v23, %v990_v17  ;;  %v2653_v13 = vcombine.low %v4237_v52, %v4241_v63 }
  0x8c   :  { %2113 = vmatprep.mubr.bf16.mxu0 %v3347_v2  ;;  %v974_v2 = vor.u32 %v973_v34, %v969_v24  ;;  %v1705_v34 = vshll.u32 %v4261_v41, 16  ;;  %v1703_v53 = vshrl.u32 %v4261_v41, 16  ;;  %v1002_v42 = vor.u32 %v1001_v55, %v997_v27 }
  0x8d   :  { %v988_v46 = vor.u32 %v987_v51, %v983_v10  ;;  %3036 = vmatmul.mubr.bf16.gmra.mrb[4].mxu1 %v2499_v16  ;;  %v1700_v24 = vrot.slane %v1698_v47, 1  ;;  %v1673_v3 = vor.u32 %v1672_v20, %v1668_v5  ;;  %v1719_v10 = vshll.u32 %v4275_v18, 16 }
  0x8e   :  { %3089 = vmatpush3.bf16.msra.mxu1 %v3878_v43  ;;  %3039 = vmatprep.mubr.bf16.mxu1 %v2502_v39  ;;  %v2505_v16 = vcombine.low %v967_v33, %v974_v2  ;;  %v1661_v43 = vshrl.u32 %v4137_v40, 16  ;;  %v1677_v40 = vshll.u32 %v4254_v1, 16  ;;  %v1726_v51 = vshll.u32 %v4278_v21, 16 }
  0x8f   :  { %3082 = vmatprep.subr.bf16.mxu1 %v3917_v54  ;;  %v2508_v22 = vcombine.low %v981_v36, %v988_v46  ;;  %v1694_v49 = vor.u32 %v1693_v26, %v1689_v14  ;;  %v1701_v45 = vor.u32 %v1700_v24, %v1696_v31  ;;  %v1707_v11 = vrot.slane %v1705_v34, 1 }
  0x90   :  { %v1666_v19 = vor.u32 %v1665_v4, %v1661_v43  ;;  %v1710_v57 = vshrl.u32 %v4271_v44, 16  ;;  %v1675_v61 = vshrl.u32 %v4254_v1, 16  ;;  %v1679_v50 = vrot.slane %v1677_v40, 1 }
  0x91   :  { %v1682_v39 = vshrl.u32 %v4257_v35, 16  ;;  %v2511_v52 = vcombine.low %v995_v32, %v1002_v42  ;;  %v1717_v33 = vshrl.u32 %v4275_v18, 16  ;;  %v2662_v2 = vcombine.low %v1694_v49, %v1701_v45 }
  0x92   :  { %3090 = vmatpush3.bf16.msra.mxu1 %v3917_v54  ;;  %v2582_v54 = vld [vmem:[%s4453_s0 + $0x15c] sm:$0x1]  ;;  %v2656_v29 = vcombine.low %v1666_v19, %v1673_v3  ;;  %v1721_v7 = vrot.slane %v1719_v10, 1  ;;  %v1724_v62 = vshrl.u32 %v4278_v21, 16  ;;  %v1728_v36 = vrot.slane %v1726_v51, 1 }
  0x93   :  { %2114 = vmatmul.mubr.bf16.gmra.mrb[56].mxu0 %v2666_v38  ;;  %v1712_v38 = vshll.u32 %v4271_v44, 16  ;;  %3083 = vmatprep.subr.bf16.mxu1 %v3923_v56  ;;  %v2598_v60 = vcombine.low %v2550_v6, %v2582_v54  ;;  %v1708_v46 = vor.u32 %v1707_v11, %v1703_v53  ;;  %v1680_v30 = vor.u32 %v1679_v50, %v1675_v61  ;;  %v4331_v11 = vld [vmem:[%s4454_s2] ss:$0 sm:$0xff] }
  0x94   :  { %2121 = vmatprep.mubr.bf16.mxu0 %v3352_v48  ;;  %v2583_v48 = vld [vmem:[%s4453_s0 + $0x164] sm:$0x1] }
  0x95   :  { %3040 = vmatmul.mubr.bf16.gmra.mrb[8].mxu1 %v2505_v16  ;;  %v1714_v58 = vrot.slane %v1712_v38, 1  ;;  %v2599_v63 = vcombine.low %v2551_v8, %v2583_v48  ;;  %v1733_v41 = vshll.u32 %v2598_v60, 16  ;;  %v1729_v8 = vor.u32 %v1728_v36, %v1724_v62 }
  0x96   :  { %3091 = vmatpush3.bf16.msra.mxu1 %v3923_v56  ;;  %3043 = vmatprep.mubr.bf16.mxu1 %v2508_v22  ;;  %v1686_v56 = vrot.slane %v1684_v12, 1  ;;  %v1731_v47 = vshrl.u32 %v2598_v60, 16 }
  0x97   :  { %3084 = vmatprep.subr.bf16.mxu1 %v4057_v59  ;;  %v1715_v1 = vor.u32 %v1714_v58, %v1710_v57  ;;  %v1740_v6 = vshll.u32 %v2599_v63, 16  ;;  %v1735_v44 = vrot.slane %v1733_v41, 1  ;;  %v1738_v18 = vshrl.u32 %v2599_v63, 16 }
  0x98   :  { %v1687_v35 = vor.u32 %v1686_v56, %v1682_v39 }
  0x99   :  { %v2665_v9 = vcombine.low %v1708_v46, %v1715_v1  ;;  %v1742_v21 = vrot.slane %v1740_v6, 1  ;;  %v1736_v17 = vor.u32 %v1735_v44, %v1731_v47 }
  0x9a   :  { %3092 = vmatpush3.bf16.msra.mxu1 %v4057_v59  ;;  %v1722_v59 = vor.u32 %v1721_v7, %v1717_v33  ;;  %v2659_v0 = vcombine.low %v1680_v30, %v1687_v35 }
  0x9b   :  { %2122 = vmatmul.mubr.bf16.gmra.mrb[60].mxu0 %v2669_v28  ;;  %3085 = vmatprep.subr.bf16.mxu1 %v4098_v15  ;;  %v1743_v23 = vor.u32 %v1742_v21, %v1738_v18 }
  0x9c   :  { %3063 = vmatprep.mubr.bf16.mxu0 %v2650_v37  ;;  %v2668_v16 = vcombine.low %v1722_v59, %v1729_v8 }
  0x9d   :  { %3044 = vmatmul.mubr.bf16.gmra.mrb[12].mxu1 %v2511_v52 }
  0x9e   :  { %3093 = vmatpush3.bf16.msra.mxu1 %v4098_v15  ;;  %3071 = vmatprep.mubr.bf16.mxu1 %v2662_v2  ;;  %v2671_v15 = vcombine.low %v1736_v17, %v1743_v23 }
  0x9f   :  { %3086 = vmatprep.subr.bf16.mxu1 %v4119_v25 }
  0xa2   :  { %3094 = vmatpush3.bf16.msra.mxu1 %v4119_v25 }
  0xa3   :  { %3064 = vmatmul.mubr.bf16.vlgmr.msra.gmra.mrb[64].mxu0 %v2653_v13 }
  0xa4   :  { %3067 = vmatprep.mubr.bf16.mxu0 %v2656_v29 }
  0xa5   :  { %3072 = vmatmul.mubr.bf16.vlgmr.msra.gmra.mrb[8].mxu1 %v2665_v9 }
  0xa6   :  { %3075 = vmatprep.mubr.bf16.mxu1 %v2668_v16 }
  0xab   :  { %3068 = vmatmul.mubr.bf16.gmra.mrb[68].mxu0 %v2659_v0 }
  0xad   :  { %3076 = vmatmul.mubr.bf16.gmra.mrb[12].mxu1 %v2671_v15 }
  0xf6   :  { %v2759_v27 = vpop.f32.mrb[0].mxu0 }
  0xf7   :  { %v2760_v22 = vpop.f32.mrb[1].mxu0 }
  0xf8   :  { %v2761_v55 = vadd.f32 %v2760_v22, %v2759_v27  ;;  %v2762_v28 = vpop.f32.mrb[2].mxu0 }
  0xf9   :  { %v2763_v43 = vpop.f32.mrb[3].mxu0 }
  0xfa   :  { %v2764_v37 = vadd.f32 %v2763_v43, %v2762_v28  ;;  %v3100_v56 = vadd.f32 %v2761_v55, %v4331_v11 }
  0xfc   :  { %v3110_v7 = vadd.f32 %v2764_v37, %v4331_v11 }
  0xfe   :  { %v2765_v4 = vpop.f32.mrb[4].mxu0 }
  0xff   :  { %v2766_v5 = vpop.f32.mrb[5].mxu0 }
 0x100   :  { %v2767_v20 = vadd.f32 %v2766_v5, %v2765_v4  ;;  %v2768_v14 = vpop.f32.mrb[6].mxu0 }
 0x101   :  { %v2769_v26 = vpop.f32.mrb[7].mxu0 }
 0x102   :  { %v2770_v25 = vadd.f32 %v2769_v26, %v2768_v14  ;;  %v3095_v8 = vadd.f32 %v2767_v20, %v4331_v11 }
 0x104   :  { %v3105_v21 = vadd.f32 %v2770_v25, %v4331_v11 }
 0x106   :  { %v2771_v31 = vpop.f32.mrb[8].mxu0 }
 0x107   :  { %v2772_v24 = vpop.f32.mrb[9].mxu0 }
 0x108   :  { %v2773_v34 = vadd.f32 %v2772_v24, %v2771_v31  ;;  %v2774_v38 = vpop.f32.mrb[10].mxu0 }
 0x109   :  { %v2775_v40 = vpop.f32.mrb[11].mxu0 }
 0x10a   :  { %v2776_v12 = vadd.f32 %v2775_v40, %v2774_v38  ;;  %v3120_v37 = vadd.f32 %v2773_v34, %v4331_v11 }
 0x10c   :  { %v3130_v25 = vadd.f32 %v2776_v12, %v4331_v11 }
 0x10e   :  { %v2777_v32 = vpop.f32.mrb[12].mxu0 }
 0x10f   :  { %v2778_v54 = vpop.f32.mrb[13].mxu0 }
 0x110   :  { %v4320_v13 = vadd.f32 %v2778_v54, %v2777_v32  ;;  %v2780_v53 = vpop.f32.mrb[14].mxu0 }
 0x111   :  { %v2781_v42 = vpop.f32.mrb[15].mxu0 }
 0x112   :  { %v4322_v19 = vadd.f32 %v2781_v42, %v2780_v53 }
 0x116   :  { %v2783_v3 = vpop.f32.mrb[16].mxu0 }
 0x117   :  { %v2784_v10 = vpop.f32.mrb[17].mxu0  ;;  %v2839_v58 = vpop.f32.mrb[16].mxu1 }
 0x118   :  { %v4324_v51 = vadd.f32 %v2784_v10, %v2783_v3  ;;  %v2786_v48 = vpop.f32.mrb[18].mxu0  ;;  %v2840_v61 = vpop.f32.mrb[17].mxu1  ;;  %v3115_v3 = vadd.f32 %v4320_v13, %v4331_v11 }
 0x119   :  { %v2787_v49 = vpop.f32.mrb[19].mxu0  ;;  %v2841_v52 = vadd.f32 %v2840_v61, %v2839_v58  ;;  %v2842_v63 = vpop.f32.mrb[18].mxu1  ;;  %v3125_v58 = vadd.f32 %v4322_v19, %v4331_v11 }
 0x11a   :  { %v4326_v45 = vadd.f32 %v2787_v49, %v2786_v48  ;;  %v2843_v33 = vpop.f32.mrb[19].mxu1 }
 0x11b   :  { %v2844_v62 = vadd.f32 %v2843_v33, %v2842_v63  ;;  %v4339_v36 = vadd.f32 %v3100_v56, %v2841_v52 }
 0x11d   :  { %v4341_v46 = vadd.f32 %v3110_v7, %v2844_v62  ;;  %v3139_v7 = vadd.f32 %v4324_v51, %v4331_v11 }
 0x11e   :  { %v2789_v57 = vpop.f32.mrb[20].mxu0 }
 0x11f   :  { %v2790_v60 = vpop.f32.mrb[21].mxu0  ;;  %v2845_v30 = vpop.f32.mrb[20].mxu1 }
 0x120   :  { %v4333_v50 = vadd.f32 %v2790_v60, %v2789_v57  ;;  %v2792_v39 = vpop.f32.mrb[22].mxu0  ;;  %v2846_v41 = vpop.f32.mrb[21].mxu1 }
 0x121   :  { %v2793_v29 = vpop.f32.mrb[23].mxu0  ;;  %v2847_v9 = vadd.f32 %v2846_v41, %v2845_v30  ;;  %v2848_v0 = vpop.f32.mrb[22].mxu1  ;;  %v3147_v41 = vadd.f32 %v4326_v45, %v4331_v11 }
 0x122   :  { %v4336_v2 = vadd.f32 %v2793_v29, %v2792_v39  ;;  %v2849_v44 = vpop.f32.mrb[23].mxu1  ;;  %v3135_v51 = vadd.f32 %v4333_v50, %v4331_v11 }
 0x123   :  { %v2850_v16 = vadd.f32 %v2849_v44, %v2848_v0  ;;  %v4349_v17 = vadd.f32 %v3095_v8, %v2847_v9 }
 0x124   :  { %v3143_v45 = vadd.f32 %v4336_v2, %v4331_v11 }
 0x125   :  { %v4351_v23 = vadd.f32 %v3105_v21, %v2850_v16 }
 0x126   :  { %v2795_v1 = vpop.f32.mrb[24].mxu0 }
 0x127   :  { %v2796_v35 = vpop.f32.mrb[25].mxu0  ;;  %v2851_v27 = vpop.f32.mrb[24].mxu1 }
 0x128   :  { %v4343_v6 = vadd.f32 %v2796_v35, %v2795_v1  ;;  %v2798_v59 = vpop.f32.mrb[26].mxu0  ;;  %v2852_v55 = vpop.f32.mrb[25].mxu1 }
 0x129   :  { %v2799_v47 = vpop.f32.mrb[27].mxu0  ;;  %v2853_v4 = vadd.f32 %v2852_v55, %v2851_v27  ;;  %v2854_v5 = vpop.f32.mrb[26].mxu1 }
 0x12a   :  { %v4346_v18 = vadd.f32 %v2799_v47, %v2798_v59  ;;  %v2855_v14 = vpop.f32.mrb[27].mxu1  ;;  %v3155_v50 = vadd.f32 %v4343_v6, %v4331_v11 }
 0x12b   :  { %v2856_v31 = vadd.f32 %v2855_v14, %v2854_v5  ;;  %v4359_v24 = vadd.f32 %v3120_v37, %v2853_v4 }
 0x12c   :  { %v3163_v2 = vadd.f32 %v4346_v18, %v4331_v11 }
 0x12d   :  { %v4361_v38 = vadd.f32 %v3130_v25, %v2856_v31 }
 0x12e   :  { %v2801_v15 = vpop.f32.mrb[28].mxu0 }
 0x12f   :  { %v2802_v22 = vpop.f32.mrb[29].mxu0  ;;  %v2857_v32 = vpop.f32.mrb[28].mxu1 }
 0x130   :  { %v4353_v28 = vadd.f32 %v2802_v22, %v2801_v15  ;;  %v2804_v43 = vpop.f32.mrb[30].mxu0  ;;  %v2858_v53 = vpop.f32.mrb[29].mxu1 }
 0x131   :  { %v2805_v20 = vpop.f32.mrb[31].mxu0  ;;  %v2859_v10 = vadd.f32 %v2858_v53, %v2857_v32  ;;  %v2860_v48 = vpop.f32.mrb[30].mxu1 }
 0x132   :  { %v4356_v26 = vadd.f32 %v2805_v20, %v2804_v43  ;;  %v2861_v57 = vpop.f32.mrb[31].mxu1  ;;  %v3151_v6 = vadd.f32 %v4353_v28, %v4331_v11 }
 0x133   :  { %v2862_v60 = vadd.f32 %v2861_v57, %v2860_v48  ;;  %v4371_v61 = vadd.f32 %v3115_v3, %v2859_v10 }
 0x134   :  { %v3159_v18 = vadd.f32 %v4356_v26, %v4331_v11 }
 0x135   :  { %v4373_v39 = vadd.f32 %v3125_v58, %v2862_v60 }
 0x136   :  { %v2919_v40 = vpop.f32.mrb[32].mxu0 }
 0x137   :  { %v2920_v54 = vpop.f32.mrb[33].mxu0 }
 0x138   :  { %v4363_v42 = vadd.f32 %v2920_v54, %v2919_v40  ;;  %v2922_v34 = vpop.f32.mrb[34].mxu0  ;;  %v2863_v52 = vpop.f32.mrb[32].mxu1 }
 0x139   :  { %v2923_v49 = vpop.f32.mrb[35].mxu0  ;;  %v2864_v29 = vpop.f32.mrb[33].mxu1 }
 0x13a   :  { %v4367_v12 = vadd.f32 %v2923_v49, %v2922_v34  ;;  %v2865_v62 = vadd.f32 %v2864_v29, %v2863_v52  ;;  %v2866_v1 = vpop.f32.mrb[34].mxu1 }
 0x13b   :  { %v2867_v35 = vpop.f32.mrb[35].mxu1 }
 0x13c   :  { %v3140_v59 = vadd.f32 %v3139_v7, %v2865_v62  ;;  %v2868_v8 = vadd.f32 %v2867_v35, %v2866_v1 }
 0x13e   :  { %v2925_v56 = vpop.f32.mrb[36].mxu0  ;;  %v3148_v9 = vadd.f32 %v3147_v41, %v2868_v8 }
 0x13f   :  { %v2926_v63 = vpop.f32.mrb[37].mxu0 }
 0x140   :  { %v4375_v33 = vadd.f32 %v2926_v63, %v2925_v56  ;;  %v2928_v13 = vpop.f32.mrb[38].mxu0  ;;  %v2869_v47 = vpop.f32.mrb[36].mxu1 }
 0x141   :  { %v2929_v30 = vpop.f32.mrb[39].mxu0  ;;  %v2870_v21 = vpop.f32.mrb[37].mxu1 }
 0x142   :  { %v4379_v19 = vadd.f32 %v2929_v30, %v2928_v13  ;;  %v2871_v27 = vadd.f32 %v2870_v21, %v2869_v47  ;;  %v2872_v22 = vpop.f32.mrb[38].mxu1 }
 0x143   :  { %v2873_v43 = vpop.f32.mrb[39].mxu1 }
 0x144   :  { %v3136_v4 = vadd.f32 %v3135_v51, %v2871_v27  ;;  %v2874_v5 = vadd.f32 %v2873_v43, %v2872_v22 }
 0x146   :  { %v2931_v0 = vpop.f32.mrb[40].mxu0  ;;  %v3144_v20 = vadd.f32 %v3143_v45, %v2874_v5 }
 0x147   :  { %v2932_v44 = vpop.f32.mrb[41].mxu0 }
 0x148   :  { %v4383_v16 = vadd.f32 %v2932_v44, %v2931_v0  ;;  %v2934_v15 = vpop.f32.mrb[42].mxu0  ;;  %v2875_v25 = vpop.f32.mrb[40].mxu1 }
 0x149   :  { %v2935_v55 = vpop.f32.mrb[43].mxu0  ;;  %v2876_v40 = vpop.f32.mrb[41].mxu1 }
 0x14a   :  { %v4387_v37 = vadd.f32 %v2935_v55, %v2934_v15  ;;  %v2877_v53 = vadd.f32 %v2876_v40, %v2875_v25  ;;  %v2878_v34 = vpop.f32.mrb[42].mxu1 }
 0x14b   :  { %v2879_v10 = vpop.f32.mrb[43].mxu1 }
 0x14c   :  { %v3156_v49 = vadd.f32 %v3155_v50, %v2877_v53  ;;  %v2880_v57 = vadd.f32 %v2879_v10, %v2878_v34 }
 0x14e   :  { %v2937_v14 = vpop.f32.mrb[44].mxu0  ;;  %v3164_v58 = vadd.f32 %v3163_v2, %v2880_v57 }
 0x14f   :  { %v2938_v31 = vpop.f32.mrb[45].mxu0 }
 0x150   :  { %v4391_v32 = vadd.f32 %v2938_v31, %v2937_v14  ;;  %v2940_v54 = vpop.f32.mrb[46].mxu0  ;;  %v2881_v56 = vpop.f32.mrb[44].mxu1 }
 0x151   :  { %v2941_v3 = vpop.f32.mrb[47].mxu0  ;;  %v2882_v63 = vpop.f32.mrb[45].mxu1 }
 0x152   :  { %v2942_v48 = vadd.f32 %v2941_v3, %v2940_v54  ;;  %v2883_v7 = vadd.f32 %v2882_v63, %v2881_v56  ;;  %v2884_v62 = vpop.f32.mrb[46].mxu1 }
 0x153   :  { %v2885_v30 = vpop.f32.mrb[47].mxu1 }
 0x154   :  { %v3152_v8 = vadd.f32 %v3151_v6, %v2883_v7  ;;  %v2886_v0 = vadd.f32 %v2885_v30, %v2884_v62 }
 0x156   :  { %v2943_v60 = vpop.f32.mrb[48].mxu0  ;;  %v3160_v44 = vadd.f32 %v3159_v18, %v2886_v0 }
 0x157   :  { %v2944_v52 = vpop.f32.mrb[49].mxu0 }
 0x158   :  { %v2945_v29 = vadd.f32 %v2944_v52, %v2943_v60  ;;  %v2946_v13 = vpop.f32.mrb[50].mxu0  ;;  %v3033_v15 = vpop.f32.mrb[0].mxu1 }
 0x159   :  { %v2947_v1 = vpop.f32.mrb[51].mxu0  ;;  %v3097_v28 = vadd.f32 %v4349_v17, %v3033_v15  ;;  %v1423_v27 = vpop.f32.mrb[1].mxu1 }
 0x15a   :  { %v2948_v35 = vadd.f32 %v2947_v1, %v2946_v13  ;;  %v4399_v41 = vadd.f32 %v3140_v59, %v2945_v29  ;;  %v3102_v43 = vadd.f32 %v4339_v36, %v1423_v27  ;;  %v3034_v59 = vpop.f32.mrb[2].mxu1 }
 0x15b   :  { %v3107_v5 = vadd.f32 %v4351_v23, %v3034_v59  ;;  %v1426_v11 = vpop.f32.mrb[3].mxu1 }
 0x15c   :  { %v4403_v47 = vadd.f32 %v3148_v9, %v2948_v35  ;;  %v3098_v9 = vadd.f32 %v3097_v28, %v4375_v33  ;;  %v3112_v25 = vadd.f32 %v4341_v46, %v1426_v11  ;;  %v3103_v31 = vadd.f32 %v3102_v43, %v4363_v42 }
 0x15d   :  { %v3108_v17 = vadd.f32 %v3107_v5, %v4379_v19 }
 0x15e   :  { %v2949_v21 = vpop.f32.mrb[52].mxu0  ;;  %v3113_v54 = vadd.f32 %v3112_v25, %v4367_v12 }
 0x15f   :  { %v2950_v51 = vpop.f32.mrb[53].mxu0 }
 0x160   :  { %v2951_v22 = vadd.f32 %v2950_v51, %v2949_v21  ;;  %v2952_v55 = vpop.f32.mrb[54].mxu0  ;;  %v3037_v36 = vpop.f32.mrb[4].mxu1 }
 0x161   :  { %v2953_v45 = vpop.f32.mrb[55].mxu0  ;;  %v3117_v34 = vadd.f32 %v4371_v61, %v3037_v36  ;;  %v1439_v23 = vpop.f32.mrb[5].mxu1 }
 0x162   :  { %v2954_v26 = vadd.f32 %v2953_v45, %v2952_v55  ;;  %v3137_v14 = vadd.f32 %v3136_v4, %v2951_v22  ;;  %v3122_v33 = vadd.f32 %v4359_v24, %v1439_v23  ;;  %v3038_v4 = vpop.f32.mrb[6].mxu1 }
 0x163   :  { %v3127_v46 = vadd.f32 %v4373_v39, %v3038_v4  ;;  %v1442_v42 = vpop.f32.mrb[7].mxu1  ;;  %v3118_v19 = vadd.f32 %v3117_v34, %v4391_v32 }
 0x164   :  { %v3145_v40 = vadd.f32 %v3144_v20, %v2954_v26  ;;  %v3132_v12 = vadd.f32 %v4361_v38, %v1442_v42  ;;  %v3123_v60 = vadd.f32 %v3122_v33, %v4383_v16 }
 0x165   :  { %v3128_v61 = vadd.f32 %v3127_v46, %v2942_v48 }
 0x166   :  { %v2955_v50 = vpop.f32.mrb[56].mxu0  ;;  %v3133_v52 = vadd.f32 %v3132_v12, %v4387_v37 }
 0x167   :  { %v2956_v53 = vpop.f32.mrb[57].mxu0 }
 0x168   :  { %v2957_v3 = vadd.f32 %v2956_v53, %v2955_v50  ;;  %v2958_v10 = vpop.f32.mrb[58].mxu0 }
 0x169   :  { %v2959_v2 = vpop.f32.mrb[59].mxu0 }
 0x16a   :  { %v2960_v57 = vadd.f32 %v2959_v2, %v2958_v10  ;;  %v4417_v20 = vadd.f32 %v3156_v49, %v2957_v3 }
 0x16c   :  { %v4421_v56 = vadd.f32 %v3164_v58, %v2960_v57 }
 0x16e   :  { %v2961_v24 = vpop.f32.mrb[60].mxu0 }
 0x16f   :  { %v2962_v63 = vpop.f32.mrb[61].mxu0 }
 0x170   :  { %v2963_v29 = vadd.f32 %v2962_v63, %v2961_v24  ;;  %v2964_v13 = vpop.f32.mrb[62].mxu0 }
 0x171   :  { %v2965_v39 = vpop.f32.mrb[63].mxu0 }
 0x172   :  { %v2966_v6 = vadd.f32 %v2965_v39, %v2964_v13  ;;  %v3153_v7 = vadd.f32 %v3152_v8, %v2963_v29 }
 0x174   :  { %v3161_v62 = vadd.f32 %v3160_v44, %v2966_v6 }
 0x176   :  { %v3065_v32 = vpop.f32.mrb[64].mxu0 }
 0x177   :  { %v3099_v49 = vadd.f32 %v3098_v9, %v3065_v32  ;;  %v2164_v1 = vpop.f32.mrb[65].mxu0 }
 0x178   :  { %v3104_v30 = vadd.f32 %v3103_v31, %v2164_v1  ;;  %v3066_v38 = vpop.f32.mrb[66].mxu0  ;;  %v3073_v28 = vpop.f32.mrb[8].mxu1 }
 0x179   :  { %v3109_v35 = vadd.f32 %v3108_v17, %v3066_v38  ;;  %v2167_v16 = vpop.f32.mrb[67].mxu0  ;;  %v2245_v58 = vmax.f32 %v3099_v49, 0.0  ;;  %v3138_v27 = vadd.f32 %v3137_v14, %v3073_v28  ;;  %v2196_v22 = vpop.f32.mrb[9].mxu1 }
 0x17a   :  { %v3114_v48 = vadd.f32 %v3113_v54, %v2167_v16  ;;  %v2243_v0 = vmax.f32 %v3104_v30, 0.0  ;;  %v3142_v59 = vadd.f32 %v4399_v41, %v2196_v22  ;;  %v3074_v45 = vpop.f32.mrb[10].mxu1 }
 0x17b   :  { %v2246_v18 = vmax.f32 %v3109_v35, 0.0  ;;  %v3146_v26 = vadd.f32 %v3145_v40, %v3074_v45  ;;  %v2199_v9 = vpop.f32.mrb[11].mxu1  ;;  %v2253_v14 = vmax.f32 %v3138_v27, 0.0 }
 0x17c   :  { %v2244_v37 = vmax.f32 %v3114_v48, 0.0  ;;  %v3150_v31 = vadd.f32 %v4403_v47, %v2199_v9  ;;  %v2251_v34 = vmax.f32 %v3142_v59, 0.0 }
 0x17d   :  { %v2704_v21 = vpack.c.bf16 %v2246_v18, %v2245_v58  ;;  %v2254_v50 = vmax.f32 %v3146_v26, 0.0 }
 0x17e   :  { %v2699_v15 = vpack.c.bf16 %v2244_v37, %v2243_v0  ;;  %v3069_v51 = vpop.f32.mrb[68].mxu0  ;;  %v2252_v23 = vmax.f32 %v3150_v31, 0.0 }
 0x17f   :  { %2736 = vst [vmem:[%s4455_s3 + $0x8] sm:$0xff] %v2704_v21   ;;  %v3119_v8 = vadd.f32 %v3118_v19, %v3069_v51  ;;  %v2180_v44 = vpop.f32.mrb[69].mxu0  ;;  %v2724_v10 = vpack.c.bf16 %v2254_v50, %v2253_v14 }
 0x180   :  { %2700 = vst [vmem:[%s4455_s3] sm:$0xff] %v2699_v15   ;;  %v3124_v55 = vadd.f32 %v3123_v60, %v2180_v44  ;;  %v3070_v43 = vpop.f32.mrb[70].mxu0  ;;  %v2719_v41 = vpack.c.bf16 %v2252_v23, %v2251_v34  ;;  %v3077_v4 = vpop.f32.mrb[12].mxu1 }
 0x181   :  { %v3129_v5 = vadd.f32 %v3128_v61, %v3070_v43  ;;  %v2183_v11 = vpop.f32.mrb[71].mxu0  ;;  %v2249_v17 = vmax.f32 %v3119_v8, 0.0  ;;  %2740 = vst [vmem:[%s4455_s3 + $0x28] sm:$0xff] %v2724_v10   ;;  %v3154_v47 = vadd.f32 %v3153_v7, %v3077_v4  ;;  %v2212_v40 = vpop.f32.mrb[13].mxu1 }
 0x182   :  { %v3134_v25 = vadd.f32 %v3133_v52, %v2183_v11  ;;  %v2247_v36 = vmax.f32 %v3124_v55, 0.0  ;;  %2739 = vst [vmem:[%s4455_s3 + $0x20] sm:$0xff] %v2719_v41   ;;  %v3158_v2 = vadd.f32 %v4417_v20, %v2212_v40  ;;  %v3078_v46 = vpop.f32.mrb[14].mxu1 }
 0x183   :  { %v2250_v54 = vmax.f32 %v3129_v5, 0.0  ;;  %v3162_v42 = vadd.f32 %v3161_v62, %v3078_v46  ;;  %v2215_v57 = vpop.f32.mrb[15].mxu1  ;;  %v2257_v12 = vmax.f32 %v3154_v47, 0.0 }
 0x184   :  { %v2248_v53 = vmax.f32 %v3134_v25, 0.0  ;;  %v3166_v19 = vadd.f32 %v4421_v56, %v2215_v57  ;;  %v2255_v61 = vmax.f32 %v3158_v2, 0.0 }
 0x185   :  { %v2714_v3 = vpack.c.bf16 %v2250_v54, %v2249_v17  ;;  %v2258_v60 = vmax.f32 %v3162_v42, 0.0 }
 0x186   :  { %v2709_v33 = vpack.c.bf16 %v2248_v53, %v2247_v36  ;;  %v2256_v52 = vmax.f32 %v3166_v19, 0.0 }
 0x187   :  { %2738 = vst [vmem:[%s4455_s3 + $0x18] sm:$0xff] %v2714_v3   ;;  %v2734_v24 = vpack.c.bf16 %v2258_v60, %v2257_v12 }
 0x188   :  { %2737 = vst [vmem:[%s4455_s3 + $0x10] sm:$0xff] %v2709_v33   ;;  %v2729_v63 = vpack.c.bf16 %v2256_v52, %v2255_v61 }
 0x189   :  { %2742 = vst [vmem:[%s4455_s3 + $0x38] sm:$0xff] %v2734_v24  }
 0x18a   :  { %2741 = vst [vmem:[%s4455_s3 + $0x30] sm:$0xff] %v2729_v63  }

// kernel: a_call__.11
= control target key start
LH: loop header
LB: loop body
LE: loop exit
PB: predicated region body
PF: predicated region fallthrough
CT: control target
= control target key end

     0   :  { %s4922_s1 = inlined_call_operand.vmem [shape: bf16[3,384,128], index: 1, kind: input, shape index: {}]   ;;  %s4923_s0 = inlined_call_operand.vmem [shape: bf16[2,10,10,128], index: 0, kind: input, shape index: {}]   ;;  %s4924_s2 = inlined_call_operand.vmem [shape: f32[1,128], index: 2, kind: input, shape index: {}]   ;;  %s4925_s3 = inlined_call_operand.vmem [shape: bf16[2,8,8,128], index: 3, kind: input, shape index: {}]   ;;  %s4926_s4 = inlined_call_operand.vmem [shape: bf16[2,8,8,128], index: 4, kind: output, shape index: {}]  }
   0x1   :  { %v3454_v0 = vld [vmem:[%s4922_s1 + $0x40] sm:$0xff]   ;;  %v3457_v3 = vld [vmem:[%s4922_s1 + $0x48] sm:$0xff]   ;;  %v3460_v6 = vld [vmem:[%s4922_s1 + $0x50] sm:$0xff]  }
   0x2   :  { %v3455_v1 = vld [vmem:[%s4922_s1 + $0x80] sm:$0xff]   ;;  %3006 = vmatprep.subr.bf16.mxu0 %v3454_v0  ;;  %v3458_v4 = vld [vmem:[%s4922_s1 + $0x88] sm:$0xff]   ;;  %v3461_v7 = vld [vmem:[%s4922_s1 + $0x90] sm:$0xff]  }
   0x3   :  { %v3456_v2 = vld [vmem:[%s4922_s1] sm:$0xff]   ;;  %3246 = vmatprep.subr.bf16.mxu1 %v3455_v1  ;;  %v3459_v5 = vld [vmem:[%s4922_s1 + $0x8] sm:$0xff]   ;;  %v3462_v8 = vld [vmem:[%s4922_s1 + $0x10] sm:$0xff]  }
   0x4   :  { %3007 = vmatpush3.bf16.msra.mxu0 %v3456_v2  ;;  %3247 = vmatpush3.bf16.msra.mxu1 %v3455_v1  ;;  %v3463_v9 = vld [vmem:[%s4922_s1 + $0x58] sm:$0xff]   ;;  %v3466_v12 = vld [vmem:[%s4922_s1 + $0x60] sm:$0xff]   ;;  %v3469_v15 = vld [vmem:[%s4922_s1 + $0x68] sm:$0xff]  }
   0x5   :  { %3008 = vmatprep.subr.bf16.mxu0 %v3457_v3  ;;  %3248 = vmatprep.subr.bf16.mxu1 %v3458_v4  ;;  %v3464_v10 = vld [vmem:[%s4922_s1 + $0x98] sm:$0xff]   ;;  %v3467_v13 = vld [vmem:[%s4922_s1 + $0xa0] sm:$0xff]   ;;  %v3470_v16 = vld [vmem:[%s4922_s1 + $0xa8] sm:$0xff]  }
   0x6   :  { %v3465_v11 = vld [vmem:[%s4922_s1 + $0x18] sm:$0xff]   ;;  %v3468_v14 = vld [vmem:[%s4922_s1 + $0x20] sm:$0xff]   ;;  %v3471_v17 = vld [vmem:[%s4922_s1 + $0x28] sm:$0xff]  }
   0x7   :  { %v3472_v18 = vld [vmem:[%s4922_s1 + $0x70] sm:$0xff]   ;;  %v3475_v21 = vld [vmem:[%s4922_s1 + $0x78] sm:$0xff]   ;;  %v3743_v23 = vld [vmem:[%s4923_s0] sm:$0xf] }
   0x8   :  { %3009 = vmatpush3.bf16.msra.mxu0 %v3459_v5  ;;  %3249 = vmatpush3.bf16.msra.mxu1 %v3458_v4  ;;  %v3473_v19 = vld [vmem:[%s4922_s1 + $0xb0] sm:$0xff]   ;;  %v3476_v22 = vld [vmem:[%s4922_s1 + $0xb8] sm:$0xff]   ;;  %v3748_v24 = vld [vmem:[%s4923_s0 + $0x8] sm:$0xf] }
   0x9   :  { %3010 = vmatprep.subr.bf16.mxu0 %v3460_v6  ;;  %3250 = vmatprep.subr.bf16.mxu1 %v3461_v7  ;;  %v3474_v20 = vld [vmem:[%s4922_s1 + $0x30] sm:$0xff]   ;;  %v41_v25 = vld [vmem:[%s4923_s0 + $0x4] sm:$0x1]  ;;  %v42_v26 = vld [vmem:[%s4923_s0 + $0xc] sm:$0x1]  ;;  %v2520_v61 = vcombine.low %v3743_v23, %v3748_v24 }
   0xa   :  { %v2488_v27 = vcombine.low %v3743_v23, %v41_v25  ;;  %v57_v28 = vld [vmem:[%s4923_s0] sm:$0xe]  ;;  %v58_v29 = vld [vmem:[%s4923_s0 + $0x8] sm:$0xe]  ;;  %v3477_v30 = vld [vmem:[%s4922_s1 + $0x38] sm:$0xff]   ;;  %v2489_v31 = vcombine.low %v3748_v24, %v42_v26 }
   0xb   :  { %v2504_v32 = vcombine.low %v57_v28, %v41_v25  ;;  %v2505_v33 = vcombine.low %v58_v29, %v42_v26  ;;  %v3770_v34 = vld [vmem:[%s4923_s0 + $0x10] sm:$0xf]  ;;  %v3775_v35 = vld [vmem:[%s4923_s0 + $0x18] sm:$0xf]  ;;  %v43_v36 = vld [vmem:[%s4923_s0 + $0x14] sm:$0x1] }
   0xc   :  { %3011 = vmatpush3.bf16.msra.mxu0 %v3462_v8  ;;  %3251 = vmatpush3.bf16.msra.mxu1 %v3461_v7  ;;  %v154_v37 = vshrl.u32 %v2488_v27, 16  ;;  %v156_v38 = vshll.u32 %v2488_v27, 16  ;;  %v44_v39 = vld [vmem:[%s4923_s0 + $0x1c] sm:$0x1]  ;;  %v59_v40 = vld [vmem:[%s4923_s0 + $0x10] sm:$0xe]  ;;  %v2490_v47 = vcombine.low %v3770_v34, %v43_v36  ;;  %v2523_v26 = vcombine.low %v3770_v34, %v3775_v35 }
   0xd   :  { %3012 = vmatprep.subr.bf16.mxu0 %v3463_v9  ;;  %3252 = vmatprep.subr.bf16.mxu1 %v3464_v10  ;;  %v161_v41 = vshrl.u32 %v2489_v31, 16  ;;  %v163_v42 = vshll.u32 %v2489_v31, 16  ;;  %v313_v43 = vrot.slane %v2504_v32, 1  ;;  %v314_v44 = vrot.slane %v2505_v33, 1  ;;  %v60_v45 = vld [vmem:[%s4923_s0 + $0x18] sm:$0xe] }
   0xe   :  { %v158_v46 = vrot.slane %v156_v38, 1  ;;  %v2506_v48 = vcombine.low %v59_v40, %v43_v36  ;;  %v2507_v49 = vcombine.low %v60_v45, %v44_v39  ;;  %v3487_v50 = vld [vmem:[%s4922_s1 + $0x100] sm:$0xff]   ;;  %v2491_v55 = vcombine.low %v3775_v35, %v44_v39  ;;  %v3491_v2 = vld [vmem:[%s4922_s1 + $0x108] sm:$0xff]   ;;  %v3502_v9 = vld [vmem:[%s4922_s1 + $0x110] sm:$0xff]  }
   0xf   :  { %v165_v51 = vrot.slane %v163_v42, 1  ;;  %v2522_v52 = vcombine.low %v313_v43, %v314_v44  ;;  %v3488_v53 = vld [vmem:[%s4922_s1 + $0x1c0] sm:$0xff]   ;;  %v168_v60 = vshrl.u32 %v2490_v47, 16  ;;  %v170_v0 = vshll.u32 %v2490_v47, 16  ;;  %v3492_v3 = vld [vmem:[%s4922_s1 + $0xc8] sm:$0xff]   ;;  %v3504_v36 = vld [vmem:[%s4922_s1 + $0xd0] sm:$0xff]  }
  0x10   :  { %3013 = vmatpush3.bf16.msra.mxu0 %v3465_v11  ;;  %3253 = vmatpush3.bf16.msra.mxu1 %v3464_v10  ;;  %v159_v54 = vor.u32 %v158_v46, %v154_v37  ;;  %v315_v56 = vrot.slane %v2506_v48, 1  ;;  %v316_v57 = vrot.slane %v2507_v49, 1  ;;  %v3489_v59 = vld [vmem:[%s4922_s1 + $0xc0] sm:$0xff]   ;;  %v175_v5 = vshrl.u32 %v2491_v55, 16  ;;  %v46_v8 = vld [vmem:[%s4923_s0 + $0x2c] sm:$0x1] }
  0x11   :  { %3014 = vmatprep.subr.bf16.mxu0 %v3466_v12  ;;  %3254 = vmatprep.subr.bf16.mxu1 %v3467_v13  ;;  %v166_v58 = vor.u32 %v165_v51, %v161_v41  ;;  %v3490_v63 = vld [vmem:[%s4922_s1 + $0x180] sm:$0xff]   ;;  %v172_v4 = vrot.slane %v170_v0, 1  ;;  %v177_v6 = vshll.u32 %v2491_v55, 16  ;;  %v64_v23 = vld [vmem:[%s4923_s0 + $0x38] sm:$0xe]  ;;  %v3505_v34 = vld [vmem:[%s4922_s1 + $0x188] sm:$0xff]  }
  0x12   :  { %3262 = vmatprep.mubr.bf16.mxu1 %v2522_v52  ;;  %v2525_v62 = vcombine.low %v315_v56, %v316_v57  ;;  %v45_v7 = vld [vmem:[%s4923_s0 + $0x24] sm:$0x1]  ;;  %v61_v12 = vld [vmem:[%s4923_s0 + $0x20] sm:$0xe]  ;;  %v3506_v35 = vld [vmem:[%s4922_s1 + $0x118] sm:$0xff]  }
  0x13   :  { %v2521_v1 = vcombine.low %v159_v54, %v166_v58  ;;  %v173_v10 = vor.u32 %v172_v4, %v168_v60  ;;  %v179_v11 = vrot.slane %v177_v6, 1  ;;  %v3507_v40 = vld [vmem:[%s4922_s1 + $0xd8] sm:$0xff]   ;;  %v49_v44 = vld [vmem:[%s4923_s0 + $0x54] sm:$0x1]  ;;  %v65_v48 = vld [vmem:[%s4923_s0 + $0x50] sm:$0xe] }
  0x14   :  { %3015 = vmatpush3.bf16.msra.mxu0 %v3468_v14  ;;  %3255 = vmatpush3.bf16.msra.mxu1 %v3467_v13  ;;  %v62_v13 = vld [vmem:[%s4923_s0 + $0x28] sm:$0xe]  ;;  %v3873_v47 = vld [vmem:[%s4923_s0 + $0x5c] sm:$0x1]  ;;  %v3881_v49 = vld [vmem:[%s4923_s0 + $0x30] sm:$0xf]  ;;  %v2512_v52 = vcombine.low %v65_v48, %v49_v44 }
  0x15   :  { %3016 = vmatprep.subr.bf16.mxu0 %v3469_v15  ;;  %3256 = vmatprep.subr.bf16.mxu1 %v3470_v16  ;;  %v3503_v14 = vld [vmem:[%s4922_s1 + $0x1c8] sm:$0xff]   ;;  %v3832_v15 = vld [vmem:[%s4923_s0 + $0x20] sm:$0xf]  ;;  %v66_v51 = vld [vmem:[%s4923_s0 + $0x58] sm:$0xe] }
  0x16   :  { %633 = vmatprep.mubr.bf16.mxu0 %v2521_v1  ;;  %v2492_v29 = vcombine.low %v3832_v15, %v45_v7  ;;  %v2513_v55 = vcombine.low %v66_v51, %v3873_v47  ;;  %v3895_v56 = vld [vmem:[%s4923_s0 + $0x64] sm:$0x1]  ;;  %v3900_v57 = vld [vmem:[%s4923_s0 + $0x6c] sm:$0x1]  ;;  %v67_v58 = vld [vmem:[%s4923_s0 + $0x60] sm:$0xe] }
  0x17   :  { %v4005_v51 = vld [vmem:[%s4923_s0 + $0x70] sm:$0xf] }
  0x18   :  { %3017 = vmatpush3.bf16.msra.mxu0 %v3471_v17  ;;  %3257 = vmatpush3.bf16.msra.mxu1 %v3470_v16  ;;  %v3837_v16 = vld [vmem:[%s4923_s0 + $0x28] sm:$0xf]  ;;  %v2508_v17 = vcombine.low %v61_v12, %v45_v7  ;;  %v182_v38 = vshrl.u32 %v2492_v29, 16  ;;  %v184_v41 = vshll.u32 %v2492_v29, 16  ;;  %v322_v1 = vrot.slane %v2513_v55, 1  ;;  %v3519_v7 = vld [vmem:[%s4922_s1 + $0xe0] sm:$0xff]  }
  0x19   :  { %3018 = vmatprep.subr.bf16.mxu0 %v3472_v18  ;;  %3258 = vmatprep.subr.bf16.mxu1 %v3473_v19  ;;  %v2509_v18 = vcombine.low %v62_v13, %v46_v8  ;;  %v2526_v60 = vcombine.low %v3832_v15, %v3837_v16  ;;  %v3521_v12 = vld [vmem:[%s4922_s1 + $0x128] sm:$0xff]   ;;  %v3536_v55 = vld [vmem:[%s4922_s1 + $0x138] sm:$0xff]  }
  0x1a   :  { %v317_v24 = vrot.slane %v2508_v17, 1  ;;  %v186_v45 = vrot.slane %v184_v41, 1  ;;  %v3522_v13 = vld [vmem:[%s4922_s1 + $0xe8] sm:$0xff]   ;;  %v3532_v41 = vld [vmem:[%s4922_s1 + $0x130] sm:$0xff]  }
  0x1b   :  { %v318_v25 = vrot.slane %v2509_v18, 1  ;;  %v3935_v18 = vld [vmem:[%s4923_s0 + $0x50] sm:$0xf] }
  0x1c   :  { %3019 = vmatpush3.bf16.msra.mxu0 %v3474_v20  ;;  %3259 = vmatpush3.bf16.msra.mxu1 %v3473_v19  ;;  %v47_v19 = vld [vmem:[%s4923_s0 + $0x34] sm:$0x1]  ;;  %v180_v20 = vor.u32 %v179_v11, %v175_v5  ;;  %v2496_v29 = vcombine.low %v3935_v18, %v49_v44  ;;  %v3989_v44 = vld [vmem:[%s4923_s0 + $0x60] sm:$0xf] }
  0x1d   :  { %3020 = vmatprep.subr.bf16.mxu0 %v3475_v21  ;;  %3260 = vmatprep.subr.bf16.mxu1 %v3476_v22  ;;  %v48_v21 = vld [vmem:[%s4923_s0 + $0x3c] sm:$0x1]  ;;  %v2528_v32 = vcombine.low %v317_v24, %v318_v25  ;;  %v2494_v4 = vcombine.low %v3881_v49, %v47_v19  ;;  %v70_v24 = vld [vmem:[%s4923_s0 + $0x78] sm:$0xe] }
  0x1e   :  { %v2524_v28 = vcombine.low %v173_v10, %v180_v20  ;;  %v2511_v31 = vcombine.low %v64_v23, %v48_v21  ;;  %v3520_v10 = vld [vmem:[%s4922_s1 + $0x190] sm:$0xff]   ;;  %v3945_v20 = vld [vmem:[%s4923_s0 + $0x7c] sm:$0x1]  ;;  %v3956_v25 = vld [vmem:[%s4923_s0 + $0x58] sm:$0xf] }
  0x1f   :  { %v198_v15 = vshll.u32 %v2494_v4, 16  ;;  %v69_v23 = vld [vmem:[%s4923_s0 + $0x70] sm:$0xe] }
  0x20   :  { %3021 = vmatpush3.bf16.msra.mxu0 %v3477_v30  ;;  %3261 = vmatpush3.bf16.msra.mxu1 %v3476_v22  ;;  %v63_v22 = vld [vmem:[%s4923_s0 + $0x30] sm:$0xe]  ;;  %v2493_v30 = vcombine.low %v3837_v16, %v46_v8  ;;  %v320_v37 = vrot.slane %v2511_v31, 1 }
  0x21   :  { %3086 = vmatprep.subr.bf16.mxu1 %v3487_v50  ;;  %3166 = vmatprep.subr.bf16.mxu0 %v3488_v53  ;;  %v2510_v27 = vcombine.low %v63_v22, %v47_v19  ;;  %v3886_v50 = vld [vmem:[%s4923_s0 + $0x38] sm:$0xf]  ;;  %v187_v53 = vor.u32 %v186_v45, %v182_v38  ;;  %v3940_v19 = vld [vmem:[%s4923_s0 + $0x74] sm:$0x1]  ;;  %v3994_v45 = vld [vmem:[%s4923_s0 + $0x68] sm:$0xf] }
  0x22   :  { %v189_v42 = vshrl.u32 %v2493_v30, 16  ;;  %v191_v43 = vshll.u32 %v2493_v30, 16  ;;  %v2495_v5 = vcombine.low %v3886_v50, %v48_v21  ;;  %v200_v21 = vrot.slane %v198_v15, 1 }
  0x23   :  { %3263 = vmatmul.mubr.bf16.vlgmr.msra.gmra.mrb[0].mxu1 %v2525_v62  ;;  %634 = vmatmul.mubr.bf16.vlgmr.msra.gmra.mrb[0].mxu0 %v2520_v61  ;;  %v319_v33 = vrot.slane %v2510_v27, 1  ;;  %v68_v61 = vld [vmem:[%s4923_s0 + $0x68] sm:$0xe]  ;;  %v2514_v62 = vcombine.low %v67_v58, %v3895_v56  ;;  %v2517_v27 = vcombine.low %v70_v24, %v3945_v20  ;;  %v4081_v24 = vld [vmem:[%s4923_s0 + $0x80] sm:$0xf] }
  0x24   :  { %3087 = vmatpush3.bf16.msra.mxu1 %v3489_v59  ;;  %3167 = vmatpush3.bf16.msra.mxu0 %v3490_v63  ;;  %v193_v46 = vrot.slane %v191_v43, 1  ;;  %v321_v59 = vrot.slane %v2512_v52, 1  ;;  %v3517_v63 = vld [vmem:[%s4922_s1 + $0x120] sm:$0xff]   ;;  %v203_v16 = vshrl.u32 %v2495_v5, 16  ;;  %v205_v17 = vshll.u32 %v2495_v5, 16  ;;  %v3535_v52 = vld [vmem:[%s4922_s1 + $0x198] sm:$0xff]  }
  0x25   :  { %3088 = vmatprep.subr.bf16.mxu1 %v3491_v2  ;;  %3168 = vmatprep.subr.bf16.mxu0 %v3503_v14  ;;  %v2531_v39 = vcombine.low %v319_v33, %v320_v37  ;;  %v2515_v2 = vcombine.low %v68_v61, %v3900_v57  ;;  %v323_v6 = vrot.slane %v2514_v62, 1  ;;  %v196_v14 = vshrl.u32 %v2494_v4, 16  ;;  %v71_v33 = vld [vmem:[%s4923_s0 + $0x80] sm:$0xe]  ;;  %v4019_v62 = vld [vmem:[%s4923_s0 + $0x8] sm:$0xf] }
  0x26   :  { %641 = vmatprep.mubr.bf16.mxu0 %v2524_v28  ;;  %3266 = vmatprep.mubr.bf16.mxu1 %v2528_v32  ;;  %v194_v54 = vor.u32 %v193_v46, %v189_v42  ;;  %v2534_v8 = vcombine.low %v321_v59, %v322_v1  ;;  %v207_v22 = vrot.slane %v205_v17, 1  ;;  %v3963_v28 = vld [vmem:[%s4923_s0 + $0x84] sm:$0x1]  ;;  %v3969_v32 = vld [vmem:[%s4923_s0 + $0x8c] sm:$0x1]  ;;  %v210_v42 = vshrl.u32 %v2496_v29, 16 }
  0x27   :  { %v201_v30 = vor.u32 %v200_v21, %v196_v14  ;;  %v2518_v38 = vcombine.low %v71_v33, %v3963_v28  ;;  %v2497_v43 = vcombine.low %v3956_v25, %v3873_v47  ;;  %v3534_v47 = vld [vmem:[%s4922_s1 + $0xf0] sm:$0xff]   ;;  %v3537_v59 = vld [vmem:[%s4922_s1 + $0xf8] sm:$0xff]   ;;  %v2499_v1 = vcombine.low %v3994_v45, %v3900_v57  ;;  %v4043_v4 = vld [vmem:[%s4923_s0 + $0xc] sm:$0x1] }
  0x28   :  { %3089 = vmatpush3.bf16.msra.mxu1 %v3492_v3  ;;  %3169 = vmatpush3.bf16.msra.mxu0 %v3505_v34  ;;  %v2527_v0 = vcombine.low %v187_v53, %v194_v54  ;;  %v3518_v3 = vld [vmem:[%s4922_s1 + $0x1d0] sm:$0xff]   ;;  %v208_v31 = vor.u32 %v207_v22, %v203_v16  ;;  %v326_v34 = vrot.slane %v2517_v27, 1  ;;  %v212_v53 = vshll.u32 %v2496_v29, 16  ;;  %v3544_v16 = vld [vmem:[%s4922_s1 + $0x1a0] sm:$0xff]  }
  0x29   :  { %3090 = vmatprep.subr.bf16.mxu1 %v3502_v9  ;;  %v324_v9 = vrot.slane %v2515_v2, 1  ;;  %3170 = vmatprep.subr.bf16.mxu0 %v3518_v3  ;;  %v327_v48 = vrot.slane %v2518_v38, 1  ;;  %v217_v58 = vshrl.u32 %v2497_v43, 16  ;;  %v219_v61 = vshll.u32 %v2497_v43, 16  ;;  %v4033_v2 = vld [vmem:[%s4923_s0 + $0x78] sm:$0xf] }
  0x2a   :  { %v4038_v3 = vld [vmem:[%s4923_s0 + $0x10] sm:$0xf]  ;;  %v231_v22 = vshrl.u32 %v2499_v1, 16  ;;  %v233_v27 = vshll.u32 %v2499_v1, 16  ;;  %v4086_v29 = vld [vmem:[%s4923_s0 + $0x20] sm:$0xf] }
  0x2b   :  { %642 = vmatmul.mubr.bf16.gmra.mrb[4].mxu0 %v2523_v26  ;;  %3267 = vmatmul.mubr.bf16.gmra.mrb[4].mxu1 %v2531_v39  ;;  %v2537_v11 = vcombine.low %v323_v6, %v324_v9  ;;  %v2516_v26 = vcombine.low %v69_v23, %v3940_v19  ;;  %v2530_v39 = vcombine.low %v201_v30, %v208_v31  ;;  %v221_v5 = vrot.slane %v219_v61, 1  ;;  %v2586_v30 = vld [vmem:[%s4923_s0 + $0x1c] sm:$0x1] }
  0x2c   :  { %3091 = vmatpush3.bf16.msra.mxu1 %v3504_v36  ;;  %649 = vmatprep.mubr.bf16.mxu0 %v2527_v0  ;;  %v72_v36 = vld [vmem:[%s4923_s0 + $0x88] sm:$0xe]  ;;  %v2498_v0 = vcombine.low %v3989_v44, %v3895_v56  ;;  %v4048_v56 = vld [vmem:[%s4923_s0 + $0x14] sm:$0x1]  ;;  %v2616_v6 = vcombine.low %v4019_v62, %v4043_v4  ;;  %v4059_v9 = vcombine.low %v4005_v51, %v3940_v19  ;;  %v235_v38 = vrot.slane %v233_v27, 1 }
  0x2d   :  { %3092 = vmatprep.subr.bf16.mxu1 %v3506_v35  ;;  %3270 = vmatprep.mubr.bf16.mxu1 %v2534_v8  ;;  %v325_v37 = vrot.slane %v2516_v26, 1  ;;  %v2529_v35 = vcombine.low %v3881_v49, %v3886_v50  ;;  %v3533_v49 = vld [vmem:[%s4922_s1 + $0x1d8] sm:$0xff]   ;;  %v3543_v8 = vld [vmem:[%s4922_s1 + $0x1e0] sm:$0xff]   ;;  %v4076_v23 = vcombine.low %v4033_v2, %v3945_v20  ;;  %v2696_v31 = vcombine.low %v4019_v62, %v4038_v3 }
  0x2e   :  { %3171 = vmatpush3.bf16.msra.mxu0 %v3520_v10  ;;  %v2532_v10 = vcombine.low %v3935_v18, %v3956_v25  ;;  %v943_v14 = vshll.u32 %v2616_v6, 16  ;;  %v224_v19 = vshrl.u32 %v2498_v0, 16  ;;  %v226_v21 = vshll.u32 %v2498_v0, 16  ;;  %v4072_v18 = vld [vmem:[%s4923_s0 + $0x18] sm:$0xf] }
  0x2f   :  { %v2540_v46 = vcombine.low %v325_v37, %v326_v34  ;;  %3172 = vmatprep.subr.bf16.mxu0 %v3533_v49  ;;  %v2602_v37 = vld [vmem:[%s4923_s0 + $0x18] sm:$0xe]  ;;  %v2618_v34 = vcombine.low %v4072_v18, %v2586_v30 }
  0x30   :  { %3093 = vmatpush3.bf16.msra.mxu1 %v3507_v40  ;;  %v2519_v40 = vcombine.low %v72_v36, %v3969_v32  ;;  %v945_v26 = vrot.slane %v943_v14, 1  ;;  %v228_v33 = vrot.slane %v226_v21, 1  ;;  %v2587_v36 = vld [vmem:[%s4923_s0 + $0x24] sm:$0x1] }
  0x31   :  { %3094 = vmatprep.subr.bf16.mxu1 %v3517_v63  ;;  %v4024_v63 = vld [vmem:[%s4922_s1 + $0x140] sm:$0xff]   ;;  %v957_v49 = vshll.u32 %v2618_v34, 16 }
  0x32   :  { %v328_v50 = vrot.slane %v2519_v40, 1  ;;  %3173 = vmatpush3.bf16.msra.mxu0 %v3535_v52  ;;  %v2619_v40 = vcombine.low %v4086_v29, %v2587_v36 }
  0x33   :  { %650 = vmatmul.mubr.bf16.gmra.mrb[8].mxu0 %v2526_v60  ;;  %3271 = vmatmul.mubr.bf16.gmra.mrb[8].mxu1 %v2537_v11  ;;  %v214_v60 = vrot.slane %v212_v53, 1  ;;  %v2535_v11 = vcombine.low %v3989_v44, %v3994_v45  ;;  %v4183_v45 = vld [vmem:[%s4923_s0 + $0x40] sm:$0xf] }
  0x34   :  { %3095 = vmatpush3.bf16.msra.mxu1 %v3519_v7  ;;  %657 = vmatprep.mubr.bf16.mxu0 %v2530_v39  ;;  %v2543_v54 = vcombine.low %v327_v48, %v328_v50  ;;  %v2617_v7 = vcombine.low %v4038_v3, %v4048_v56  ;;  %v2603_v39 = vld [vmem:[%s4923_s0 + $0x20] sm:$0xe]  ;;  %v955_v48 = vshrl.u32 %v2618_v34, 16  ;;  %v236_v50 = vor.u32 %v235_v38, %v231_v22  ;;  %v3551_v3 = vld [vmem:[%s4922_s1 + $0x148] sm:$0xff]   ;;  %v4191_v38 = vld [vmem:[%s4923_s0 + $0x3c] sm:$0x1] }
  0x35   :  { %3096 = vmatprep.subr.bf16.mxu1 %v3521_v12  ;;  %3274 = vmatprep.mubr.bf16.mxu1 %v2540_v46  ;;  %v215_v57 = vor.u32 %v214_v60, %v210_v42  ;;  %v222_v12 = vor.u32 %v221_v5, %v217_v58  ;;  %v4107_v42 = vld [vmem:[%s4923_s0 + $0x88] sm:$0xf]  ;;  %v229_v46 = vor.u32 %v228_v33, %v224_v19  ;;  %v964_v52 = vshll.u32 %v2619_v40, 16 }
  0x36   :  { %v948_v15 = vshrl.u32 %v2617_v7, 16  ;;  %3174 = vmatprep.subr.bf16.mxu0 %v3543_v8  ;;  %v950_v17 = vshll.u32 %v2617_v7, 16  ;;  %v2635_v53 = vcombine.low %v2603_v39, %v2587_v36  ;;  %v4117_v58 = vcombine.low %v4081_v24, %v3963_v28  ;;  %v4130_v28 = vld [vmem:[%s4923_s0 + $0x28] sm:$0xf]  ;;  %v3566_v39 = vld [vmem:[%s4922_s1 + $0x1f8] sm:$0xff]  }
  0x37   :  { %v2533_v25 = vcombine.low %v215_v57, %v222_v12  ;;  %3175 = vmatpush3.bf16.msra.mxu0 %v3544_v16  ;;  %v959_v60 = vrot.slane %v957_v49, 1  ;;  %v2536_v62 = vcombine.low %v229_v46, %v236_v50  ;;  %v966_v0 = vrot.slane %v964_v52, 1  ;;  %v3559_v12 = vld [vmem:[%s4922_s1 + $0x1f0] sm:$0xff]   ;;  %v3567_v52 = vld [vmem:[%s4922_s1 + $0x1b8] sm:$0xff]  }
  0x38   :  { %3097 = vmatpush3.bf16.msra.mxu1 %v3522_v13  ;;  %v941_v13 = vshrl.u32 %v2616_v6, 16  ;;  %v952_v20 = vrot.slane %v950_v17, 1  ;;  %v4121_v1 = vrot.slane %v2635_v53, 1  ;;  %v238_v57 = vshrl.u32 %v4059_v9, 16  ;;  %v3558_v16 = vld [vmem:[%s4922_s1 + $0x150] sm:$0xff]  }
  0x39   :  { %3098 = vmatprep.subr.bf16.mxu1 %v3532_v41  ;;  %v2634_v41 = vcombine.low %v2602_v37, %v2586_v30  ;;  %v960_v5 = vor.u32 %v959_v60, %v955_v48  ;;  %v240_v6 = vshll.u32 %v4059_v9, 16  ;;  %v245_v7 = vshrl.u32 %v4076_v23, 16  ;;  %v4148_v9 = vld [vmem:[%s4923_s0 + $0x2c] sm:$0x1] }
  0x3a   :  { %v953_v43 = vor.u32 %v952_v20, %v948_v15  ;;  %v247_v8 = vshll.u32 %v4076_v23, 16  ;;  %v4153_v15 = vld [vmem:[%s4923_s0 + $0x34] sm:$0x1]  ;;  %v2620_v21 = vcombine.low %v4130_v28, %v4148_v9  ;;  %v252_v33 = vshrl.u32 %v4117_v58, 16 }
  0x3b   :  { %658 = vmatmul.mubr.bf16.gmra.mrb[12].mxu0 %v2529_v35  ;;  %3275 = vmatmul.mubr.bf16.gmra.mrb[12].mxu1 %v2543_v54  ;;  %v946_v35 = vor.u32 %v945_v26, %v941_v13  ;;  %v3552_v54 = vld [vmem:[%s4922_s1 + $0x1e8] sm:$0xff]   ;;  %v4119_v61 = vrot.slane %v2634_v41, 1  ;;  %v2503_v13 = vcombine.low %v4107_v42, %v3969_v32  ;;  %v242_v17 = vrot.slane %v240_v6, 1  ;;  %v3560_v20 = vld [vmem:[%s4922_s1 + $0x1b0] sm:$0xff]  }
  0x3c   :  { %3099 = vmatpush3.bf16.msra.mxu1 %v3534_v47  ;;  %665 = vmatprep.mubr.bf16.mxu0 %v2533_v25  ;;  %v962_v47 = vshrl.u32 %v2619_v40, 16  ;;  %v249_v19 = vrot.slane %v247_v8, 1  ;;  %v2699_v25 = vcombine.low %v4072_v18, %v4086_v29  ;;  %v969_v27 = vshrl.u32 %v2620_v21, 16  ;;  %v4231_v8 = vld [vmem:[%s4923_s0 + $0x64] sm:$0x1] }
  0x3d   :  { %3100 = vmatprep.subr.bf16.mxu1 %v3536_v55  ;;  %v3553_v55 = vld [vmem:[%s4922_s1 + $0x1a8] sm:$0xff]   ;;  %3176 = vmatprep.subr.bf16.mxu0 %v3552_v54  ;;  %v243_v26 = vor.u32 %v242_v17, %v238_v57  ;;  %v971_v30 = vshll.u32 %v2620_v21, 16  ;;  %v254_v44 = vshll.u32 %v4117_v58, 16  ;;  %v259_v34 = vshrl.u32 %v2503_v13, 16  ;;  %v4223_v57 = vld [vmem:[%s4923_s0 + $0x5c] sm:$0x1] }
  0x3e   :  { %3177 = vmatpush3.bf16.msra.mxu0 %v3553_v55  ;;  %v967_v14 = vor.u32 %v966_v0, %v962_v47  ;;  %v2538_v49 = vcombine.low %v4005_v51, %v4033_v2  ;;  %v4213_v51 = vld [vmem:[%s4923_s0 + $0x58] sm:$0xf] }
  0x3f   :  { %3178 = vmatprep.subr.bf16.mxu0 %v3559_v12  ;;  %v973_v37 = vrot.slane %v971_v30, 1  ;;  %v256_v41 = vrot.slane %v254_v44, 1  ;;  %v2624_v12 = vcombine.low %v4213_v51, %v4223_v57  ;;  %v4252_v21 = vld [vmem:[%s4923_s0 + $0x18] sm:$0xf] }
  0x40   :  { %3101 = vmatpush3.bf16.msra.mxu1 %v3537_v59  ;;  %v2697_v59 = vcombine.low %v946_v35, %v953_v43  ;;  %v2700_v23 = vcombine.low %v960_v5, %v967_v14  ;;  %v261_v35 = vshll.u32 %v2503_v13, 16  ;;  %v4199_v43 = vld [vmem:[%s4923_s0 + $0x44] sm:$0x1]  ;;  %v4238_v13 = vld [vmem:[%s4923_s0 + $0x10] sm:$0xf] }
  0x41   :  { %3278 = vmatprep.subr.bf16.mxu1 %v4024_v63  ;;  %v974_v48 = vor.u32 %v973_v37, %v969_v27  ;;  %v2623_v47 = vcombine.low %v4183_v45, %v4199_v43  ;;  %v257_v54 = vor.u32 %v256_v41, %v252_v33  ;;  %v3573_v5 = vld [vmem:[%s4922_s1 + $0x160] sm:$0xff]   ;;  %v4292_v41 = vld [vmem:[%s4923_s0 + $0x74] sm:$0x1] }
  0x42   :  { %1421 = vmatprep.mubr.bf16.mxu1 %v2697_v59  ;;  %3179 = vmatpush3.bf16.msra.mxu0 %v3560_v20  ;;  %v263_v50 = vrot.slane %v261_v35, 1  ;;  %v4243_v14 = vld [vmem:[%s4922_s1 + $0x200] sm:$0xff]  }
  0x43   :  { %666 = vmatmul.mubr.bf16.gmra.mrb[16].mxu0 %v2532_v10  ;;  %v4138_v10 = vld [vmem:[%s4923_s0 + $0x30] sm:$0xf]  ;;  %1422 = vmatmul.mubr.bf16.vlgmr.msra.gmra.mrb[16].mxu1 %v2696_v31  ;;  %v4176_v31 = vld [vmem:[%s4923_s0 + $0x38] sm:$0xf]  ;;  %v990_v60 = vshrl.u32 %v2623_v47, 16 }
  0x44   :  { %673 = vmatprep.mubr.bf16.mxu0 %v2536_v62  ;;  %3279 = vmatpush3.bf16.msra.mxu1 %v4024_v63  ;;  %v2621_v22 = vcombine.low %v4138_v10, %v4153_v15  ;;  %v250_v63 = vor.u32 %v249_v19, %v245_v7  ;;  %v2622_v46 = vcombine.low %v4176_v31, %v4191_v38  ;;  %v992_v62 = vshll.u32 %v2623_v47, 16  ;;  %v4301_v47 = vld [vmem:[%s4923_s0 + $0x20] sm:$0xf] }
  0x45   :  { %3280 = vmatprep.subr.bf16.mxu1 %v3551_v3  ;;  %1429 = vmatprep.mubr.bf16.mxu1 %v2700_v23  ;;  %v264_v59 = vor.u32 %v263_v50, %v259_v34  ;;  %v4262_v23 = vld [vmem:[%s4923_s0 + $0x1c] sm:$0x1]  ;;  %v4282_v34 = vld [vmem:[%s4923_s0 + $0x70] sm:$0xf] }
  0x46   :  { %v976_v18 = vshrl.u32 %v2621_v22, 16  ;;  %v978_v29 = vshll.u32 %v2621_v22, 16  ;;  %v2539_v36 = vcombine.low %v243_v26, %v250_v63  ;;  %3180 = vmatprep.subr.bf16.mxu0 %v3566_v39  ;;  %v983_v55 = vshrl.u32 %v2622_v46, 16  ;;  %v4257_v22 = vld [vmem:[%s4923_s0 + $0x14] sm:$0x1] }
  0x47   :  { %v985_v58 = vshll.u32 %v2622_v46, 16  ;;  %3181 = vmatpush3.bf16.msra.mxu0 %v3567_v52  ;;  %v2542_v6 = vcombine.low %v257_v54, %v264_v59  ;;  %v994_v7 = vrot.slane %v992_v62, 1  ;;  %v2792_v26 = vcombine.low %v4238_v13, %v4257_v22  ;;  %v4306_v52 = vld [vmem:[%s4923_s0 + $0x28] sm:$0xf]  ;;  %v4321_v59 = vld [vmem:[%s4923_s0 + $0x2c] sm:$0x1] }
  0x48   :  { %3281 = vmatpush3.bf16.msra.mxu1 %v3551_v3  ;;  %v980_v40 = vrot.slane %v978_v29, 1  ;;  %v4218_v3 = vld [vmem:[%s4923_s0 + $0x60] sm:$0xf]  ;;  %v2541_v63 = vcombine.low %v4081_v24, %v4107_v42  ;;  %v2793_v20 = vcombine.low %v4252_v21, %v4262_v23  ;;  %3310 = vmatprep.subr.bf16.mxu0 %v4243_v14  ;;  %v3583_v24 = vld [vmem:[%s4922_s1 + $0x168] sm:$0xff]   ;;  %v2627_v50 = vcombine.low %v4282_v34, %v4292_v41 }
  0x49   :  { %3282 = vmatprep.subr.bf16.mxu1 %v3558_v16  ;;  %v987_v0 = vrot.slane %v985_v58, 1  ;;  %v2625_v19 = vcombine.low %v4218_v3, %v4231_v8  ;;  %v1729_v33 = vshrl.u32 %v2792_v26, 16  ;;  %v1731_v44 = vshll.u32 %v2792_v26, 16  ;;  %v4316_v58 = vld [vmem:[%s4923_s0 + $0x24] sm:$0x1] }
  0x4a   :  { %v981_v53 = vor.u32 %v980_v40, %v976_v18  ;;  %v1738_v37 = vshll.u32 %v2793_v20, 16  ;;  %v4287_v40 = vld [vmem:[%s4923_s0 + $0x6c] sm:$0x1]  ;;  %v2705_v54 = vcombine.low %v4176_v31, %v4183_v45  ;;  %v2794_v31 = vcombine.low %v4301_v47, %v4316_v58  ;;  %v4340_v26 = vld [vmem:[%s4923_s0 + $0x80] sm:$0xf] }
  0x4b   :  { %674 = vmatmul.mubr.bf16.gmra.mrb[20].mxu0 %v2535_v11  ;;  %v3565_v11 = vld [vmem:[%s4922_s1 + $0x158] sm:$0xff]   ;;  %1430 = vmatmul.mubr.bf16.gmra.mrb[20].mxu1 %v2699_v25  ;;  %v988_v17 = vor.u32 %v987_v0, %v983_v55  ;;  %v999_v25 = vshll.u32 %v2624_v12, 16  ;;  %v1004_v27 = vshrl.u32 %v2625_v19, 16  ;;  %v1006_v30 = vshll.u32 %v2625_v19, 16 }
  0x4c   :  { %681 = vmatprep.mubr.bf16.mxu0 %v2539_v36  ;;  %3283 = vmatpush3.bf16.msra.mxu1 %v3558_v16  ;;  %v2703_v2 = vcombine.low %v974_v48, %v981_v53  ;;  %v2702_v16 = vcombine.low %v4130_v28, %v4138_v10  ;;  %v995_v28 = vor.u32 %v994_v7, %v990_v60  ;;  %v997_v10 = vshrl.u32 %v2624_v12, 16  ;;  %v3591_v53 = vld [vmem:[%s4922_s1 + $0x170] sm:$0xff]  }
  0x4d   :  { %3284 = vmatprep.subr.bf16.mxu1 %v3565_v11  ;;  %v1001_v29 = vrot.slane %v999_v25, 1  ;;  %v1008_v42 = vrot.slane %v1006_v30, 1  ;;  %v1736_v36 = vshrl.u32 %v2793_v20, 16  ;;  %v1733_v39 = vrot.slane %v1731_v44, 1  ;;  %v4345_v30 = vld [vmem:[%s4923_s0 + $0x7c] sm:$0x1] }
  0x4e   :  { %1437 = vmatprep.mubr.bf16.mxu1 %v2703_v2  ;;  %v2706_v18 = vcombine.low %v988_v17, %v995_v28  ;;  %v1740_v48 = vrot.slane %v1738_v37, 1  ;;  %v2795_v45 = vcombine.low %v4306_v52, %v4321_v59  ;;  %v3599_v17 = vld [vmem:[%s4922_s1 + $0x178] sm:$0xff]   ;;  %v2872_v19 = vcombine.low %v4238_v13, %v4252_v21  ;;  %v4362_v44 = vld [vmem:[%s4923_s0 + $0x30] sm:$0xf]  ;;  %v4374_v37 = vld [vmem:[%s4923_s0 + $0x34] sm:$0x1] }
  0x4f   :  { %v1002_v35 = vor.u32 %v1001_v29, %v997_v10  ;;  %v1009_v46 = vor.u32 %v1008_v42, %v1004_v27  ;;  %v1734_v55 = vor.u32 %v1733_v39, %v1729_v33  ;;  %v1743_v10 = vshrl.u32 %v2794_v31, 16  ;;  %v4355_v29 = vld [vmem:[%s4923_s0 + $0x84] sm:$0x1] }
  0x50   :  { %3285 = vmatpush3.bf16.msra.mxu1 %v3565_v11  ;;  %v4274_v11 = vld [vmem:[%s4923_s0 + $0x68] sm:$0xf]  ;;  %v1741_v62 = vor.u32 %v1740_v48, %v1736_v36  ;;  %v1745_v25 = vshll.u32 %v2794_v31, 16  ;;  %v1752_v27 = vshll.u32 %v2795_v45, 16  ;;  %v2629_v42 = vcombine.low %v4340_v26, %v4355_v29  ;;  %v4369_v36 = vld [vmem:[%s4923_s0 + $0x38] sm:$0xf] }
  0x51   :  { %3286 = vmatprep.subr.bf16.mxu1 %v3573_v5  ;;  %v2709_v60 = vcombine.low %v1002_v35, %v1009_v46  ;;  %v2708_v35 = vcombine.low %v4213_v51, %v4218_v3  ;;  %v4397_v31 = vld [vmem:[%s4922_s1 + $0x210] sm:$0xff]  }
  0x52   :  { %v2873_v7 = vcombine.low %v1734_v55, %v1741_v62  ;;  %v1747_v21 = vrot.slane %v1745_v25, 1  ;;  %v2796_v55 = vcombine.low %v4362_v44, %v4374_v37  ;;  %v4392_v62 = vld [vmem:[%s4923_s0 + $0x88] sm:$0xf] }
  0x53   :  { %682 = vmatmul.mubr.bf16.gmra.mrb[24].mxu0 %v2538_v49  ;;  %1438 = vmatmul.mubr.bf16.gmra.mrb[24].mxu1 %v2702_v16  ;;  %v2626_v49 = vcombine.low %v4274_v11, %v4287_v40  ;;  %v4330_v16 = vld [vmem:[%s4923_s0 + $0x78] sm:$0xf] }
  0x54   :  { %689 = vmatprep.mubr.bf16.mxu0 %v2542_v6  ;;  %1445 = vmatprep.mubr.bf16.mxu1 %v2706_v18  ;;  %v1020_v6 = vshll.u32 %v2627_v50, 16  ;;  %v4350_v18 = vld [vmem:[%s4922_s1 + $0x208] sm:$0xff]   ;;  %v2628_v33 = vcombine.low %v4330_v16, %v4345_v30  ;;  %v1748_v39 = vor.u32 %v1747_v21, %v1743_v10  ;;  %v4415_v10 = vld [vmem:[%s4923_s0 + $0x94] sm:$0x1]  ;;  %v4435_v21 = vld [vmem:[%s4923_s0 + $0x44] sm:$0x1] }
  0x55   :  { %3287 = vmatpush3.bf16.msra.mxu1 %v3573_v5  ;;  %v1011_v2 = vshrl.u32 %v2626_v49, 16  ;;  %v1013_v0 = vshll.u32 %v2626_v49, 16  ;;  %v1018_v5 = vshrl.u32 %v2627_v50, 16  ;;  %v4381_v49 = vld [vmem:[%s4923_s0 + $0x3c] sm:$0x1]  ;;  %4933 = vst [vmem:[#allocation2_spill] sm:$0xff] %v4435_v21 }
  0x56   :  { %3288 = vmatprep.subr.bf16.mxu1 %v3583_v24  ;;  %v1022_v28 = vrot.slane %v1020_v6, 1  ;;  %v1025_v46 = vshrl.u32 %v2628_v33, 16  ;;  %v1027_v48 = vshll.u32 %v2628_v33, 16  ;;  %v2797_v3 = vcombine.low %v4369_v36, %v4381_v49  ;;  %v4440_v33 = vld [vmem:[%s4923_s0 + $0x4c] sm:$0x1] }
  0x57   :  { %v1015_v12 = vrot.slane %v1013_v0, 1  ;;  %v1759_v6 = vshll.u32 %v2796_v55, 16  ;;  %4934 = vst [vmem:[#allocation3_spill] sm:$0xff] %v4440_v33 }
  0x58   :  { %v1023_v13 = vor.u32 %v1022_v28, %v1018_v5  ;;  %v1029_v51 = vrot.slane %v1027_v48, 1  ;;  %v1757_v5 = vshrl.u32 %v2796_v55, 16  ;;  %v4410_v28 = vld [vmem:[%s4923_s0 + $0x8c] sm:$0x1] }
  0x59   :  { %3289 = vmatpush3.bf16.msra.mxu1 %v3583_v24  ;;  %v1016_v20 = vor.u32 %v1015_v12, %v1011_v2  ;;  %v1754_v24 = vrot.slane %v1752_v27, 1  ;;  %v4424_v27 = vld [vmem:[%s4923_s0 + $0x40] sm:$0xf] }
  0x5a   :  { %3290 = vmatprep.subr.bf16.mxu1 %v3591_v53  ;;  %v1030_v12 = vor.u32 %v1029_v51, %v1025_v46 }
  0x5b   :  { %690 = vmatmul.mubr.bf16.gmra.mrb[28].mxu0 %v2541_v63  ;;  %1446 = vmatmul.mubr.bf16.gmra.mrb[28].mxu1 %v2705_v54  ;;  %v1750_v63 = vshrl.u32 %v2795_v45, 16  ;;  %v1034_v54 = vshll.u32 %v2629_v42, 16  ;;  %v4402_v45 = vld [vmem:[%s4923_s0 + $0x90] sm:$0xf] }
  0x5c   :  { %2209 = vmatprep.mubr.bf16.mxu0 %v2873_v7  ;;  %1453 = vmatprep.mubr.bf16.mxu1 %v2709_v60  ;;  %v2712_v60 = vcombine.low %v1016_v20, %v1023_v13  ;;  %v2875_v7 = vcombine.low %v4301_v47, %v4306_v52  ;;  %v2630_v47 = vcombine.low %v4392_v62, %v4410_v28  ;;  %v4429_v20 = vld [vmem:[%s4923_s0 + $0x48] sm:$0xf] }
  0x5d   :  { %3291 = vmatpush3.bf16.msra.mxu1 %v3591_v53  ;;  %v1755_v50 = vor.u32 %v1754_v24, %v1750_v63  ;;  %v1032_v53 = vshrl.u32 %v2629_v42, 16  ;;  %v1036_v0 = vrot.slane %v1034_v54, 1  ;;  %v1761_v63 = vrot.slane %v1759_v6, 1 }
  0x5e   :  { %3292 = vmatprep.subr.bf16.mxu1 %v3599_v17  ;;  %v2631_v52 = vcombine.low %v4402_v45, %v4415_v10  ;;  %v2711_v24 = vcombine.low %v4274_v11, %v4282_v34  ;;  %v1039_v54 = vshrl.u32 %v2630_v47, 16  ;;  %v2799_v11 = vcombine.low %v4429_v20, %v4440_v33 }
  0x5f   :  { %v2876_v2 = vcombine.low %v1748_v39, %v1755_v50  ;;  %v1037_v25 = vor.u32 %v1036_v0, %v1032_v53  ;;  %v1762_v42 = vor.u32 %v1761_v63, %v1757_v5  ;;  %v4448_v39 = vld [vmem:[%s4922_s1 + $0x218] sm:$0xff]   ;;  %v2798_v53 = vcombine.low %v4424_v27, %v4435_v21  ;;  %v4458_v0 = vld [vmem:[%s4923_s0 + $0x60] sm:$0xf]  ;;  %v4481_v63 = vld [vmem:[%s4923_s0 + $0x6c] sm:$0x1] }
  0x60   :  { %v1048_v50 = vshll.u32 %v2631_v52, 16  ;;  %v4463_v5 = vld [vmem:[%s4922_s1 + $0x220] sm:$0xff]   ;;  %v1778_v6 = vshrl.u32 %v2799_v11, 16 }
  0x61   :  { %3293 = vmatpush3.bf16.msra.mxu1 %v3599_v17  ;;  %v1764_v17 = vshrl.u32 %v2797_v3, 16  ;;  %v2715_v46 = vcombine.low %v1030_v12, %v1037_v25  ;;  %v4469_v12 = vld [vmem:[%s4923_s0 + $0x68] sm:$0xf] }
  0x62   :  { %3342 = vmatprep.subr.bf16.mxu1 %v4243_v14  ;;  %v1050_v51 = vrot.slane %v1048_v50, 1 }
  0x63   :  { %2210 = vmatmul.mubr.bf16.vlgmr.msra.gmra.mrb[32].mxu0 %v2872_v19  ;;  %v1766_v19 = vshll.u32 %v2797_v3, 16  ;;  %1454 = vmatmul.mubr.bf16.gmra.mrb[32].mxu1 %v2708_v35  ;;  %v1041_v35 = vshll.u32 %v2630_v47, 16  ;;  %v1771_v3 = vshrl.u32 %v2798_v53, 16 }
  0x64   :  { %3311 = vmatpush3.bf16.msra.mxu0 %v4243_v14  ;;  %2217 = vmatprep.mubr.bf16.mxu0 %v2876_v2  ;;  %v1773_v2 = vshll.u32 %v2798_v53, 16 }
  0x65   :  { %3312 = vmatprep.subr.bf16.mxu0 %v4350_v18  ;;  %1461 = vmatprep.mubr.bf16.mxu1 %v2712_v60  ;;  %v1768_v13 = vrot.slane %v1766_v19, 1  ;;  %v1043_v55 = vrot.slane %v1041_v35, 1  ;;  %v1046_v60 = vshrl.u32 %v2631_v52, 16  ;;  %v2878_v19 = vcombine.low %v4362_v44, %v4369_v36 }
  0x66   :  { %v1775_v25 = vrot.slane %v1773_v2, 1 }
  0x67   :  { %v1769_v48 = vor.u32 %v1768_v13, %v1764_v17  ;;  %v4474_v17 = vld [vmem:[%s4923_s0 + $0x64] sm:$0x1]  ;;  %v2600_v13 = vld [vmem:[%s4923_s0 + $0x8] sm:$0xe]  ;;  %v1044_v44 = vor.u32 %v1043_v55, %v1039_v54  ;;  %v1051_v36 = vor.u32 %v1050_v51, %v1046_v60  ;;  %v2714_v55 = vcombine.low %v4330_v16, %v4340_v26  ;;  %v4515_v60 = vld [vmem:[%s4923_s0 + $0x74] sm:$0x1] }
  0x68   :  { %3313 = vmatpush3.bf16.msra.mxu0 %v4350_v18  ;;  %v2800_v47 = vcombine.low %v4458_v0, %v4474_v17  ;;  %v1776_v35 = vor.u32 %v1775_v25, %v1771_v3  ;;  %v4508_v54 = vld [vmem:[%s4922_s1 + $0x228] sm:$0xff]   ;;  %v4520_v51 = vld [vmem:[%s4923_s0 + $0x7c] sm:$0x1]  ;;  %v2632_v16 = vcombine.low %v2600_v13, %v4043_v4  ;;  %v2881_v4 = vcombine.low %v4424_v27, %v4429_v20  ;;  %v4550_v27 = vld [vmem:[%s4923_s0 + $0x84] sm:$0x1] }
  0x69   :  { %3314 = vmatprep.subr.bf16.mxu0 %v4397_v31  ;;  %v2879_v34 = vcombine.low %v1762_v42, %v1769_v48  ;;  %v2801_v42 = vcombine.low %v4469_v12, %v4481_v63  ;;  %v2601_v48 = vld [vmem:[%s4923_s0 + $0x10] sm:$0xe] }
  0x6a   :  { %v1785_v50 = vshrl.u32 %v2800_v47, 16  ;;  %v2633_v26 = vcombine.low %v2601_v48, %v4048_v56  ;;  %v1100_v20 = vrot.slane %v2632_v16, 1  ;;  %v2717_v16 = vcombine.low %v4392_v62, %v4402_v45  ;;  %v4592_v62 = vld [vmem:[%s4923_s0 + $0x94] sm:$0x1] }
  0x6b   :  { %2218 = vmatmul.mubr.bf16.gmra.mrb[36].mxu0 %v2875_v7  ;;  %v1780_v7 = vshll.u32 %v2799_v11, 16  ;;  %1462 = vmatmul.mubr.bf16.gmra.mrb[36].mxu1 %v2711_v24  ;;  %v4497_v24 = vld [vmem:[%s4923_s0 + $0x70] sm:$0xf]  ;;  %v1787_v11 = vshll.u32 %v2800_v47, 16  ;;  %v1794_v2 = vshll.u32 %v2801_v42, 16  ;;  %v2718_v47 = vcombine.low %v1044_v44, %v1051_v36  ;;  %4936 = vst [vmem:[#allocation5_spill] sm:$0xff] %v4592_v62 }
  0x6c   :  { %3315 = vmatpush3.bf16.msra.mxu0 %v4397_v31  ;;  %2225 = vmatprep.mubr.bf16.mxu0 %v2879_v34  ;;  %v1792_v34 = vshrl.u32 %v2801_v42, 16  ;;  %v2802_v25 = vcombine.low %v4497_v24, %v4515_v60  ;;  %v4540_v36 = vld [vmem:[%s4923_s0 + $0x80] sm:$0xf] }
  0x6d   :  { %3316 = vmatprep.subr.bf16.mxu0 %v4448_v39  ;;  %v1782_v52 = vrot.slane %v1780_v7, 1  ;;  %1469 = vmatprep.mubr.bf16.mxu1 %v2715_v46  ;;  %v4503_v46 = vld [vmem:[%s4923_s0 + $0x78] sm:$0xf]  ;;  %v1796_v7 = vrot.slane %v1794_v2, 1 }
  0x6e   :  { %v1801_v32 = vshll.u32 %v2802_v25, 16  ;;  %v1799_v56 = vshrl.u32 %v2802_v25, 16  ;;  %v4561_v2 = vld [vmem:[%s4922_s1 + $0x238] sm:$0xff]  }
  0x6f   :  { %v1783_v53 = vor.u32 %v1782_v52, %v1778_v6  ;;  %v1789_v6 = vrot.slane %v1787_v11, 1  ;;  %v1797_v42 = vor.u32 %v1796_v7, %v1792_v34  ;;  %v1101_v11 = vrot.slane %v2633_v26, 1  ;;  %4935 = vst [vmem:[#allocation4_spill] sm:$0xff] %v4561_v2 }
  0x70   :  { %3317 = vmatpush3.bf16.msra.mxu0 %v4448_v39 }
  0x71   :  { %3318 = vmatprep.subr.bf16.mxu0 %v4463_v5  ;;  %v2882_v3 = vcombine.low %v1776_v35, %v1783_v53  ;;  %v1790_v52 = vor.u32 %v1789_v6, %v1785_v50  ;;  %v4533_v35 = vld [vmem:[%s4922_s1 + $0x230] sm:$0xff]   ;;  %v1803_v50 = vrot.slane %v1801_v32, 1  ;;  %v4545_v53 = vld [vmem:[%s4923_s0 + $0x88] sm:$0xf]  ;;  %v4556_v32 = vld [vmem:[%s4923_s0 + $0x8c] sm:$0x1]  ;;  %v2804_v6 = vcombine.low %v4540_v36, %v4550_v27 }
  0x73   :  { %2226 = vmatmul.mubr.bf16.gmra.mrb[40].mxu0 %v2878_v19  ;;  %v2803_v19 = vcombine.low %v4503_v46, %v4520_v51  ;;  %1470 = vmatmul.mubr.bf16.gmra.mrb[40].mxu1 %v2714_v55  ;;  %v2885_v48 = vcombine.low %v1790_v52, %v1797_v42  ;;  %v2604_v55 = vld [vmem:[%s4923_s0 + $0x28] sm:$0xe]  ;;  %v1804_v7 = vor.u32 %v1803_v50, %v1799_v56  ;;  %v1815_v26 = vshll.u32 %v2804_v6, 16  ;;  %v4587_v56 = vld [vmem:[%s4923_s0 + $0x98] sm:$0xf] }
  0x74   :  { %3319 = vmatpush3.bf16.msra.mxu0 %v4463_v5  ;;  %2233 = vmatprep.mubr.bf16.mxu0 %v2882_v3  ;;  %v2605_v3 = vld [vmem:[%s4923_s0 + $0x30] sm:$0xe]  ;;  %v2636_v52 = vcombine.low %v2604_v55, %v4148_v9  ;;  %v4597_v9 = vld [vmem:[%s4923_s0 + $0x9c] sm:$0x1]  ;;  %v1813_v50 = vshrl.u32 %v2804_v6, 16 }
  0x75   :  { %3320 = vmatprep.subr.bf16.mxu0 %v4508_v54  ;;  %v1806_v13 = vshrl.u32 %v2803_v19, 16  ;;  %v1808_v44 = vshll.u32 %v2803_v19, 16  ;;  %1477 = vmatprep.mubr.bf16.mxu1 %v2718_v47  ;;  %v2805_v47 = vcombine.low %v4545_v53, %v4556_v32  ;;  %v2698_v19 = vcombine.low %v1100_v20, %v1101_v11  ;;  %4937 = vst [vmem:[#allocation6_spill] sm:$0xff] %v4597_v9  ;;  %v2608_v6 = vld [vmem:[%s4923_s0 + $0x58] sm:$0xe] }
  0x76   :  { %v2637_v42 = vcombine.low %v2605_v3, %v4153_v15  ;;  %v2884_v15 = vcombine.low %v4458_v0, %v4469_v12  ;;  %v1817_v20 = vrot.slane %v1815_v26, 1  ;;  %v2807_v0 = vcombine.low %v4587_v56, %v4597_v9 }
  0x77   :  { %v1810_v34 = vrot.slane %v1808_v44, 1  ;;  %v1822_v44 = vshll.u32 %v2805_v47, 16  ;;  %v1820_v11 = vshrl.u32 %v2805_v47, 16  ;;  %v1104_v12 = vrot.slane %v2636_v52, 1  ;;  %v2777_v47 = vld [vmem:[%s4923_s0 + $0x18] sm:$0xe] }
  0x78   :  { %3321 = vmatpush3.bf16.msra.mxu0 %v4508_v54  ;;  %v1105_v3 = vrot.slane %v2637_v42, 1  ;;  %v2809_v21 = vcombine.low %v2777_v47, %v4262_v23  ;;  %v1834_v23 = vshrl.u32 %v2807_v0, 16 }
  0x79   :  { %3322 = vmatprep.subr.bf16.mxu0 %v4533_v35  ;;  %v1811_v25 = vor.u32 %v1810_v34, %v1806_v13  ;;  %v2606_v13 = vld [vmem:[%s4923_s0 + $0x38] sm:$0xe]  ;;  %v1824_v34 = vrot.slane %v1822_v44, 1  ;;  %v1836_v44 = vshll.u32 %v2807_v0, 16 }
  0x7b   :  { %2234 = vmatmul.mubr.bf16.gmra.mrb[44].mxu0 %v2881_v4  ;;  %v4582_v4 = vld [vmem:[%s4923_s0 + $0x90] sm:$0xf]  ;;  %v2888_v45 = vcombine.low %v1804_v7, %v1811_v25  ;;  %1478 = vmatmul.mubr.bf16.gmra.mrb[44].mxu1 %v2717_v16  ;;  %v2609_v25 = vld [vmem:[%s4923_s0 + $0x60] sm:$0xe]  ;;  %v2638_v16 = vcombine.low %v2606_v13, %v4191_v38  ;;  %v1825_v52 = vor.u32 %v1824_v34, %v1820_v11 }
  0x7c   :  { %2241 = vmatprep.mubr.bf16.mxu0 %v2885_v48  ;;  %3323 = vmatpush3.bf16.msra.mxu0 %v4533_v35  ;;  %v2607_v48 = vld [vmem:[%s4923_s0 + $0x40] sm:$0xe]  ;;  %v2806_v55 = vcombine.low %v4582_v4, %v4592_v62  ;;  %v2776_v7 = vld [vmem:[%s4923_s0 + $0x10] sm:$0xe]  ;;  %v2704_v62 = vcombine.low %v1104_v12, %v1105_v3  ;;  %v2641_v33 = vcombine.low %v2609_v25, %v4231_v8 }
  0x7d   :  { %3324 = vmatprep.subr.bf16.mxu0 %v4561_v2  ;;  %3294 = vmatprep.mubr.bf16.mxu1 %v2698_v19  ;;  %v2639_v26 = vcombine.low %v2607_v48, %v4199_v43  ;;  %v1818_v19 = vor.u32 %v1817_v20, %v1813_v50  ;;  %v2808_v9 = vcombine.low %v2776_v7, %v4257_v22  ;;  %v1106_v43 = vrot.slane %v2638_v16, 1 }
  0x7e   :  { %v1829_v42 = vshll.u32 %v2806_v55, 16  ;;  %v4635_v48 = vrot.slane %v2809_v21, 1  ;;  %v4938_v22 = vcombine.low %v4119_v61, %v4121_v1  ;;  %v1838_v20 = vrot.slane %v1836_v44, 1  ;;  %v2611_v21 = vld [vmem:[%s4923_s0 + $0x70] sm:$0xe] }
  0x7f   :  { %v4633_v38 = vrot.slane %v2808_v9, 1  ;;  %v1107_v13 = vrot.slane %v2639_v26, 1  ;;  %v2891_v50 = vcombine.low %v1818_v19, %v1825_v52  ;;  %v2612_v1 = vld [vmem:[%s4923_s0 + $0x78] sm:$0xe]  ;;  %v2890_v12 = vcombine.low %v4540_v36, %v4545_v53  ;;  %v2778_v36 = vld [vmem:[%s4923_s0 + $0x20] sm:$0xe] }
  0x80   :  { %3325 = vmatpush3.bf16.msra.mxu0 %v4561_v2  ;;  %v2640_v2 = vcombine.low %v2608_v6, %v4223_v57  ;;  %v2610_v57 = vld [vmem:[%s4923_s0 + $0x68] sm:$0xe]  ;;  %v1831_v8 = vrot.slane %v1829_v42, 1  ;;  %v1839_v11 = vor.u32 %v1838_v20, %v1834_v23  ;;  %v2780_v42 = vld [vmem:[%s4923_s0 + $0x30] sm:$0xe] }
  0x81   :  { %v2874_v61 = vcombine.low %v4633_v38, %v4635_v48  ;;  %v2779_v53 = vld [vmem:[%s4923_s0 + $0x28] sm:$0xe]  ;;  %v2781_v44 = vld [vmem:[%s4923_s0 + $0x38] sm:$0xe]  ;;  %v2782_v23 = vld [vmem:[%s4923_s0 + $0x40] sm:$0xe] }
  0x82   :  { %v2783_v20 = vld [vmem:[%s4923_s0 + $0x48] sm:$0xe]  ;;  %v4939_v48 = vld [vmem:[#allocation2_spill] sm:$0xff] }
  0x83   :  { %2242 = vmatmul.mubr.bf16.gmra.mrb[48].mxu0 %v2884_v15  ;;  %v2887_v15 = vcombine.low %v4497_v24, %v4503_v46  ;;  %3295 = vmatmul.mubr.bf16.vlgmr.msra.gmra.mrb[0].mxu1 %v4938_v22  ;;  %v1108_v24 = vrot.slane %v2640_v2, 1  ;;  %v1109_v46 = vrot.slane %v2641_v33, 1  ;;  %v2642_v33 = vcombine.low %v2610_v57, %v4287_v40 }
  0x84   :  { %2249 = vmatprep.mubr.bf16.mxu0 %v2888_v45  ;;  %v1827_v45 = vshrl.u32 %v2806_v55, 16  ;;  %3350 = vmatpush3.bf16.msra.mxu1 %v4243_v14  ;;  %v2613_v14 = vld [vmem:[%s4923_s0 + $0x80] sm:$0xe]  ;;  %v2707_v2 = vcombine.low %v1106_v43, %v1107_v13  ;;  %v2644_v55 = vcombine.low %v2612_v1, %v4345_v30  ;;  %v2614_v30 = vld [vmem:[%s4923_s0 + $0x88] sm:$0xe]  ;;  %v2812_v43 = vcombine.low %v2780_v42, %v4374_v37 }
  0x85   :  { %3298 = vmatprep.mubr.bf16.mxu1 %v2704_v62  ;;  %3343 = vmatprep.subr.bf16.mxu1 %v4350_v18  ;;  %v2643_v62 = vcombine.low %v2611_v21, %v4292_v41  ;;  %v2710_v34 = vcombine.low %v1108_v24, %v1109_v46  ;;  %v2645_v0 = vcombine.low %v2613_v14, %v4355_v29  ;;  %v1110_v40 = vrot.slane %v2642_v33, 1  ;;  %v2784_v29 = vld [vmem:[%s4923_s0 + $0x60] sm:$0xe]  ;;  %v2789_v37 = vld [vmem:[%s4923_s0 + $0x88] sm:$0xe] }
  0x86   :  { %v1832_v9 = vor.u32 %v1831_v8, %v1827_v45  ;;  %v1112_v41 = vrot.slane %v2644_v55, 1  ;;  %v2646_v47 = vcombine.low %v2614_v30, %v4410_v28  ;;  %v2816_v19 = vcombine.low %v2784_v29, %v4474_v17  ;;  %v2786_v17 = vld [vmem:[%s4923_s0 + $0x70] sm:$0xe]  ;;  %v4940_v21 = vld [vmem:[#allocation3_spill] sm:$0xff]  ;;  %v4942_v55 = vld [vmem:[#allocation5_spill] sm:$0xff] }
  0x87   :  { %v1111_v3 = vrot.slane %v2643_v62, 1  ;;  %v1113_v6 = vrot.slane %v2645_v0, 1  ;;  %v2810_v28 = vcombine.low %v2778_v36, %v4316_v58  ;;  %v2813_v13 = vcombine.low %v2781_v44, %v4381_v49  ;;  %v2787_v58 = vld [vmem:[%s4923_s0 + $0x78] sm:$0xe]  ;;  %v4941_v62 = vld [vmem:[#allocation4_spill] sm:$0xff]  ;;  %v4943_v0 = vld [vmem:[#allocation6_spill] sm:$0xff] }
  0x88   :  { %3351 = vmatpush3.bf16.msra.mxu1 %v4350_v18  ;;  %v2894_v7 = vcombine.low %v1832_v9, %v1839_v11  ;;  %v2615_v18 = vld [vmem:[%s4923_s0 + $0x90] sm:$0xe]  ;;  %v2818_v22 = vcombine.low %v2786_v17, %v4515_v60  ;;  %v1892_v57 = vrot.slane %v2812_v43, 1  ;;  %v2821_v24 = vcombine.low %v2789_v37, %v4556_v32  ;;  %v2791_v32 = vld [vmem:[%s4923_s0 + $0x98] sm:$0xe] }
  0x89   :  { %3344 = vmatprep.subr.bf16.mxu1 %v4397_v31  ;;  %v2713_v25 = vcombine.low %v1110_v40, %v1111_v3  ;;  %v2647_v16 = vcombine.low %v2615_v18, %v4415_v10  ;;  %v2716_v26 = vcombine.low %v1112_v41, %v1113_v6  ;;  %v2811_v10 = vcombine.low %v2779_v53, %v4321_v59 }
  0x8a   :  { %v1896_v59 = vrot.slane %v2816_v19, 1  ;;  %v1890_v49 = vrot.slane %v2810_v28, 1  ;;  %v1893_v8 = vrot.slane %v2813_v13, 1  ;;  %v2814_v46 = vcombine.low %v2782_v23, %v4939_v48 }
  0x8b   :  { %2250 = vmatmul.mubr.bf16.gmra.mrb[52].mxu0 %v2887_v15  ;;  %3299 = vmatmul.mubr.bf16.gmra.mrb[4].mxu1 %v2707_v2  ;;  %v1115_v15 = vrot.slane %v2647_v16, 1  ;;  %v1891_v45 = vrot.slane %v2811_v10, 1  ;;  %v1898_v1 = vrot.slane %v2818_v22, 1  ;;  %v1901_v2 = vrot.slane %v2821_v24, 1  ;;  %v4751_v22 = vld [vmem:[%s4924_s2] ss:$0 sm:$0xff] }
  0x8c   :  { %2257 = vmatprep.mubr.bf16.mxu0 %v2891_v50  ;;  %3352 = vmatpush3.bf16.msra.mxu1 %v4397_v31  ;;  %v2785_v31 = vld [vmem:[%s4923_s0 + $0x68] sm:$0xe]  ;;  %v2880_v33 = vcombine.low %v1892_v57, %v1893_v8  ;;  %v1894_v9 = vrot.slane %v2814_v46, 1 }
  0x8d   :  { %3302 = vmatprep.mubr.bf16.mxu1 %v2710_v34  ;;  %3345 = vmatprep.subr.bf16.mxu1 %v4448_v39  ;;  %v2817_v52 = vcombine.low %v2785_v31, %v4481_v63  ;;  %v1114_v63 = vrot.slane %v2646_v47, 1  ;;  %v2877_v38 = vcombine.low %v1890_v49, %v1891_v45 }
  0x8f   :  { %v2719_v50 = vcombine.low %v1114_v63, %v1115_v15 }
  0x90   :  { %3353 = vmatpush3.bf16.msra.mxu1 %v4448_v39  ;;  %v2893_v39 = vcombine.low %v4582_v4, %v4587_v56  ;;  %v1897_v4 = vrot.slane %v2817_v52, 1  ;;  %v2788_v56 = vld [vmem:[%s4923_s0 + $0x80] sm:$0xe] }
  0x91   :  { %3346 = vmatprep.subr.bf16.mxu1 %v4463_v5 }
  0x92   :  { %v2886_v60 = vcombine.low %v1896_v59, %v1897_v4 }
  0x93   :  { %2258 = vmatmul.mubr.bf16.gmra.mrb[56].mxu0 %v2890_v12  ;;  %3303 = vmatmul.mubr.bf16.gmra.mrb[8].mxu1 %v2713_v25  ;;  %v2823_v12 = vcombine.low %v2791_v32, %v4943_v0 }
  0x94   :  { %2265 = vmatprep.mubr.bf16.mxu0 %v2894_v7  ;;  %3354 = vmatpush3.bf16.msra.mxu1 %v4463_v5  ;;  %v2819_v5 = vcombine.low %v2787_v58, %v4520_v51  ;;  %v2820_v51 = vcombine.low %v2788_v56, %v4550_v27  ;;  %v2790_v27 = vld [vmem:[%s4923_s0 + $0x90] sm:$0xe] }
  0x95   :  { %3306 = vmatprep.mubr.bf16.mxu1 %v2716_v26  ;;  %3347 = vmatprep.subr.bf16.mxu1 %v4508_v54  ;;  %v1903_v41 = vrot.slane %v2823_v12, 1 }
  0x96   :  { %v1899_v14 = vrot.slane %v2819_v5, 1 }
  0x98   :  { %3355 = vmatpush3.bf16.msra.mxu1 %v4508_v54  ;;  %v1900_v54 = vrot.slane %v2820_v51, 1  ;;  %v2889_v34 = vcombine.low %v1898_v1, %v1899_v14 }
  0x99   :  { %3348 = vmatprep.subr.bf16.mxu1 %v4533_v35 }
  0x9a   :  { %v2892_v40 = vcombine.low %v1900_v54, %v1901_v2 }
  0x9b   :  { %2266 = vmatmul.mubr.bf16.gmra.mrb[60].mxu0 %v2893_v39  ;;  %3307 = vmatmul.mubr.bf16.gmra.mrb[12].mxu1 %v2719_v50 }
  0x9c   :  { %3326 = vmatprep.mubr.bf16.mxu0 %v2874_v61  ;;  %v2815_v61 = vcombine.low %v2783_v20, %v4940_v21  ;;  %3356 = vmatpush3.bf16.msra.mxu1 %v4533_v35  ;;  %v2822_v35 = vcombine.low %v2790_v27, %v4942_v55 }
  0x9d   :  { %3334 = vmatprep.mubr.bf16.mxu1 %v2886_v60  ;;  %3349 = vmatprep.subr.bf16.mxu1 %v4941_v62 }
  0x9e   :  { %v1895_v11 = vrot.slane %v2815_v61, 1  ;;  %v1902_v7 = vrot.slane %v2822_v35, 1 }
  0xa0   :  { %3357 = vmatpush3.bf16.msra.mxu1 %v4941_v62  ;;  %v2883_v3 = vcombine.low %v1894_v9, %v1895_v11  ;;  %v2895_v6 = vcombine.low %v1902_v7, %v1903_v41 }
  0xa3   :  { %3327 = vmatmul.mubr.bf16.vlgmr.msra.gmra.mrb[64].mxu0 %v2877_v38  ;;  %3335 = vmatmul.mubr.bf16.vlgmr.msra.gmra.mrb[8].mxu1 %v2889_v34 }
  0xa4   :  { %3330 = vmatprep.mubr.bf16.mxu0 %v2880_v33  ;;  %3338 = vmatprep.mubr.bf16.mxu1 %v2892_v40 }
  0xab   :  { %3331 = vmatmul.mubr.bf16.gmra.mrb[68].mxu0 %v2883_v3  ;;  %3339 = vmatmul.mubr.bf16.gmra.mrb[12].mxu1 %v2895_v6 }
  0xf6   :  { %v3022_v30 = vpop.f32.mrb[0].mxu0 }
  0xf7   :  { %v3023_v18 = vpop.f32.mrb[1].mxu0 }
  0xf8   :  { %v3024_v29 = vadd.f32 %v3023_v18, %v3022_v30  ;;  %v3025_v31 = vpop.f32.mrb[2].mxu0 }
  0xf9   :  { %v3026_v36 = vpop.f32.mrb[3].mxu0 }
  0xfa   :  { %v3027_v53 = vadd.f32 %v3026_v36, %v3025_v31  ;;  %v3363_v8 = vadd.f32 %v3024_v29, %v4751_v22 }
  0xfc   :  { %v3373_v24 = vadd.f32 %v3027_v53, %v4751_v22 }
  0xfe   :  { %v3028_v25 = vpop.f32.mrb[4].mxu0 }
  0xff   :  { %v3029_v47 = vpop.f32.mrb[5].mxu0 }
 0x100   :  { %v3030_v16 = vadd.f32 %v3029_v47, %v3028_v25  ;;  %v3031_v26 = vpop.f32.mrb[6].mxu0 }
 0x101   :  { %v3032_v19 = vpop.f32.mrb[7].mxu0 }
 0x102   :  { %v3033_v52 = vadd.f32 %v3032_v19, %v3031_v26  ;;  %v3358_v27 = vadd.f32 %v3030_v16, %v4751_v22 }
 0x104   :  { %v3368_v34 = vadd.f32 %v3033_v52, %v4751_v22 }
 0x106   :  { %v3034_v42 = vpop.f32.mrb[8].mxu0 }
 0x107   :  { %v3035_v44 = vpop.f32.mrb[9].mxu0 }
 0x108   :  { %v3036_v28 = vadd.f32 %v3035_v44, %v3034_v42  ;;  %v3037_v10 = vpop.f32.mrb[10].mxu0 }
 0x109   :  { %v3038_v39 = vpop.f32.mrb[11].mxu0 }
 0x10a   :  { %v3039_v17 = vadd.f32 %v3038_v39, %v3037_v10  ;;  %v3383_v18 = vadd.f32 %v3036_v28, %v4751_v22 }
 0x10c   :  { %v3393_v25 = vadd.f32 %v3039_v17, %v4751_v22 }
 0x10e   :  { %v3040_v63 = vpop.f32.mrb[12].mxu0 }
 0x10f   :  { %v3041_v15 = vpop.f32.mrb[13].mxu0 }
 0x110   :  { %v3042_v43 = vadd.f32 %v3041_v15, %v3040_v63  ;;  %v3043_v13 = vpop.f32.mrb[14].mxu0 }
 0x111   :  { %v3044_v58 = vpop.f32.mrb[15].mxu0 }
 0x112   :  { %v4744_v59 = vadd.f32 %v3044_v58, %v3043_v13  ;;  %v3378_v63 = vadd.f32 %v3042_v43, %v4751_v22 }
 0x116   :  { %v3046_v4 = vpop.f32.mrb[16].mxu0  ;;  %v3102_v50 = vpop.f32.mrb[16].mxu1 }
 0x117   :  { %v3047_v56 = vpop.f32.mrb[17].mxu0  ;;  %v3103_v57 = vpop.f32.mrb[17].mxu1 }
 0x118   :  { %v4746_v37 = vadd.f32 %v3047_v56, %v3046_v4  ;;  %v3049_v49 = vpop.f32.mrb[18].mxu0  ;;  %v3104_v23 = vadd.f32 %v3103_v57, %v3102_v50  ;;  %v3105_v20 = vpop.f32.mrb[18].mxu1  ;;  %v3388_v4 = vadd.f32 %v4744_v59, %v4751_v22 }
 0x119   :  { %v3050_v45 = vpop.f32.mrb[19].mxu0  ;;  %v3106_v60 = vpop.f32.mrb[19].mxu1 }
 0x11a   :  { %v4753_v5 = vadd.f32 %v3050_v45, %v3049_v49  ;;  %v3107_v38 = vadd.f32 %v3106_v60, %v3105_v20  ;;  %v4757_v46 = vadd.f32 %v3363_v8, %v3104_v23 }
 0x11c   :  { %v4761_v14 = vadd.f32 %v3373_v24, %v3107_v38 }
 0x11e   :  { %v3052_v51 = vpop.f32.mrb[20].mxu0  ;;  %v3108_v54 = vpop.f32.mrb[20].mxu1 }
 0x11f   :  { %v3053_v48 = vpop.f32.mrb[21].mxu0  ;;  %v3109_v2 = vpop.f32.mrb[21].mxu1 }
 0x120   :  { %v4759_v21 = vadd.f32 %v3053_v48, %v3052_v51  ;;  %v3055_v61 = vpop.f32.mrb[22].mxu0  ;;  %v3110_v32 = vadd.f32 %v3109_v2, %v3108_v54  ;;  %v3111_v62 = vpop.f32.mrb[22].mxu1  ;;  %v3402_v51 = vadd.f32 %v4746_v37, %v4751_v22 }
 0x121   :  { %v3056_v1 = vpop.f32.mrb[23].mxu0  ;;  %v3112_v9 = vpop.f32.mrb[23].mxu1 }
 0x122   :  { %v4763_v33 = vadd.f32 %v3056_v1, %v3055_v61  ;;  %v3113_v55 = vadd.f32 %v3112_v9, %v3111_v62  ;;  %v4767_v0 = vadd.f32 %v3358_v27, %v3110_v32  ;;  %v3410_v61 = vadd.f32 %v4753_v5, %v4751_v22 }
 0x123   :  { %v3398_v37 = vadd.f32 %v4759_v21, %v4751_v22 }
 0x124   :  { %v4771_v7 = vadd.f32 %v3368_v34, %v3113_v55  ;;  %v3406_v5 = vadd.f32 %v4763_v33, %v4751_v22 }
 0x126   :  { %v3058_v11 = vpop.f32.mrb[24].mxu0  ;;  %v3114_v6 = vpop.f32.mrb[24].mxu1 }
 0x127   :  { %v3059_v35 = vpop.f32.mrb[25].mxu0  ;;  %v3115_v30 = vpop.f32.mrb[25].mxu1 }
 0x128   :  { %v4769_v12 = vadd.f32 %v3059_v35, %v3058_v11  ;;  %v3061_v40 = vpop.f32.mrb[26].mxu0  ;;  %v3116_v29 = vadd.f32 %v3115_v30, %v3114_v6  ;;  %v3117_v31 = vpop.f32.mrb[26].mxu1 }
 0x129   :  { %v3062_v3 = vpop.f32.mrb[27].mxu0  ;;  %v3118_v36 = vpop.f32.mrb[27].mxu1 }
 0x12a   :  { %v4773_v41 = vadd.f32 %v3062_v3, %v3061_v40  ;;  %v3119_v47 = vadd.f32 %v3118_v36, %v3117_v31  ;;  %v4777_v26 = vadd.f32 %v3383_v18, %v3116_v29  ;;  %v3418_v21 = vadd.f32 %v4769_v12, %v4751_v22 }
 0x12c   :  { %v4781_v44 = vadd.f32 %v3393_v25, %v3119_v47  ;;  %v3426_v33 = vadd.f32 %v4773_v41, %v4751_v22 }
 0x12e   :  { %v3064_v53 = vpop.f32.mrb[28].mxu0  ;;  %v3120_v39 = vpop.f32.mrb[28].mxu1 }
 0x12f   :  { %v3065_v16 = vpop.f32.mrb[29].mxu0  ;;  %v3121_v28 = vpop.f32.mrb[29].mxu1 }
 0x130   :  { %v4779_v19 = vadd.f32 %v3065_v16, %v3064_v53  ;;  %v3067_v52 = vpop.f32.mrb[30].mxu0  ;;  %v3122_v15 = vadd.f32 %v3121_v28, %v3120_v39  ;;  %v3123_v13 = vpop.f32.mrb[30].mxu1 }
 0x131   :  { %v3068_v42 = vpop.f32.mrb[31].mxu0  ;;  %v3124_v58 = vpop.f32.mrb[31].mxu1 }
 0x132   :  { %v4783_v10 = vadd.f32 %v3068_v42, %v3067_v52  ;;  %v3125_v56 = vadd.f32 %v3124_v58, %v3123_v13  ;;  %v4788_v45 = vadd.f32 %v3378_v63, %v3122_v15  ;;  %v3414_v12 = vadd.f32 %v4779_v19, %v4751_v22 }
 0x134   :  { %v4792_v23 = vadd.f32 %v3388_v4, %v3125_v56  ;;  %v3422_v41 = vadd.f32 %v4783_v10, %v4751_v22 }
 0x136   :  { %v3182_v17 = vpop.f32.mrb[32].mxu0  ;;  %v3126_v43 = vpop.f32.mrb[32].mxu1 }
 0x137   :  { %v3183_v49 = vpop.f32.mrb[33].mxu0  ;;  %v3127_v60 = vpop.f32.mrb[33].mxu1 }
 0x138   :  { %v4790_v50 = vadd.f32 %v3183_v49, %v3182_v17  ;;  %v3185_v57 = vpop.f32.mrb[34].mxu0  ;;  %v3128_v24 = vadd.f32 %v3127_v60, %v3126_v43  ;;  %v3129_v38 = vpop.f32.mrb[34].mxu1 }
 0x139   :  { %v3186_v8 = vpop.f32.mrb[35].mxu0  ;;  %v3130_v59 = vpop.f32.mrb[35].mxu1 }
 0x13a   :  { %v4794_v20 = vadd.f32 %v3186_v8, %v3185_v57  ;;  %v3403_v1 = vadd.f32 %v3402_v51, %v3128_v24  ;;  %v3131_v54 = vadd.f32 %v3130_v59, %v3129_v38 }
 0x13c   :  { %v3411_v62 = vadd.f32 %v3410_v61, %v3131_v54 }
 0x13e   :  { %v3188_v48 = vpop.f32.mrb[36].mxu0  ;;  %v3132_v34 = vpop.f32.mrb[36].mxu1 }
 0x13f   :  { %v3189_v2 = vpop.f32.mrb[37].mxu0  ;;  %v3133_v55 = vpop.f32.mrb[37].mxu1 }
 0x140   :  { %v4800_v27 = vadd.f32 %v3189_v2, %v3188_v48  ;;  %v3191_v32 = vpop.f32.mrb[38].mxu0  ;;  %v3134_v35 = vadd.f32 %v3133_v55, %v3132_v34  ;;  %v3135_v40 = vpop.f32.mrb[38].mxu1 }
 0x141   :  { %v3192_v9 = vpop.f32.mrb[39].mxu0  ;;  %v3136_v3 = vpop.f32.mrb[39].mxu1 }
 0x142   :  { %v4802_v11 = vadd.f32 %v3192_v9, %v3191_v32  ;;  %v3399_v30 = vadd.f32 %v3398_v37, %v3134_v35  ;;  %v3137_v18 = vadd.f32 %v3136_v3, %v3135_v40 }
 0x144   :  { %v3407_v53 = vadd.f32 %v3406_v5, %v3137_v18 }
 0x146   :  { %v3194_v6 = vpop.f32.mrb[40].mxu0  ;;  %v3138_v16 = vpop.f32.mrb[40].mxu1 }
 0x147   :  { %v3195_v29 = vpop.f32.mrb[41].mxu0  ;;  %v3139_v52 = vpop.f32.mrb[41].mxu1 }
 0x148   :  { %v4808_v31 = vadd.f32 %v3195_v29, %v3194_v6  ;;  %v3197_v36 = vpop.f32.mrb[42].mxu0  ;;  %v3140_v42 = vadd.f32 %v3139_v52, %v3138_v16  ;;  %v3141_v39 = vpop.f32.mrb[42].mxu1 }
 0x149   :  { %v3198_v25 = vpop.f32.mrb[43].mxu0  ;;  %v3142_v28 = vpop.f32.mrb[43].mxu1 }
 0x14a   :  { %v4810_v47 = vadd.f32 %v3198_v25, %v3197_v36  ;;  %v4816_v15 = vadd.f32 %v3418_v21, %v3140_v42  ;;  %v3143_v13 = vadd.f32 %v3142_v28, %v3141_v39 }
 0x14c   :  { %v3427_v56 = vadd.f32 %v3426_v33, %v3143_v13 }
 0x14e   :  { %v3200_v63 = vpop.f32.mrb[44].mxu0  ;;  %v3144_v8 = vpop.f32.mrb[44].mxu1 }
 0x14f   :  { %v3201_v58 = vpop.f32.mrb[45].mxu0  ;;  %v3145_v43 = vpop.f32.mrb[45].mxu1 }
 0x150   :  { %v3202_v17 = vadd.f32 %v3201_v58, %v3200_v63  ;;  %v3203_v4 = vpop.f32.mrb[46].mxu0  ;;  %v3146_v60 = vadd.f32 %v3145_v43, %v3144_v8  ;;  %v3147_v51 = vpop.f32.mrb[46].mxu1 }
 0x151   :  { %v3204_v49 = vpop.f32.mrb[47].mxu0  ;;  %v3148_v24 = vpop.f32.mrb[47].mxu1 }
 0x152   :  { %v3205_v57 = vadd.f32 %v3204_v49, %v3203_v4  ;;  %v3415_v59 = vadd.f32 %v3414_v12, %v3146_v60  ;;  %v3149_v48 = vadd.f32 %v3148_v24, %v3147_v51 }
 0x154   :  { %v3423_v32 = vadd.f32 %v3422_v41, %v3149_v48  ;;  %v2996_v48 = vld [vmem:[%s4925_s3 + $0x28] sm:$0xff]  }
 0x156   :  { %v3206_v38 = vpop.f32.mrb[48].mxu0  ;;  %v3296_v37 = vpop.f32.mrb[0].mxu1 }
 0x157   :  { %v3207_v61 = vpop.f32.mrb[49].mxu0  ;;  %v3360_v19 = vadd.f32 %v4767_v0, %v3296_v37  ;;  %v1520_v35 = vpop.f32.mrb[1].mxu1 }
 0x158   :  { %v3208_v54 = vadd.f32 %v3207_v61, %v3206_v38  ;;  %v3209_v2 = vpop.f32.mrb[50].mxu0  ;;  %v3365_v3 = vadd.f32 %v4757_v46, %v1520_v35  ;;  %v3297_v6 = vpop.f32.mrb[2].mxu1 }
 0x159   :  { %v3210_v9 = vpop.f32.mrb[51].mxu0  ;;  %v3370_v22 = vadd.f32 %v4771_v7, %v3297_v6  ;;  %v1523_v10 = vpop.f32.mrb[3].mxu1  ;;  %v3361_v18 = vadd.f32 %v3360_v19, %v4800_v27  ;;  %v2993_v6 = vld [vmem:[%s4925_s3 + $0x10] sm:$0xff]  }
 0x15a   :  { %v3211_v34 = vadd.f32 %v3210_v9, %v3209_v2  ;;  %v4822_v55 = vadd.f32 %v3403_v1, %v3208_v54  ;;  %v3375_v29 = vadd.f32 %v4761_v14, %v1523_v10  ;;  %v3366_v1 = vadd.f32 %v3365_v3, %v4790_v50  ;;  %v4877_v3 = vld [vmem:[%s4925_s3 + $0x38] sm:$0xff]  }
 0x15b   :  { %v3371_v0 = vadd.f32 %v3370_v22, %v4802_v11  ;;  %v2942_v22 = vunpack.c.l.bf16 %v2996_v48 }
 0x15c   :  { %v4825_v40 = vadd.f32 %v3411_v62, %v3211_v34  ;;  %v3376_v52 = vadd.f32 %v3375_v29, %v4794_v20 }
 0x15e   :  { %v3212_v5 = vpop.f32.mrb[52].mxu0  ;;  %v3300_v42 = vpop.f32.mrb[4].mxu1 }
 0x15f   :  { %v3213_v36 = vpop.f32.mrb[53].mxu0  ;;  %v3380_v7 = vadd.f32 %v4788_v45, %v3300_v42  ;;  %v1536_v39 = vpop.f32.mrb[5].mxu1  ;;  %v2950_v42 = vunpack.c.l.bf16 %v4877_v3 }
 0x160   :  { %v3214_v25 = vadd.f32 %v3213_v36, %v3212_v5  ;;  %v3215_v16 = vpop.f32.mrb[54].mxu0  ;;  %v3385_v14 = vadd.f32 %v4777_v26, %v1536_v39  ;;  %v3301_v27 = vpop.f32.mrb[6].mxu1 }
 0x161   :  { %v3216_v62 = vpop.f32.mrb[55].mxu0  ;;  %v3390_v50 = vadd.f32 %v4792_v23, %v3301_v27  ;;  %v1539_v63 = vpop.f32.mrb[7].mxu1  ;;  %v4839_v13 = vadd.f32 %v3380_v7, %v3202_v17  ;;  %v2930_v7 = vunpack.c.l.bf16 %v2993_v6 }
 0x162   :  { %v3217_v46 = vadd.f32 %v3216_v62, %v3215_v16  ;;  %v3400_v21 = vadd.f32 %v3399_v30, %v3214_v25  ;;  %v3395_v11 = vadd.f32 %v4781_v44, %v1539_v63  ;;  %v4843_v30 = vadd.f32 %v3385_v14, %v4808_v31 }
 0x163   :  { %v4845_v4 = vadd.f32 %v3390_v50, %v3205_v57  ;;  %v2992_v57 = vld [vmem:[%s4925_s3 + $0x8] sm:$0xff]  }
 0x164   :  { %v4835_v28 = vadd.f32 %v3407_v53, %v3217_v46  ;;  %v4848_v26 = vadd.f32 %v3395_v11, %v4810_v47  ;;  %v2921_v47 = vld [vmem:[%s4925_s3] sm:$0xff]   ;;  %v2927_v54 = vunpack.c.h.bf16 %v2992_v57 }
 0x165   :  { %v2922_v38 = vunpack.c.l.bf16 %v2921_v47  ;;  %v2923_v34 = vunpack.c.h.bf16 %v2921_v47 }
 0x166   :  { %v3218_v33 = vpop.f32.mrb[56].mxu0 }
 0x167   :  { %v3219_v20 = vpop.f32.mrb[57].mxu0 }
 0x168   :  { %v3220_v58 = vadd.f32 %v3219_v20, %v3218_v33  ;;  %v3221_v45 = vpop.f32.mrb[58].mxu0 }
 0x169   :  { %v3222_v53 = vpop.f32.mrb[59].mxu0 }
 0x16a   :  { %v3223_v49 = vadd.f32 %v3222_v53, %v3221_v45  ;;  %v4851_v23 = vadd.f32 %v4816_v15, %v3220_v58 }
 0x16c   :  { %v4853_v17 = vadd.f32 %v3427_v56, %v3223_v49  ;;  %v2926_v56 = vunpack.c.l.bf16 %v2992_v57 }
 0x16e   :  { %v3224_v8 = vpop.f32.mrb[60].mxu0 }
 0x16f   :  { %v3225_v44 = vpop.f32.mrb[61].mxu0 }
 0x170   :  { %v3226_v43 = vadd.f32 %v3225_v44, %v3224_v8  ;;  %v3227_v12 = vpop.f32.mrb[62].mxu0 }
 0x171   :  { %v3228_v31 = vpop.f32.mrb[63].mxu0 }
 0x172   :  { %v3229_v60 = vadd.f32 %v3228_v31, %v3227_v12  ;;  %v4858_v51 = vadd.f32 %v3415_v59, %v3226_v43  ;;  %v2995_v59 = vld [vmem:[%s4925_s3 + $0x20] sm:$0xff]  }
 0x173   :  { %v2938_v5 = vunpack.c.l.bf16 %v2995_v59  ;;  %v2939_v25 = vunpack.c.h.bf16 %v2995_v59 }
 0x174   :  { %v4863_v15 = vadd.f32 %v3423_v32, %v3229_v60  ;;  %v2994_v32 = vld [vmem:[%s4925_s3 + $0x18] sm:$0xff]  }
 0x175   :  { %v2934_v16 = vunpack.c.l.bf16 %v2994_v32  ;;  %v2935_v63 = vunpack.c.h.bf16 %v2994_v32 }
 0x176   :  { %v3328_v24 = vpop.f32.mrb[64].mxu0  ;;  %v3336_v29 = vpop.f32.mrb[8].mxu1 }
 0x177   :  { %v3362_v41 = vadd.f32 %v3361_v18, %v3328_v24  ;;  %v2308_v61 = vpop.f32.mrb[65].mxu0  ;;  %v2340_v62 = vpop.f32.mrb[9].mxu1 }
 0x178   :  { %v3367_v2 = vadd.f32 %v3366_v1, %v2308_v61  ;;  %v3329_v9 = vpop.f32.mrb[66].mxu0  ;;  %v2943_v1 = vunpack.c.h.bf16 %v2996_v48  ;;  %v3405_v14 = vadd.f32 %v4822_v55, %v2340_v62  ;;  %v3337_v50 = vpop.f32.mrb[10].mxu1 }
 0x179   :  { %v2421_v37 = vadd.f32 %v3362_v41, %v2926_v56  ;;  %v3372_v19 = vadd.f32 %v3371_v0, %v3329_v9  ;;  %v2311_v35 = vpop.f32.mrb[67].mxu0  ;;  %v3401_v0 = vadd.f32 %v3400_v21, %v3336_v29  ;;  %v2343_v58 = vpop.f32.mrb[11].mxu1  ;;  %v2997_v21 = vld [vmem:[%s4925_s3 + $0x30] sm:$0xff]  }
 0x17a   :  { %v2419_v10 = vadd.f32 %v3367_v2, %v2922_v38  ;;  %v3377_v18 = vadd.f32 %v3376_v52, %v2311_v35  ;;  %v3409_v52 = vadd.f32 %v4835_v28, %v3337_v50  ;;  %v2427_v53 = vadd.f32 %v3405_v14, %v2938_v5 }
 0x17b   :  { %v2422_v36 = vadd.f32 %v3372_v19, %v2927_v54  ;;  %v2437_v39 = vmax.f32 %v2421_v37, 0.0  ;;  %v2429_v33 = vadd.f32 %v3401_v0, %v2942_v22  ;;  %v3413_v8 = vadd.f32 %v4825_v40, %v2343_v58 }
 0x17c   :  { %v2420_v46 = vadd.f32 %v3377_v18, %v2923_v34  ;;  %v2435_v11 = vmax.f32 %v2419_v10, 0.0  ;;  %v2430_v43 = vadd.f32 %v3409_v52, %v2943_v1  ;;  %v2931_v28 = vunpack.c.h.bf16 %v2993_v6 }
 0x17d   :  { %v2438_v27 = vmax.f32 %v2422_v36, 0.0  ;;  %v2428_v57 = vadd.f32 %v3413_v8, %v2939_v25  ;;  %v2946_v56 = vunpack.c.l.bf16 %v2997_v21  ;;  %v2445_v40 = vmax.f32 %v2429_v33, 0.0 }
 0x17e   :  { %v2436_v20 = vmax.f32 %v2420_v46, 0.0  ;;  %v3332_v45 = vpop.f32.mrb[68].mxu0  ;;  %v2446_v41 = vmax.f32 %v2430_v43, 0.0  ;;  %v2443_v48 = vmax.f32 %v2427_v53, 0.0  ;;  %v3340_v59 = vpop.f32.mrb[12].mxu1  ;;  %v2951_v2 = vunpack.c.h.bf16 %v4877_v3 }
 0x17f   :  { %v2960_v49 = vpack.c.bf16 %v2438_v27, %v2437_v39  ;;  %v3382_v55 = vadd.f32 %v4839_v13, %v3332_v45  ;;  %v2324_v44 = vpop.f32.mrb[69].mxu0  ;;  %v2444_v61 = vmax.f32 %v2428_v57, 0.0  ;;  %v3417_v34 = vadd.f32 %v4858_v51, %v3340_v59 }
 0x180   :  { %v2955_v12 = vpack.c.bf16 %v2436_v20, %v2435_v11  ;;  %v3387_v31 = vadd.f32 %v4843_v30, %v2324_v44  ;;  %v3333_v60 = vpop.f32.mrb[70].mxu0  ;;  %v2980_v9 = vpack.c.bf16 %v2446_v41, %v2445_v40  ;;  %v2947_v37 = vunpack.c.h.bf16 %v2997_v21 }
 0x181   :  { %2999 = vst [vmem:[%s4926_s4 + $0x8] sm:$0xff] %v2960_v49   ;;  %v2425_v47 = vadd.f32 %v3382_v55, %v2934_v16  ;;  %v3392_v24 = vadd.f32 %v4845_v4, %v3333_v60  ;;  %v2327_v38 = vpop.f32.mrb[71].mxu0  ;;  %v2356_v4 = vpop.f32.mrb[13].mxu1  ;;  %v2975_v19 = vpack.c.bf16 %v2444_v61, %v2443_v48 }
 0x182   :  { %2956 = vst [vmem:[%s4926_s4] sm:$0xff] %v2955_v12   ;;  %v2423_v13 = vadd.f32 %v3387_v31, %v2930_v7  ;;  %v3397_v30 = vadd.f32 %v4848_v26, %v2327_v38  ;;  %v3421_v6 = vadd.f32 %v4851_v23, %v2356_v4  ;;  %v3341_v10 = vpop.f32.mrb[14].mxu1  ;;  %3003 = vst [vmem:[%s4926_s4 + $0x28] sm:$0xff] %v2980_v9  }
 0x183   :  { %v2426_v54 = vadd.f32 %v3392_v24, %v2935_v63  ;;  %v2441_v35 = vmax.f32 %v2425_v47, 0.0  ;;  %v2433_v26 = vadd.f32 %v3417_v34, %v2950_v42  ;;  %v3425_v3 = vadd.f32 %v4863_v15, %v3341_v10  ;;  %v2359_v29 = vpop.f32.mrb[15].mxu1  ;;  %3002 = vst [vmem:[%s4926_s4 + $0x20] sm:$0xff] %v2975_v19  }
 0x184   :  { %v2424_v32 = vadd.f32 %v3397_v30, %v2931_v28  ;;  %v2439_v5 = vmax.f32 %v2423_v13, 0.0  ;;  %v2431_v51 = vadd.f32 %v3421_v6, %v2946_v56  ;;  %v3429_v23 = vadd.f32 %v4853_v17, %v2359_v29 }
 0x185   :  { %v2442_v22 = vmax.f32 %v2426_v54, 0.0  ;;  %v2434_v1 = vadd.f32 %v3425_v3, %v2951_v2  ;;  %v2449_v0 = vmax.f32 %v2433_v26, 0.0 }
 0x186   :  { %v2440_v18 = vmax.f32 %v2424_v32, 0.0  ;;  %v2432_v16 = vadd.f32 %v3429_v23, %v2947_v37  ;;  %v2447_v15 = vmax.f32 %v2431_v51, 0.0 }
 0x187   :  { %v2970_v36 = vpack.c.bf16 %v2442_v22, %v2441_v35  ;;  %v2450_v62 = vmax.f32 %v2434_v1, 0.0 }
 0x188   :  { %v2965_v25 = vpack.c.bf16 %v2440_v18, %v2439_v5  ;;  %v2448_v46 = vmax.f32 %v2432_v16, 0.0 }
 0x189   :  { %3001 = vst [vmem:[%s4926_s4 + $0x18] sm:$0xff] %v2970_v36   ;;  %v2990_v42 = vpack.c.bf16 %v2450_v62, %v2449_v0 }
 0x18a   :  { %3000 = vst [vmem:[%s4926_s4 + $0x10] sm:$0xff] %v2965_v25   ;;  %v2985_v7 = vpack.c.bf16 %v2448_v46, %v2447_v15 }
 0x18b   :  { %3005 = vst [vmem:[%s4926_s4 + $0x38] sm:$0xff] %v2990_v42  }
 0x18c   :  { %3004 = vst [vmem:[%s4926_s4 + $0x30] sm:$0xff] %v2985_v7  }

</bundles_post_ra>
